<compile_context>
chip_gen: v6e
topology: v6e:2x2x1
jax: 0.10.0
libtpu: 0.0.40
codegen_flags: <defaults>
</compile_context>

<pallas_src>
import functools
import math

import jax
import jax.numpy as jnp
from jax.experimental import pallas as pl
from jax.experimental.pallas import tpu as pltpu

BN_EPS = 1e-4


# ----------------------------------------------------------------------------
# Pallas kernels
# ----------------------------------------------------------------------------
def _conv3x3_stats_kernel(xp_ref, w_ref, y_ref, st_ref, *, TH, W):
    """3x3 conv (stride 1, padding pre-applied) for one (sample, row-tile).

    xp_ref : (1, H+2, W+2, Cin) bf16  padded sample; its block index ignores
                                      the row-tile axis -> DMA'd once/sample
    w_ref  : (9*Cin, Cout)      bf16  resident weights (im2col ordering)
    y_ref  : (TH*W, Cout)       f32   conv output rows of this tile
    st_ref : (1, 8, Cout)       f32   row0 = per-tile sum, row1 = sum of sq
    """
    t = pl.program_id(1)
    row0 = pl.multiple_of(t * TH, TH)
    w = w_ref[...]
    cout = y_ref.shape[-1]

    # Load the TH+2 padded rows this tile needs once (dynamic start on the
    # untiled leading dim is a plain address offset).
    tile = xp_ref[0, pl.ds(row0, TH + 2), :, :]            # (TH+2, W+2, Cin)

    # Build the im2col patch matrix for the whole tile in VMEM, then issue a
    # single MXU matmul (much better utilization than TH tiny matmuls).
    row_patches = []
    for h in range(TH):                                    # static unroll
        cols = [tile[h + di, dj:dj + W, :]                 # (W, Cin) each
                for di in range(3) for dj in range(3)]
        row_patches.append(jnp.concatenate(cols, axis=-1))  # (W, 9*Cin) bf16
    p = jnp.concatenate(row_patches, axis=0)               # (TH*W, 9*Cin)

    y = jnp.dot(p, w, preferred_element_type=jnp.float32)  # MXU bf16 -> f32
    y_ref[...] = y

    # BN batch-statistics partials from the VMEM-resident output block.
    s = jnp.sum(y, axis=0, keepdims=True)
    sq = jnp.sum(y * y, axis=0, keepdims=True)
    st_ref[0] = jnp.concatenate(
        [s, sq, jnp.zeros((6, cout), jnp.float32)], axis=0)


def _bn_relu_kernel(y_ref, sc_ref, sh_ref, o_ref):
    # y: (TR, L) f32, sc/sh: (1, L) f32, lane-dense L (multiple of 128)
    o_ref[...] = jnp.maximum(y_ref[...] * sc_ref[...] + sh_ref[...], 0.0)


def _maxpool_kernel(x_ref, o_ref):
    # x: (TR, 2, W/2, 2*C) -> o: (TR, W/2, C)   (2x2 max reduction in-kernel)
    v = x_ref[...]
    hm = jnp.maximum(v[:, 0, :, :], v[:, 1, :, :])      # pool over the H pair
    C = o_ref.shape[-1]
    o_ref[...] = jnp.maximum(hm[..., :C], hm[..., C:])  # pool over the W pair


def _matmul_bias_kernel(p_ref, w_ref, b_ref, o_ref):
    # 1x1 conv / classifier: no BN stats, bias kept
    o_ref[...] = (
        jnp.dot(p_ref[...], w_ref[...], preferred_element_type=jnp.float32)
        + b_ref[...]
    )


# ----------------------------------------------------------------------------
# Pallas wrappers (tiling / BlockSpec choices)
# ----------------------------------------------------------------------------
def _pick_row_tile(H, W):
    """Largest divisor TH of H with TH*W <= 2048 (keeps the patches matrix
    small while giving the MXU a tall matmul and few grid steps)."""
    best = 1
    for th in range(1, H + 1):
        if H % th == 0 and th * W <= 2048:
            best = th
    return best


def conv3x3_with_stats(x, w_mat):
    """x: (N,H,W,Cin) f32, w_mat: (9*Cin, Cout) f32.
    Returns y: (N*H*W, Cout) f32 and per-channel (sum, sumsq)."""
    n, H, W, cin = x.shape
    cout = w_mat.shape[1]
    TH = _pick_row_tile(H, W)
    nT = H // TH
    xp = jnp.pad(x, ((0, 0), (1, 1), (1, 1), (0, 0))).astype(jnp.bfloat16)
    wb = w_mat.astype(jnp.bfloat16)
    kernel = functools.partial(_conv3x3_stats_kernel, TH=TH, W=W)
    y, st = pl.pallas_call(
        kernel,
        out_shape=(
            jax.ShapeDtypeStruct((n * H * W, cout), jnp.float32),
            jax.ShapeDtypeStruct((n * nT, 8, cout), jnp.float32),
        ),
        grid=(n, nT),
        in_specs=[
            # padded sample: block index ignores t -> fetched once per sample
            pl.BlockSpec((1, H + 2, W + 2, cin), lambda i, t: (i, 0, 0, 0)),
            # weights resident across the whole grid
            pl.BlockSpec((9 * cin, cout), lambda i, t: (0, 0)),
        ],
        out_specs=(
            pl.BlockSpec((TH * W, cout), lambda i, t: (i * nT + t, 0)),
            pl.BlockSpec((1, 8, cout), lambda i, t: (i * nT + t, 0, 0)),
        ),
        compiler_params=pltpu.CompilerParams(
            dimension_semantics=("parallel", "parallel"),
            vmem_limit_bytes=32 * 1024 * 1024,   # explicit; safe on v5e/v6e/v7x
        ),
    )(xp, wb)
    s = st[:, 0, :].sum(axis=0)
    sq = st[:, 1, :].sum(axis=0)
    return y, s, sq


def bn_relu(y, scale, shift):
    """Affine BatchNorm apply + ReLU on a lane-dense view of (M, C)."""
    M, C = y.shape
    f = ((C * 128) // math.gcd(C, 128)) // C   # positions per lane-dense row
    if M % f == 0:
        R, L = M // f, f * C                   # L = lcm(C,128) (=384 for C=24)
    else:
        R, L, f = M, C, 1                      # fallback: masked stores
    y2 = y.reshape(R, L)                       # free row-major reshape
    sc = jnp.tile(scale, f).reshape(1, L)
    sh = jnp.tile(shift, f).reshape(1, L)
    TR = R
    for cand in (256, 128, 64, 32, 16, 8):
        if R % cand == 0:
            TR = cand
            break
    out = pl.pallas_call(
        _bn_relu_kernel,
        out_shape=jax.ShapeDtypeStruct((R, L), jnp.float32),
        grid=(R // TR,),
        in_specs=[
            pl.BlockSpec((TR, L), lambda i: (i, 0)),
            pl.BlockSpec((1, L), lambda i: (0, 0)),
            pl.BlockSpec((1, L), lambda i: (0, 0)),
        ],
        out_specs=pl.BlockSpec((TR, L), lambda i: (i, 0)),
        compiler_params=pltpu.CompilerParams(dimension_semantics=("parallel",)),
    )(y2, sc, sh)
    return out.reshape(M, C)


def conv_bn_relu(x, w_mat, gamma, beta):
    """Conv2d(3x3, pad=1, bias=False) + BatchNorm2d (batch stats) + ReLU."""
    n, H, W, _ = x.shape
    cout = w_mat.shape[1]
    y, s, sq = conv3x3_with_stats(x, w_mat)
    m = float(n * H * W)
    mean = s / m
    var = jnp.maximum(sq / m - mean * mean, 0.0)   # biased var, clamped >= 0
    scale = gamma / jnp.sqrt(var + BN_EPS)
    shift = beta - mean * scale
    z = bn_relu(y, scale, shift)
    return z.reshape(n, H, W, cout)


def max_pool_2x2(x):
    """2x2 / stride-2 max pool; single input, reduction done in-kernel."""
    n, H, W, C = x.shape
    H2, W2 = H // 2, W // 2
    xr = x.reshape(n * H2, 2, W2, 2 * C)       # free row-major reshape
    R = n * H2
    TR = 8 if R % 8 == 0 else R
    out = pl.pallas_call(
        _maxpool_kernel,
        out_shape=jax.ShapeDtypeStruct((R, W2, C), jnp.float32),
        grid=(R // TR,),
        in_specs=[pl.BlockSpec((TR, 2, W2, 2 * C), lambda i: (i, 0, 0, 0))],
        out_specs=pl.BlockSpec((TR, W2, C), lambda i: (i, 0, 0)),
        compiler_params=pltpu.CompilerParams(dimension_semantics=("parallel",)),
    )(xr)
    return out.reshape(n, H2, W2, C)


def conv1x1_bias(x, w_mat, b):
    """Classifier: Conv2d(24, 3, kernel_size=1, bias=True) - no BN stats."""
    n, H, W, cin = x.shape
    cout = w_mat.shape[1]
    M = n * H * W
    p = x.reshape(M, cin).astype(jnp.bfloat16)
    TM = M
    for cand in (256, 128, 64, 32, 16, 8):
        if M % cand == 0:
            TM = cand
            break
    y = pl.pallas_call(
        _matmul_bias_kernel,
        out_shape=jax.ShapeDtypeStruct((M, cout), jnp.float32),
        grid=(M // TM,),
        in_specs=[
            pl.BlockSpec((TM, cin), lambda i: (i, 0)),
            pl.BlockSpec((cin, cout), lambda i: (0, 0)),
            pl.BlockSpec((1, cout), lambda i: (0, 0)),
        ],
        out_specs=pl.BlockSpec((TM, cout), lambda i: (i, 0)),
        compiler_params=pltpu.CompilerParams(dimension_semantics=("parallel",)),
    )(p, w_mat.astype(jnp.bfloat16), b.reshape(1, cout))
    return y.reshape(n, H, W, cout)


# ----------------------------------------------------------------------------
# JAX glue (layout plumbing / gathers, no hot-path FLOPs)
# ----------------------------------------------------------------------------
def bilinear_upsample(x, out_h, out_w):
    # Matches F.interpolate(..., mode='bilinear', align_corners=False), the
    # behaviour of the deprecated F.upsample call.
    # TODO(synk): gather-based interpolation kept in plain JAX (index plumbing).
    n, in_h, in_w, c = x.shape

    def src_idx(out_size, in_size):
        scale = in_size / out_size
        i = jnp.arange(out_size, dtype=jnp.float32)
        s = jnp.maximum((i + 0.5) * scale - 0.5, 0.0)
        i0 = jnp.minimum(jnp.floor(s).astype(jnp.int32), in_size - 1)
        i1 = jnp.minimum(i0 + 1, in_size - 1)
        lam = s - i0.astype(jnp.float32)
        return i0, i1, lam

    h0, h1, lh = src_idx(out_h, in_h)
    w0, w1, lw = src_idx(out_w, in_w)
    hh0, hh1 = h0[:, None], h1[:, None]
    ww0, ww1 = w0[None, :], w1[None, :]
    # single-gather corners (no chained fancy indexing)
    x00 = x[:, hh0, ww0, :]
    x01 = x[:, hh0, ww1, :]
    x10 = x[:, hh1, ww0, :]
    x11 = x[:, hh1, ww1, :]
    lh = lh[None, :, None, None]
    lw = lw[None, None, :, None]
    top = x00 * (1.0 - lw) + x01 * lw
    bot = x10 * (1.0 - lw) + x11 * lw
    return top * (1.0 - lh) + bot * lh


# ----------------------------------------------------------------------------
# Parameters (deterministic synthetic init; shapes match the PyTorch module)
# ----------------------------------------------------------------------------
def init_params(key):
    # conv weights stored as (k*k*Cin, Cout) matching the in-kernel im2col order
    specs = [
        ("d1_0", 3, 24, 3),   # down1.encode[0]
        ("d1_1", 24, 24, 3),  # down1.encode[1]
        ("c_0", 24, 24, 3),   # center[0]
        ("u1_0", 48, 24, 3),  # up1.decode[0]  (24 upsampled + 24 skip)
        ("u1_1", 24, 24, 3),  # up1.decode[1]
        ("u1_2", 24, 24, 3),  # up1.decode[2]
    ]
    keys = jax.random.split(key, len(specs) + 2)
    params = {}
    for (name, cin, cout, k), kk in zip(specs, keys[: len(specs)]):
        fan_in = k * k * cin
        w = jax.random.normal(kk, (k, k, cin, cout), jnp.float32) / jnp.sqrt(fan_in)
        params[name + "_w"] = w.reshape(k * k * cin, cout)
        params[name + "_gamma"] = jnp.ones((cout,), jnp.float32)   # BN default
        params[name + "_beta"] = jnp.zeros((cout,), jnp.float32)   # BN default
    # classify: Conv2d(24, 3, kernel_size=1, bias=True)
    params["cls_w"] = (
        jax.random.normal(keys[-2], (1, 1, 24, 3), jnp.float32) / jnp.sqrt(24.0)
    ).reshape(24, 3)
    params["cls_b"] = 0.01 * jax.random.normal(keys[-1], (3,), jnp.float32)
    return params


# ----------------------------------------------------------------------------
# UNet_small forward
# ----------------------------------------------------------------------------
def unet_small_forward(params, x_nchw):
    x = jnp.transpose(x_nchw, (0, 2, 3, 1)).astype(jnp.float32)  # NCHW -> NHWC

    # down1 = StackEncoder(3, 24, kernel_size=3)
    d = conv_bn_relu(x, params["d1_0_w"], params["d1_0_gamma"], params["d1_0_beta"])
    d = conv_bn_relu(d, params["d1_1_w"], params["d1_1_gamma"], params["d1_1_beta"])
    down1 = d
    out = max_pool_2x2(d)

    # center = ConvBnRelu2d(24, 24, kernel_size=3, padding=1)
    out = conv_bn_relu(out, params["c_0_w"], params["c_0_gamma"], params["c_0_beta"])

    # up1 = StackDecoder(24, 24, 24, kernel_size=3)
    n, H, W, _ = down1.shape
    up = bilinear_upsample(out, H, W)
    cat = jnp.concatenate([up, down1], axis=-1)   # torch.cat([x, down_tensor], 1)
    o = conv_bn_relu(cat, params["u1_0_w"], params["u1_0_gamma"], params["u1_0_beta"])
    o = conv_bn_relu(o, params["u1_1_w"], params["u1_1_gamma"], params["u1_1_beta"])
    o = conv_bn_relu(o, params["u1_2_w"], params["u1_2_gamma"], params["u1_2_beta"])

    # classify = Conv2d(24, 3, kernel_size=1, bias=True)
    o = conv1x1_bias(o, params["cls_w"], params["cls_b"])

    o = jnp.transpose(o, (0, 3, 1, 2))            # NHWC -> NCHW
    # torch.squeeze(out, dim=1): channel dim has size 3, so it is a no-op.
    return o


if __name__ == "__main__":
    key = jax.random.PRNGKey(0)
    pkey, xkey = jax.random.split(key)
    params = init_params(pkey)
    x = jax.random.normal(xkey, (2, 3, 16, 16), jnp.float32)  # N, C, H, W

    fwd = jax.jit(unet_small_forward)
    out = fwd(params, x)
    jax.block_until_ready(out)

    assert out.shape == (2, 3, 16, 16), out.shape
    assert out.dtype == jnp.float32
    assert bool(jnp.all(jnp.isfinite(out)))
    print("KERNEL_OK")
</pallas_src>

<mosaic_0001>
module attributes {stable_mosaic.version = 11 : i64} {
  func.func @_conv3x3_stats_kernel(%arg0: i32, %arg1: i32, %arg2: memref<1x18x18x3xbf16, #tpu.memory_space<vmem>>, %arg3: memref<27x24xbf16, #tpu.memory_space<vmem>>, %arg4: memref<256x24xf32, #tpu.memory_space<vmem>>, %arg5: memref<1x8x24xf32, #tpu.memory_space<vmem>>) attributes {dimension_semantics = [#tpu.dimension_semantics<parallel>, #tpu.dimension_semantics<parallel>], iteration_bounds = array<i64: 2, 1>, scalar_prefetch = 0 : i64, scratch_operands = 0 : i64, tpu.core_type = #tpu.core_type<tc>, window_params = [{transform_indices = @transform_0, window_bounds = array<i64: 1, 18, 18, 3>}, {pipeline_mode = #tpu.pipeline_mode<synchronous>, transform_indices = @transform_1, window_bounds = array<i64: 27, 24>}, {transform_indices = @transform_2, window_bounds = array<i64: 256, 24>}, {transform_indices = @transform_3, window_bounds = array<i64: 1, 8, 24>}]} {
    %c16_i32 = arith.constant 16 : i32
    %0 = arith.muli %arg1, %c16_i32 : i32
    %1 = tpu.assume_multiple %0, 16 : i32
    %c0 = arith.constant 0 : index
    %c0_0 = arith.constant 0 : index
    %2 = vector.load %arg3[%c0, %c0_0] : memref<27x24xbf16, #tpu.memory_space<vmem>>, vector<27x24xbf16>
    %c0_1 = arith.constant 0 : index
    %3 = arith.index_cast %1 : i32 to index
    %c0_2 = arith.constant 0 : index
    %c0_3 = arith.constant 0 : index
    %4 = vector.load %arg2[%c0_1, %3, %c0_2, %c0_3] : memref<1x18x18x3xbf16, #tpu.memory_space<vmem>>, vector<1x18x18x3xbf16>
    %5 = vector.shape_cast %4 : vector<1x18x18x3xbf16> to vector<18x18x3xbf16>
    %6 = vector.extract_strided_slice %5 {offsets = [0, 0, 0], sizes = [1, 16, 3], strides = [1, 1, 1]} : vector<18x18x3xbf16> to vector<1x16x3xbf16>
    %7 = vector.shape_cast %6 : vector<1x16x3xbf16> to vector<16x3xbf16>
    %8 = vector.extract_strided_slice %5 {offsets = [0, 1, 0], sizes = [1, 16, 3], strides = [1, 1, 1]} : vector<18x18x3xbf16> to vector<1x16x3xbf16>
    %9 = vector.shape_cast %8 : vector<1x16x3xbf16> to vector<16x3xbf16>
    %10 = vector.extract_strided_slice %5 {offsets = [0, 2, 0], sizes = [1, 16, 3], strides = [1, 1, 1]} : vector<18x18x3xbf16> to vector<1x16x3xbf16>
    %11 = vector.shape_cast %10 : vector<1x16x3xbf16> to vector<16x3xbf16>
    %12 = vector.extract_strided_slice %5 {offsets = [1, 0, 0], sizes = [1, 16, 3], strides = [1, 1, 1]} : vector<18x18x3xbf16> to vector<1x16x3xbf16>
    %13 = vector.shape_cast %12 : vector<1x16x3xbf16> to vector<16x3xbf16>
    %14 = vector.extract_strided_slice %5 {offsets = [1, 1, 0], sizes = [1, 16, 3], strides = [1, 1, 1]} : vector<18x18x3xbf16> to vector<1x16x3xbf16>
    %15 = vector.shape_cast %14 : vector<1x16x3xbf16> to vector<16x3xbf16>
    %16 = vector.extract_strided_slice %5 {offsets = [1, 2, 0], sizes = [1, 16, 3], strides = [1, 1, 1]} : vector<18x18x3xbf16> to vector<1x16x3xbf16>
    %17 = vector.shape_cast %16 : vector<1x16x3xbf16> to vector<16x3xbf16>
    %18 = vector.extract_strided_slice %5 {offsets = [2, 0, 0], sizes = [1, 16, 3], strides = [1, 1, 1]} : vector<18x18x3xbf16> to vector<1x16x3xbf16>
    %19 = vector.shape_cast %18 : vector<1x16x3xbf16> to vector<16x3xbf16>
    %20 = vector.extract_strided_slice %5 {offsets = [2, 1, 0], sizes = [1, 16, 3], strides = [1, 1, 1]} : vector<18x18x3xbf16> to vector<1x16x3xbf16>
    %21 = vector.shape_cast %20 : vector<1x16x3xbf16> to vector<16x3xbf16>
    %22 = vector.extract_strided_slice %5 {offsets = [2, 2, 0], sizes = [1, 16, 3], strides = [1, 1, 1]} : vector<18x18x3xbf16> to vector<1x16x3xbf16>
    %23 = vector.shape_cast %22 : vector<1x16x3xbf16> to vector<16x3xbf16>
    %24 = tpu.concatenate %7, %9, %11, %13, %15, %17, %19, %21, %23 in 1 : vector<16x3xbf16>, vector<16x3xbf16>, vector<16x3xbf16>, vector<16x3xbf16>, vector<16x3xbf16>, vector<16x3xbf16>, vector<16x3xbf16>, vector<16x3xbf16>, vector<16x3xbf16> -> vector<16x27xbf16>
    %25 = vector.extract_strided_slice %5 {offsets = [1, 0, 0], sizes = [1, 16, 3], strides = [1, 1, 1]} : vector<18x18x3xbf16> to vector<1x16x3xbf16>
    %26 = vector.shape_cast %25 : vector<1x16x3xbf16> to vector<16x3xbf16>
    %27 = vector.extract_strided_slice %5 {offsets = [1, 1, 0], sizes = [1, 16, 3], strides = [1, 1, 1]} : vector<18x18x3xbf16> to vector<1x16x3xbf16>
    %28 = vector.shape_cast %27 : vector<1x16x3xbf16> to vector<16x3xbf16>
    %29 = vector.extract_strided_slice %5 {offsets = [1, 2, 0], sizes = [1, 16, 3], strides = [1, 1, 1]} : vector<18x18x3xbf16> to vector<1x16x3xbf16>
    %30 = vector.shape_cast %29 : vector<1x16x3xbf16> to vector<16x3xbf16>
    %31 = vector.extract_strided_slice %5 {offsets = [2, 0, 0], sizes = [1, 16, 3], strides = [1, 1, 1]} : vector<18x18x3xbf16> to vector<1x16x3xbf16>
    %32 = vector.shape_cast %31 : vector<1x16x3xbf16> to vector<16x3xbf16>
    %33 = vector.extract_strided_slice %5 {offsets = [2, 1, 0], sizes = [1, 16, 3], strides = [1, 1, 1]} : vector<18x18x3xbf16> to vector<1x16x3xbf16>
    %34 = vector.shape_cast %33 : vector<1x16x3xbf16> to vector<16x3xbf16>
    %35 = vector.extract_strided_slice %5 {offsets = [2, 2, 0], sizes = [1, 16, 3], strides = [1, 1, 1]} : vector<18x18x3xbf16> to vector<1x16x3xbf16>
    %36 = vector.shape_cast %35 : vector<1x16x3xbf16> to vector<16x3xbf16>
    %37 = vector.extract_strided_slice %5 {offsets = [3, 0, 0], sizes = [1, 16, 3], strides = [1, 1, 1]} : vector<18x18x3xbf16> to vector<1x16x3xbf16>
    %38 = vector.shape_cast %37 : vector<1x16x3xbf16> to vector<16x3xbf16>
    %39 = vector.extract_strided_slice %5 {offsets = [3, 1, 0], sizes = [1, 16, 3], strides = [1, 1, 1]} : vector<18x18x3xbf16> to vector<1x16x3xbf16>
    %40 = vector.shape_cast %39 : vector<1x16x3xbf16> to vector<16x3xbf16>
    %41 = vector.extract_strided_slice %5 {offsets = [3, 2, 0], sizes = [1, 16, 3], strides = [1, 1, 1]} : vector<18x18x3xbf16> to vector<1x16x3xbf16>
    %42 = vector.shape_cast %41 : vector<1x16x3xbf16> to vector<16x3xbf16>
    %43 = tpu.concatenate %26, %28, %30, %32, %34, %36, %38, %40, %42 in 1 : vector<16x3xbf16>, vector<16x3xbf16>, vector<16x3xbf16>, vector<16x3xbf16>, vector<16x3xbf16>, vector<16x3xbf16>, vector<16x3xbf16>, vector<16x3xbf16>, vector<16x3xbf16> -> vector<16x27xbf16>
    %44 = vector.extract_strided_slice %5 {offsets = [2, 0, 0], sizes = [1, 16, 3], strides = [1, 1, 1]} : vector<18x18x3xbf16> to vector<1x16x3xbf16>
    %45 = vector.shape_cast %44 : vector<1x16x3xbf16> to vector<16x3xbf16>
    %46 = vector.extract_strided_slice %5 {offsets = [2, 1, 0], sizes = [1, 16, 3], strides = [1, 1, 1]} : vector<18x18x3xbf16> to vector<1x16x3xbf16>
    %47 = vector.shape_cast %46 : vector<1x16x3xbf16> to vector<16x3xbf16>
    %48 = vector.extract_strided_slice %5 {offsets = [2, 2, 0], sizes = [1, 16, 3], strides = [1, 1, 1]} : vector<18x18x3xbf16> to vector<1x16x3xbf16>
    %49 = vector.shape_cast %48 : vector<1x16x3xbf16> to vector<16x3xbf16>
    %50 = vector.extract_strided_slice %5 {offsets = [3, 0, 0], sizes = [1, 16, 3], strides = [1, 1, 1]} : vector<18x18x3xbf16> to vector<1x16x3xbf16>
    %51 = vector.shape_cast %50 : vector<1x16x3xbf16> to vector<16x3xbf16>
    %52 = vector.extract_strided_slice %5 {offsets = [3, 1, 0], sizes = [1, 16, 3], strides = [1, 1, 1]} : vector<18x18x3xbf16> to vector<1x16x3xbf16>
    %53 = vector.shape_cast %52 : vector<1x16x3xbf16> to vector<16x3xbf16>
    %54 = vector.extract_strided_slice %5 {offsets = [3, 2, 0], sizes = [1, 16, 3], strides = [1, 1, 1]} : vector<18x18x3xbf16> to vector<1x16x3xbf16>
    %55 = vector.shape_cast %54 : vector<1x16x3xbf16> to vector<16x3xbf16>
    %56 = vector.extract_strided_slice %5 {offsets = [4, 0, 0], sizes = [1, 16, 3], strides = [1, 1, 1]} : vector<18x18x3xbf16> to vector<1x16x3xbf16>
    %57 = vector.shape_cast %56 : vector<1x16x3xbf16> to vector<16x3xbf16>
    %58 = vector.extract_strided_slice %5 {offsets = [4, 1, 0], sizes = [1, 16, 3], strides = [1, 1, 1]} : vector<18x18x3xbf16> to vector<1x16x3xbf16>
    %59 = vector.shape_cast %58 : vector<1x16x3xbf16> to vector<16x3xbf16>
    %60 = vector.extract_strided_slice %5 {offsets = [4, 2, 0], sizes = [1, 16, 3], strides = [1, 1, 1]} : vector<18x18x3xbf16> to vector<1x16x3xbf16>
    %61 = vector.shape_cast %60 : vector<1x16x3xbf16> to vector<16x3xbf16>
    %62 = tpu.concatenate %45, %47, %49, %51, %53, %55, %57, %59, %61 in 1 : vector<16x3xbf16>, vector<16x3xbf16>, vector<16x3xbf16>, vector<16x3xbf16>, vector<16x3xbf16>, vector<16x3xbf16>, vector<16x3xbf16>, vector<16x3xbf16>, vector<16x3xbf16> -> vector<16x27xbf16>
    %63 = vector.extract_strided_slice %5 {offsets = [3, 0, 0], sizes = [1, 16, 3], strides = [1, 1, 1]} : vector<18x18x3xbf16> to vector<1x16x3xbf16>
    %64 = vector.shape_cast %63 : vector<1x16x3xbf16> to vector<16x3xbf16>
    %65 = vector.extract_strided_slice %5 {offsets = [3, 1, 0], sizes = [1, 16, 3], strides = [1, 1, 1]} : vector<18x18x3xbf16> to vector<1x16x3xbf16>
    %66 = vector.shape_cast %65 : vector<1x16x3xbf16> to vector<16x3xbf16>
    %67 = vector.extract_strided_slice %5 {offsets = [3, 2, 0], sizes = [1, 16, 3], strides = [1, 1, 1]} : vector<18x18x3xbf16> to vector<1x16x3xbf16>
    %68 = vector.shape_cast %67 : vector<1x16x3xbf16> to vector<16x3xbf16>
    %69 = vector.extract_strided_slice %5 {offsets = [4, 0, 0], sizes = [1, 16, 3], strides = [1, 1, 1]} : vector<18x18x3xbf16> to vector<1x16x3xbf16>
    %70 = vector.shape_cast %69 : vector<1x16x3xbf16> to vector<16x3xbf16>
    %71 = vector.extract_strided_slice %5 {offsets = [4, 1, 0], sizes = [1, 16, 3], strides = [1, 1, 1]} : vector<18x18x3xbf16> to vector<1x16x3xbf16>
    %72 = vector.shape_cast %71 : vector<1x16x3xbf16> to vector<16x3xbf16>
    %73 = vector.extract_strided_slice %5 {offsets = [4, 2, 0], sizes = [1, 16, 3], strides = [1, 1, 1]} : vector<18x18x3xbf16> to vector<1x16x3xbf16>
    %74 = vector.shape_cast %73 : vector<1x16x3xbf16> to vector<16x3xbf16>
    %75 = vector.extract_strided_slice %5 {offsets = [5, 0, 0], sizes = [1, 16, 3], strides = [1, 1, 1]} : vector<18x18x3xbf16> to vector<1x16x3xbf16>
    %76 = vector.shape_cast %75 : vector<1x16x3xbf16> to vector<16x3xbf16>
    %77 = vector.extract_strided_slice %5 {offsets = [5, 1, 0], sizes = [1, 16, 3], strides = [1, 1, 1]} : vector<18x18x3xbf16> to vector<1x16x3xbf16>
    %78 = vector.shape_cast %77 : vector<1x16x3xbf16> to vector<16x3xbf16>
    %79 = vector.extract_strided_slice %5 {offsets = [5, 2, 0], sizes = [1, 16, 3], strides = [1, 1, 1]} : vector<18x18x3xbf16> to vector<1x16x3xbf16>
    %80 = vector.shape_cast %79 : vector<1x16x3xbf16> to vector<16x3xbf16>
    %81 = tpu.concatenate %64, %66, %68, %70, %72, %74, %76, %78, %80 in 1 : vector<16x3xbf16>, vector<16x3xbf16>, vector<16x3xbf16>, vector<16x3xbf16>, vector<16x3xbf16>, vector<16x3xbf16>, vector<16x3xbf16>, vector<16x3xbf16>, vector<16x3xbf16> -> vector<16x27xbf16>
    %82 = vector.extract_strided_slice %5 {offsets = [4, 0, 0], sizes = [1, 16, 3], strides = [1, 1, 1]} : vector<18x18x3xbf16> to vector<1x16x3xbf16>
    %83 = vector.shape_cast %82 : vector<1x16x3xbf16> to vector<16x3xbf16>
    %84 = vector.extract_strided_slice %5 {offsets = [4, 1, 0], sizes = [1, 16, 3], strides = [1, 1, 1]} : vector<18x18x3xbf16> to vector<1x16x3xbf16>
    %85 = vector.shape_cast %84 : vector<1x16x3xbf16> to vector<16x3xbf16>
    %86 = vector.extract_strided_slice %5 {offsets = [4, 2, 0], sizes = [1, 16, 3], strides = [1, 1, 1]} : vector<18x18x3xbf16> to vector<1x16x3xbf16>
    %87 = vector.shape_cast %86 : vector<1x16x3xbf16> to vector<16x3xbf16>
    %88 = vector.extract_strided_slice %5 {offsets = [5, 0, 0], sizes = [1, 16, 3], strides = [1, 1, 1]} : vector<18x18x3xbf16> to vector<1x16x3xbf16>
    %89 = vector.shape_cast %88 : vector<1x16x3xbf16> to vector<16x3xbf16>
    %90 = vector.extract_strided_slice %5 {offsets = [5, 1, 0], sizes = [1, 16, 3], strides = [1, 1, 1]} : vector<18x18x3xbf16> to vector<1x16x3xbf16>
    %91 = vector.shape_cast %90 : vector<1x16x3xbf16> to vector<16x3xbf16>
    %92 = vector.extract_strided_slice %5 {offsets = [5, 2, 0], sizes = [1, 16, 3], strides = [1, 1, 1]} : vector<18x18x3xbf16> to vector<1x16x3xbf16>
    %93 = vector.shape_cast %92 : vector<1x16x3xbf16> to vector<16x3xbf16>
    %94 = vector.extract_strided_slice %5 {offsets = [6, 0, 0], sizes = [1, 16, 3], strides = [1, 1, 1]} : vector<18x18x3xbf16> to vector<1x16x3xbf16>
    %95 = vector.shape_cast %94 : vector<1x16x3xbf16> to vector<16x3xbf16>
    %96 = vector.extract_strided_slice %5 {offsets = [6, 1, 0], sizes = [1, 16, 3], strides = [1, 1, 1]} : vector<18x18x3xbf16> to vector<1x16x3xbf16>
    %97 = vector.shape_cast %96 : vector<1x16x3xbf16> to vector<16x3xbf16>
    %98 = vector.extract_strided_slice %5 {offsets = [6, 2, 0], sizes = [1, 16, 3], strides = [1, 1, 1]} : vector<18x18x3xbf16> to vector<1x16x3xbf16>
    %99 = vector.shape_cast %98 : vector<1x16x3xbf16> to vector<16x3xbf16>
    %100 = tpu.concatenate %83, %85, %87, %89, %91, %93, %95, %97, %99 in 1 : vector<16x3xbf16>, vector<16x3xbf16>, vector<16x3xbf16>, vector<16x3xbf16>, vector<16x3xbf16>, vector<16x3xbf16>, vector<16x3xbf16>, vector<16x3xbf16>, vector<16x3xbf16> -> vector<16x27xbf16>
    %101 = vector.extract_strided_slice %5 {offsets = [5, 0, 0], sizes = [1, 16, 3], strides = [1, 1, 1]} : vector<18x18x3xbf16> to vector<1x16x3xbf16>
    %102 = vector.shape_cast %101 : vector<1x16x3xbf16> to vector<16x3xbf16>
    %103 = vector.extract_strided_slice %5 {offsets = [5, 1, 0], sizes = [1, 16, 3], strides = [1, 1, 1]} : vector<18x18x3xbf16> to vector<1x16x3xbf16>
    %104 = vector.shape_cast %103 : vector<1x16x3xbf16> to vector<16x3xbf16>
    %105 = vector.extract_strided_slice %5 {offsets = [5, 2, 0], sizes = [1, 16, 3], strides = [1, 1, 1]} : vector<18x18x3xbf16> to vector<1x16x3xbf16>
    %106 = vector.shape_cast %105 : vector<1x16x3xbf16> to vector<16x3xbf16>
    %107 = vector.extract_strided_slice %5 {offsets = [6, 0, 0], sizes = [1, 16, 3], strides = [1, 1, 1]} : vector<18x18x3xbf16> to vector<1x16x3xbf16>
    %108 = vector.shape_cast %107 : vector<1x16x3xbf16> to vector<16x3xbf16>
    %109 = vector.extract_strided_slice %5 {offsets = [6, 1, 0], sizes = [1, 16, 3], strides = [1, 1, 1]} : vector<18x18x3xbf16> to vector<1x16x3xbf16>
    %110 = vector.shape_cast %109 : vector<1x16x3xbf16> to vector<16x3xbf16>
    %111 = vector.extract_strided_slice %5 {offsets = [6, 2, 0], sizes = [1, 16, 3], strides = [1, 1, 1]} : vector<18x18x3xbf16> to vector<1x16x3xbf16>
    %112 = vector.shape_cast %111 : vector<1x16x3xbf16> to vector<16x3xbf16>
    %113 = vector.extract_strided_slice %5 {offsets = [7, 0, 0], sizes = [1, 16, 3], strides = [1, 1, 1]} : vector<18x18x3xbf16> to vector<1x16x3xbf16>
    %114 = vector.shape_cast %113 : vector<1x16x3xbf16> to vector<16x3xbf16>
    %115 = vector.extract_strided_slice %5 {offsets = [7, 1, 0], sizes = [1, 16, 3], strides = [1, 1, 1]} : vector<18x18x3xbf16> to vector<1x16x3xbf16>
    %116 = vector.shape_cast %115 : vector<1x16x3xbf16> to vector<16x3xbf16>
    %117 = vector.extract_strided_slice %5 {offsets = [7, 2, 0], sizes = [1, 16, 3], strides = [1, 1, 1]} : vector<18x18x3xbf16> to vector<1x16x3xbf16>
    %118 = vector.shape_cast %117 : vector<1x16x3xbf16> to vector<16x3xbf16>
    %119 = tpu.concatenate %102, %104, %106, %108, %110, %112, %114, %116, %118 in 1 : vector<16x3xbf16>, vector<16x3xbf16>, vector<16x3xbf16>, vector<16x3xbf16>, vector<16x3xbf16>, vector<16x3xbf16>, vector<16x3xbf16>, vector<16x3xbf16>, vector<16x3xbf16> -> vector<16x27xbf16>
    %120 = vector.extract_strided_slice %5 {offsets = [6, 0, 0], sizes = [1, 16, 3], strides = [1, 1, 1]} : vector<18x18x3xbf16> to vector<1x16x3xbf16>
    %121 = vector.shape_cast %120 : vector<1x16x3xbf16> to vector<16x3xbf16>
    %122 = vector.extract_strided_slice %5 {offsets = [6, 1, 0], sizes = [1, 16, 3], strides = [1, 1, 1]} : vector<18x18x3xbf16> to vector<1x16x3xbf16>
    %123 = vector.shape_cast %122 : vector<1x16x3xbf16> to vector<16x3xbf16>
    %124 = vector.extract_strided_slice %5 {offsets = [6, 2, 0], sizes = [1, 16, 3], strides = [1, 1, 1]} : vector<18x18x3xbf16> to vector<1x16x3xbf16>
    %125 = vector.shape_cast %124 : vector<1x16x3xbf16> to vector<16x3xbf16>
    %126 = vector.extract_strided_slice %5 {offsets = [7, 0, 0], sizes = [1, 16, 3], strides = [1, 1, 1]} : vector<18x18x3xbf16> to vector<1x16x3xbf16>
    %127 = vector.shape_cast %126 : vector<1x16x3xbf16> to vector<16x3xbf16>
    %128 = vector.extract_strided_slice %5 {offsets = [7, 1, 0], sizes = [1, 16, 3], strides = [1, 1, 1]} : vector<18x18x3xbf16> to vector<1x16x3xbf16>
    %129 = vector.shape_cast %128 : vector<1x16x3xbf16> to vector<16x3xbf16>
    %130 = vector.extract_strided_slice %5 {offsets = [7, 2, 0], sizes = [1, 16, 3], strides = [1, 1, 1]} : vector<18x18x3xbf16> to vector<1x16x3xbf16>
    %131 = vector.shape_cast %130 : vector<1x16x3xbf16> to vector<16x3xbf16>
    %132 = vector.extract_strided_slice %5 {offsets = [8, 0, 0], sizes = [1, 16, 3], strides = [1, 1, 1]} : vector<18x18x3xbf16> to vector<1x16x3xbf16>
    %133 = vector.shape_cast %132 : vector<1x16x3xbf16> to vector<16x3xbf16>
    %134 = vector.extract_strided_slice %5 {offsets = [8, 1, 0], sizes = [1, 16, 3], strides = [1, 1, 1]} : vector<18x18x3xbf16> to vector<1x16x3xbf16>
    %135 = vector.shape_cast %134 : vector<1x16x3xbf16> to vector<16x3xbf16>
    %136 = vector.extract_strided_slice %5 {offsets = [8, 2, 0], sizes = [1, 16, 3], strides = [1, 1, 1]} : vector<18x18x3xbf16> to vector<1x16x3xbf16>
    %137 = vector.shape_cast %136 : vector<1x16x3xbf16> to vector<16x3xbf16>
    %138 = tpu.concatenate %121, %123, %125, %127, %129, %131, %133, %135, %137 in 1 : vector<16x3xbf16>, vector<16x3xbf16>, vector<16x3xbf16>, vector<16x3xbf16>, vector<16x3xbf16>, vector<16x3xbf16>, vector<16x3xbf16>, vector<16x3xbf16>, vector<16x3xbf16> -> vector<16x27xbf16>
    %139 = vector.extract_strided_slice %5 {offsets = [7, 0, 0], sizes = [1, 16, 3], strides = [1, 1, 1]} : vector<18x18x3xbf16> to vector<1x16x3xbf16>
    %140 = vector.shape_cast %139 : vector<1x16x3xbf16> to vector<16x3xbf16>
    %141 = vector.extract_strided_slice %5 {offsets = [7, 1, 0], sizes = [1, 16, 3], strides = [1, 1, 1]} : vector<18x18x3xbf16> to vector<1x16x3xbf16>
    %142 = vector.shape_cast %141 : vector<1x16x3xbf16> to vector<16x3xbf16>
    %143 = vector.extract_strided_slice %5 {offsets = [7, 2, 0], sizes = [1, 16, 3], strides = [1, 1, 1]} : vector<18x18x3xbf16> to vector<1x16x3xbf16>
    %144 = vector.shape_cast %143 : vector<1x16x3xbf16> to vector<16x3xbf16>
    %145 = vector.extract_strided_slice %5 {offsets = [8, 0, 0], sizes = [1, 16, 3], strides = [1, 1, 1]} : vector<18x18x3xbf16> to vector<1x16x3xbf16>
    %146 = vector.shape_cast %145 : vector<1x16x3xbf16> to vector<16x3xbf16>
    %147 = vector.extract_strided_slice %5 {offsets = [8, 1, 0], sizes = [1, 16, 3], strides = [1, 1, 1]} : vector<18x18x3xbf16> to vector<1x16x3xbf16>
    %148 = vector.shape_cast %147 : vector<1x16x3xbf16> to vector<16x3xbf16>
    %149 = vector.extract_strided_slice %5 {offsets = [8, 2, 0], sizes = [1, 16, 3], strides = [1, 1, 1]} : vector<18x18x3xbf16> to vector<1x16x3xbf16>
    %150 = vector.shape_cast %149 : vector<1x16x3xbf16> to vector<16x3xbf16>
    %151 = vector.extract_strided_slice %5 {offsets = [9, 0, 0], sizes = [1, 16, 3], strides = [1, 1, 1]} : vector<18x18x3xbf16> to vector<1x16x3xbf16>
    %152 = vector.shape_cast %151 : vector<1x16x3xbf16> to vector<16x3xbf16>
    %153 = vector.extract_strided_slice %5 {offsets = [9, 1, 0], sizes = [1, 16, 3], strides = [1, 1, 1]} : vector<18x18x3xbf16> to vector<1x16x3xbf16>
    %154 = vector.shape_cast %153 : vector<1x16x3xbf16> to vector<16x3xbf16>
    %155 = vector.extract_strided_slice %5 {offsets = [9, 2, 0], sizes = [1, 16, 3], strides = [1, 1, 1]} : vector<18x18x3xbf16> to vector<1x16x3xbf16>
    %156 = vector.shape_cast %155 : vector<1x16x3xbf16> to vector<16x3xbf16>
    %157 = tpu.concatenate %140, %142, %144, %146, %148, %150, %152, %154, %156 in 1 : vector<16x3xbf16>, vector<16x3xbf16>, vector<16x3xbf16>, vector<16x3xbf16>, vector<16x3xbf16>, vector<16x3xbf16>, vector<16x3xbf16>, vector<16x3xbf16>, vector<16x3xbf16> -> vector<16x27xbf16>
    %158 = vector.extract_strided_slice %5 {offsets = [8, 0, 0], sizes = [1, 16, 3], strides = [1, 1, 1]} : vector<18x18x3xbf16> to vector<1x16x3xbf16>
    %159 = vector.shape_cast %158 : vector<1x16x3xbf16> to vector<16x3xbf16>
    %160 = vector.extract_strided_slice %5 {offsets = [8, 1, 0], sizes = [1, 16, 3], strides = [1, 1, 1]} : vector<18x18x3xbf16> to vector<1x16x3xbf16>
    %161 = vector.shape_cast %160 : vector<1x16x3xbf16> to vector<16x3xbf16>
    %162 = vector.extract_strided_slice %5 {offsets = [8, 2, 0], sizes = [1, 16, 3], strides = [1, 1, 1]} : vector<18x18x3xbf16> to vector<1x16x3xbf16>
    %163 = vector.shape_cast %162 : vector<1x16x3xbf16> to vector<16x3xbf16>
    %164 = vector.extract_strided_slice %5 {offsets = [9, 0, 0], sizes = [1, 16, 3], strides = [1, 1, 1]} : vector<18x18x3xbf16> to vector<1x16x3xbf16>
    %165 = vector.shape_cast %164 : vector<1x16x3xbf16> to vector<16x3xbf16>
    %166 = vector.extract_strided_slice %5 {offsets = [9, 1, 0], sizes = [1, 16, 3], strides = [1, 1, 1]} : vector<18x18x3xbf16> to vector<1x16x3xbf16>
    %167 = vector.shape_cast %166 : vector<1x16x3xbf16> to vector<16x3xbf16>
    %168 = vector.extract_strided_slice %5 {offsets = [9, 2, 0], sizes = [1, 16, 3], strides = [1, 1, 1]} : vector<18x18x3xbf16> to vector<1x16x3xbf16>
    %169 = vector.shape_cast %168 : vector<1x16x3xbf16> to vector<16x3xbf16>
    %170 = vector.extract_strided_slice %5 {offsets = [10, 0, 0], sizes = [1, 16, 3], strides = [1, 1, 1]} : vector<18x18x3xbf16> to vector<1x16x3xbf16>
    %171 = vector.shape_cast %170 : vector<1x16x3xbf16> to vector<16x3xbf16>
    %172 = vector.extract_strided_slice %5 {offsets = [10, 1, 0], sizes = [1, 16, 3], strides = [1, 1, 1]} : vector<18x18x3xbf16> to vector<1x16x3xbf16>
    %173 = vector.shape_cast %172 : vector<1x16x3xbf16> to vector<16x3xbf16>
    %174 = vector.extract_strided_slice %5 {offsets = [10, 2, 0], sizes = [1, 16, 3], strides = [1, 1, 1]} : vector<18x18x3xbf16> to vector<1x16x3xbf16>
    %175 = vector.shape_cast %174 : vector<1x16x3xbf16> to vector<16x3xbf16>
    %176 = tpu.concatenate %159, %161, %163, %165, %167, %169, %171, %173, %175 in 1 : vector<16x3xbf16>, vector<16x3xbf16>, vector<16x3xbf16>, vector<16x3xbf16>, vector<16x3xbf16>, vector<16x3xbf16>, vector<16x3xbf16>, vector<16x3xbf16>, vector<16x3xbf16> -> vector<16x27xbf16>
    %177 = vector.extract_strided_slice %5 {offsets = [9, 0, 0], sizes = [1, 16, 3], strides = [1, 1, 1]} : vector<18x18x3xbf16> to vector<1x16x3xbf16>
    %178 = vector.shape_cast %177 : vector<1x16x3xbf16> to vector<16x3xbf16>
    %179 = vector.extract_strided_slice %5 {offsets = [9, 1, 0], sizes = [1, 16, 3], strides = [1, 1, 1]} : vector<18x18x3xbf16> to vector<1x16x3xbf16>
    %180 = vector.shape_cast %179 : vector<1x16x3xbf16> to vector<16x3xbf16>
    %181 = vector.extract_strided_slice %5 {offsets = [9, 2, 0], sizes = [1, 16, 3], strides = [1, 1, 1]} : vector<18x18x3xbf16> to vector<1x16x3xbf16>
    %182 = vector.shape_cast %181 : vector<1x16x3xbf16> to vector<16x3xbf16>
    %183 = vector.extract_strided_slice %5 {offsets = [10, 0, 0], sizes = [1, 16, 3], strides = [1, 1, 1]} : vector<18x18x3xbf16> to vector<1x16x3xbf16>
    %184 = vector.shape_cast %183 : vector<1x16x3xbf16> to vector<16x3xbf16>
    %185 = vector.extract_strided_slice %5 {offsets = [10, 1, 0], sizes = [1, 16, 3], strides = [1, 1, 1]} : vector<18x18x3xbf16> to vector<1x16x3xbf16>
    %186 = vector.shape_cast %185 : vector<1x16x3xbf16> to vector<16x3xbf16>
    %187 = vector.extract_strided_slice %5 {offsets = [10, 2, 0], sizes = [1, 16, 3], strides = [1, 1, 1]} : vector<18x18x3xbf16> to vector<1x16x3xbf16>
    %188 = vector.shape_cast %187 : vector<1x16x3xbf16> to vector<16x3xbf16>
    %189 = vector.extract_strided_slice %5 {offsets = [11, 0, 0], sizes = [1, 16, 3], strides = [1, 1, 1]} : vector<18x18x3xbf16> to vector<1x16x3xbf16>
    %190 = vector.shape_cast %189 : vector<1x16x3xbf16> to vector<16x3xbf16>
    %191 = vector.extract_strided_slice %5 {offsets = [11, 1, 0], sizes = [1, 16, 3], strides = [1, 1, 1]} : vector<18x18x3xbf16> to vector<1x16x3xbf16>
    %192 = vector.shape_cast %191 : vector<1x16x3xbf16> to vector<16x3xbf16>
    %193 = vector.extract_strided_slice %5 {offsets = [11, 2, 0], sizes = [1, 16, 3], strides = [1, 1, 1]} : vector<18x18x3xbf16> to vector<1x16x3xbf16>
    %194 = vector.shape_cast %193 : vector<1x16x3xbf16> to vector<16x3xbf16>
    %195 = tpu.concatenate %178, %180, %182, %184, %186, %188, %190, %192, %194 in 1 : vector<16x3xbf16>, vector<16x3xbf16>, vector<16x3xbf16>, vector<16x3xbf16>, vector<16x3xbf16>, vector<16x3xbf16>, vector<16x3xbf16>, vector<16x3xbf16>, vector<16x3xbf16> -> vector<16x27xbf16>
    %196 = vector.extract_strided_slice %5 {offsets = [10, 0, 0], sizes = [1, 16, 3], strides = [1, 1, 1]} : vector<18x18x3xbf16> to vector<1x16x3xbf16>
    %197 = vector.shape_cast %196 : vector<1x16x3xbf16> to vector<16x3xbf16>
    %198 = vector.extract_strided_slice %5 {offsets = [10, 1, 0], sizes = [1, 16, 3], strides = [1, 1, 1]} : vector<18x18x3xbf16> to vector<1x16x3xbf16>
    %199 = vector.shape_cast %198 : vector<1x16x3xbf16> to vector<16x3xbf16>
    %200 = vector.extract_strided_slice %5 {offsets = [10, 2, 0], sizes = [1, 16, 3], strides = [1, 1, 1]} : vector<18x18x3xbf16> to vector<1x16x3xbf16>
    %201 = vector.shape_cast %200 : vector<1x16x3xbf16> to vector<16x3xbf16>
    %202 = vector.extract_strided_slice %5 {offsets = [11, 0, 0], sizes = [1, 16, 3], strides = [1, 1, 1]} : vector<18x18x3xbf16> to vector<1x16x3xbf16>
    %203 = vector.shape_cast %202 : vector<1x16x3xbf16> to vector<16x3xbf16>
    %204 = vector.extract_strided_slice %5 {offsets = [11, 1, 0], sizes = [1, 16, 3], strides = [1, 1, 1]} : vector<18x18x3xbf16> to vector<1x16x3xbf16>
    %205 = vector.shape_cast %204 : vector<1x16x3xbf16> to vector<16x3xbf16>
    %206 = vector.extract_strided_slice %5 {offsets = [11, 2, 0], sizes = [1, 16, 3], strides = [1, 1, 1]} : vector<18x18x3xbf16> to vector<1x16x3xbf16>
    %207 = vector.shape_cast %206 : vector<1x16x3xbf16> to vector<16x3xbf16>
    %208 = vector.extract_strided_slice %5 {offsets = [12, 0, 0], sizes = [1, 16, 3], strides = [1, 1, 1]} : vector<18x18x3xbf16> to vector<1x16x3xbf16>
    %209 = vector.shape_cast %208 : vector<1x16x3xbf16> to vector<16x3xbf16>
    %210 = vector.extract_strided_slice %5 {offsets = [12, 1, 0], sizes = [1, 16, 3], strides = [1, 1, 1]} : vector<18x18x3xbf16> to vector<1x16x3xbf16>
    %211 = vector.shape_cast %210 : vector<1x16x3xbf16> to vector<16x3xbf16>
    %212 = vector.extract_strided_slice %5 {offsets = [12, 2, 0], sizes = [1, 16, 3], strides = [1, 1, 1]} : vector<18x18x3xbf16> to vector<1x16x3xbf16>
    %213 = vector.shape_cast %212 : vector<1x16x3xbf16> to vector<16x3xbf16>
    %214 = tpu.concatenate %197, %199, %201, %203, %205, %207, %209, %211, %213 in 1 : vector<16x3xbf16>, vector<16x3xbf16>, vector<16x3xbf16>, vector<16x3xbf16>, vector<16x3xbf16>, vector<16x3xbf16>, vector<16x3xbf16>, vector<16x3xbf16>, vector<16x3xbf16> -> vector<16x27xbf16>
    %215 = vector.extract_strided_slice %5 {offsets = [11, 0, 0], sizes = [1, 16, 3], strides = [1, 1, 1]} : vector<18x18x3xbf16> to vector<1x16x3xbf16>
    %216 = vector.shape_cast %215 : vector<1x16x3xbf16> to vector<16x3xbf16>
    %217 = vector.extract_strided_slice %5 {offsets = [11, 1, 0], sizes = [1, 16, 3], strides = [1, 1, 1]} : vector<18x18x3xbf16> to vector<1x16x3xbf16>
    %218 = vector.shape_cast %217 : vector<1x16x3xbf16> to vector<16x3xbf16>
    %219 = vector.extract_strided_slice %5 {offsets = [11, 2, 0], sizes = [1, 16, 3], strides = [1, 1, 1]} : vector<18x18x3xbf16> to vector<1x16x3xbf16>
    %220 = vector.shape_cast %219 : vector<1x16x3xbf16> to vector<16x3xbf16>
    %221 = vector.extract_strided_slice %5 {offsets = [12, 0, 0], sizes = [1, 16, 3], strides = [1, 1, 1]} : vector<18x18x3xbf16> to vector<1x16x3xbf16>
    %222 = vector.shape_cast %221 : vector<1x16x3xbf16> to vector<16x3xbf16>
    %223 = vector.extract_strided_slice %5 {offsets = [12, 1, 0], sizes = [1, 16, 3], strides = [1, 1, 1]} : vector<18x18x3xbf16> to vector<1x16x3xbf16>
    %224 = vector.shape_cast %223 : vector<1x16x3xbf16> to vector<16x3xbf16>
    %225 = vector.extract_strided_slice %5 {offsets = [12, 2, 0], sizes = [1, 16, 3], strides = [1, 1, 1]} : vector<18x18x3xbf16> to vector<1x16x3xbf16>
    %226 = vector.shape_cast %225 : vector<1x16x3xbf16> to vector<16x3xbf16>
    %227 = vector.extract_strided_slice %5 {offsets = [13, 0, 0], sizes = [1, 16, 3], strides = [1, 1, 1]} : vector<18x18x3xbf16> to vector<1x16x3xbf16>
    %228 = vector.shape_cast %227 : vector<1x16x3xbf16> to vector<16x3xbf16>
    %229 = vector.extract_strided_slice %5 {offsets = [13, 1, 0], sizes = [1, 16, 3], strides = [1, 1, 1]} : vector<18x18x3xbf16> to vector<1x16x3xbf16>
    %230 = vector.shape_cast %229 : vector<1x16x3xbf16> to vector<16x3xbf16>
    %231 = vector.extract_strided_slice %5 {offsets = [13, 2, 0], sizes = [1, 16, 3], strides = [1, 1, 1]} : vector<18x18x3xbf16> to vector<1x16x3xbf16>
    %232 = vector.shape_cast %231 : vector<1x16x3xbf16> to vector<16x3xbf16>
    %233 = tpu.concatenate %216, %218, %220, %222, %224, %226, %228, %230, %232 in 1 : vector<16x3xbf16>, vector<16x3xbf16>, vector<16x3xbf16>, vector<16x3xbf16>, vector<16x3xbf16>, vector<16x3xbf16>, vector<16x3xbf16>, vector<16x3xbf16>, vector<16x3xbf16> -> vector<16x27xbf16>
    %234 = vector.extract_strided_slice %5 {offsets = [12, 0, 0], sizes = [1, 16, 3], strides = [1, 1, 1]} : vector<18x18x3xbf16> to vector<1x16x3xbf16>
    %235 = vector.shape_cast %234 : vector<1x16x3xbf16> to vector<16x3xbf16>
    %236 = vector.extract_strided_slice %5 {offsets = [12, 1, 0], sizes = [1, 16, 3], strides = [1, 1, 1]} : vector<18x18x3xbf16> to vector<1x16x3xbf16>
    %237 = vector.shape_cast %236 : vector<1x16x3xbf16> to vector<16x3xbf16>
    %238 = vector.extract_strided_slice %5 {offsets = [12, 2, 0], sizes = [1, 16, 3], strides = [1, 1, 1]} : vector<18x18x3xbf16> to vector<1x16x3xbf16>
    %239 = vector.shape_cast %238 : vector<1x16x3xbf16> to vector<16x3xbf16>
    %240 = vector.extract_strided_slice %5 {offsets = [13, 0, 0], sizes = [1, 16, 3], strides = [1, 1, 1]} : vector<18x18x3xbf16> to vector<1x16x3xbf16>
    %241 = vector.shape_cast %240 : vector<1x16x3xbf16> to vector<16x3xbf16>
    %242 = vector.extract_strided_slice %5 {offsets = [13, 1, 0], sizes = [1, 16, 3], strides = [1, 1, 1]} : vector<18x18x3xbf16> to vector<1x16x3xbf16>
    %243 = vector.shape_cast %242 : vector<1x16x3xbf16> to vector<16x3xbf16>
    %244 = vector.extract_strided_slice %5 {offsets = [13, 2, 0], sizes = [1, 16, 3], strides = [1, 1, 1]} : vector<18x18x3xbf16> to vector<1x16x3xbf16>
    %245 = vector.shape_cast %244 : vector<1x16x3xbf16> to vector<16x3xbf16>
    %246 = vector.extract_strided_slice %5 {offsets = [14, 0, 0], sizes = [1, 16, 3], strides = [1, 1, 1]} : vector<18x18x3xbf16> to vector<1x16x3xbf16>
    %247 = vector.shape_cast %246 : vector<1x16x3xbf16> to vector<16x3xbf16>
    %248 = vector.extract_strided_slice %5 {offsets = [14, 1, 0], sizes = [1, 16, 3], strides = [1, 1, 1]} : vector<18x18x3xbf16> to vector<1x16x3xbf16>
    %249 = vector.shape_cast %248 : vector<1x16x3xbf16> to vector<16x3xbf16>
    %250 = vector.extract_strided_slice %5 {offsets = [14, 2, 0], sizes = [1, 16, 3], strides = [1, 1, 1]} : vector<18x18x3xbf16> to vector<1x16x3xbf16>
    %251 = vector.shape_cast %250 : vector<1x16x3xbf16> to vector<16x3xbf16>
    %252 = tpu.concatenate %235, %237, %239, %241, %243, %245, %247, %249, %251 in 1 : vector<16x3xbf16>, vector<16x3xbf16>, vector<16x3xbf16>, vector<16x3xbf16>, vector<16x3xbf16>, vector<16x3xbf16>, vector<16x3xbf16>, vector<16x3xbf16>, vector<16x3xbf16> -> vector<16x27xbf16>
    %253 = vector.extract_strided_slice %5 {offsets = [13, 0, 0], sizes = [1, 16, 3], strides = [1, 1, 1]} : vector<18x18x3xbf16> to vector<1x16x3xbf16>
    %254 = vector.shape_cast %253 : vector<1x16x3xbf16> to vector<16x3xbf16>
    %255 = vector.extract_strided_slice %5 {offsets = [13, 1, 0], sizes = [1, 16, 3], strides = [1, 1, 1]} : vector<18x18x3xbf16> to vector<1x16x3xbf16>
    %256 = vector.shape_cast %255 : vector<1x16x3xbf16> to vector<16x3xbf16>
    %257 = vector.extract_strided_slice %5 {offsets = [13, 2, 0], sizes = [1, 16, 3], strides = [1, 1, 1]} : vector<18x18x3xbf16> to vector<1x16x3xbf16>
    %258 = vector.shape_cast %257 : vector<1x16x3xbf16> to vector<16x3xbf16>
    %259 = vector.extract_strided_slice %5 {offsets = [14, 0, 0], sizes = [1, 16, 3], strides = [1, 1, 1]} : vector<18x18x3xbf16> to vector<1x16x3xbf16>
    %260 = vector.shape_cast %259 : vector<1x16x3xbf16> to vector<16x3xbf16>
    %261 = vector.extract_strided_slice %5 {offsets = [14, 1, 0], sizes = [1, 16, 3], strides = [1, 1, 1]} : vector<18x18x3xbf16> to vector<1x16x3xbf16>
    %262 = vector.shape_cast %261 : vector<1x16x3xbf16> to vector<16x3xbf16>
    %263 = vector.extract_strided_slice %5 {offsets = [14, 2, 0], sizes = [1, 16, 3], strides = [1, 1, 1]} : vector<18x18x3xbf16> to vector<1x16x3xbf16>
    %264 = vector.shape_cast %263 : vector<1x16x3xbf16> to vector<16x3xbf16>
    %265 = vector.extract_strided_slice %5 {offsets = [15, 0, 0], sizes = [1, 16, 3], strides = [1, 1, 1]} : vector<18x18x3xbf16> to vector<1x16x3xbf16>
    %266 = vector.shape_cast %265 : vector<1x16x3xbf16> to vector<16x3xbf16>
    %267 = vector.extract_strided_slice %5 {offsets = [15, 1, 0], sizes = [1, 16, 3], strides = [1, 1, 1]} : vector<18x18x3xbf16> to vector<1x16x3xbf16>
    %268 = vector.shape_cast %267 : vector<1x16x3xbf16> to vector<16x3xbf16>
    %269 = vector.extract_strided_slice %5 {offsets = [15, 2, 0], sizes = [1, 16, 3], strides = [1, 1, 1]} : vector<18x18x3xbf16> to vector<1x16x3xbf16>
    %270 = vector.shape_cast %269 : vector<1x16x3xbf16> to vector<16x3xbf16>
    %271 = tpu.concatenate %254, %256, %258, %260, %262, %264, %266, %268, %270 in 1 : vector<16x3xbf16>, vector<16x3xbf16>, vector<16x3xbf16>, vector<16x3xbf16>, vector<16x3xbf16>, vector<16x3xbf16>, vector<16x3xbf16>, vector<16x3xbf16>, vector<16x3xbf16> -> vector<16x27xbf16>
    %272 = vector.extract_strided_slice %5 {offsets = [14, 0, 0], sizes = [1, 16, 3], strides = [1, 1, 1]} : vector<18x18x3xbf16> to vector<1x16x3xbf16>
    %273 = vector.shape_cast %272 : vector<1x16x3xbf16> to vector<16x3xbf16>
    %274 = vector.extract_strided_slice %5 {offsets = [14, 1, 0], sizes = [1, 16, 3], strides = [1, 1, 1]} : vector<18x18x3xbf16> to vector<1x16x3xbf16>
    %275 = vector.shape_cast %274 : vector<1x16x3xbf16> to vector<16x3xbf16>
    %276 = vector.extract_strided_slice %5 {offsets = [14, 2, 0], sizes = [1, 16, 3], strides = [1, 1, 1]} : vector<18x18x3xbf16> to vector<1x16x3xbf16>
    %277 = vector.shape_cast %276 : vector<1x16x3xbf16> to vector<16x3xbf16>
    %278 = vector.extract_strided_slice %5 {offsets = [15, 0, 0], sizes = [1, 16, 3], strides = [1, 1, 1]} : vector<18x18x3xbf16> to vector<1x16x3xbf16>
    %279 = vector.shape_cast %278 : vector<1x16x3xbf16> to vector<16x3xbf16>
    %280 = vector.extract_strided_slice %5 {offsets = [15, 1, 0], sizes = [1, 16, 3], strides = [1, 1, 1]} : vector<18x18x3xbf16> to vector<1x16x3xbf16>
    %281 = vector.shape_cast %280 : vector<1x16x3xbf16> to vector<16x3xbf16>
    %282 = vector.extract_strided_slice %5 {offsets = [15, 2, 0], sizes = [1, 16, 3], strides = [1, 1, 1]} : vector<18x18x3xbf16> to vector<1x16x3xbf16>
    %283 = vector.shape_cast %282 : vector<1x16x3xbf16> to vector<16x3xbf16>
    %284 = vector.extract_strided_slice %5 {offsets = [16, 0, 0], sizes = [1, 16, 3], strides = [1, 1, 1]} : vector<18x18x3xbf16> to vector<1x16x3xbf16>
    %285 = vector.shape_cast %284 : vector<1x16x3xbf16> to vector<16x3xbf16>
    %286 = vector.extract_strided_slice %5 {offsets = [16, 1, 0], sizes = [1, 16, 3], strides = [1, 1, 1]} : vector<18x18x3xbf16> to vector<1x16x3xbf16>
    %287 = vector.shape_cast %286 : vector<1x16x3xbf16> to vector<16x3xbf16>
    %288 = vector.extract_strided_slice %5 {offsets = [16, 2, 0], sizes = [1, 16, 3], strides = [1, 1, 1]} : vector<18x18x3xbf16> to vector<1x16x3xbf16>
    %289 = vector.shape_cast %288 : vector<1x16x3xbf16> to vector<16x3xbf16>
    %290 = tpu.concatenate %273, %275, %277, %279, %281, %283, %285, %287, %289 in 1 : vector<16x3xbf16>, vector<16x3xbf16>, vector<16x3xbf16>, vector<16x3xbf16>, vector<16x3xbf16>, vector<16x3xbf16>, vector<16x3xbf16>, vector<16x3xbf16>, vector<16x3xbf16> -> vector<16x27xbf16>
    %291 = vector.extract_strided_slice %5 {offsets = [15, 0, 0], sizes = [1, 16, 3], strides = [1, 1, 1]} : vector<18x18x3xbf16> to vector<1x16x3xbf16>
    %292 = vector.shape_cast %291 : vector<1x16x3xbf16> to vector<16x3xbf16>
    %293 = vector.extract_strided_slice %5 {offsets = [15, 1, 0], sizes = [1, 16, 3], strides = [1, 1, 1]} : vector<18x18x3xbf16> to vector<1x16x3xbf16>
    %294 = vector.shape_cast %293 : vector<1x16x3xbf16> to vector<16x3xbf16>
    %295 = vector.extract_strided_slice %5 {offsets = [15, 2, 0], sizes = [1, 16, 3], strides = [1, 1, 1]} : vector<18x18x3xbf16> to vector<1x16x3xbf16>
    %296 = vector.shape_cast %295 : vector<1x16x3xbf16> to vector<16x3xbf16>
    %297 = vector.extract_strided_slice %5 {offsets = [16, 0, 0], sizes = [1, 16, 3], strides = [1, 1, 1]} : vector<18x18x3xbf16> to vector<1x16x3xbf16>
    %298 = vector.shape_cast %297 : vector<1x16x3xbf16> to vector<16x3xbf16>
    %299 = vector.extract_strided_slice %5 {offsets = [16, 1, 0], sizes = [1, 16, 3], strides = [1, 1, 1]} : vector<18x18x3xbf16> to vector<1x16x3xbf16>
    %300 = vector.shape_cast %299 : vector<1x16x3xbf16> to vector<16x3xbf16>
    %301 = vector.extract_strided_slice %5 {offsets = [16, 2, 0], sizes = [1, 16, 3], strides = [1, 1, 1]} : vector<18x18x3xbf16> to vector<1x16x3xbf16>
    %302 = vector.shape_cast %301 : vector<1x16x3xbf16> to vector<16x3xbf16>
    %303 = vector.extract_strided_slice %5 {offsets = [17, 0, 0], sizes = [1, 16, 3], strides = [1, 1, 1]} : vector<18x18x3xbf16> to vector<1x16x3xbf16>
    %304 = vector.shape_cast %303 : vector<1x16x3xbf16> to vector<16x3xbf16>
    %305 = vector.extract_strided_slice %5 {offsets = [17, 1, 0], sizes = [1, 16, 3], strides = [1, 1, 1]} : vector<18x18x3xbf16> to vector<1x16x3xbf16>
    %306 = vector.shape_cast %305 : vector<1x16x3xbf16> to vector<16x3xbf16>
    %307 = vector.extract_strided_slice %5 {offsets = [17, 2, 0], sizes = [1, 16, 3], strides = [1, 1, 1]} : vector<18x18x3xbf16> to vector<1x16x3xbf16>
    %308 = vector.shape_cast %307 : vector<1x16x3xbf16> to vector<16x3xbf16>
    %309 = tpu.concatenate %292, %294, %296, %298, %300, %302, %304, %306, %308 in 1 : vector<16x3xbf16>, vector<16x3xbf16>, vector<16x3xbf16>, vector<16x3xbf16>, vector<16x3xbf16>, vector<16x3xbf16>, vector<16x3xbf16>, vector<16x3xbf16>, vector<16x3xbf16> -> vector<16x27xbf16>
    %310 = tpu.concatenate %24, %43, %62, %81, %100, %119, %138, %157, %176, %195, %214, %233, %252, %271, %290, %309 in 0 : vector<16x27xbf16>, vector<16x27xbf16>, vector<16x27xbf16>, vector<16x27xbf16>, vector<16x27xbf16>, vector<16x27xbf16>, vector<16x27xbf16>, vector<16x27xbf16>, vector<16x27xbf16>, vector<16x27xbf16>, vector<16x27xbf16>, vector<16x27xbf16>, vector<16x27xbf16>, vector<16x27xbf16>, vector<16x27xbf16>, vector<16x27xbf16> -> vector<256x27xbf16>
    %cst = arith.constant dense<0.000000e+00> : vector<256x24xf32>
    %311 = tpu.matmul %310, %2, %cst {dimension_numbers = #tpu.dot_dimension_numbers<[1], [0], [0], [1], [0, 0, 1, 1], [], []>} : vector<256x27xbf16>, vector<27x24xbf16>, vector<256x24xf32> -> vector<256x24xf32>
    %c0_4 = arith.constant 0 : index
    %c0_5 = arith.constant 0 : index
    %312 = vector.load %arg4[%c0_4, %c0_5] : memref<256x24xf32, #tpu.memory_space<vmem>>, vector<256x24xf32>
    tpu.vector_store %arg4[%c0_4, %c0_5], %311 {strides = array<i32>} : memref<256x24xf32, #tpu.memory_space<vmem>>, vector<256x24xf32>,
    %cst_6 = arith.constant dense<0.000000e+00> : vector<24xf32>
    %313 = vector.multi_reduction <add>, %311, %cst_6 [0] : vector<256x24xf32> to vector<24xf32>
    %314 = vector.shape_cast %313 : vector<24xf32> to vector<1x24xf32>
    %315 = arith.mulf %311, %311 : vector<256x24xf32>
    %cst_7 = arith.constant dense<0.000000e+00> : vector<24xf32>
    %316 = vector.multi_reduction <add>, %315, %cst_7 [0] : vector<256x24xf32> to vector<24xf32>
    %317 = vector.shape_cast %316 : vector<24xf32> to vector<1x24xf32>
    %cst_8 = arith.constant 0.000000e+00 : f32
    %318 = vector.broadcast %cst_8 : f32 to vector<6x24xf32>
    %319 = tpu.concatenate %314, %317, %318 in 0 : vector<1x24xf32>, vector<1x24xf32>, vector<6x24xf32> -> vector<8x24xf32>
    %c0_9 = arith.constant 0 : index
    %c0_10 = arith.constant 0 : index
    %c0_11 = arith.constant 0 : index
    %320 = vector.load %arg5[%c0_9, %c0_10, %c0_11] : memref<1x8x24xf32, #tpu.memory_space<vmem>>, vector<1x8x24xf32>
    %321 = vector.shape_cast %320 : vector<1x8x24xf32> to vector<8x24xf32>
    %322 = vector.shape_cast %319 : vector<8x24xf32> to vector<1x8x24xf32>
    tpu.vector_store %arg5[%c0_9, %c0_10, %c0_11], %322 {strides = array<i32>} : memref<1x8x24xf32, #tpu.memory_space<vmem>>, vector<1x8x24xf32>,
    return
  }
  func.func @transform_0(%arg0: i32, %arg1: i32) -> (i32, i32, i32, i32) {
    %c0_i32 = arith.constant 0 : i32
    %c0_i32_0 = arith.constant 0 : i32
    %c0_i32_1 = arith.constant 0 : i32
    %c0_i32_2 = arith.constant 0 : i32
    return %arg0, %c0_i32, %c0_i32_0, %c0_i32_1 : i32, i32, i32, i32
  }
  func.func @transform_1(%arg0: i32, %arg1: i32) -> (i32, i32) {
    %c0_i32 = arith.constant 0 : i32
    %c0_i32_0 = arith.constant 0 : i32
    %c0_i32_1 = arith.constant 0 : i32
    return %c0_i32, %c0_i32_0 : i32, i32
  }
  func.func @transform_2(%arg0: i32, %arg1: i32) -> (i32, i32) {
    %c1_i32 = arith.constant 1 : i32
    %0 = arith.muli %arg0, %c1_i32 : i32
    %1 = arith.addi %0, %arg1 : i32
    %c0_i32 = arith.constant 0 : i32
    %c0_i32_0 = arith.constant 0 : i32
    return %1, %c0_i32 : i32, i32
  }
  func.func @transform_3(%arg0: i32, %arg1: i32) -> (i32, i32, i32) {
    %c1_i32 = arith.constant 1 : i32
    %0 = arith.muli %arg0, %c1_i32 : i32
    %1 = arith.addi %0, %arg1 : i32
    %c0_i32 = arith.constant 0 : i32
    %c0_i32_0 = arith.constant 0 : i32
    %c0_i32_1 = arith.constant 0 : i32
    return %1, %c0_i32, %c0_i32_0 : i32, i32, i32
  }
}

module attributes {stable_mosaic.version = 11 : i64} {
  func.func @_bn_relu_kernel(%arg0: i32, %arg1: memref<32x384xf32, #tpu.memory_space<vmem>>, %arg2: memref<1x384xf32, #tpu.memory_space<vmem>>, %arg3: memref<1x384xf32, #tpu.memory_space<vmem>>, %arg4: memref<32x384xf32, #tpu.memory_space<vmem>>) attributes {dimension_semantics = [#tpu.dimension_semantics<parallel>], iteration_bounds = array<i64: 1>, scalar_prefetch = 0 : i64, scratch_operands = 0 : i64, tpu.core_type = #tpu.core_type<tc>, window_params = [{transform_indices = @transform_0, window_bounds = array<i64: 32, 384>}, {pipeline_mode = #tpu.pipeline_mode<synchronous>, transform_indices = @transform_1, window_bounds = array<i64: 1, 384>}, {pipeline_mode = #tpu.pipeline_mode<synchronous>, transform_indices = @transform_2, window_bounds = array<i64: 1, 384>}, {transform_indices = @transform_3, window_bounds = array<i64: 32, 384>}]} {
    %c0 = arith.constant 0 : index
    %c0_0 = arith.constant 0 : index
    %0 = vector.load %arg1[%c0, %c0_0] : memref<32x384xf32, #tpu.memory_space<vmem>>, vector<32x384xf32>
    %c0_1 = arith.constant 0 : index
    %c0_2 = arith.constant 0 : index
    %1 = vector.load %arg2[%c0_1, %c0_2] : memref<1x384xf32, #tpu.memory_space<vmem>>, vector<1x384xf32>
    %2 = vector.broadcast %1 : vector<1x384xf32> to vector<32x384xf32>
    %3 = arith.mulf %0, %2 : vector<32x384xf32>
    %c0_3 = arith.constant 0 : index
    %c0_4 = arith.constant 0 : index
    %4 = vector.load %arg3[%c0_3, %c0_4] : memref<1x384xf32, #tpu.memory_space<vmem>>, vector<1x384xf32>
    %5 = vector.broadcast %4 : vector<1x384xf32> to vector<32x384xf32>
    %6 = arith.addf %3, %5 : vector<32x384xf32>
    %cst = arith.constant 0.000000e+00 : f32
    %7 = vector.broadcast %cst : f32 to vector<32x384xf32>
    %8 = arith.maximumf %6, %7 : vector<32x384xf32>
    %c0_5 = arith.constant 0 : index
    %c0_6 = arith.constant 0 : index
    %9 = vector.load %arg4[%c0_5, %c0_6] : memref<32x384xf32, #tpu.memory_space<vmem>>, vector<32x384xf32>
    tpu.vector_store %arg4[%c0_5, %c0_6], %8 {strides = array<i32>} : memref<32x384xf32, #tpu.memory_space<vmem>>, vector<32x384xf32>,
    return
  }
  func.func @transform_0(%arg0: i32) -> (i32, i32) {
    %c0_i32 = arith.constant 0 : i32
    %c0_i32_0 = arith.constant 0 : i32
    return %arg0, %c0_i32 : i32, i32
  }
  func.func @transform_1(%arg0: i32) -> (i32, i32) {
    %c0_i32 = arith.constant 0 : i32
    %c0_i32_0 = arith.constant 0 : i32
    %c0_i32_1 = arith.constant 0 : i32
    return %c0_i32, %c0_i32_0 : i32, i32
  }
  func.func @transform_2(%arg0: i32) -> (i32, i32) {
    %c0_i32 = arith.constant 0 : i32
    %c0_i32_0 = arith.constant 0 : i32
    %c0_i32_1 = arith.constant 0 : i32
    return %c0_i32, %c0_i32_0 : i32, i32
  }
  func.func @transform_3(%arg0: i32) -> (i32, i32) {
    %c0_i32 = arith.constant 0 : i32
    %c0_i32_0 = arith.constant 0 : i32
    return %arg0, %c0_i32 : i32, i32
  }
}

module attributes {stable_mosaic.version = 11 : i64} {
  func.func @_maxpool_kernel(%arg0: i32, %arg1: memref<8x2x8x48xf32, #tpu.memory_space<vmem>>, %arg2: memref<8x8x24xf32, #tpu.memory_space<vmem>>) attributes {dimension_semantics = [#tpu.dimension_semantics<parallel>], iteration_bounds = array<i64: 2>, scalar_prefetch = 0 : i64, scratch_operands = 0 : i64, tpu.core_type = #tpu.core_type<tc>, window_params = [{transform_indices = @transform_0, window_bounds = array<i64: 8, 2, 8, 48>}, {transform_indices = @transform_1, window_bounds = array<i64: 8, 8, 24>}]} {
    %c0 = arith.constant 0 : index
    %c0_0 = arith.constant 0 : index
    %c0_1 = arith.constant 0 : index
    %c0_2 = arith.constant 0 : index
    %0 = vector.load %arg1[%c0, %c0_0, %c0_1, %c0_2] : memref<8x2x8x48xf32, #tpu.memory_space<vmem>>, vector<8x2x8x48xf32>
    %1 = vector.extract_strided_slice %0 {offsets = [0, 0, 0, 0], sizes = [8, 1, 8, 48], strides = [1, 1, 1, 1]} : vector<8x2x8x48xf32> to vector<8x1x8x48xf32>
    %2 = vector.shape_cast %1 : vector<8x1x8x48xf32> to vector<8x8x48xf32>
    %3 = vector.extract_strided_slice %0 {offsets = [0, 1, 0, 0], sizes = [8, 1, 8, 48], strides = [1, 1, 1, 1]} : vector<8x2x8x48xf32> to vector<8x1x8x48xf32>
    %4 = vector.shape_cast %3 : vector<8x1x8x48xf32> to vector<8x8x48xf32>
    %5 = arith.maximumf %2, %4 : vector<8x8x48xf32>
    %6 = vector.extract_strided_slice %5 {offsets = [0, 0, 0], sizes = [8, 8, 24], strides = [1, 1, 1]} : vector<8x8x48xf32> to vector<8x8x24xf32>
    %7 = vector.extract_strided_slice %5 {offsets = [0, 0, 24], sizes = [8, 8, 24], strides = [1, 1, 1]} : vector<8x8x48xf32> to vector<8x8x24xf32>
    %8 = arith.maximumf %6, %7 : vector<8x8x24xf32>
    %c0_3 = arith.constant 0 : index
    %c0_4 = arith.constant 0 : index
    %c0_5 = arith.constant 0 : index
    %9 = vector.load %arg2[%c0_3, %c0_4, %c0_5] : memref<8x8x24xf32, #tpu.memory_space<vmem>>, vector<8x8x24xf32>
    tpu.vector_store %arg2[%c0_3, %c0_4, %c0_5], %8 {strides = array<i32>} : memref<8x8x24xf32, #tpu.memory_space<vmem>>, vector<8x8x24xf32>,
    return
  }
  func.func @transform_0(%arg0: i32) -> (i32, i32, i32, i32) {
    %c0_i32 = arith.constant 0 : i32
    %c0_i32_0 = arith.constant 0 : i32
    %c0_i32_1 = arith.constant 0 : i32
    %c0_i32_2 = arith.constant 0 : i32
    return %arg0, %c0_i32, %c0_i32_0, %c0_i32_1 : i32, i32, i32, i32
  }
  func.func @transform_1(%arg0: i32) -> (i32, i32, i32) {
    %c0_i32 = arith.constant 0 : i32
    %c0_i32_0 = arith.constant 0 : i32
    %c0_i32_1 = arith.constant 0 : i32
    return %arg0, %c0_i32, %c0_i32_0 : i32, i32, i32
  }
}

module attributes {stable_mosaic.version = 11 : i64} {
  func.func @_conv3x3_stats_kernel(%arg0: i32, %arg1: i32, %arg2: memref<1x18x18x24xbf16, #tpu.memory_space<vmem>>, %arg3: memref<216x24xbf16, #tpu.memory_space<vmem>>, %arg4: memref<256x24xf32, #tpu.memory_space<vmem>>, %arg5: memref<1x8x24xf32, #tpu.memory_space<vmem>>) attributes {dimension_semantics = [#tpu.dimension_semantics<parallel>, #tpu.dimension_semantics<parallel>], iteration_bounds = array<i64: 2, 1>, scalar_prefetch = 0 : i64, scratch_operands = 0 : i64, tpu.core_type = #tpu.core_type<tc>, window_params = [{transform_indices = @transform_0, window_bounds = array<i64: 1, 18, 18, 24>}, {pipeline_mode = #tpu.pipeline_mode<synchronous>, transform_indices = @transform_1, window_bounds = array<i64: 216, 24>}, {transform_indices = @transform_2, window_bounds = array<i64: 256, 24>}, {transform_indices = @transform_3, window_bounds = array<i64: 1, 8, 24>}]} {
    %c16_i32 = arith.constant 16 : i32
    %0 = arith.muli %arg1, %c16_i32 : i32
    %1 = tpu.assume_multiple %0, 16 : i32
    %c0 = arith.constant 0 : index
    %c0_0 = arith.constant 0 : index
    %2 = vector.load %arg3[%c0, %c0_0] : memref<216x24xbf16, #tpu.memory_space<vmem>>, vector<216x24xbf16>
    %c0_1 = arith.constant 0 : index
    %3 = arith.index_cast %1 : i32 to index
    %c0_2 = arith.constant 0 : index
    %c0_3 = arith.constant 0 : index
    %4 = vector.load %arg2[%c0_1, %3, %c0_2, %c0_3] : memref<1x18x18x24xbf16, #tpu.memory_space<vmem>>, vector<1x18x18x24xbf16>
    %5 = vector.shape_cast %4 : vector<1x18x18x24xbf16> to vector<18x18x24xbf16>
    %6 = vector.extract_strided_slice %5 {offsets = [0, 0, 0], sizes = [1, 16, 24], strides = [1, 1, 1]} : vector<18x18x24xbf16> to vector<1x16x24xbf16>
    %7 = vector.shape_cast %6 : vector<1x16x24xbf16> to vector<16x24xbf16>
    %8 = vector.extract_strided_slice %5 {offsets = [0, 1, 0], sizes = [1, 16, 24], strides = [1, 1, 1]} : vector<18x18x24xbf16> to vector<1x16x24xbf16>
    %9 = vector.shape_cast %8 : vector<1x16x24xbf16> to vector<16x24xbf16>
    %10 = vector.extract_strided_slice %5 {offsets = [0, 2, 0], sizes = [1, 16, 24], strides = [1, 1, 1]} : vector<18x18x24xbf16> to vector<1x16x24xbf16>
    %11 = vector.shape_cast %10 : vector<1x16x24xbf16> to vector<16x24xbf16>
    %12 = vector.extract_strided_slice %5 {offsets = [1, 0, 0], sizes = [1, 16, 24], strides = [1, 1, 1]} : vector<18x18x24xbf16> to vector<1x16x24xbf16>
    %13 = vector.shape_cast %12 : vector<1x16x24xbf16> to vector<16x24xbf16>
    %14 = vector.extract_strided_slice %5 {offsets = [1, 1, 0], sizes = [1, 16, 24], strides = [1, 1, 1]} : vector<18x18x24xbf16> to vector<1x16x24xbf16>
    %15 = vector.shape_cast %14 : vector<1x16x24xbf16> to vector<16x24xbf16>
    %16 = vector.extract_strided_slice %5 {offsets = [1, 2, 0], sizes = [1, 16, 24], strides = [1, 1, 1]} : vector<18x18x24xbf16> to vector<1x16x24xbf16>
    %17 = vector.shape_cast %16 : vector<1x16x24xbf16> to vector<16x24xbf16>
    %18 = vector.extract_strided_slice %5 {offsets = [2, 0, 0], sizes = [1, 16, 24], strides = [1, 1, 1]} : vector<18x18x24xbf16> to vector<1x16x24xbf16>
    %19 = vector.shape_cast %18 : vector<1x16x24xbf16> to vector<16x24xbf16>
    %20 = vector.extract_strided_slice %5 {offsets = [2, 1, 0], sizes = [1, 16, 24], strides = [1, 1, 1]} : vector<18x18x24xbf16> to vector<1x16x24xbf16>
    %21 = vector.shape_cast %20 : vector<1x16x24xbf16> to vector<16x24xbf16>
    %22 = vector.extract_strided_slice %5 {offsets = [2, 2, 0], sizes = [1, 16, 24], strides = [1, 1, 1]} : vector<18x18x24xbf16> to vector<1x16x24xbf16>
    %23 = vector.shape_cast %22 : vector<1x16x24xbf16> to vector<16x24xbf16>
    %24 = tpu.concatenate %7, %9, %11, %13, %15, %17, %19, %21, %23 in 1 : vector<16x24xbf16>, vector<16x24xbf16>, vector<16x24xbf16>, vector<16x24xbf16>, vector<16x24xbf16>, vector<16x24xbf16>, vector<16x24xbf16>, vector<16x24xbf16>, vector<16x24xbf16> -> vector<16x216xbf16>
    %25 = vector.extract_strided_slice %5 {offsets = [1, 0, 0], sizes = [1, 16, 24], strides = [1, 1, 1]} : vector<18x18x24xbf16> to vector<1x16x24xbf16>
    %26 = vector.shape_cast %25 : vector<1x16x24xbf16> to vector<16x24xbf16>
    %27 = vector.extract_strided_slice %5 {offsets = [1, 1, 0], sizes = [1, 16, 24], strides = [1, 1, 1]} : vector<18x18x24xbf16> to vector<1x16x24xbf16>
    %28 = vector.shape_cast %27 : vector<1x16x24xbf16> to vector<16x24xbf16>
    %29 = vector.extract_strided_slice %5 {offsets = [1, 2, 0], sizes = [1, 16, 24], strides = [1, 1, 1]} : vector<18x18x24xbf16> to vector<1x16x24xbf16>
    %30 = vector.shape_cast %29 : vector<1x16x24xbf16> to vector<16x24xbf16>
    %31 = vector.extract_strided_slice %5 {offsets = [2, 0, 0], sizes = [1, 16, 24], strides = [1, 1, 1]} : vector<18x18x24xbf16> to vector<1x16x24xbf16>
    %32 = vector.shape_cast %31 : vector<1x16x24xbf16> to vector<16x24xbf16>
    %33 = vector.extract_strided_slice %5 {offsets = [2, 1, 0], sizes = [1, 16, 24], strides = [1, 1, 1]} : vector<18x18x24xbf16> to vector<1x16x24xbf16>
    %34 = vector.shape_cast %33 : vector<1x16x24xbf16> to vector<16x24xbf16>
    %35 = vector.extract_strided_slice %5 {offsets = [2, 2, 0], sizes = [1, 16, 24], strides = [1, 1, 1]} : vector<18x18x24xbf16> to vector<1x16x24xbf16>
    %36 = vector.shape_cast %35 : vector<1x16x24xbf16> to vector<16x24xbf16>
    %37 = vector.extract_strided_slice %5 {offsets = [3, 0, 0], sizes = [1, 16, 24], strides = [1, 1, 1]} : vector<18x18x24xbf16> to vector<1x16x24xbf16>
    %38 = vector.shape_cast %37 : vector<1x16x24xbf16> to vector<16x24xbf16>
    %39 = vector.extract_strided_slice %5 {offsets = [3, 1, 0], sizes = [1, 16, 24], strides = [1, 1, 1]} : vector<18x18x24xbf16> to vector<1x16x24xbf16>
    %40 = vector.shape_cast %39 : vector<1x16x24xbf16> to vector<16x24xbf16>
    %41 = vector.extract_strided_slice %5 {offsets = [3, 2, 0], sizes = [1, 16, 24], strides = [1, 1, 1]} : vector<18x18x24xbf16> to vector<1x16x24xbf16>
    %42 = vector.shape_cast %41 : vector<1x16x24xbf16> to vector<16x24xbf16>
    %43 = tpu.concatenate %26, %28, %30, %32, %34, %36, %38, %40, %42 in 1 : vector<16x24xbf16>, vector<16x24xbf16>, vector<16x24xbf16>, vector<16x24xbf16>, vector<16x24xbf16>, vector<16x24xbf16>, vector<16x24xbf16>, vector<16x24xbf16>, vector<16x24xbf16> -> vector<16x216xbf16>
    %44 = vector.extract_strided_slice %5 {offsets = [2, 0, 0], sizes = [1, 16, 24], strides = [1, 1, 1]} : vector<18x18x24xbf16> to vector<1x16x24xbf16>
    %45 = vector.shape_cast %44 : vector<1x16x24xbf16> to vector<16x24xbf16>
    %46 = vector.extract_strided_slice %5 {offsets = [2, 1, 0], sizes = [1, 16, 24], strides = [1, 1, 1]} : vector<18x18x24xbf16> to vector<1x16x24xbf16>
    %47 = vector.shape_cast %46 : vector<1x16x24xbf16> to vector<16x24xbf16>
    %48 = vector.extract_strided_slice %5 {offsets = [2, 2, 0], sizes = [1, 16, 24], strides = [1, 1, 1]} : vector<18x18x24xbf16> to vector<1x16x24xbf16>
    %49 = vector.shape_cast %48 : vector<1x16x24xbf16> to vector<16x24xbf16>
    %50 = vector.extract_strided_slice %5 {offsets = [3, 0, 0], sizes = [1, 16, 24], strides = [1, 1, 1]} : vector<18x18x24xbf16> to vector<1x16x24xbf16>
    %51 = vector.shape_cast %50 : vector<1x16x24xbf16> to vector<16x24xbf16>
    %52 = vector.extract_strided_slice %5 {offsets = [3, 1, 0], sizes = [1, 16, 24], strides = [1, 1, 1]} : vector<18x18x24xbf16> to vector<1x16x24xbf16>
    %53 = vector.shape_cast %52 : vector<1x16x24xbf16> to vector<16x24xbf16>
    %54 = vector.extract_strided_slice %5 {offsets = [3, 2, 0], sizes = [1, 16, 24], strides = [1, 1, 1]} : vector<18x18x24xbf16> to vector<1x16x24xbf16>
    %55 = vector.shape_cast %54 : vector<1x16x24xbf16> to vector<16x24xbf16>
    %56 = vector.extract_strided_slice %5 {offsets = [4, 0, 0], sizes = [1, 16, 24], strides = [1, 1, 1]} : vector<18x18x24xbf16> to vector<1x16x24xbf16>
    %57 = vector.shape_cast %56 : vector<1x16x24xbf16> to vector<16x24xbf16>
    %58 = vector.extract_strided_slice %5 {offsets = [4, 1, 0], sizes = [1, 16, 24], strides = [1, 1, 1]} : vector<18x18x24xbf16> to vector<1x16x24xbf16>
    %59 = vector.shape_cast %58 : vector<1x16x24xbf16> to vector<16x24xbf16>
    %60 = vector.extract_strided_slice %5 {offsets = [4, 2, 0], sizes = [1, 16, 24], strides = [1, 1, 1]} : vector<18x18x24xbf16> to vector<1x16x24xbf16>
    %61 = vector.shape_cast %60 : vector<1x16x24xbf16> to vector<16x24xbf16>
    %62 = tpu.concatenate %45, %47, %49, %51, %53, %55, %57, %59, %61 in 1 : vector<16x24xbf16>, vector<16x24xbf16>, vector<16x24xbf16>, vector<16x24xbf16>, vector<16x24xbf16>, vector<16x24xbf16>, vector<16x24xbf16>, vector<16x24xbf16>, vector<16x24xbf16> -> vector<16x216xbf16>
    %63 = vector.extract_strided_slice %5 {offsets = [3, 0, 0], sizes = [1, 16, 24], strides = [1, 1, 1]} : vector<18x18x24xbf16> to vector<1x16x24xbf16>
    %64 = vector.shape_cast %63 : vector<1x16x24xbf16> to vector<16x24xbf16>
    %65 = vector.extract_strided_slice %5 {offsets = [3, 1, 0], sizes = [1, 16, 24], strides = [1, 1, 1]} : vector<18x18x24xbf16> to vector<1x16x24xbf16>
    %66 = vector.shape_cast %65 : vector<1x16x24xbf16> to vector<16x24xbf16>
    %67 = vector.extract_strided_slice %5 {offsets = [3, 2, 0], sizes = [1, 16, 24], strides = [1, 1, 1]} : vector<18x18x24xbf16> to vector<1x16x24xbf16>
    %68 = vector.shape_cast %67 : vector<1x16x24xbf16> to vector<16x24xbf16>
    %69 = vector.extract_strided_slice %5 {offsets = [4, 0, 0], sizes = [1, 16, 24], strides = [1, 1, 1]} : vector<18x18x24xbf16> to vector<1x16x24xbf16>
    %70 = vector.shape_cast %69 : vector<1x16x24xbf16> to vector<16x24xbf16>
    %71 = vector.extract_strided_slice %5 {offsets = [4, 1, 0], sizes = [1, 16, 24], strides = [1, 1, 1]} : vector<18x18x24xbf16> to vector<1x16x24xbf16>
    %72 = vector.shape_cast %71 : vector<1x16x24xbf16> to vector<16x24xbf16>
    %73 = vector.extract_strided_slice %5 {offsets = [4, 2, 0], sizes = [1, 16, 24], strides = [1, 1, 1]} : vector<18x18x24xbf16> to vector<1x16x24xbf16>
    %74 = vector.shape_cast %73 : vector<1x16x24xbf16> to vector<16x24xbf16>
    %75 = vector.extract_strided_slice %5 {offsets = [5, 0, 0], sizes = [1, 16, 24], strides = [1, 1, 1]} : vector<18x18x24xbf16> to vector<1x16x24xbf16>
    %76 = vector.shape_cast %75 : vector<1x16x24xbf16> to vector<16x24xbf16>
    %77 = vector.extract_strided_slice %5 {offsets = [5, 1, 0], sizes = [1, 16, 24], strides = [1, 1, 1]} : vector<18x18x24xbf16> to vector<1x16x24xbf16>
    %78 = vector.shape_cast %77 : vector<1x16x24xbf16> to vector<16x24xbf16>
    %79 = vector.extract_strided_slice %5 {offsets = [5, 2, 0], sizes = [1, 16, 24], strides = [1, 1, 1]} : vector<18x18x24xbf16> to vector<1x16x24xbf16>
    %80 = vector.shape_cast %79 : vector<1x16x24xbf16> to vector<16x24xbf16>
    %81 = tpu.concatenate %64, %66, %68, %70, %72, %74, %76, %78, %80 in 1 : vector<16x24xbf16>, vector<16x24xbf16>, vector<16x24xbf16>, vector<16x24xbf16>, vector<16x24xbf16>, vector<16x24xbf16>, vector<16x24xbf16>, vector<16x24xbf16>, vector<16x24xbf16> -> vector<16x216xbf16>
    %82 = vector.extract_strided_slice %5 {offsets = [4, 0, 0], sizes = [1, 16, 24], strides = [1, 1, 1]} : vector<18x18x24xbf16> to vector<1x16x24xbf16>
    %83 = vector.shape_cast %82 : vector<1x16x24xbf16> to vector<16x24xbf16>
    %84 = vector.extract_strided_slice %5 {offsets = [4, 1, 0], sizes = [1, 16, 24], strides = [1, 1, 1]} : vector<18x18x24xbf16> to vector<1x16x24xbf16>
    %85 = vector.shape_cast %84 : vector<1x16x24xbf16> to vector<16x24xbf16>
    %86 = vector.extract_strided_slice %5 {offsets = [4, 2, 0], sizes = [1, 16, 24], strides = [1, 1, 1]} : vector<18x18x24xbf16> to vector<1x16x24xbf16>
    %87 = vector.shape_cast %86 : vector<1x16x24xbf16> to vector<16x24xbf16>
    %88 = vector.extract_strided_slice %5 {offsets = [5, 0, 0], sizes = [1, 16, 24], strides = [1, 1, 1]} : vector<18x18x24xbf16> to vector<1x16x24xbf16>
    %89 = vector.shape_cast %88 : vector<1x16x24xbf16> to vector<16x24xbf16>
    %90 = vector.extract_strided_slice %5 {offsets = [5, 1, 0], sizes = [1, 16, 24], strides = [1, 1, 1]} : vector<18x18x24xbf16> to vector<1x16x24xbf16>
    %91 = vector.shape_cast %90 : vector<1x16x24xbf16> to vector<16x24xbf16>
    %92 = vector.extract_strided_slice %5 {offsets = [5, 2, 0], sizes = [1, 16, 24], strides = [1, 1, 1]} : vector<18x18x24xbf16> to vector<1x16x24xbf16>
    %93 = vector.shape_cast %92 : vector<1x16x24xbf16> to vector<16x24xbf16>
    %94 = vector.extract_strided_slice %5 {offsets = [6, 0, 0], sizes = [1, 16, 24], strides = [1, 1, 1]} : vector<18x18x24xbf16> to vector<1x16x24xbf16>
    %95 = vector.shape_cast %94 : vector<1x16x24xbf16> to vector<16x24xbf16>
    %96 = vector.extract_strided_slice %5 {offsets = [6, 1, 0], sizes = [1, 16, 24], strides = [1, 1, 1]} : vector<18x18x24xbf16> to vector<1x16x24xbf16>
    %97 = vector.shape_cast %96 : vector<1x16x24xbf16> to vector<16x24xbf16>
    %98 = vector.extract_strided_slice %5 {offsets = [6, 2, 0], sizes = [1, 16, 24], strides = [1, 1, 1]} : vector<18x18x24xbf16> to vector<1x16x24xbf16>
    %99 = vector.shape_cast %98 : vector<1x16x24xbf16> to vector<16x24xbf16>
    %100 = tpu.concatenate %83, %85, %87, %89, %91, %93, %95, %97, %99 in 1 : vector<16x24xbf16>, vector<16x24xbf16>, vector<16x24xbf16>, vector<16x24xbf16>, vector<16x24xbf16>, vector<16x24xbf16>, vector<16x24xbf16>, vector<16x24xbf16>, vector<16x24xbf16> -> vector<16x216xbf16>
    %101 = vector.extract_strided_slice %5 {offsets = [5, 0, 0], sizes = [1, 16, 24], strides = [1, 1, 1]} : vector<18x18x24xbf16> to vector<1x16x24xbf16>
    %102 = vector.shape_cast %101 : vector<1x16x24xbf16> to vector<16x24xbf16>
    %103 = vector.extract_strided_slice %5 {offsets = [5, 1, 0], sizes = [1, 16, 24], strides = [1, 1, 1]} : vector<18x18x24xbf16> to vector<1x16x24xbf16>
    %104 = vector.shape_cast %103 : vector<1x16x24xbf16> to vector<16x24xbf16>
    %105 = vector.extract_strided_slice %5 {offsets = [5, 2, 0], sizes = [1, 16, 24], strides = [1, 1, 1]} : vector<18x18x24xbf16> to vector<1x16x24xbf16>
    %106 = vector.shape_cast %105 : vector<1x16x24xbf16> to vector<16x24xbf16>
    %107 = vector.extract_strided_slice %5 {offsets = [6, 0, 0], sizes = [1, 16, 24], strides = [1, 1, 1]} : vector<18x18x24xbf16> to vector<1x16x24xbf16>
    %108 = vector.shape_cast %107 : vector<1x16x24xbf16> to vector<16x24xbf16>
    %109 = vector.extract_strided_slice %5 {offsets = [6, 1, 0], sizes = [1, 16, 24], strides = [1, 1, 1]} : vector<18x18x24xbf16> to vector<1x16x24xbf16>
    %110 = vector.shape_cast %109 : vector<1x16x24xbf16> to vector<16x24xbf16>
    %111 = vector.extract_strided_slice %5 {offsets = [6, 2, 0], sizes = [1, 16, 24], strides = [1, 1, 1]} : vector<18x18x24xbf16> to vector<1x16x24xbf16>
    %112 = vector.shape_cast %111 : vector<1x16x24xbf16> to vector<16x24xbf16>
    %113 = vector.extract_strided_slice %5 {offsets = [7, 0, 0], sizes = [1, 16, 24], strides = [1, 1, 1]} : vector<18x18x24xbf16> to vector<1x16x24xbf16>
    %114 = vector.shape_cast %113 : vector<1x16x24xbf16> to vector<16x24xbf16>
    %115 = vector.extract_strided_slice %5 {offsets = [7, 1, 0], sizes = [1, 16, 24], strides = [1, 1, 1]} : vector<18x18x24xbf16> to vector<1x16x24xbf16>
    %116 = vector.shape_cast %115 : vector<1x16x24xbf16> to vector<16x24xbf16>
    %117 = vector.extract_strided_slice %5 {offsets = [7, 2, 0], sizes = [1, 16, 24], strides = [1, 1, 1]} : vector<18x18x24xbf16> to vector<1x16x24xbf16>
    %118 = vector.shape_cast %117 : vector<1x16x24xbf16> to vector<16x24xbf16>
    %119 = tpu.concatenate %102, %104, %106, %108, %110, %112, %114, %116, %118 in 1 : vector<16x24xbf16>, vector<16x24xbf16>, vector<16x24xbf16>, vector<16x24xbf16>, vector<16x24xbf16>, vector<16x24xbf16>, vector<16x24xbf16>, vector<16x24xbf16>, vector<16x24xbf16> -> vector<16x216xbf16>
    %120 = vector.extract_strided_slice %5 {offsets = [6, 0, 0], sizes = [1, 16, 24], strides = [1, 1, 1]} : vector<18x18x24xbf16> to vector<1x16x24xbf16>
    %121 = vector.shape_cast %120 : vector<1x16x24xbf16> to vector<16x24xbf16>
    %122 = vector.extract_strided_slice %5 {offsets = [6, 1, 0], sizes = [1, 16, 24], strides = [1, 1, 1]} : vector<18x18x24xbf16> to vector<1x16x24xbf16>
    %123 = vector.shape_cast %122 : vector<1x16x24xbf16> to vector<16x24xbf16>
    %124 = vector.extract_strided_slice %5 {offsets = [6, 2, 0], sizes = [1, 16, 24], strides = [1, 1, 1]} : vector<18x18x24xbf16> to vector<1x16x24xbf16>
    %125 = vector.shape_cast %124 : vector<1x16x24xbf16> to vector<16x24xbf16>
    %126 = vector.extract_strided_slice %5 {offsets = [7, 0, 0], sizes = [1, 16, 24], strides = [1, 1, 1]} : vector<18x18x24xbf16> to vector<1x16x24xbf16>
    %127 = vector.shape_cast %126 : vector<1x16x24xbf16> to vector<16x24xbf16>
    %128 = vector.extract_strided_slice %5 {offsets = [7, 1, 0], sizes = [1, 16, 24], strides = [1, 1, 1]} : vector<18x18x24xbf16> to vector<1x16x24xbf16>
    %129 = vector.shape_cast %128 : vector<1x16x24xbf16> to vector<16x24xbf16>
    %130 = vector.extract_strided_slice %5 {offsets = [7, 2, 0], sizes = [1, 16, 24], strides = [1, 1, 1]} : vector<18x18x24xbf16> to vector<1x16x24xbf16>
    %131 = vector.shape_cast %130 : vector<1x16x24xbf16> to vector<16x24xbf16>
    %132 = vector.extract_strided_slice %5 {offsets = [8, 0, 0], sizes = [1, 16, 24], strides = [1, 1, 1]} : vector<18x18x24xbf16> to vector<1x16x24xbf16>
    %133 = vector.shape_cast %132 : vector<1x16x24xbf16> to vector<16x24xbf16>
    %134 = vector.extract_strided_slice %5 {offsets = [8, 1, 0], sizes = [1, 16, 24], strides = [1, 1, 1]} : vector<18x18x24xbf16> to vector<1x16x24xbf16>
    %135 = vector.shape_cast %134 : vector<1x16x24xbf16> to vector<16x24xbf16>
    %136 = vector.extract_strided_slice %5 {offsets = [8, 2, 0], sizes = [1, 16, 24], strides = [1, 1, 1]} : vector<18x18x24xbf16> to vector<1x16x24xbf16>
    %137 = vector.shape_cast %136 : vector<1x16x24xbf16> to vector<16x24xbf16>
    %138 = tpu.concatenate %121, %123, %125, %127, %129, %131, %133, %135, %137 in 1 : vector<16x24xbf16>, vector<16x24xbf16>, vector<16x24xbf16>, vector<16x24xbf16>, vector<16x24xbf16>, vector<16x24xbf16>, vector<16x24xbf16>, vector<16x24xbf16>, vector<16x24xbf16> -> vector<16x216xbf16>
    %139 = vector.extract_strided_slice %5 {offsets = [7, 0, 0], sizes = [1, 16, 24], strides = [1, 1, 1]} : vector<18x18x24xbf16> to vector<1x16x24xbf16>
    %140 = vector.shape_cast %139 : vector<1x16x24xbf16> to vector<16x24xbf16>
    %141 = vector.extract_strided_slice %5 {offsets = [7, 1, 0], sizes = [1, 16, 24], strides = [1, 1, 1]} : vector<18x18x24xbf16> to vector<1x16x24xbf16>
    %142 = vector.shape_cast %141 : vector<1x16x24xbf16> to vector<16x24xbf16>
    %143 = vector.extract_strided_slice %5 {offsets = [7, 2, 0], sizes = [1, 16, 24], strides = [1, 1, 1]} : vector<18x18x24xbf16> to vector<1x16x24xbf16>
    %144 = vector.shape_cast %143 : vector<1x16x24xbf16> to vector<16x24xbf16>
    %145 = vector.extract_strided_slice %5 {offsets = [8, 0, 0], sizes = [1, 16, 24], strides = [1, 1, 1]} : vector<18x18x24xbf16> to vector<1x16x24xbf16>
    %146 = vector.shape_cast %145 : vector<1x16x24xbf16> to vector<16x24xbf16>
    %147 = vector.extract_strided_slice %5 {offsets = [8, 1, 0], sizes = [1, 16, 24], strides = [1, 1, 1]} : vector<18x18x24xbf16> to vector<1x16x24xbf16>
    %148 = vector.shape_cast %147 : vector<1x16x24xbf16> to vector<16x24xbf16>
    %149 = vector.extract_strided_slice %5 {offsets = [8, 2, 0], sizes = [1, 16, 24], strides = [1, 1, 1]} : vector<18x18x24xbf16> to vector<1x16x24xbf16>
    %150 = vector.shape_cast %149 : vector<1x16x24xbf16> to vector<16x24xbf16>
    %151 = vector.extract_strided_slice %5 {offsets = [9, 0, 0], sizes = [1, 16, 24], strides = [1, 1, 1]} : vector<18x18x24xbf16> to vector<1x16x24xbf16>
    %152 = vector.shape_cast %151 : vector<1x16x24xbf16> to vector<16x24xbf16>
    %153 = vector.extract_strided_slice %5 {offsets = [9, 1, 0], sizes = [1, 16, 24], strides = [1, 1, 1]} : vector<18x18x24xbf16> to vector<1x16x24xbf16>
    %154 = vector.shape_cast %153 : vector<1x16x24xbf16> to vector<16x24xbf16>
    %155 = vector.extract_strided_slice %5 {offsets = [9, 2, 0], sizes = [1, 16, 24], strides = [1, 1, 1]} : vector<18x18x24xbf16> to vector<1x16x24xbf16>
    %156 = vector.shape_cast %155 : vector<1x16x24xbf16> to vector<16x24xbf16>
    %157 = tpu.concatenate %140, %142, %144, %146, %148, %150, %152, %154, %156 in 1 : vector<16x24xbf16>, vector<16x24xbf16>, vector<16x24xbf16>, vector<16x24xbf16>, vector<16x24xbf16>, vector<16x24xbf16>, vector<16x24xbf16>, vector<16x24xbf16>, vector<16x24xbf16> -> vector<16x216xbf16>
    %158 = vector.extract_strided_slice %5 {offsets = [8, 0, 0], sizes = [1, 16, 24], strides = [1, 1, 1]} : vector<18x18x24xbf16> to vector<1x16x24xbf16>
    %159 = vector.shape_cast %158 : vector<1x16x24xbf16> to vector<16x24xbf16>
    %160 = vector.extract_strided_slice %5 {offsets = [8, 1, 0], sizes = [1, 16, 24], strides = [1, 1, 1]} : vector<18x18x24xbf16> to vector<1x16x24xbf16>
    %161 = vector.shape_cast %160 : vector<1x16x24xbf16> to vector<16x24xbf16>
    %162 = vector.extract_strided_slice %5 {offsets = [8, 2, 0], sizes = [1, 16, 24], strides = [1, 1, 1]} : vector<18x18x24xbf16> to vector<1x16x24xbf16>
    %163 = vector.shape_cast %162 : vector<1x16x24xbf16> to vector<16x24xbf16>
    %164 = vector.extract_strided_slice %5 {offsets = [9, 0, 0], sizes = [1, 16, 24], strides = [1, 1, 1]} : vector<18x18x24xbf16> to vector<1x16x24xbf16>
    %165 = vector.shape_cast %164 : vector<1x16x24xbf16> to vector<16x24xbf16>
    %166 = vector.extract_strided_slice %5 {offsets = [9, 1, 0], sizes = [1, 16, 24], strides = [1, 1, 1]} : vector<18x18x24xbf16> to vector<1x16x24xbf16>
    %167 = vector.shape_cast %166 : vector<1x16x24xbf16> to vector<16x24xbf16>
    %168 = vector.extract_strided_slice %5 {offsets = [9, 2, 0], sizes = [1, 16, 24], strides = [1, 1, 1]} : vector<18x18x24xbf16> to vector<1x16x24xbf16>
    %169 = vector.shape_cast %168 : vector<1x16x24xbf16> to vector<16x24xbf16>
    %170 = vector.extract_strided_slice %5 {offsets = [10, 0, 0], sizes = [1, 16, 24], strides = [1, 1, 1]} : vector<18x18x24xbf16> to vector<1x16x24xbf16>
    %171 = vector.shape_cast %170 : vector<1x16x24xbf16> to vector<16x24xbf16>
    %172 = vector.extract_strided_slice %5 {offsets = [10, 1, 0], sizes = [1, 16, 24], strides = [1, 1, 1]} : vector<18x18x24xbf16> to vector<1x16x24xbf16>
    %173 = vector.shape_cast %172 : vector<1x16x24xbf16> to vector<16x24xbf16>
    %174 = vector.extract_strided_slice %5 {offsets = [10, 2, 0], sizes = [1, 16, 24], strides = [1, 1, 1]} : vector<18x18x24xbf16> to vector<1x16x24xbf16>
    %175 = vector.shape_cast %174 : vector<1x16x24xbf16> to vector<16x24xbf16>
    %176 = tpu.concatenate %159, %161, %163, %165, %167, %169, %171, %173, %175 in 1 : vector<16x24xbf16>, vector<16x24xbf16>, vector<16x24xbf16>, vector<16x24xbf16>, vector<16x24xbf16>, vector<16x24xbf16>, vector<16x24xbf16>, vector<16x24xbf16>, vector<16x24xbf16> -> vector<16x216xbf16>
    %177 = vector.extract_strided_slice %5 {offsets = [9, 0, 0], sizes = [1, 16, 24], strides = [1, 1, 1]} : vector<18x18x24xbf16> to vector<1x16x24xbf16>
    %178 = vector.shape_cast %177 : vector<1x16x24xbf16> to vector<16x24xbf16>
    %179 = vector.extract_strided_slice %5 {offsets = [9, 1, 0], sizes = [1, 16, 24], strides = [1, 1, 1]} : vector<18x18x24xbf16> to vector<1x16x24xbf16>
    %180 = vector.shape_cast %179 : vector<1x16x24xbf16> to vector<16x24xbf16>
    %181 = vector.extract_strided_slice %5 {offsets = [9, 2, 0], sizes = [1, 16, 24], strides = [1, 1, 1]} : vector<18x18x24xbf16> to vector<1x16x24xbf16>
    %182 = vector.shape_cast %181 : vector<1x16x24xbf16> to vector<16x24xbf16>
    %183 = vector.extract_strided_slice %5 {offsets = [10, 0, 0], sizes = [1, 16, 24], strides = [1, 1, 1]} : vector<18x18x24xbf16> to vector<1x16x24xbf16>
    %184 = vector.shape_cast %183 : vector<1x16x24xbf16> to vector<16x24xbf16>
    %185 = vector.extract_strided_slice %5 {offsets = [10, 1, 0], sizes = [1, 16, 24], strides = [1, 1, 1]} : vector<18x18x24xbf16> to vector<1x16x24xbf16>
    %186 = vector.shape_cast %185 : vector<1x16x24xbf16> to vector<16x24xbf16>
    %187 = vector.extract_strided_slice %5 {offsets = [10, 2, 0], sizes = [1, 16, 24], strides = [1, 1, 1]} : vector<18x18x24xbf16> to vector<1x16x24xbf16>
    %188 = vector.shape_cast %187 : vector<1x16x24xbf16> to vector<16x24xbf16>
    %189 = vector.extract_strided_slice %5 {offsets = [11, 0, 0], sizes = [1, 16, 24], strides = [1, 1, 1]} : vector<18x18x24xbf16> to vector<1x16x24xbf16>
    %190 = vector.shape_cast %189 : vector<1x16x24xbf16> to vector<16x24xbf16>
    %191 = vector.extract_strided_slice %5 {offsets = [11, 1, 0], sizes = [1, 16, 24], strides = [1, 1, 1]} : vector<18x18x24xbf16> to vector<1x16x24xbf16>
    %192 = vector.shape_cast %191 : vector<1x16x24xbf16> to vector<16x24xbf16>
    %193 = vector.extract_strided_slice %5 {offsets = [11, 2, 0], sizes = [1, 16, 24], strides = [1, 1, 1]} : vector<18x18x24xbf16> to vector<1x16x24xbf16>
    %194 = vector.shape_cast %193 : vector<1x16x24xbf16> to vector<16x24xbf16>
    %195 = tpu.concatenate %178, %180, %182, %184, %186, %188, %190, %192, %194 in 1 : vector<16x24xbf16>, vector<16x24xbf16>, vector<16x24xbf16>, vector<16x24xbf16>, vector<16x24xbf16>, vector<16x24xbf16>, vector<16x24xbf16>, vector<16x24xbf16>, vector<16x24xbf16> -> vector<16x216xbf16>
    %196 = vector.extract_strided_slice %5 {offsets = [10, 0, 0], sizes = [1, 16, 24], strides = [1, 1, 1]} : vector<18x18x24xbf16> to vector<1x16x24xbf16>
    %197 = vector.shape_cast %196 : vector<1x16x24xbf16> to vector<16x24xbf16>
    %198 = vector.extract_strided_slice %5 {offsets = [10, 1, 0], sizes = [1, 16, 24], strides = [1, 1, 1]} : vector<18x18x24xbf16> to vector<1x16x24xbf16>
    %199 = vector.shape_cast %198 : vector<1x16x24xbf16> to vector<16x24xbf16>
    %200 = vector.extract_strided_slice %5 {offsets = [10, 2, 0], sizes = [1, 16, 24], strides = [1, 1, 1]} : vector<18x18x24xbf16> to vector<1x16x24xbf16>
    %201 = vector.shape_cast %200 : vector<1x16x24xbf16> to vector<16x24xbf16>
    %202 = vector.extract_strided_slice %5 {offsets = [11, 0, 0], sizes = [1, 16, 24], strides = [1, 1, 1]} : vector<18x18x24xbf16> to vector<1x16x24xbf16>
    %203 = vector.shape_cast %202 : vector<1x16x24xbf16> to vector<16x24xbf16>
    %204 = vector.extract_strided_slice %5 {offsets = [11, 1, 0], sizes = [1, 16, 24], strides = [1, 1, 1]} : vector<18x18x24xbf16> to vector<1x16x24xbf16>
    %205 = vector.shape_cast %204 : vector<1x16x24xbf16> to vector<16x24xbf16>
    %206 = vector.extract_strided_slice %5 {offsets = [11, 2, 0], sizes = [1, 16, 24], strides = [1, 1, 1]} : vector<18x18x24xbf16> to vector<1x16x24xbf16>
    %207 = vector.shape_cast %206 : vector<1x16x24xbf16> to vector<16x24xbf16>
    %208 = vector.extract_strided_slice %5 {offsets = [12, 0, 0], sizes = [1, 16, 24], strides = [1, 1, 1]} : vector<18x18x24xbf16> to vector<1x16x24xbf16>
    %209 = vector.shape_cast %208 : vector<1x16x24xbf16> to vector<16x24xbf16>
    %210 = vector.extract_strided_slice %5 {offsets = [12, 1, 0], sizes = [1, 16, 24], strides = [1, 1, 1]} : vector<18x18x24xbf16> to vector<1x16x24xbf16>
    %211 = vector.shape_cast %210 : vector<1x16x24xbf16> to vector<16x24xbf16>
    %212 = vector.extract_strided_slice %5 {offsets = [12, 2, 0], sizes = [1, 16, 24], strides = [1, 1, 1]} : vector<18x18x24xbf16> to vector<1x16x24xbf16>
    %213 = vector.shape_cast %212 : vector<1x16x24xbf16> to vector<16x24xbf16>
    %214 = tpu.concatenate %197, %199, %201, %203, %205, %207, %209, %211, %213 in 1 : vector<16x24xbf16>, vector<16x24xbf16>, vector<16x24xbf16>, vector<16x24xbf16>, vector<16x24xbf16>, vector<16x24xbf16>, vector<16x24xbf16>, vector<16x24xbf16>, vector<16x24xbf16> -> vector<16x216xbf16>
    %215 = vector.extract_strided_slice %5 {offsets = [11, 0, 0], sizes = [1, 16, 24], strides = [1, 1, 1]} : vector<18x18x24xbf16> to vector<1x16x24xbf16>
    %216 = vector.shape_cast %215 : vector<1x16x24xbf16> to vector<16x24xbf16>
    %217 = vector.extract_strided_slice %5 {offsets = [11, 1, 0], sizes = [1, 16, 24], strides = [1, 1, 1]} : vector<18x18x24xbf16> to vector<1x16x24xbf16>
    %218 = vector.shape_cast %217 : vector<1x16x24xbf16> to vector<16x24xbf16>
    %219 = vector.extract_strided_slice %5 {offsets = [11, 2, 0], sizes = [1, 16, 24], strides = [1, 1, 1]} : vector<18x18x24xbf16> to vector<1x16x24xbf16>
    %220 = vector.shape_cast %219 : vector<1x16x24xbf16> to vector<16x24xbf16>
    %221 = vector.extract_strided_slice %5 {offsets = [12, 0, 0], sizes = [1, 16, 24], strides = [1, 1, 1]} : vector<18x18x24xbf16> to vector<1x16x24xbf16>
    %222 = vector.shape_cast %221 : vector<1x16x24xbf16> to vector<16x24xbf16>
    %223 = vector.extract_strided_slice %5 {offsets = [12, 1, 0], sizes = [1, 16, 24], strides = [1, 1, 1]} : vector<18x18x24xbf16> to vector<1x16x24xbf16>
    %224 = vector.shape_cast %223 : vector<1x16x24xbf16> to vector<16x24xbf16>
    %225 = vector.extract_strided_slice %5 {offsets = [12, 2, 0], sizes = [1, 16, 24], strides = [1, 1, 1]} : vector<18x18x24xbf16> to vector<1x16x24xbf16>
    %226 = vector.shape_cast %225 : vector<1x16x24xbf16> to vector<16x24xbf16>
    %227 = vector.extract_strided_slice %5 {offsets = [13, 0, 0], sizes = [1, 16, 24], strides = [1, 1, 1]} : vector<18x18x24xbf16> to vector<1x16x24xbf16>
    %228 = vector.shape_cast %227 : vector<1x16x24xbf16> to vector<16x24xbf16>
    %229 = vector.extract_strided_slice %5 {offsets = [13, 1, 0], sizes = [1, 16, 24], strides = [1, 1, 1]} : vector<18x18x24xbf16> to vector<1x16x24xbf16>
    %230 = vector.shape_cast %229 : vector<1x16x24xbf16> to vector<16x24xbf16>
    %231 = vector.extract_strided_slice %5 {offsets = [13, 2, 0], sizes = [1, 16, 24], strides = [1, 1, 1]} : vector<18x18x24xbf16> to vector<1x16x24xbf16>
    %232 = vector.shape_cast %231 : vector<1x16x24xbf16> to vector<16x24xbf16>
    %233 = tpu.concatenate %216, %218, %220, %222, %224, %226, %228, %230, %232 in 1 : vector<16x24xbf16>, vector<16x24xbf16>, vector<16x24xbf16>, vector<16x24xbf16>, vector<16x24xbf16>, vector<16x24xbf16>, vector<16x24xbf16>, vector<16x24xbf16>, vector<16x24xbf16> -> vector<16x216xbf16>
    %234 = vector.extract_strided_slice %5 {offsets = [12, 0, 0], sizes = [1, 16, 24], strides = [1, 1, 1]} : vector<18x18x24xbf16> to vector<1x16x24xbf16>
    %235 = vector.shape_cast %234 : vector<1x16x24xbf16> to vector<16x24xbf16>
    %236 = vector.extract_strided_slice %5 {offsets = [12, 1, 0], sizes = [1, 16, 24], strides = [1, 1, 1]} : vector<18x18x24xbf16> to vector<1x16x24xbf16>
    %237 = vector.shape_cast %236 : vector<1x16x24xbf16> to vector<16x24xbf16>
    %238 = vector.extract_strided_slice %5 {offsets = [12, 2, 0], sizes = [1, 16, 24], strides = [1, 1, 1]} : vector<18x18x24xbf16> to vector<1x16x24xbf16>
    %239 = vector.shape_cast %238 : vector<1x16x24xbf16> to vector<16x24xbf16>
    %240 = vector.extract_strided_slice %5 {offsets = [13, 0, 0], sizes = [1, 16, 24], strides = [1, 1, 1]} : vector<18x18x24xbf16> to vector<1x16x24xbf16>
    %241 = vector.shape_cast %240 : vector<1x16x24xbf16> to vector<16x24xbf16>
    %242 = vector.extract_strided_slice %5 {offsets = [13, 1, 0], sizes = [1, 16, 24], strides = [1, 1, 1]} : vector<18x18x24xbf16> to vector<1x16x24xbf16>
    %243 = vector.shape_cast %242 : vector<1x16x24xbf16> to vector<16x24xbf16>
    %244 = vector.extract_strided_slice %5 {offsets = [13, 2, 0], sizes = [1, 16, 24], strides = [1, 1, 1]} : vector<18x18x24xbf16> to vector<1x16x24xbf16>
    %245 = vector.shape_cast %244 : vector<1x16x24xbf16> to vector<16x24xbf16>
    %246 = vector.extract_strided_slice %5 {offsets = [14, 0, 0], sizes = [1, 16, 24], strides = [1, 1, 1]} : vector<18x18x24xbf16> to vector<1x16x24xbf16>
    %247 = vector.shape_cast %246 : vector<1x16x24xbf16> to vector<16x24xbf16>
    %248 = vector.extract_strided_slice %5 {offsets = [14, 1, 0], sizes = [1, 16, 24], strides = [1, 1, 1]} : vector<18x18x24xbf16> to vector<1x16x24xbf16>
    %249 = vector.shape_cast %248 : vector<1x16x24xbf16> to vector<16x24xbf16>
    %250 = vector.extract_strided_slice %5 {offsets = [14, 2, 0], sizes = [1, 16, 24], strides = [1, 1, 1]} : vector<18x18x24xbf16> to vector<1x16x24xbf16>
    %251 = vector.shape_cast %250 : vector<1x16x24xbf16> to vector<16x24xbf16>
    %252 = tpu.concatenate %235, %237, %239, %241, %243, %245, %247, %249, %251 in 1 : vector<16x24xbf16>, vector<16x24xbf16>, vector<16x24xbf16>, vector<16x24xbf16>, vector<16x24xbf16>, vector<16x24xbf16>, vector<16x24xbf16>, vector<16x24xbf16>, vector<16x24xbf16> -> vector<16x216xbf16>
    %253 = vector.extract_strided_slice %5 {offsets = [13, 0, 0], sizes = [1, 16, 24], strides = [1, 1, 1]} : vector<18x18x24xbf16> to vector<1x16x24xbf16>
    %254 = vector.shape_cast %253 : vector<1x16x24xbf16> to vector<16x24xbf16>
    %255 = vector.extract_strided_slice %5 {offsets = [13, 1, 0], sizes = [1, 16, 24], strides = [1, 1, 1]} : vector<18x18x24xbf16> to vector<1x16x24xbf16>
    %256 = vector.shape_cast %255 : vector<1x16x24xbf16> to vector<16x24xbf16>
    %257 = vector.extract_strided_slice %5 {offsets = [13, 2, 0], sizes = [1, 16, 24], strides = [1, 1, 1]} : vector<18x18x24xbf16> to vector<1x16x24xbf16>
    %258 = vector.shape_cast %257 : vector<1x16x24xbf16> to vector<16x24xbf16>
    %259 = vector.extract_strided_slice %5 {offsets = [14, 0, 0], sizes = [1, 16, 24], strides = [1, 1, 1]} : vector<18x18x24xbf16> to vector<1x16x24xbf16>
    %260 = vector.shape_cast %259 : vector<1x16x24xbf16> to vector<16x24xbf16>
    %261 = vector.extract_strided_slice %5 {offsets = [14, 1, 0], sizes = [1, 16, 24], strides = [1, 1, 1]} : vector<18x18x24xbf16> to vector<1x16x24xbf16>
    %262 = vector.shape_cast %261 : vector<1x16x24xbf16> to vector<16x24xbf16>
    %263 = vector.extract_strided_slice %5 {offsets = [14, 2, 0], sizes = [1, 16, 24], strides = [1, 1, 1]} : vector<18x18x24xbf16> to vector<1x16x24xbf16>
    %264 = vector.shape_cast %263 : vector<1x16x24xbf16> to vector<16x24xbf16>
    %265 = vector.extract_strided_slice %5 {offsets = [15, 0, 0], sizes = [1, 16, 24], strides = [1, 1, 1]} : vector<18x18x24xbf16> to vector<1x16x24xbf16>
    %266 = vector.shape_cast %265 : vector<1x16x24xbf16> to vector<16x24xbf16>
    %267 = vector.extract_strided_slice %5 {offsets = [15, 1, 0], sizes = [1, 16, 24], strides = [1, 1, 1]} : vector<18x18x24xbf16> to vector<1x16x24xbf16>
    %268 = vector.shape_cast %267 : vector<1x16x24xbf16> to vector<16x24xbf16>
    %269 = vector.extract_strided_slice %5 {offsets = [15, 2, 0], sizes = [1, 16, 24], strides = [1, 1, 1]} : vector<18x18x24xbf16> to vector<1x16x24xbf16>
    %270 = vector.shape_cast %269 : vector<1x16x24xbf16> to vector<16x24xbf16>
    %271 = tpu.concatenate %254, %256, %258, %260, %262, %264, %266, %268, %270 in 1 : vector<16x24xbf16>, vector<16x24xbf16>, vector<16x24xbf16>, vector<16x24xbf16>, vector<16x24xbf16>, vector<16x24xbf16>, vector<16x24xbf16>, vector<16x24xbf16>, vector<16x24xbf16> -> vector<16x216xbf16>
    %272 = vector.extract_strided_slice %5 {offsets = [14, 0, 0], sizes = [1, 16, 24], strides = [1, 1, 1]} : vector<18x18x24xbf16> to vector<1x16x24xbf16>
    %273 = vector.shape_cast %272 : vector<1x16x24xbf16> to vector<16x24xbf16>
    %274 = vector.extract_strided_slice %5 {offsets = [14, 1, 0], sizes = [1, 16, 24], strides = [1, 1, 1]} : vector<18x18x24xbf16> to vector<1x16x24xbf16>
    %275 = vector.shape_cast %274 : vector<1x16x24xbf16> to vector<16x24xbf16>
    %276 = vector.extract_strided_slice %5 {offsets = [14, 2, 0], sizes = [1, 16, 24], strides = [1, 1, 1]} : vector<18x18x24xbf16> to vector<1x16x24xbf16>
    %277 = vector.shape_cast %276 : vector<1x16x24xbf16> to vector<16x24xbf16>
    %278 = vector.extract_strided_slice %5 {offsets = [15, 0, 0], sizes = [1, 16, 24], strides = [1, 1, 1]} : vector<18x18x24xbf16> to vector<1x16x24xbf16>
    %279 = vector.shape_cast %278 : vector<1x16x24xbf16> to vector<16x24xbf16>
    %280 = vector.extract_strided_slice %5 {offsets = [15, 1, 0], sizes = [1, 16, 24], strides = [1, 1, 1]} : vector<18x18x24xbf16> to vector<1x16x24xbf16>
    %281 = vector.shape_cast %280 : vector<1x16x24xbf16> to vector<16x24xbf16>
    %282 = vector.extract_strided_slice %5 {offsets = [15, 2, 0], sizes = [1, 16, 24], strides = [1, 1, 1]} : vector<18x18x24xbf16> to vector<1x16x24xbf16>
    %283 = vector.shape_cast %282 : vector<1x16x24xbf16> to vector<16x24xbf16>
    %284 = vector.extract_strided_slice %5 {offsets = [16, 0, 0], sizes = [1, 16, 24], strides = [1, 1, 1]} : vector<18x18x24xbf16> to vector<1x16x24xbf16>
    %285 = vector.shape_cast %284 : vector<1x16x24xbf16> to vector<16x24xbf16>
    %286 = vector.extract_strided_slice %5 {offsets = [16, 1, 0], sizes = [1, 16, 24], strides = [1, 1, 1]} : vector<18x18x24xbf16> to vector<1x16x24xbf16>
    %287 = vector.shape_cast %286 : vector<1x16x24xbf16> to vector<16x24xbf16>
    %288 = vector.extract_strided_slice %5 {offsets = [16, 2, 0], sizes = [1, 16, 24], strides = [1, 1, 1]} : vector<18x18x24xbf16> to vector<1x16x24xbf16>
    %289 = vector.shape_cast %288 : vector<1x16x24xbf16> to vector<16x24xbf16>
    %290 = tpu.concatenate %273, %275, %277, %279, %281, %283, %285, %287, %289 in 1 : vector<16x24xbf16>, vector<16x24xbf16>, vector<16x24xbf16>, vector<16x24xbf16>, vector<16x24xbf16>, vector<16x24xbf16>, vector<16x24xbf16>, vector<16x24xbf16>, vector<16x24xbf16> -> vector<16x216xbf16>
    %291 = vector.extract_strided_slice %5 {offsets = [15, 0, 0], sizes = [1, 16, 24], strides = [1, 1, 1]} : vector<18x18x24xbf16> to vector<1x16x24xbf16>
    %292 = vector.shape_cast %291 : vector<1x16x24xbf16> to vector<16x24xbf16>
    %293 = vector.extract_strided_slice %5 {offsets = [15, 1, 0], sizes = [1, 16, 24], strides = [1, 1, 1]} : vector<18x18x24xbf16> to vector<1x16x24xbf16>
    %294 = vector.shape_cast %293 : vector<1x16x24xbf16> to vector<16x24xbf16>
    %295 = vector.extract_strided_slice %5 {offsets = [15, 2, 0], sizes = [1, 16, 24], strides = [1, 1, 1]} : vector<18x18x24xbf16> to vector<1x16x24xbf16>
    %296 = vector.shape_cast %295 : vector<1x16x24xbf16> to vector<16x24xbf16>
    %297 = vector.extract_strided_slice %5 {offsets = [16, 0, 0], sizes = [1, 16, 24], strides = [1, 1, 1]} : vector<18x18x24xbf16> to vector<1x16x24xbf16>
    %298 = vector.shape_cast %297 : vector<1x16x24xbf16> to vector<16x24xbf16>
    %299 = vector.extract_strided_slice %5 {offsets = [16, 1, 0], sizes = [1, 16, 24], strides = [1, 1, 1]} : vector<18x18x24xbf16> to vector<1x16x24xbf16>
    %300 = vector.shape_cast %299 : vector<1x16x24xbf16> to vector<16x24xbf16>
    %301 = vector.extract_strided_slice %5 {offsets = [16, 2, 0], sizes = [1, 16, 24], strides = [1, 1, 1]} : vector<18x18x24xbf16> to vector<1x16x24xbf16>
    %302 = vector.shape_cast %301 : vector<1x16x24xbf16> to vector<16x24xbf16>
    %303 = vector.extract_strided_slice %5 {offsets = [17, 0, 0], sizes = [1, 16, 24], strides = [1, 1, 1]} : vector<18x18x24xbf16> to vector<1x16x24xbf16>
    %304 = vector.shape_cast %303 : vector<1x16x24xbf16> to vector<16x24xbf16>
    %305 = vector.extract_strided_slice %5 {offsets = [17, 1, 0], sizes = [1, 16, 24], strides = [1, 1, 1]} : vector<18x18x24xbf16> to vector<1x16x24xbf16>
    %306 = vector.shape_cast %305 : vector<1x16x24xbf16> to vector<16x24xbf16>
    %307 = vector.extract_strided_slice %5 {offsets = [17, 2, 0], sizes = [1, 16, 24], strides = [1, 1, 1]} : vector<18x18x24xbf16> to vector<1x16x24xbf16>
    %308 = vector.shape_cast %307 : vector<1x16x24xbf16> to vector<16x24xbf16>
    %309 = tpu.concatenate %292, %294, %296, %298, %300, %302, %304, %306, %308 in 1 : vector<16x24xbf16>, vector<16x24xbf16>, vector<16x24xbf16>, vector<16x24xbf16>, vector<16x24xbf16>, vector<16x24xbf16>, vector<16x24xbf16>, vector<16x24xbf16>, vector<16x24xbf16> -> vector<16x216xbf16>
    %310 = tpu.concatenate %24, %43, %62, %81, %100, %119, %138, %157, %176, %195, %214, %233, %252, %271, %290, %309 in 0 : vector<16x216xbf16>, vector<16x216xbf16>, vector<16x216xbf16>, vector<16x216xbf16>, vector<16x216xbf16>, vector<16x216xbf16>, vector<16x216xbf16>, vector<16x216xbf16>, vector<16x216xbf16>, vector<16x216xbf16>, vector<16x216xbf16>, vector<16x216xbf16>, vector<16x216xbf16>, vector<16x216xbf16>, vector<16x216xbf16>, vector<16x216xbf16> -> vector<256x216xbf16>
    %cst = arith.constant dense<0.000000e+00> : vector<256x24xf32>
    %311 = tpu.matmul %310, %2, %cst {dimension_numbers = #tpu.dot_dimension_numbers<[1], [0], [0], [1], [0, 0, 1, 1], [], []>} : vector<256x216xbf16>, vector<216x24xbf16>, vector<256x24xf32> -> vector<256x24xf32>
    %c0_4 = arith.constant 0 : index
    %c0_5 = arith.constant 0 : index
    %312 = vector.load %arg4[%c0_4, %c0_5] : memref<256x24xf32, #tpu.memory_space<vmem>>, vector<256x24xf32>
    tpu.vector_store %arg4[%c0_4, %c0_5], %311 {strides = array<i32>} : memref<256x24xf32, #tpu.memory_space<vmem>>, vector<256x24xf32>,
    %cst_6 = arith.constant dense<0.000000e+00> : vector<24xf32>
    %313 = vector.multi_reduction <add>, %311, %cst_6 [0] : vector<256x24xf32> to vector<24xf32>
    %314 = vector.shape_cast %313 : vector<24xf32> to vector<1x24xf32>
    %315 = arith.mulf %311, %311 : vector<256x24xf32>
    %cst_7 = arith.constant dense<0.000000e+00> : vector<24xf32>
    %316 = vector.multi_reduction <add>, %315, %cst_7 [0] : vector<256x24xf32> to vector<24xf32>
    %317 = vector.shape_cast %316 : vector<24xf32> to vector<1x24xf32>
    %cst_8 = arith.constant 0.000000e+00 : f32
    %318 = vector.broadcast %cst_8 : f32 to vector<6x24xf32>
    %319 = tpu.concatenate %314, %317, %318 in 0 : vector<1x24xf32>, vector<1x24xf32>, vector<6x24xf32> -> vector<8x24xf32>
    %c0_9 = arith.constant 0 : index
    %c0_10 = arith.constant 0 : index
    %c0_11 = arith.constant 0 : index
    %320 = vector.load %arg5[%c0_9, %c0_10, %c0_11] : memref<1x8x24xf32, #tpu.memory_space<vmem>>, vector<1x8x24xf32>
    %321 = vector.shape_cast %320 : vector<1x8x24xf32> to vector<8x24xf32>
    %322 = vector.shape_cast %319 : vector<8x24xf32> to vector<1x8x24xf32>
    tpu.vector_store %arg5[%c0_9, %c0_10, %c0_11], %322 {strides = array<i32>} : memref<1x8x24xf32, #tpu.memory_space<vmem>>, vector<1x8x24xf32>,
    return
  }
  func.func @transform_0(%arg0: i32, %arg1: i32) -> (i32, i32, i32, i32) {
    %c0_i32 = arith.constant 0 : i32
    %c0_i32_0 = arith.constant 0 : i32
    %c0_i32_1 = arith.constant 0 : i32
    %c0_i32_2 = arith.constant 0 : i32
    return %arg0, %c0_i32, %c0_i32_0, %c0_i32_1 : i32, i32, i32, i32
  }
  func.func @transform_1(%arg0: i32, %arg1: i32) -> (i32, i32) {
    %c0_i32 = arith.constant 0 : i32
    %c0_i32_0 = arith.constant 0 : i32
    %c0_i32_1 = arith.constant 0 : i32
    return %c0_i32, %c0_i32_0 : i32, i32
  }
  func.func @transform_2(%arg0: i32, %arg1: i32) -> (i32, i32) {
    %c1_i32 = arith.constant 1 : i32
    %0 = arith.muli %arg0, %c1_i32 : i32
    %1 = arith.addi %0, %arg1 : i32
    %c0_i32 = arith.constant 0 : i32
    %c0_i32_0 = arith.constant 0 : i32
    return %1, %c0_i32 : i32, i32
  }
  func.func @transform_3(%arg0: i32, %arg1: i32) -> (i32, i32, i32) {
    %c1_i32 = arith.constant 1 : i32
    %0 = arith.muli %arg0, %c1_i32 : i32
    %1 = arith.addi %0, %arg1 : i32
    %c0_i32 = arith.constant 0 : i32
    %c0_i32_0 = arith.constant 0 : i32
    %c0_i32_1 = arith.constant 0 : i32
    return %1, %c0_i32, %c0_i32_0 : i32, i32, i32
  }
}

module attributes {stable_mosaic.version = 11 : i64} {
  func.func @_conv3x3_stats_kernel(%arg0: i32, %arg1: i32, %arg2: memref<1x10x10x24xbf16, #tpu.memory_space<vmem>>, %arg3: memref<216x24xbf16, #tpu.memory_space<vmem>>, %arg4: memref<64x24xf32, #tpu.memory_space<vmem>>, %arg5: memref<1x8x24xf32, #tpu.memory_space<vmem>>) attributes {dimension_semantics = [#tpu.dimension_semantics<parallel>, #tpu.dimension_semantics<parallel>], iteration_bounds = array<i64: 2, 1>, scalar_prefetch = 0 : i64, scratch_operands = 0 : i64, tpu.core_type = #tpu.core_type<tc>, window_params = [{transform_indices = @transform_0, window_bounds = array<i64: 1, 10, 10, 24>}, {pipeline_mode = #tpu.pipeline_mode<synchronous>, transform_indices = @transform_1, window_bounds = array<i64: 216, 24>}, {transform_indices = @transform_2, window_bounds = array<i64: 64, 24>}, {transform_indices = @transform_3, window_bounds = array<i64: 1, 8, 24>}]} {
    %c8_i32 = arith.constant 8 : i32
    %0 = arith.muli %arg1, %c8_i32 : i32
    %1 = tpu.assume_multiple %0, 8 : i32
    %c0 = arith.constant 0 : index
    %c0_0 = arith.constant 0 : index
    %2 = vector.load %arg3[%c0, %c0_0] : memref<216x24xbf16, #tpu.memory_space<vmem>>, vector<216x24xbf16>
    %c0_1 = arith.constant 0 : index
    %3 = arith.index_cast %1 : i32 to index
    %c0_2 = arith.constant 0 : index
    %c0_3 = arith.constant 0 : index
    %4 = vector.load %arg2[%c0_1, %3, %c0_2, %c0_3] : memref<1x10x10x24xbf16, #tpu.memory_space<vmem>>, vector<1x10x10x24xbf16>
    %5 = vector.shape_cast %4 : vector<1x10x10x24xbf16> to vector<10x10x24xbf16>
    %6 = vector.extract_strided_slice %5 {offsets = [0, 0, 0], sizes = [1, 8, 24], strides = [1, 1, 1]} : vector<10x10x24xbf16> to vector<1x8x24xbf16>
    %7 = vector.shape_cast %6 : vector<1x8x24xbf16> to vector<8x24xbf16>
    %8 = vector.extract_strided_slice %5 {offsets = [0, 1, 0], sizes = [1, 8, 24], strides = [1, 1, 1]} : vector<10x10x24xbf16> to vector<1x8x24xbf16>
    %9 = vector.shape_cast %8 : vector<1x8x24xbf16> to vector<8x24xbf16>
    %10 = vector.extract_strided_slice %5 {offsets = [0, 2, 0], sizes = [1, 8, 24], strides = [1, 1, 1]} : vector<10x10x24xbf16> to vector<1x8x24xbf16>
    %11 = vector.shape_cast %10 : vector<1x8x24xbf16> to vector<8x24xbf16>
    %12 = vector.extract_strided_slice %5 {offsets = [1, 0, 0], sizes = [1, 8, 24], strides = [1, 1, 1]} : vector<10x10x24xbf16> to vector<1x8x24xbf16>
    %13 = vector.shape_cast %12 : vector<1x8x24xbf16> to vector<8x24xbf16>
    %14 = vector.extract_strided_slice %5 {offsets = [1, 1, 0], sizes = [1, 8, 24], strides = [1, 1, 1]} : vector<10x10x24xbf16> to vector<1x8x24xbf16>
    %15 = vector.shape_cast %14 : vector<1x8x24xbf16> to vector<8x24xbf16>
    %16 = vector.extract_strided_slice %5 {offsets = [1, 2, 0], sizes = [1, 8, 24], strides = [1, 1, 1]} : vector<10x10x24xbf16> to vector<1x8x24xbf16>
    %17 = vector.shape_cast %16 : vector<1x8x24xbf16> to vector<8x24xbf16>
    %18 = vector.extract_strided_slice %5 {offsets = [2, 0, 0], sizes = [1, 8, 24], strides = [1, 1, 1]} : vector<10x10x24xbf16> to vector<1x8x24xbf16>
    %19 = vector.shape_cast %18 : vector<1x8x24xbf16> to vector<8x24xbf16>
    %20 = vector.extract_strided_slice %5 {offsets = [2, 1, 0], sizes = [1, 8, 24], strides = [1, 1, 1]} : vector<10x10x24xbf16> to vector<1x8x24xbf16>
    %21 = vector.shape_cast %20 : vector<1x8x24xbf16> to vector<8x24xbf16>
    %22 = vector.extract_strided_slice %5 {offsets = [2, 2, 0], sizes = [1, 8, 24], strides = [1, 1, 1]} : vector<10x10x24xbf16> to vector<1x8x24xbf16>
    %23 = vector.shape_cast %22 : vector<1x8x24xbf16> to vector<8x24xbf16>
    %24 = tpu.concatenate %7, %9, %11, %13, %15, %17, %19, %21, %23 in 1 : vector<8x24xbf16>, vector<8x24xbf16>, vector<8x24xbf16>, vector<8x24xbf16>, vector<8x24xbf16>, vector<8x24xbf16>, vector<8x24xbf16>, vector<8x24xbf16>, vector<8x24xbf16> -> vector<8x216xbf16>
    %25 = vector.extract_strided_slice %5 {offsets = [1, 0, 0], sizes = [1, 8, 24], strides = [1, 1, 1]} : vector<10x10x24xbf16> to vector<1x8x24xbf16>
    %26 = vector.shape_cast %25 : vector<1x8x24xbf16> to vector<8x24xbf16>
    %27 = vector.extract_strided_slice %5 {offsets = [1, 1, 0], sizes = [1, 8, 24], strides = [1, 1, 1]} : vector<10x10x24xbf16> to vector<1x8x24xbf16>
    %28 = vector.shape_cast %27 : vector<1x8x24xbf16> to vector<8x24xbf16>
    %29 = vector.extract_strided_slice %5 {offsets = [1, 2, 0], sizes = [1, 8, 24], strides = [1, 1, 1]} : vector<10x10x24xbf16> to vector<1x8x24xbf16>
    %30 = vector.shape_cast %29 : vector<1x8x24xbf16> to vector<8x24xbf16>
    %31 = vector.extract_strided_slice %5 {offsets = [2, 0, 0], sizes = [1, 8, 24], strides = [1, 1, 1]} : vector<10x10x24xbf16> to vector<1x8x24xbf16>
    %32 = vector.shape_cast %31 : vector<1x8x24xbf16> to vector<8x24xbf16>
    %33 = vector.extract_strided_slice %5 {offsets = [2, 1, 0], sizes = [1, 8, 24], strides = [1, 1, 1]} : vector<10x10x24xbf16> to vector<1x8x24xbf16>
    %34 = vector.shape_cast %33 : vector<1x8x24xbf16> to vector<8x24xbf16>
    %35 = vector.extract_strided_slice %5 {offsets = [2, 2, 0], sizes = [1, 8, 24], strides = [1, 1, 1]} : vector<10x10x24xbf16> to vector<1x8x24xbf16>
    %36 = vector.shape_cast %35 : vector<1x8x24xbf16> to vector<8x24xbf16>
    %37 = vector.extract_strided_slice %5 {offsets = [3, 0, 0], sizes = [1, 8, 24], strides = [1, 1, 1]} : vector<10x10x24xbf16> to vector<1x8x24xbf16>
    %38 = vector.shape_cast %37 : vector<1x8x24xbf16> to vector<8x24xbf16>
    %39 = vector.extract_strided_slice %5 {offsets = [3, 1, 0], sizes = [1, 8, 24], strides = [1, 1, 1]} : vector<10x10x24xbf16> to vector<1x8x24xbf16>
    %40 = vector.shape_cast %39 : vector<1x8x24xbf16> to vector<8x24xbf16>
    %41 = vector.extract_strided_slice %5 {offsets = [3, 2, 0], sizes = [1, 8, 24], strides = [1, 1, 1]} : vector<10x10x24xbf16> to vector<1x8x24xbf16>
    %42 = vector.shape_cast %41 : vector<1x8x24xbf16> to vector<8x24xbf16>
    %43 = tpu.concatenate %26, %28, %30, %32, %34, %36, %38, %40, %42 in 1 : vector<8x24xbf16>, vector<8x24xbf16>, vector<8x24xbf16>, vector<8x24xbf16>, vector<8x24xbf16>, vector<8x24xbf16>, vector<8x24xbf16>, vector<8x24xbf16>, vector<8x24xbf16> -> vector<8x216xbf16>
    %44 = vector.extract_strided_slice %5 {offsets = [2, 0, 0], sizes = [1, 8, 24], strides = [1, 1, 1]} : vector<10x10x24xbf16> to vector<1x8x24xbf16>
    %45 = vector.shape_cast %44 : vector<1x8x24xbf16> to vector<8x24xbf16>
    %46 = vector.extract_strided_slice %5 {offsets = [2, 1, 0], sizes = [1, 8, 24], strides = [1, 1, 1]} : vector<10x10x24xbf16> to vector<1x8x24xbf16>
    %47 = vector.shape_cast %46 : vector<1x8x24xbf16> to vector<8x24xbf16>
    %48 = vector.extract_strided_slice %5 {offsets = [2, 2, 0], sizes = [1, 8, 24], strides = [1, 1, 1]} : vector<10x10x24xbf16> to vector<1x8x24xbf16>
    %49 = vector.shape_cast %48 : vector<1x8x24xbf16> to vector<8x24xbf16>
    %50 = vector.extract_strided_slice %5 {offsets = [3, 0, 0], sizes = [1, 8, 24], strides = [1, 1, 1]} : vector<10x10x24xbf16> to vector<1x8x24xbf16>
    %51 = vector.shape_cast %50 : vector<1x8x24xbf16> to vector<8x24xbf16>
    %52 = vector.extract_strided_slice %5 {offsets = [3, 1, 0], sizes = [1, 8, 24], strides = [1, 1, 1]} : vector<10x10x24xbf16> to vector<1x8x24xbf16>
    %53 = vector.shape_cast %52 : vector<1x8x24xbf16> to vector<8x24xbf16>
    %54 = vector.extract_strided_slice %5 {offsets = [3, 2, 0], sizes = [1, 8, 24], strides = [1, 1, 1]} : vector<10x10x24xbf16> to vector<1x8x24xbf16>
    %55 = vector.shape_cast %54 : vector<1x8x24xbf16> to vector<8x24xbf16>
    %56 = vector.extract_strided_slice %5 {offsets = [4, 0, 0], sizes = [1, 8, 24], strides = [1, 1, 1]} : vector<10x10x24xbf16> to vector<1x8x24xbf16>
    %57 = vector.shape_cast %56 : vector<1x8x24xbf16> to vector<8x24xbf16>
    %58 = vector.extract_strided_slice %5 {offsets = [4, 1, 0], sizes = [1, 8, 24], strides = [1, 1, 1]} : vector<10x10x24xbf16> to vector<1x8x24xbf16>
    %59 = vector.shape_cast %58 : vector<1x8x24xbf16> to vector<8x24xbf16>
    %60 = vector.extract_strided_slice %5 {offsets = [4, 2, 0], sizes = [1, 8, 24], strides = [1, 1, 1]} : vector<10x10x24xbf16> to vector<1x8x24xbf16>
    %61 = vector.shape_cast %60 : vector<1x8x24xbf16> to vector<8x24xbf16>
    %62 = tpu.concatenate %45, %47, %49, %51, %53, %55, %57, %59, %61 in 1 : vector<8x24xbf16>, vector<8x24xbf16>, vector<8x24xbf16>, vector<8x24xbf16>, vector<8x24xbf16>, vector<8x24xbf16>, vector<8x24xbf16>, vector<8x24xbf16>, vector<8x24xbf16> -> vector<8x216xbf16>
    %63 = vector.extract_strided_slice %5 {offsets = [3, 0, 0], sizes = [1, 8, 24], strides = [1, 1, 1]} : vector<10x10x24xbf16> to vector<1x8x24xbf16>
    %64 = vector.shape_cast %63 : vector<1x8x24xbf16> to vector<8x24xbf16>
    %65 = vector.extract_strided_slice %5 {offsets = [3, 1, 0], sizes = [1, 8, 24], strides = [1, 1, 1]} : vector<10x10x24xbf16> to vector<1x8x24xbf16>
    %66 = vector.shape_cast %65 : vector<1x8x24xbf16> to vector<8x24xbf16>
    %67 = vector.extract_strided_slice %5 {offsets = [3, 2, 0], sizes = [1, 8, 24], strides = [1, 1, 1]} : vector<10x10x24xbf16> to vector<1x8x24xbf16>
    %68 = vector.shape_cast %67 : vector<1x8x24xbf16> to vector<8x24xbf16>
    %69 = vector.extract_strided_slice %5 {offsets = [4, 0, 0], sizes = [1, 8, 24], strides = [1, 1, 1]} : vector<10x10x24xbf16> to vector<1x8x24xbf16>
    %70 = vector.shape_cast %69 : vector<1x8x24xbf16> to vector<8x24xbf16>
    %71 = vector.extract_strided_slice %5 {offsets = [4, 1, 0], sizes = [1, 8, 24], strides = [1, 1, 1]} : vector<10x10x24xbf16> to vector<1x8x24xbf16>
    %72 = vector.shape_cast %71 : vector<1x8x24xbf16> to vector<8x24xbf16>
    %73 = vector.extract_strided_slice %5 {offsets = [4, 2, 0], sizes = [1, 8, 24], strides = [1, 1, 1]} : vector<10x10x24xbf16> to vector<1x8x24xbf16>
    %74 = vector.shape_cast %73 : vector<1x8x24xbf16> to vector<8x24xbf16>
    %75 = vector.extract_strided_slice %5 {offsets = [5, 0, 0], sizes = [1, 8, 24], strides = [1, 1, 1]} : vector<10x10x24xbf16> to vector<1x8x24xbf16>
    %76 = vector.shape_cast %75 : vector<1x8x24xbf16> to vector<8x24xbf16>
    %77 = vector.extract_strided_slice %5 {offsets = [5, 1, 0], sizes = [1, 8, 24], strides = [1, 1, 1]} : vector<10x10x24xbf16> to vector<1x8x24xbf16>
    %78 = vector.shape_cast %77 : vector<1x8x24xbf16> to vector<8x24xbf16>
    %79 = vector.extract_strided_slice %5 {offsets = [5, 2, 0], sizes = [1, 8, 24], strides = [1, 1, 1]} : vector<10x10x24xbf16> to vector<1x8x24xbf16>
    %80 = vector.shape_cast %79 : vector<1x8x24xbf16> to vector<8x24xbf16>
    %81 = tpu.concatenate %64, %66, %68, %70, %72, %74, %76, %78, %80 in 1 : vector<8x24xbf16>, vector<8x24xbf16>, vector<8x24xbf16>, vector<8x24xbf16>, vector<8x24xbf16>, vector<8x24xbf16>, vector<8x24xbf16>, vector<8x24xbf16>, vector<8x24xbf16> -> vector<8x216xbf16>
    %82 = vector.extract_strided_slice %5 {offsets = [4, 0, 0], sizes = [1, 8, 24], strides = [1, 1, 1]} : vector<10x10x24xbf16> to vector<1x8x24xbf16>
    %83 = vector.shape_cast %82 : vector<1x8x24xbf16> to vector<8x24xbf16>
    %84 = vector.extract_strided_slice %5 {offsets = [4, 1, 0], sizes = [1, 8, 24], strides = [1, 1, 1]} : vector<10x10x24xbf16> to vector<1x8x24xbf16>
    %85 = vector.shape_cast %84 : vector<1x8x24xbf16> to vector<8x24xbf16>
    %86 = vector.extract_strided_slice %5 {offsets = [4, 2, 0], sizes = [1, 8, 24], strides = [1, 1, 1]} : vector<10x10x24xbf16> to vector<1x8x24xbf16>
    %87 = vector.shape_cast %86 : vector<1x8x24xbf16> to vector<8x24xbf16>
    %88 = vector.extract_strided_slice %5 {offsets = [5, 0, 0], sizes = [1, 8, 24], strides = [1, 1, 1]} : vector<10x10x24xbf16> to vector<1x8x24xbf16>
    %89 = vector.shape_cast %88 : vector<1x8x24xbf16> to vector<8x24xbf16>
    %90 = vector.extract_strided_slice %5 {offsets = [5, 1, 0], sizes = [1, 8, 24], strides = [1, 1, 1]} : vector<10x10x24xbf16> to vector<1x8x24xbf16>
    %91 = vector.shape_cast %90 : vector<1x8x24xbf16> to vector<8x24xbf16>
    %92 = vector.extract_strided_slice %5 {offsets = [5, 2, 0], sizes = [1, 8, 24], strides = [1, 1, 1]} : vector<10x10x24xbf16> to vector<1x8x24xbf16>
    %93 = vector.shape_cast %92 : vector<1x8x24xbf16> to vector<8x24xbf16>
    %94 = vector.extract_strided_slice %5 {offsets = [6, 0, 0], sizes = [1, 8, 24], strides = [1, 1, 1]} : vector<10x10x24xbf16> to vector<1x8x24xbf16>
    %95 = vector.shape_cast %94 : vector<1x8x24xbf16> to vector<8x24xbf16>
    %96 = vector.extract_strided_slice %5 {offsets = [6, 1, 0], sizes = [1, 8, 24], strides = [1, 1, 1]} : vector<10x10x24xbf16> to vector<1x8x24xbf16>
    %97 = vector.shape_cast %96 : vector<1x8x24xbf16> to vector<8x24xbf16>
    %98 = vector.extract_strided_slice %5 {offsets = [6, 2, 0], sizes = [1, 8, 24], strides = [1, 1, 1]} : vector<10x10x24xbf16> to vector<1x8x24xbf16>
    %99 = vector.shape_cast %98 : vector<1x8x24xbf16> to vector<8x24xbf16>
    %100 = tpu.concatenate %83, %85, %87, %89, %91, %93, %95, %97, %99 in 1 : vector<8x24xbf16>, vector<8x24xbf16>, vector<8x24xbf16>, vector<8x24xbf16>, vector<8x24xbf16>, vector<8x24xbf16>, vector<8x24xbf16>, vector<8x24xbf16>, vector<8x24xbf16> -> vector<8x216xbf16>
    %101 = vector.extract_strided_slice %5 {offsets = [5, 0, 0], sizes = [1, 8, 24], strides = [1, 1, 1]} : vector<10x10x24xbf16> to vector<1x8x24xbf16>
    %102 = vector.shape_cast %101 : vector<1x8x24xbf16> to vector<8x24xbf16>
    %103 = vector.extract_strided_slice %5 {offsets = [5, 1, 0], sizes = [1, 8, 24], strides = [1, 1, 1]} : vector<10x10x24xbf16> to vector<1x8x24xbf16>
    %104 = vector.shape_cast %103 : vector<1x8x24xbf16> to vector<8x24xbf16>
    %105 = vector.extract_strided_slice %5 {offsets = [5, 2, 0], sizes = [1, 8, 24], strides = [1, 1, 1]} : vector<10x10x24xbf16> to vector<1x8x24xbf16>
    %106 = vector.shape_cast %105 : vector<1x8x24xbf16> to vector<8x24xbf16>
    %107 = vector.extract_strided_slice %5 {offsets = [6, 0, 0], sizes = [1, 8, 24], strides = [1, 1, 1]} : vector<10x10x24xbf16> to vector<1x8x24xbf16>
    %108 = vector.shape_cast %107 : vector<1x8x24xbf16> to vector<8x24xbf16>
    %109 = vector.extract_strided_slice %5 {offsets = [6, 1, 0], sizes = [1, 8, 24], strides = [1, 1, 1]} : vector<10x10x24xbf16> to vector<1x8x24xbf16>
    %110 = vector.shape_cast %109 : vector<1x8x24xbf16> to vector<8x24xbf16>
    %111 = vector.extract_strided_slice %5 {offsets = [6, 2, 0], sizes = [1, 8, 24], strides = [1, 1, 1]} : vector<10x10x24xbf16> to vector<1x8x24xbf16>
    %112 = vector.shape_cast %111 : vector<1x8x24xbf16> to vector<8x24xbf16>
    %113 = vector.extract_strided_slice %5 {offsets = [7, 0, 0], sizes = [1, 8, 24], strides = [1, 1, 1]} : vector<10x10x24xbf16> to vector<1x8x24xbf16>
    %114 = vector.shape_cast %113 : vector<1x8x24xbf16> to vector<8x24xbf16>
    %115 = vector.extract_strided_slice %5 {offsets = [7, 1, 0], sizes = [1, 8, 24], strides = [1, 1, 1]} : vector<10x10x24xbf16> to vector<1x8x24xbf16>
    %116 = vector.shape_cast %115 : vector<1x8x24xbf16> to vector<8x24xbf16>
    %117 = vector.extract_strided_slice %5 {offsets = [7, 2, 0], sizes = [1, 8, 24], strides = [1, 1, 1]} : vector<10x10x24xbf16> to vector<1x8x24xbf16>
    %118 = vector.shape_cast %117 : vector<1x8x24xbf16> to vector<8x24xbf16>
    %119 = tpu.concatenate %102, %104, %106, %108, %110, %112, %114, %116, %118 in 1 : vector<8x24xbf16>, vector<8x24xbf16>, vector<8x24xbf16>, vector<8x24xbf16>, vector<8x24xbf16>, vector<8x24xbf16>, vector<8x24xbf16>, vector<8x24xbf16>, vector<8x24xbf16> -> vector<8x216xbf16>
    %120 = vector.extract_strided_slice %5 {offsets = [6, 0, 0], sizes = [1, 8, 24], strides = [1, 1, 1]} : vector<10x10x24xbf16> to vector<1x8x24xbf16>
    %121 = vector.shape_cast %120 : vector<1x8x24xbf16> to vector<8x24xbf16>
    %122 = vector.extract_strided_slice %5 {offsets = [6, 1, 0], sizes = [1, 8, 24], strides = [1, 1, 1]} : vector<10x10x24xbf16> to vector<1x8x24xbf16>
    %123 = vector.shape_cast %122 : vector<1x8x24xbf16> to vector<8x24xbf16>
    %124 = vector.extract_strided_slice %5 {offsets = [6, 2, 0], sizes = [1, 8, 24], strides = [1, 1, 1]} : vector<10x10x24xbf16> to vector<1x8x24xbf16>
    %125 = vector.shape_cast %124 : vector<1x8x24xbf16> to vector<8x24xbf16>
    %126 = vector.extract_strided_slice %5 {offsets = [7, 0, 0], sizes = [1, 8, 24], strides = [1, 1, 1]} : vector<10x10x24xbf16> to vector<1x8x24xbf16>
    %127 = vector.shape_cast %126 : vector<1x8x24xbf16> to vector<8x24xbf16>
    %128 = vector.extract_strided_slice %5 {offsets = [7, 1, 0], sizes = [1, 8, 24], strides = [1, 1, 1]} : vector<10x10x24xbf16> to vector<1x8x24xbf16>
    %129 = vector.shape_cast %128 : vector<1x8x24xbf16> to vector<8x24xbf16>
    %130 = vector.extract_strided_slice %5 {offsets = [7, 2, 0], sizes = [1, 8, 24], strides = [1, 1, 1]} : vector<10x10x24xbf16> to vector<1x8x24xbf16>
    %131 = vector.shape_cast %130 : vector<1x8x24xbf16> to vector<8x24xbf16>
    %132 = vector.extract_strided_slice %5 {offsets = [8, 0, 0], sizes = [1, 8, 24], strides = [1, 1, 1]} : vector<10x10x24xbf16> to vector<1x8x24xbf16>
    %133 = vector.shape_cast %132 : vector<1x8x24xbf16> to vector<8x24xbf16>
    %134 = vector.extract_strided_slice %5 {offsets = [8, 1, 0], sizes = [1, 8, 24], strides = [1, 1, 1]} : vector<10x10x24xbf16> to vector<1x8x24xbf16>
    %135 = vector.shape_cast %134 : vector<1x8x24xbf16> to vector<8x24xbf16>
    %136 = vector.extract_strided_slice %5 {offsets = [8, 2, 0], sizes = [1, 8, 24], strides = [1, 1, 1]} : vector<10x10x24xbf16> to vector<1x8x24xbf16>
    %137 = vector.shape_cast %136 : vector<1x8x24xbf16> to vector<8x24xbf16>
    %138 = tpu.concatenate %121, %123, %125, %127, %129, %131, %133, %135, %137 in 1 : vector<8x24xbf16>, vector<8x24xbf16>, vector<8x24xbf16>, vector<8x24xbf16>, vector<8x24xbf16>, vector<8x24xbf16>, vector<8x24xbf16>, vector<8x24xbf16>, vector<8x24xbf16> -> vector<8x216xbf16>
    %139 = vector.extract_strided_slice %5 {offsets = [7, 0, 0], sizes = [1, 8, 24], strides = [1, 1, 1]} : vector<10x10x24xbf16> to vector<1x8x24xbf16>
    %140 = vector.shape_cast %139 : vector<1x8x24xbf16> to vector<8x24xbf16>
    %141 = vector.extract_strided_slice %5 {offsets = [7, 1, 0], sizes = [1, 8, 24], strides = [1, 1, 1]} : vector<10x10x24xbf16> to vector<1x8x24xbf16>
    %142 = vector.shape_cast %141 : vector<1x8x24xbf16> to vector<8x24xbf16>
    %143 = vector.extract_strided_slice %5 {offsets = [7, 2, 0], sizes = [1, 8, 24], strides = [1, 1, 1]} : vector<10x10x24xbf16> to vector<1x8x24xbf16>
    %144 = vector.shape_cast %143 : vector<1x8x24xbf16> to vector<8x24xbf16>
    %145 = vector.extract_strided_slice %5 {offsets = [8, 0, 0], sizes = [1, 8, 24], strides = [1, 1, 1]} : vector<10x10x24xbf16> to vector<1x8x24xbf16>
    %146 = vector.shape_cast %145 : vector<1x8x24xbf16> to vector<8x24xbf16>
    %147 = vector.extract_strided_slice %5 {offsets = [8, 1, 0], sizes = [1, 8, 24], strides = [1, 1, 1]} : vector<10x10x24xbf16> to vector<1x8x24xbf16>
    %148 = vector.shape_cast %147 : vector<1x8x24xbf16> to vector<8x24xbf16>
    %149 = vector.extract_strided_slice %5 {offsets = [8, 2, 0], sizes = [1, 8, 24], strides = [1, 1, 1]} : vector<10x10x24xbf16> to vector<1x8x24xbf16>
    %150 = vector.shape_cast %149 : vector<1x8x24xbf16> to vector<8x24xbf16>
    %151 = vector.extract_strided_slice %5 {offsets = [9, 0, 0], sizes = [1, 8, 24], strides = [1, 1, 1]} : vector<10x10x24xbf16> to vector<1x8x24xbf16>
    %152 = vector.shape_cast %151 : vector<1x8x24xbf16> to vector<8x24xbf16>
    %153 = vector.extract_strided_slice %5 {offsets = [9, 1, 0], sizes = [1, 8, 24], strides = [1, 1, 1]} : vector<10x10x24xbf16> to vector<1x8x24xbf16>
    %154 = vector.shape_cast %153 : vector<1x8x24xbf16> to vector<8x24xbf16>
    %155 = vector.extract_strided_slice %5 {offsets = [9, 2, 0], sizes = [1, 8, 24], strides = [1, 1, 1]} : vector<10x10x24xbf16> to vector<1x8x24xbf16>
    %156 = vector.shape_cast %155 : vector<1x8x24xbf16> to vector<8x24xbf16>
    %157 = tpu.concatenate %140, %142, %144, %146, %148, %150, %152, %154, %156 in 1 : vector<8x24xbf16>, vector<8x24xbf16>, vector<8x24xbf16>, vector<8x24xbf16>, vector<8x24xbf16>, vector<8x24xbf16>, vector<8x24xbf16>, vector<8x24xbf16>, vector<8x24xbf16> -> vector<8x216xbf16>
    %158 = tpu.concatenate %24, %43, %62, %81, %100, %119, %138, %157 in 0 : vector<8x216xbf16>, vector<8x216xbf16>, vector<8x216xbf16>, vector<8x216xbf16>, vector<8x216xbf16>, vector<8x216xbf16>, vector<8x216xbf16>, vector<8x216xbf16> -> vector<64x216xbf16>
    %cst = arith.constant dense<0.000000e+00> : vector<64x24xf32>
    %159 = tpu.matmul %158, %2, %cst {dimension_numbers = #tpu.dot_dimension_numbers<[1], [0], [0], [1], [0, 0, 1, 1], [], []>} : vector<64x216xbf16>, vector<216x24xbf16>, vector<64x24xf32> -> vector<64x24xf32>
    %c0_4 = arith.constant 0 : index
    %c0_5 = arith.constant 0 : index
    %160 = vector.load %arg4[%c0_4, %c0_5] : memref<64x24xf32, #tpu.memory_space<vmem>>, vector<64x24xf32>
    tpu.vector_store %arg4[%c0_4, %c0_5], %159 {strides = array<i32>} : memref<64x24xf32, #tpu.memory_space<vmem>>, vector<64x24xf32>,
    %cst_6 = arith.constant dense<0.000000e+00> : vector<24xf32>
    %161 = vector.multi_reduction <add>, %159, %cst_6 [0] : vector<64x24xf32> to vector<24xf32>
    %162 = vector.shape_cast %161 : vector<24xf32> to vector<1x24xf32>
    %163 = arith.mulf %159, %159 : vector<64x24xf32>
    %cst_7 = arith.constant dense<0.000000e+00> : vector<24xf32>
    %164 = vector.multi_reduction <add>, %163, %cst_7 [0] : vector<64x24xf32> to vector<24xf32>
    %165 = vector.shape_cast %164 : vector<24xf32> to vector<1x24xf32>
    %cst_8 = arith.constant 0.000000e+00 : f32
    %166 = vector.broadcast %cst_8 : f32 to vector<6x24xf32>
    %167 = tpu.concatenate %162, %165, %166 in 0 : vector<1x24xf32>, vector<1x24xf32>, vector<6x24xf32> -> vector<8x24xf32>
    %c0_9 = arith.constant 0 : index
    %c0_10 = arith.constant 0 : index
    %c0_11 = arith.constant 0 : index
    %168 = vector.load %arg5[%c0_9, %c0_10, %c0_11] : memref<1x8x24xf32, #tpu.memory_space<vmem>>, vector<1x8x24xf32>
    %169 = vector.shape_cast %168 : vector<1x8x24xf32> to vector<8x24xf32>
    %170 = vector.shape_cast %167 : vector<8x24xf32> to vector<1x8x24xf32>
    tpu.vector_store %arg5[%c0_9, %c0_10, %c0_11], %170 {strides = array<i32>} : memref<1x8x24xf32, #tpu.memory_space<vmem>>, vector<1x8x24xf32>,
    return
  }
  func.func @transform_0(%arg0: i32, %arg1: i32) -> (i32, i32, i32, i32) {
    %c0_i32 = arith.constant 0 : i32
    %c0_i32_0 = arith.constant 0 : i32
    %c0_i32_1 = arith.constant 0 : i32
    %c0_i32_2 = arith.constant 0 : i32
    return %arg0, %c0_i32, %c0_i32_0, %c0_i32_1 : i32, i32, i32, i32
  }
  func.func @transform_1(%arg0: i32, %arg1: i32) -> (i32, i32) {
    %c0_i32 = arith.constant 0 : i32
    %c0_i32_0 = arith.constant 0 : i32
    %c0_i32_1 = arith.constant 0 : i32
    return %c0_i32, %c0_i32_0 : i32, i32
  }
  func.func @transform_2(%arg0: i32, %arg1: i32) -> (i32, i32) {
    %c1_i32 = arith.constant 1 : i32
    %0 = arith.muli %arg0, %c1_i32 : i32
    %1 = arith.addi %0, %arg1 : i32
    %c0_i32 = arith.constant 0 : i32
    %c0_i32_0 = arith.constant 0 : i32
    return %1, %c0_i32 : i32, i32
  }
  func.func @transform_3(%arg0: i32, %arg1: i32) -> (i32, i32, i32) {
    %c1_i32 = arith.constant 1 : i32
    %0 = arith.muli %arg0, %c1_i32 : i32
    %1 = arith.addi %0, %arg1 : i32
    %c0_i32 = arith.constant 0 : i32
    %c0_i32_0 = arith.constant 0 : i32
    %c0_i32_1 = arith.constant 0 : i32
    return %1, %c0_i32, %c0_i32_0 : i32, i32, i32
  }
}

module attributes {stable_mosaic.version = 11 : i64} {
  func.func @_bn_relu_kernel(%arg0: i32, %arg1: memref<8x384xf32, #tpu.memory_space<vmem>>, %arg2: memref<1x384xf32, #tpu.memory_space<vmem>>, %arg3: memref<1x384xf32, #tpu.memory_space<vmem>>, %arg4: memref<8x384xf32, #tpu.memory_space<vmem>>) attributes {dimension_semantics = [#tpu.dimension_semantics<parallel>], iteration_bounds = array<i64: 1>, scalar_prefetch = 0 : i64, scratch_operands = 0 : i64, tpu.core_type = #tpu.core_type<tc>, window_params = [{transform_indices = @transform_0, window_bounds = array<i64: 8, 384>}, {pipeline_mode = #tpu.pipeline_mode<synchronous>, transform_indices = @transform_1, window_bounds = array<i64: 1, 384>}, {pipeline_mode = #tpu.pipeline_mode<synchronous>, transform_indices = @transform_2, window_bounds = array<i64: 1, 384>}, {transform_indices = @transform_3, window_bounds = array<i64: 8, 384>}]} {
    %c0 = arith.constant 0 : index
    %c0_0 = arith.constant 0 : index
    %0 = vector.load %arg1[%c0, %c0_0] : memref<8x384xf32, #tpu.memory_space<vmem>>, vector<8x384xf32>
    %c0_1 = arith.constant 0 : index
    %c0_2 = arith.constant 0 : index
    %1 = vector.load %arg2[%c0_1, %c0_2] : memref<1x384xf32, #tpu.memory_space<vmem>>, vector<1x384xf32>
    %2 = vector.broadcast %1 : vector<1x384xf32> to vector<8x384xf32>
    %3 = arith.mulf %0, %2 : vector<8x384xf32>
    %c0_3 = arith.constant 0 : index
    %c0_4 = arith.constant 0 : index
    %4 = vector.load %arg3[%c0_3, %c0_4] : memref<1x384xf32, #tpu.memory_space<vmem>>, vector<1x384xf32>
    %5 = vector.broadcast %4 : vector<1x384xf32> to vector<8x384xf32>
    %6 = arith.addf %3, %5 : vector<8x384xf32>
    %cst = arith.constant 0.000000e+00 : f32
    %7 = vector.broadcast %cst : f32 to vector<8x384xf32>
    %8 = arith.maximumf %6, %7 : vector<8x384xf32>
    %c0_5 = arith.constant 0 : index
    %c0_6 = arith.constant 0 : index
    %9 = vector.load %arg4[%c0_5, %c0_6] : memref<8x384xf32, #tpu.memory_space<vmem>>, vector<8x384xf32>
    tpu.vector_store %arg4[%c0_5, %c0_6], %8 {strides = array<i32>} : memref<8x384xf32, #tpu.memory_space<vmem>>, vector<8x384xf32>,
    return
  }
  func.func @transform_0(%arg0: i32) -> (i32, i32) {
    %c0_i32 = arith.constant 0 : i32
    %c0_i32_0 = arith.constant 0 : i32
    return %arg0, %c0_i32 : i32, i32
  }
  func.func @transform_1(%arg0: i32) -> (i32, i32) {
    %c0_i32 = arith.constant 0 : i32
    %c0_i32_0 = arith.constant 0 : i32
    %c0_i32_1 = arith.constant 0 : i32
    return %c0_i32, %c0_i32_0 : i32, i32
  }
  func.func @transform_2(%arg0: i32) -> (i32, i32) {
    %c0_i32 = arith.constant 0 : i32
    %c0_i32_0 = arith.constant 0 : i32
    %c0_i32_1 = arith.constant 0 : i32
    return %c0_i32, %c0_i32_0 : i32, i32
  }
  func.func @transform_3(%arg0: i32) -> (i32, i32) {
    %c0_i32 = arith.constant 0 : i32
    %c0_i32_0 = arith.constant 0 : i32
    return %arg0, %c0_i32 : i32, i32
  }
}

module attributes {stable_mosaic.version = 11 : i64} {
  func.func @_conv3x3_stats_kernel(%arg0: i32, %arg1: i32, %arg2: memref<1x18x18x48xbf16, #tpu.memory_space<vmem>>, %arg3: memref<432x24xbf16, #tpu.memory_space<vmem>>, %arg4: memref<256x24xf32, #tpu.memory_space<vmem>>, %arg5: memref<1x8x24xf32, #tpu.memory_space<vmem>>) attributes {dimension_semantics = [#tpu.dimension_semantics<parallel>, #tpu.dimension_semantics<parallel>], iteration_bounds = array<i64: 2, 1>, scalar_prefetch = 0 : i64, scratch_operands = 0 : i64, tpu.core_type = #tpu.core_type<tc>, window_params = [{transform_indices = @transform_0, window_bounds = array<i64: 1, 18, 18, 48>}, {pipeline_mode = #tpu.pipeline_mode<synchronous>, transform_indices = @transform_1, window_bounds = array<i64: 432, 24>}, {transform_indices = @transform_2, window_bounds = array<i64: 256, 24>}, {transform_indices = @transform_3, window_bounds = array<i64: 1, 8, 24>}]} {
    %c16_i32 = arith.constant 16 : i32
    %0 = arith.muli %arg1, %c16_i32 : i32
    %1 = tpu.assume_multiple %0, 16 : i32
    %c0 = arith.constant 0 : index
    %c0_0 = arith.constant 0 : index
    %2 = vector.load %arg3[%c0, %c0_0] : memref<432x24xbf16, #tpu.memory_space<vmem>>, vector<432x24xbf16>
    %c0_1 = arith.constant 0 : index
    %3 = arith.index_cast %1 : i32 to index
    %c0_2 = arith.constant 0 : index
    %c0_3 = arith.constant 0 : index
    %4 = vector.load %arg2[%c0_1, %3, %c0_2, %c0_3] : memref<1x18x18x48xbf16, #tpu.memory_space<vmem>>, vector<1x18x18x48xbf16>
    %5 = vector.shape_cast %4 : vector<1x18x18x48xbf16> to vector<18x18x48xbf16>
    %6 = vector.extract_strided_slice %5 {offsets = [0, 0, 0], sizes = [1, 16, 48], strides = [1, 1, 1]} : vector<18x18x48xbf16> to vector<1x16x48xbf16>
    %7 = vector.shape_cast %6 : vector<1x16x48xbf16> to vector<16x48xbf16>
    %8 = vector.extract_strided_slice %5 {offsets = [0, 1, 0], sizes = [1, 16, 48], strides = [1, 1, 1]} : vector<18x18x48xbf16> to vector<1x16x48xbf16>
    %9 = vector.shape_cast %8 : vector<1x16x48xbf16> to vector<16x48xbf16>
    %10 = vector.extract_strided_slice %5 {offsets = [0, 2, 0], sizes = [1, 16, 48], strides = [1, 1, 1]} : vector<18x18x48xbf16> to vector<1x16x48xbf16>
    %11 = vector.shape_cast %10 : vector<1x16x48xbf16> to vector<16x48xbf16>
    %12 = vector.extract_strided_slice %5 {offsets = [1, 0, 0], sizes = [1, 16, 48], strides = [1, 1, 1]} : vector<18x18x48xbf16> to vector<1x16x48xbf16>
    %13 = vector.shape_cast %12 : vector<1x16x48xbf16> to vector<16x48xbf16>
    %14 = vector.extract_strided_slice %5 {offsets = [1, 1, 0], sizes = [1, 16, 48], strides = [1, 1, 1]} : vector<18x18x48xbf16> to vector<1x16x48xbf16>
    %15 = vector.shape_cast %14 : vector<1x16x48xbf16> to vector<16x48xbf16>
    %16 = vector.extract_strided_slice %5 {offsets = [1, 2, 0], sizes = [1, 16, 48], strides = [1, 1, 1]} : vector<18x18x48xbf16> to vector<1x16x48xbf16>
    %17 = vector.shape_cast %16 : vector<1x16x48xbf16> to vector<16x48xbf16>
    %18 = vector.extract_strided_slice %5 {offsets = [2, 0, 0], sizes = [1, 16, 48], strides = [1, 1, 1]} : vector<18x18x48xbf16> to vector<1x16x48xbf16>
    %19 = vector.shape_cast %18 : vector<1x16x48xbf16> to vector<16x48xbf16>
    %20 = vector.extract_strided_slice %5 {offsets = [2, 1, 0], sizes = [1, 16, 48], strides = [1, 1, 1]} : vector<18x18x48xbf16> to vector<1x16x48xbf16>
    %21 = vector.shape_cast %20 : vector<1x16x48xbf16> to vector<16x48xbf16>
    %22 = vector.extract_strided_slice %5 {offsets = [2, 2, 0], sizes = [1, 16, 48], strides = [1, 1, 1]} : vector<18x18x48xbf16> to vector<1x16x48xbf16>
    %23 = vector.shape_cast %22 : vector<1x16x48xbf16> to vector<16x48xbf16>
    %24 = tpu.concatenate %7, %9, %11, %13, %15, %17, %19, %21, %23 in 1 : vector<16x48xbf16>, vector<16x48xbf16>, vector<16x48xbf16>, vector<16x48xbf16>, vector<16x48xbf16>, vector<16x48xbf16>, vector<16x48xbf16>, vector<16x48xbf16>, vector<16x48xbf16> -> vector<16x432xbf16>
    %25 = vector.extract_strided_slice %5 {offsets = [1, 0, 0], sizes = [1, 16, 48], strides = [1, 1, 1]} : vector<18x18x48xbf16> to vector<1x16x48xbf16>
    %26 = vector.shape_cast %25 : vector<1x16x48xbf16> to vector<16x48xbf16>
    %27 = vector.extract_strided_slice %5 {offsets = [1, 1, 0], sizes = [1, 16, 48], strides = [1, 1, 1]} : vector<18x18x48xbf16> to vector<1x16x48xbf16>
    %28 = vector.shape_cast %27 : vector<1x16x48xbf16> to vector<16x48xbf16>
    %29 = vector.extract_strided_slice %5 {offsets = [1, 2, 0], sizes = [1, 16, 48], strides = [1, 1, 1]} : vector<18x18x48xbf16> to vector<1x16x48xbf16>
    %30 = vector.shape_cast %29 : vector<1x16x48xbf16> to vector<16x48xbf16>
    %31 = vector.extract_strided_slice %5 {offsets = [2, 0, 0], sizes = [1, 16, 48], strides = [1, 1, 1]} : vector<18x18x48xbf16> to vector<1x16x48xbf16>
    %32 = vector.shape_cast %31 : vector<1x16x48xbf16> to vector<16x48xbf16>
    %33 = vector.extract_strided_slice %5 {offsets = [2, 1, 0], sizes = [1, 16, 48], strides = [1, 1, 1]} : vector<18x18x48xbf16> to vector<1x16x48xbf16>
    %34 = vector.shape_cast %33 : vector<1x16x48xbf16> to vector<16x48xbf16>
    %35 = vector.extract_strided_slice %5 {offsets = [2, 2, 0], sizes = [1, 16, 48], strides = [1, 1, 1]} : vector<18x18x48xbf16> to vector<1x16x48xbf16>
    %36 = vector.shape_cast %35 : vector<1x16x48xbf16> to vector<16x48xbf16>
    %37 = vector.extract_strided_slice %5 {offsets = [3, 0, 0], sizes = [1, 16, 48], strides = [1, 1, 1]} : vector<18x18x48xbf16> to vector<1x16x48xbf16>
    %38 = vector.shape_cast %37 : vector<1x16x48xbf16> to vector<16x48xbf16>
    %39 = vector.extract_strided_slice %5 {offsets = [3, 1, 0], sizes = [1, 16, 48], strides = [1, 1, 1]} : vector<18x18x48xbf16> to vector<1x16x48xbf16>
    %40 = vector.shape_cast %39 : vector<1x16x48xbf16> to vector<16x48xbf16>
    %41 = vector.extract_strided_slice %5 {offsets = [3, 2, 0], sizes = [1, 16, 48], strides = [1, 1, 1]} : vector<18x18x48xbf16> to vector<1x16x48xbf16>
    %42 = vector.shape_cast %41 : vector<1x16x48xbf16> to vector<16x48xbf16>
    %43 = tpu.concatenate %26, %28, %30, %32, %34, %36, %38, %40, %42 in 1 : vector<16x48xbf16>, vector<16x48xbf16>, vector<16x48xbf16>, vector<16x48xbf16>, vector<16x48xbf16>, vector<16x48xbf16>, vector<16x48xbf16>, vector<16x48xbf16>, vector<16x48xbf16> -> vector<16x432xbf16>
    %44 = vector.extract_strided_slice %5 {offsets = [2, 0, 0], sizes = [1, 16, 48], strides = [1, 1, 1]} : vector<18x18x48xbf16> to vector<1x16x48xbf16>
    %45 = vector.shape_cast %44 : vector<1x16x48xbf16> to vector<16x48xbf16>
    %46 = vector.extract_strided_slice %5 {offsets = [2, 1, 0], sizes = [1, 16, 48], strides = [1, 1, 1]} : vector<18x18x48xbf16> to vector<1x16x48xbf16>
    %47 = vector.shape_cast %46 : vector<1x16x48xbf16> to vector<16x48xbf16>
    %48 = vector.extract_strided_slice %5 {offsets = [2, 2, 0], sizes = [1, 16, 48], strides = [1, 1, 1]} : vector<18x18x48xbf16> to vector<1x16x48xbf16>
    %49 = vector.shape_cast %48 : vector<1x16x48xbf16> to vector<16x48xbf16>
    %50 = vector.extract_strided_slice %5 {offsets = [3, 0, 0], sizes = [1, 16, 48], strides = [1, 1, 1]} : vector<18x18x48xbf16> to vector<1x16x48xbf16>
    %51 = vector.shape_cast %50 : vector<1x16x48xbf16> to vector<16x48xbf16>
    %52 = vector.extract_strided_slice %5 {offsets = [3, 1, 0], sizes = [1, 16, 48], strides = [1, 1, 1]} : vector<18x18x48xbf16> to vector<1x16x48xbf16>
    %53 = vector.shape_cast %52 : vector<1x16x48xbf16> to vector<16x48xbf16>
    %54 = vector.extract_strided_slice %5 {offsets = [3, 2, 0], sizes = [1, 16, 48], strides = [1, 1, 1]} : vector<18x18x48xbf16> to vector<1x16x48xbf16>
    %55 = vector.shape_cast %54 : vector<1x16x48xbf16> to vector<16x48xbf16>
    %56 = vector.extract_strided_slice %5 {offsets = [4, 0, 0], sizes = [1, 16, 48], strides = [1, 1, 1]} : vector<18x18x48xbf16> to vector<1x16x48xbf16>
    %57 = vector.shape_cast %56 : vector<1x16x48xbf16> to vector<16x48xbf16>
    %58 = vector.extract_strided_slice %5 {offsets = [4, 1, 0], sizes = [1, 16, 48], strides = [1, 1, 1]} : vector<18x18x48xbf16> to vector<1x16x48xbf16>
    %59 = vector.shape_cast %58 : vector<1x16x48xbf16> to vector<16x48xbf16>
    %60 = vector.extract_strided_slice %5 {offsets = [4, 2, 0], sizes = [1, 16, 48], strides = [1, 1, 1]} : vector<18x18x48xbf16> to vector<1x16x48xbf16>
    %61 = vector.shape_cast %60 : vector<1x16x48xbf16> to vector<16x48xbf16>
    %62 = tpu.concatenate %45, %47, %49, %51, %53, %55, %57, %59, %61 in 1 : vector<16x48xbf16>, vector<16x48xbf16>, vector<16x48xbf16>, vector<16x48xbf16>, vector<16x48xbf16>, vector<16x48xbf16>, vector<16x48xbf16>, vector<16x48xbf16>, vector<16x48xbf16> -> vector<16x432xbf16>
    %63 = vector.extract_strided_slice %5 {offsets = [3, 0, 0], sizes = [1, 16, 48], strides = [1, 1, 1]} : vector<18x18x48xbf16> to vector<1x16x48xbf16>
    %64 = vector.shape_cast %63 : vector<1x16x48xbf16> to vector<16x48xbf16>
    %65 = vector.extract_strided_slice %5 {offsets = [3, 1, 0], sizes = [1, 16, 48], strides = [1, 1, 1]} : vector<18x18x48xbf16> to vector<1x16x48xbf16>
    %66 = vector.shape_cast %65 : vector<1x16x48xbf16> to vector<16x48xbf16>
    %67 = vector.extract_strided_slice %5 {offsets = [3, 2, 0], sizes = [1, 16, 48], strides = [1, 1, 1]} : vector<18x18x48xbf16> to vector<1x16x48xbf16>
    %68 = vector.shape_cast %67 : vector<1x16x48xbf16> to vector<16x48xbf16>
    %69 = vector.extract_strided_slice %5 {offsets = [4, 0, 0], sizes = [1, 16, 48], strides = [1, 1, 1]} : vector<18x18x48xbf16> to vector<1x16x48xbf16>
    %70 = vector.shape_cast %69 : vector<1x16x48xbf16> to vector<16x48xbf16>
    %71 = vector.extract_strided_slice %5 {offsets = [4, 1, 0], sizes = [1, 16, 48], strides = [1, 1, 1]} : vector<18x18x48xbf16> to vector<1x16x48xbf16>
    %72 = vector.shape_cast %71 : vector<1x16x48xbf16> to vector<16x48xbf16>
    %73 = vector.extract_strided_slice %5 {offsets = [4, 2, 0], sizes = [1, 16, 48], strides = [1, 1, 1]} : vector<18x18x48xbf16> to vector<1x16x48xbf16>
    %74 = vector.shape_cast %73 : vector<1x16x48xbf16> to vector<16x48xbf16>
    %75 = vector.extract_strided_slice %5 {offsets = [5, 0, 0], sizes = [1, 16, 48], strides = [1, 1, 1]} : vector<18x18x48xbf16> to vector<1x16x48xbf16>
    %76 = vector.shape_cast %75 : vector<1x16x48xbf16> to vector<16x48xbf16>
    %77 = vector.extract_strided_slice %5 {offsets = [5, 1, 0], sizes = [1, 16, 48], strides = [1, 1, 1]} : vector<18x18x48xbf16> to vector<1x16x48xbf16>
    %78 = vector.shape_cast %77 : vector<1x16x48xbf16> to vector<16x48xbf16>
    %79 = vector.extract_strided_slice %5 {offsets = [5, 2, 0], sizes = [1, 16, 48], strides = [1, 1, 1]} : vector<18x18x48xbf16> to vector<1x16x48xbf16>
    %80 = vector.shape_cast %79 : vector<1x16x48xbf16> to vector<16x48xbf16>
    %81 = tpu.concatenate %64, %66, %68, %70, %72, %74, %76, %78, %80 in 1 : vector<16x48xbf16>, vector<16x48xbf16>, vector<16x48xbf16>, vector<16x48xbf16>, vector<16x48xbf16>, vector<16x48xbf16>, vector<16x48xbf16>, vector<16x48xbf16>, vector<16x48xbf16> -> vector<16x432xbf16>
    %82 = vector.extract_strided_slice %5 {offsets = [4, 0, 0], sizes = [1, 16, 48], strides = [1, 1, 1]} : vector<18x18x48xbf16> to vector<1x16x48xbf16>
    %83 = vector.shape_cast %82 : vector<1x16x48xbf16> to vector<16x48xbf16>
    %84 = vector.extract_strided_slice %5 {offsets = [4, 1, 0], sizes = [1, 16, 48], strides = [1, 1, 1]} : vector<18x18x48xbf16> to vector<1x16x48xbf16>
    %85 = vector.shape_cast %84 : vector<1x16x48xbf16> to vector<16x48xbf16>
    %86 = vector.extract_strided_slice %5 {offsets = [4, 2, 0], sizes = [1, 16, 48], strides = [1, 1, 1]} : vector<18x18x48xbf16> to vector<1x16x48xbf16>
    %87 = vector.shape_cast %86 : vector<1x16x48xbf16> to vector<16x48xbf16>
    %88 = vector.extract_strided_slice %5 {offsets = [5, 0, 0], sizes = [1, 16, 48], strides = [1, 1, 1]} : vector<18x18x48xbf16> to vector<1x16x48xbf16>
    %89 = vector.shape_cast %88 : vector<1x16x48xbf16> to vector<16x48xbf16>
    %90 = vector.extract_strided_slice %5 {offsets = [5, 1, 0], sizes = [1, 16, 48], strides = [1, 1, 1]} : vector<18x18x48xbf16> to vector<1x16x48xbf16>
    %91 = vector.shape_cast %90 : vector<1x16x48xbf16> to vector<16x48xbf16>
    %92 = vector.extract_strided_slice %5 {offsets = [5, 2, 0], sizes = [1, 16, 48], strides = [1, 1, 1]} : vector<18x18x48xbf16> to vector<1x16x48xbf16>
    %93 = vector.shape_cast %92 : vector<1x16x48xbf16> to vector<16x48xbf16>
    %94 = vector.extract_strided_slice %5 {offsets = [6, 0, 0], sizes = [1, 16, 48], strides = [1, 1, 1]} : vector<18x18x48xbf16> to vector<1x16x48xbf16>
    %95 = vector.shape_cast %94 : vector<1x16x48xbf16> to vector<16x48xbf16>
    %96 = vector.extract_strided_slice %5 {offsets = [6, 1, 0], sizes = [1, 16, 48], strides = [1, 1, 1]} : vector<18x18x48xbf16> to vector<1x16x48xbf16>
    %97 = vector.shape_cast %96 : vector<1x16x48xbf16> to vector<16x48xbf16>
    %98 = vector.extract_strided_slice %5 {offsets = [6, 2, 0], sizes = [1, 16, 48], strides = [1, 1, 1]} : vector<18x18x48xbf16> to vector<1x16x48xbf16>
    %99 = vector.shape_cast %98 : vector<1x16x48xbf16> to vector<16x48xbf16>
    %100 = tpu.concatenate %83, %85, %87, %89, %91, %93, %95, %97, %99 in 1 : vector<16x48xbf16>, vector<16x48xbf16>, vector<16x48xbf16>, vector<16x48xbf16>, vector<16x48xbf16>, vector<16x48xbf16>, vector<16x48xbf16>, vector<16x48xbf16>, vector<16x48xbf16> -> vector<16x432xbf16>
    %101 = vector.extract_strided_slice %5 {offsets = [5, 0, 0], sizes = [1, 16, 48], strides = [1, 1, 1]} : vector<18x18x48xbf16> to vector<1x16x48xbf16>
    %102 = vector.shape_cast %101 : vector<1x16x48xbf16> to vector<16x48xbf16>
    %103 = vector.extract_strided_slice %5 {offsets = [5, 1, 0], sizes = [1, 16, 48], strides = [1, 1, 1]} : vector<18x18x48xbf16> to vector<1x16x48xbf16>
    %104 = vector.shape_cast %103 : vector<1x16x48xbf16> to vector<16x48xbf16>
    %105 = vector.extract_strided_slice %5 {offsets = [5, 2, 0], sizes = [1, 16, 48], strides = [1, 1, 1]} : vector<18x18x48xbf16> to vector<1x16x48xbf16>
    %106 = vector.shape_cast %105 : vector<1x16x48xbf16> to vector<16x48xbf16>
    %107 = vector.extract_strided_slice %5 {offsets = [6, 0, 0], sizes = [1, 16, 48], strides = [1, 1, 1]} : vector<18x18x48xbf16> to vector<1x16x48xbf16>
    %108 = vector.shape_cast %107 : vector<1x16x48xbf16> to vector<16x48xbf16>
    %109 = vector.extract_strided_slice %5 {offsets = [6, 1, 0], sizes = [1, 16, 48], strides = [1, 1, 1]} : vector<18x18x48xbf16> to vector<1x16x48xbf16>
    %110 = vector.shape_cast %109 : vector<1x16x48xbf16> to vector<16x48xbf16>
    %111 = vector.extract_strided_slice %5 {offsets = [6, 2, 0], sizes = [1, 16, 48], strides = [1, 1, 1]} : vector<18x18x48xbf16> to vector<1x16x48xbf16>
    %112 = vector.shape_cast %111 : vector<1x16x48xbf16> to vector<16x48xbf16>
    %113 = vector.extract_strided_slice %5 {offsets = [7, 0, 0], sizes = [1, 16, 48], strides = [1, 1, 1]} : vector<18x18x48xbf16> to vector<1x16x48xbf16>
    %114 = vector.shape_cast %113 : vector<1x16x48xbf16> to vector<16x48xbf16>
    %115 = vector.extract_strided_slice %5 {offsets = [7, 1, 0], sizes = [1, 16, 48], strides = [1, 1, 1]} : vector<18x18x48xbf16> to vector<1x16x48xbf16>
    %116 = vector.shape_cast %115 : vector<1x16x48xbf16> to vector<16x48xbf16>
    %117 = vector.extract_strided_slice %5 {offsets = [7, 2, 0], sizes = [1, 16, 48], strides = [1, 1, 1]} : vector<18x18x48xbf16> to vector<1x16x48xbf16>
    %118 = vector.shape_cast %117 : vector<1x16x48xbf16> to vector<16x48xbf16>
    %119 = tpu.concatenate %102, %104, %106, %108, %110, %112, %114, %116, %118 in 1 : vector<16x48xbf16>, vector<16x48xbf16>, vector<16x48xbf16>, vector<16x48xbf16>, vector<16x48xbf16>, vector<16x48xbf16>, vector<16x48xbf16>, vector<16x48xbf16>, vector<16x48xbf16> -> vector<16x432xbf16>
    %120 = vector.extract_strided_slice %5 {offsets = [6, 0, 0], sizes = [1, 16, 48], strides = [1, 1, 1]} : vector<18x18x48xbf16> to vector<1x16x48xbf16>
    %121 = vector.shape_cast %120 : vector<1x16x48xbf16> to vector<16x48xbf16>
    %122 = vector.extract_strided_slice %5 {offsets = [6, 1, 0], sizes = [1, 16, 48], strides = [1, 1, 1]} : vector<18x18x48xbf16> to vector<1x16x48xbf16>
    %123 = vector.shape_cast %122 : vector<1x16x48xbf16> to vector<16x48xbf16>
    %124 = vector.extract_strided_slice %5 {offsets = [6, 2, 0], sizes = [1, 16, 48], strides = [1, 1, 1]} : vector<18x18x48xbf16> to vector<1x16x48xbf16>
    %125 = vector.shape_cast %124 : vector<1x16x48xbf16> to vector<16x48xbf16>
    %126 = vector.extract_strided_slice %5 {offsets = [7, 0, 0], sizes = [1, 16, 48], strides = [1, 1, 1]} : vector<18x18x48xbf16> to vector<1x16x48xbf16>
    %127 = vector.shape_cast %126 : vector<1x16x48xbf16> to vector<16x48xbf16>
    %128 = vector.extract_strided_slice %5 {offsets = [7, 1, 0], sizes = [1, 16, 48], strides = [1, 1, 1]} : vector<18x18x48xbf16> to vector<1x16x48xbf16>
    %129 = vector.shape_cast %128 : vector<1x16x48xbf16> to vector<16x48xbf16>
    %130 = vector.extract_strided_slice %5 {offsets = [7, 2, 0], sizes = [1, 16, 48], strides = [1, 1, 1]} : vector<18x18x48xbf16> to vector<1x16x48xbf16>
    %131 = vector.shape_cast %130 : vector<1x16x48xbf16> to vector<16x48xbf16>
    %132 = vector.extract_strided_slice %5 {offsets = [8, 0, 0], sizes = [1, 16, 48], strides = [1, 1, 1]} : vector<18x18x48xbf16> to vector<1x16x48xbf16>
    %133 = vector.shape_cast %132 : vector<1x16x48xbf16> to vector<16x48xbf16>
    %134 = vector.extract_strided_slice %5 {offsets = [8, 1, 0], sizes = [1, 16, 48], strides = [1, 1, 1]} : vector<18x18x48xbf16> to vector<1x16x48xbf16>
    %135 = vector.shape_cast %134 : vector<1x16x48xbf16> to vector<16x48xbf16>
    %136 = vector.extract_strided_slice %5 {offsets = [8, 2, 0], sizes = [1, 16, 48], strides = [1, 1, 1]} : vector<18x18x48xbf16> to vector<1x16x48xbf16>
    %137 = vector.shape_cast %136 : vector<1x16x48xbf16> to vector<16x48xbf16>
    %138 = tpu.concatenate %121, %123, %125, %127, %129, %131, %133, %135, %137 in 1 : vector<16x48xbf16>, vector<16x48xbf16>, vector<16x48xbf16>, vector<16x48xbf16>, vector<16x48xbf16>, vector<16x48xbf16>, vector<16x48xbf16>, vector<16x48xbf16>, vector<16x48xbf16> -> vector<16x432xbf16>
    %139 = vector.extract_strided_slice %5 {offsets = [7, 0, 0], sizes = [1, 16, 48], strides = [1, 1, 1]} : vector<18x18x48xbf16> to vector<1x16x48xbf16>
    %140 = vector.shape_cast %139 : vector<1x16x48xbf16> to vector<16x48xbf16>
    %141 = vector.extract_strided_slice %5 {offsets = [7, 1, 0], sizes = [1, 16, 48], strides = [1, 1, 1]} : vector<18x18x48xbf16> to vector<1x16x48xbf16>
    %142 = vector.shape_cast %141 : vector<1x16x48xbf16> to vector<16x48xbf16>
    %143 = vector.extract_strided_slice %5 {offsets = [7, 2, 0], sizes = [1, 16, 48], strides = [1, 1, 1]} : vector<18x18x48xbf16> to vector<1x16x48xbf16>
    %144 = vector.shape_cast %143 : vector<1x16x48xbf16> to vector<16x48xbf16>
    %145 = vector.extract_strided_slice %5 {offsets = [8, 0, 0], sizes = [1, 16, 48], strides = [1, 1, 1]} : vector<18x18x48xbf16> to vector<1x16x48xbf16>
    %146 = vector.shape_cast %145 : vector<1x16x48xbf16> to vector<16x48xbf16>
    %147 = vector.extract_strided_slice %5 {offsets = [8, 1, 0], sizes = [1, 16, 48], strides = [1, 1, 1]} : vector<18x18x48xbf16> to vector<1x16x48xbf16>
    %148 = vector.shape_cast %147 : vector<1x16x48xbf16> to vector<16x48xbf16>
    %149 = vector.extract_strided_slice %5 {offsets = [8, 2, 0], sizes = [1, 16, 48], strides = [1, 1, 1]} : vector<18x18x48xbf16> to vector<1x16x48xbf16>
    %150 = vector.shape_cast %149 : vector<1x16x48xbf16> to vector<16x48xbf16>
    %151 = vector.extract_strided_slice %5 {offsets = [9, 0, 0], sizes = [1, 16, 48], strides = [1, 1, 1]} : vector<18x18x48xbf16> to vector<1x16x48xbf16>
    %152 = vector.shape_cast %151 : vector<1x16x48xbf16> to vector<16x48xbf16>
    %153 = vector.extract_strided_slice %5 {offsets = [9, 1, 0], sizes = [1, 16, 48], strides = [1, 1, 1]} : vector<18x18x48xbf16> to vector<1x16x48xbf16>
    %154 = vector.shape_cast %153 : vector<1x16x48xbf16> to vector<16x48xbf16>
    %155 = vector.extract_strided_slice %5 {offsets = [9, 2, 0], sizes = [1, 16, 48], strides = [1, 1, 1]} : vector<18x18x48xbf16> to vector<1x16x48xbf16>
    %156 = vector.shape_cast %155 : vector<1x16x48xbf16> to vector<16x48xbf16>
    %157 = tpu.concatenate %140, %142, %144, %146, %148, %150, %152, %154, %156 in 1 : vector<16x48xbf16>, vector<16x48xbf16>, vector<16x48xbf16>, vector<16x48xbf16>, vector<16x48xbf16>, vector<16x48xbf16>, vector<16x48xbf16>, vector<16x48xbf16>, vector<16x48xbf16> -> vector<16x432xbf16>
    %158 = vector.extract_strided_slice %5 {offsets = [8, 0, 0], sizes = [1, 16, 48], strides = [1, 1, 1]} : vector<18x18x48xbf16> to vector<1x16x48xbf16>
    %159 = vector.shape_cast %158 : vector<1x16x48xbf16> to vector<16x48xbf16>
    %160 = vector.extract_strided_slice %5 {offsets = [8, 1, 0], sizes = [1, 16, 48], strides = [1, 1, 1]} : vector<18x18x48xbf16> to vector<1x16x48xbf16>
    %161 = vector.shape_cast %160 : vector<1x16x48xbf16> to vector<16x48xbf16>
    %162 = vector.extract_strided_slice %5 {offsets = [8, 2, 0], sizes = [1, 16, 48], strides = [1, 1, 1]} : vector<18x18x48xbf16> to vector<1x16x48xbf16>
    %163 = vector.shape_cast %162 : vector<1x16x48xbf16> to vector<16x48xbf16>
    %164 = vector.extract_strided_slice %5 {offsets = [9, 0, 0], sizes = [1, 16, 48], strides = [1, 1, 1]} : vector<18x18x48xbf16> to vector<1x16x48xbf16>
    %165 = vector.shape_cast %164 : vector<1x16x48xbf16> to vector<16x48xbf16>
    %166 = vector.extract_strided_slice %5 {offsets = [9, 1, 0], sizes = [1, 16, 48], strides = [1, 1, 1]} : vector<18x18x48xbf16> to vector<1x16x48xbf16>
    %167 = vector.shape_cast %166 : vector<1x16x48xbf16> to vector<16x48xbf16>
    %168 = vector.extract_strided_slice %5 {offsets = [9, 2, 0], sizes = [1, 16, 48], strides = [1, 1, 1]} : vector<18x18x48xbf16> to vector<1x16x48xbf16>
    %169 = vector.shape_cast %168 : vector<1x16x48xbf16> to vector<16x48xbf16>
    %170 = vector.extract_strided_slice %5 {offsets = [10, 0, 0], sizes = [1, 16, 48], strides = [1, 1, 1]} : vector<18x18x48xbf16> to vector<1x16x48xbf16>
    %171 = vector.shape_cast %170 : vector<1x16x48xbf16> to vector<16x48xbf16>
    %172 = vector.extract_strided_slice %5 {offsets = [10, 1, 0], sizes = [1, 16, 48], strides = [1, 1, 1]} : vector<18x18x48xbf16> to vector<1x16x48xbf16>
    %173 = vector.shape_cast %172 : vector<1x16x48xbf16> to vector<16x48xbf16>
    %174 = vector.extract_strided_slice %5 {offsets = [10, 2, 0], sizes = [1, 16, 48], strides = [1, 1, 1]} : vector<18x18x48xbf16> to vector<1x16x48xbf16>
    %175 = vector.shape_cast %174 : vector<1x16x48xbf16> to vector<16x48xbf16>
    %176 = tpu.concatenate %159, %161, %163, %165, %167, %169, %171, %173, %175 in 1 : vector<16x48xbf16>, vector<16x48xbf16>, vector<16x48xbf16>, vector<16x48xbf16>, vector<16x48xbf16>, vector<16x48xbf16>, vector<16x48xbf16>, vector<16x48xbf16>, vector<16x48xbf16> -> vector<16x432xbf16>
    %177 = vector.extract_strided_slice %5 {offsets = [9, 0, 0], sizes = [1, 16, 48], strides = [1, 1, 1]} : vector<18x18x48xbf16> to vector<1x16x48xbf16>
    %178 = vector.shape_cast %177 : vector<1x16x48xbf16> to vector<16x48xbf16>
    %179 = vector.extract_strided_slice %5 {offsets = [9, 1, 0], sizes = [1, 16, 48], strides = [1, 1, 1]} : vector<18x18x48xbf16> to vector<1x16x48xbf16>
    %180 = vector.shape_cast %179 : vector<1x16x48xbf16> to vector<16x48xbf16>
    %181 = vector.extract_strided_slice %5 {offsets = [9, 2, 0], sizes = [1, 16, 48], strides = [1, 1, 1]} : vector<18x18x48xbf16> to vector<1x16x48xbf16>
    %182 = vector.shape_cast %181 : vector<1x16x48xbf16> to vector<16x48xbf16>
    %183 = vector.extract_strided_slice %5 {offsets = [10, 0, 0], sizes = [1, 16, 48], strides = [1, 1, 1]} : vector<18x18x48xbf16> to vector<1x16x48xbf16>
    %184 = vector.shape_cast %183 : vector<1x16x48xbf16> to vector<16x48xbf16>
    %185 = vector.extract_strided_slice %5 {offsets = [10, 1, 0], sizes = [1, 16, 48], strides = [1, 1, 1]} : vector<18x18x48xbf16> to vector<1x16x48xbf16>
    %186 = vector.shape_cast %185 : vector<1x16x48xbf16> to vector<16x48xbf16>
    %187 = vector.extract_strided_slice %5 {offsets = [10, 2, 0], sizes = [1, 16, 48], strides = [1, 1, 1]} : vector<18x18x48xbf16> to vector<1x16x48xbf16>
    %188 = vector.shape_cast %187 : vector<1x16x48xbf16> to vector<16x48xbf16>
    %189 = vector.extract_strided_slice %5 {offsets = [11, 0, 0], sizes = [1, 16, 48], strides = [1, 1, 1]} : vector<18x18x48xbf16> to vector<1x16x48xbf16>
    %190 = vector.shape_cast %189 : vector<1x16x48xbf16> to vector<16x48xbf16>
    %191 = vector.extract_strided_slice %5 {offsets = [11, 1, 0], sizes = [1, 16, 48], strides = [1, 1, 1]} : vector<18x18x48xbf16> to vector<1x16x48xbf16>
    %192 = vector.shape_cast %191 : vector<1x16x48xbf16> to vector<16x48xbf16>
    %193 = vector.extract_strided_slice %5 {offsets = [11, 2, 0], sizes = [1, 16, 48], strides = [1, 1, 1]} : vector<18x18x48xbf16> to vector<1x16x48xbf16>
    %194 = vector.shape_cast %193 : vector<1x16x48xbf16> to vector<16x48xbf16>
    %195 = tpu.concatenate %178, %180, %182, %184, %186, %188, %190, %192, %194 in 1 : vector<16x48xbf16>, vector<16x48xbf16>, vector<16x48xbf16>, vector<16x48xbf16>, vector<16x48xbf16>, vector<16x48xbf16>, vector<16x48xbf16>, vector<16x48xbf16>, vector<16x48xbf16> -> vector<16x432xbf16>
    %196 = vector.extract_strided_slice %5 {offsets = [10, 0, 0], sizes = [1, 16, 48], strides = [1, 1, 1]} : vector<18x18x48xbf16> to vector<1x16x48xbf16>
    %197 = vector.shape_cast %196 : vector<1x16x48xbf16> to vector<16x48xbf16>
    %198 = vector.extract_strided_slice %5 {offsets = [10, 1, 0], sizes = [1, 16, 48], strides = [1, 1, 1]} : vector<18x18x48xbf16> to vector<1x16x48xbf16>
    %199 = vector.shape_cast %198 : vector<1x16x48xbf16> to vector<16x48xbf16>
    %200 = vector.extract_strided_slice %5 {offsets = [10, 2, 0], sizes = [1, 16, 48], strides = [1, 1, 1]} : vector<18x18x48xbf16> to vector<1x16x48xbf16>
    %201 = vector.shape_cast %200 : vector<1x16x48xbf16> to vector<16x48xbf16>
    %202 = vector.extract_strided_slice %5 {offsets = [11, 0, 0], sizes = [1, 16, 48], strides = [1, 1, 1]} : vector<18x18x48xbf16> to vector<1x16x48xbf16>
    %203 = vector.shape_cast %202 : vector<1x16x48xbf16> to vector<16x48xbf16>
    %204 = vector.extract_strided_slice %5 {offsets = [11, 1, 0], sizes = [1, 16, 48], strides = [1, 1, 1]} : vector<18x18x48xbf16> to vector<1x16x48xbf16>
    %205 = vector.shape_cast %204 : vector<1x16x48xbf16> to vector<16x48xbf16>
    %206 = vector.extract_strided_slice %5 {offsets = [11, 2, 0], sizes = [1, 16, 48], strides = [1, 1, 1]} : vector<18x18x48xbf16> to vector<1x16x48xbf16>
    %207 = vector.shape_cast %206 : vector<1x16x48xbf16> to vector<16x48xbf16>
    %208 = vector.extract_strided_slice %5 {offsets = [12, 0, 0], sizes = [1, 16, 48], strides = [1, 1, 1]} : vector<18x18x48xbf16> to vector<1x16x48xbf16>
    %209 = vector.shape_cast %208 : vector<1x16x48xbf16> to vector<16x48xbf16>
    %210 = vector.extract_strided_slice %5 {offsets = [12, 1, 0], sizes = [1, 16, 48], strides = [1, 1, 1]} : vector<18x18x48xbf16> to vector<1x16x48xbf16>
    %211 = vector.shape_cast %210 : vector<1x16x48xbf16> to vector<16x48xbf16>
    %212 = vector.extract_strided_slice %5 {offsets = [12, 2, 0], sizes = [1, 16, 48], strides = [1, 1, 1]} : vector<18x18x48xbf16> to vector<1x16x48xbf16>
    %213 = vector.shape_cast %212 : vector<1x16x48xbf16> to vector<16x48xbf16>
    %214 = tpu.concatenate %197, %199, %201, %203, %205, %207, %209, %211, %213 in 1 : vector<16x48xbf16>, vector<16x48xbf16>, vector<16x48xbf16>, vector<16x48xbf16>, vector<16x48xbf16>, vector<16x48xbf16>, vector<16x48xbf16>, vector<16x48xbf16>, vector<16x48xbf16> -> vector<16x432xbf16>
    %215 = vector.extract_strided_slice %5 {offsets = [11, 0, 0], sizes = [1, 16, 48], strides = [1, 1, 1]} : vector<18x18x48xbf16> to vector<1x16x48xbf16>
    %216 = vector.shape_cast %215 : vector<1x16x48xbf16> to vector<16x48xbf16>
    %217 = vector.extract_strided_slice %5 {offsets = [11, 1, 0], sizes = [1, 16, 48], strides = [1, 1, 1]} : vector<18x18x48xbf16> to vector<1x16x48xbf16>
    %218 = vector.shape_cast %217 : vector<1x16x48xbf16> to vector<16x48xbf16>
    %219 = vector.extract_strided_slice %5 {offsets = [11, 2, 0], sizes = [1, 16, 48], strides = [1, 1, 1]} : vector<18x18x48xbf16> to vector<1x16x48xbf16>
    %220 = vector.shape_cast %219 : vector<1x16x48xbf16> to vector<16x48xbf16>
    %221 = vector.extract_strided_slice %5 {offsets = [12, 0, 0], sizes = [1, 16, 48], strides = [1, 1, 1]} : vector<18x18x48xbf16> to vector<1x16x48xbf16>
    %222 = vector.shape_cast %221 : vector<1x16x48xbf16> to vector<16x48xbf16>
    %223 = vector.extract_strided_slice %5 {offsets = [12, 1, 0], sizes = [1, 16, 48], strides = [1, 1, 1]} : vector<18x18x48xbf16> to vector<1x16x48xbf16>
    %224 = vector.shape_cast %223 : vector<1x16x48xbf16> to vector<16x48xbf16>
    %225 = vector.extract_strided_slice %5 {offsets = [12, 2, 0], sizes = [1, 16, 48], strides = [1, 1, 1]} : vector<18x18x48xbf16> to vector<1x16x48xbf16>
    %226 = vector.shape_cast %225 : vector<1x16x48xbf16> to vector<16x48xbf16>
    %227 = vector.extract_strided_slice %5 {offsets = [13, 0, 0], sizes = [1, 16, 48], strides = [1, 1, 1]} : vector<18x18x48xbf16> to vector<1x16x48xbf16>
    %228 = vector.shape_cast %227 : vector<1x16x48xbf16> to vector<16x48xbf16>
    %229 = vector.extract_strided_slice %5 {offsets = [13, 1, 0], sizes = [1, 16, 48], strides = [1, 1, 1]} : vector<18x18x48xbf16> to vector<1x16x48xbf16>
    %230 = vector.shape_cast %229 : vector<1x16x48xbf16> to vector<16x48xbf16>
    %231 = vector.extract_strided_slice %5 {offsets = [13, 2, 0], sizes = [1, 16, 48], strides = [1, 1, 1]} : vector<18x18x48xbf16> to vector<1x16x48xbf16>
    %232 = vector.shape_cast %231 : vector<1x16x48xbf16> to vector<16x48xbf16>
    %233 = tpu.concatenate %216, %218, %220, %222, %224, %226, %228, %230, %232 in 1 : vector<16x48xbf16>, vector<16x48xbf16>, vector<16x48xbf16>, vector<16x48xbf16>, vector<16x48xbf16>, vector<16x48xbf16>, vector<16x48xbf16>, vector<16x48xbf16>, vector<16x48xbf16> -> vector<16x432xbf16>
    %234 = vector.extract_strided_slice %5 {offsets = [12, 0, 0], sizes = [1, 16, 48], strides = [1, 1, 1]} : vector<18x18x48xbf16> to vector<1x16x48xbf16>
    %235 = vector.shape_cast %234 : vector<1x16x48xbf16> to vector<16x48xbf16>
    %236 = vector.extract_strided_slice %5 {offsets = [12, 1, 0], sizes = [1, 16, 48], strides = [1, 1, 1]} : vector<18x18x48xbf16> to vector<1x16x48xbf16>
    %237 = vector.shape_cast %236 : vector<1x16x48xbf16> to vector<16x48xbf16>
    %238 = vector.extract_strided_slice %5 {offsets = [12, 2, 0], sizes = [1, 16, 48], strides = [1, 1, 1]} : vector<18x18x48xbf16> to vector<1x16x48xbf16>
    %239 = vector.shape_cast %238 : vector<1x16x48xbf16> to vector<16x48xbf16>
    %240 = vector.extract_strided_slice %5 {offsets = [13, 0, 0], sizes = [1, 16, 48], strides = [1, 1, 1]} : vector<18x18x48xbf16> to vector<1x16x48xbf16>
    %241 = vector.shape_cast %240 : vector<1x16x48xbf16> to vector<16x48xbf16>
    %242 = vector.extract_strided_slice %5 {offsets = [13, 1, 0], sizes = [1, 16, 48], strides = [1, 1, 1]} : vector<18x18x48xbf16> to vector<1x16x48xbf16>
    %243 = vector.shape_cast %242 : vector<1x16x48xbf16> to vector<16x48xbf16>
    %244 = vector.extract_strided_slice %5 {offsets = [13, 2, 0], sizes = [1, 16, 48], strides = [1, 1, 1]} : vector<18x18x48xbf16> to vector<1x16x48xbf16>
    %245 = vector.shape_cast %244 : vector<1x16x48xbf16> to vector<16x48xbf16>
    %246 = vector.extract_strided_slice %5 {offsets = [14, 0, 0], sizes = [1, 16, 48], strides = [1, 1, 1]} : vector<18x18x48xbf16> to vector<1x16x48xbf16>
    %247 = vector.shape_cast %246 : vector<1x16x48xbf16> to vector<16x48xbf16>
    %248 = vector.extract_strided_slice %5 {offsets = [14, 1, 0], sizes = [1, 16, 48], strides = [1, 1, 1]} : vector<18x18x48xbf16> to vector<1x16x48xbf16>
    %249 = vector.shape_cast %248 : vector<1x16x48xbf16> to vector<16x48xbf16>
    %250 = vector.extract_strided_slice %5 {offsets = [14, 2, 0], sizes = [1, 16, 48], strides = [1, 1, 1]} : vector<18x18x48xbf16> to vector<1x16x48xbf16>
    %251 = vector.shape_cast %250 : vector<1x16x48xbf16> to vector<16x48xbf16>
    %252 = tpu.concatenate %235, %237, %239, %241, %243, %245, %247, %249, %251 in 1 : vector<16x48xbf16>, vector<16x48xbf16>, vector<16x48xbf16>, vector<16x48xbf16>, vector<16x48xbf16>, vector<16x48xbf16>, vector<16x48xbf16>, vector<16x48xbf16>, vector<16x48xbf16> -> vector<16x432xbf16>
    %253 = vector.extract_strided_slice %5 {offsets = [13, 0, 0], sizes = [1, 16, 48], strides = [1, 1, 1]} : vector<18x18x48xbf16> to vector<1x16x48xbf16>
    %254 = vector.shape_cast %253 : vector<1x16x48xbf16> to vector<16x48xbf16>
    %255 = vector.extract_strided_slice %5 {offsets = [13, 1, 0], sizes = [1, 16, 48], strides = [1, 1, 1]} : vector<18x18x48xbf16> to vector<1x16x48xbf16>
    %256 = vector.shape_cast %255 : vector<1x16x48xbf16> to vector<16x48xbf16>
    %257 = vector.extract_strided_slice %5 {offsets = [13, 2, 0], sizes = [1, 16, 48], strides = [1, 1, 1]} : vector<18x18x48xbf16> to vector<1x16x48xbf16>
    %258 = vector.shape_cast %257 : vector<1x16x48xbf16> to vector<16x48xbf16>
    %259 = vector.extract_strided_slice %5 {offsets = [14, 0, 0], sizes = [1, 16, 48], strides = [1, 1, 1]} : vector<18x18x48xbf16> to vector<1x16x48xbf16>
    %260 = vector.shape_cast %259 : vector<1x16x48xbf16> to vector<16x48xbf16>
    %261 = vector.extract_strided_slice %5 {offsets = [14, 1, 0], sizes = [1, 16, 48], strides = [1, 1, 1]} : vector<18x18x48xbf16> to vector<1x16x48xbf16>
    %262 = vector.shape_cast %261 : vector<1x16x48xbf16> to vector<16x48xbf16>
    %263 = vector.extract_strided_slice %5 {offsets = [14, 2, 0], sizes = [1, 16, 48], strides = [1, 1, 1]} : vector<18x18x48xbf16> to vector<1x16x48xbf16>
    %264 = vector.shape_cast %263 : vector<1x16x48xbf16> to vector<16x48xbf16>
    %265 = vector.extract_strided_slice %5 {offsets = [15, 0, 0], sizes = [1, 16, 48], strides = [1, 1, 1]} : vector<18x18x48xbf16> to vector<1x16x48xbf16>
    %266 = vector.shape_cast %265 : vector<1x16x48xbf16> to vector<16x48xbf16>
    %267 = vector.extract_strided_slice %5 {offsets = [15, 1, 0], sizes = [1, 16, 48], strides = [1, 1, 1]} : vector<18x18x48xbf16> to vector<1x16x48xbf16>
    %268 = vector.shape_cast %267 : vector<1x16x48xbf16> to vector<16x48xbf16>
    %269 = vector.extract_strided_slice %5 {offsets = [15, 2, 0], sizes = [1, 16, 48], strides = [1, 1, 1]} : vector<18x18x48xbf16> to vector<1x16x48xbf16>
    %270 = vector.shape_cast %269 : vector<1x16x48xbf16> to vector<16x48xbf16>
    %271 = tpu.concatenate %254, %256, %258, %260, %262, %264, %266, %268, %270 in 1 : vector<16x48xbf16>, vector<16x48xbf16>, vector<16x48xbf16>, vector<16x48xbf16>, vector<16x48xbf16>, vector<16x48xbf16>, vector<16x48xbf16>, vector<16x48xbf16>, vector<16x48xbf16> -> vector<16x432xbf16>
    %272 = vector.extract_strided_slice %5 {offsets = [14, 0, 0], sizes = [1, 16, 48], strides = [1, 1, 1]} : vector<18x18x48xbf16> to vector<1x16x48xbf16>
    %273 = vector.shape_cast %272 : vector<1x16x48xbf16> to vector<16x48xbf16>
    %274 = vector.extract_strided_slice %5 {offsets = [14, 1, 0], sizes = [1, 16, 48], strides = [1, 1, 1]} : vector<18x18x48xbf16> to vector<1x16x48xbf16>
    %275 = vector.shape_cast %274 : vector<1x16x48xbf16> to vector<16x48xbf16>
    %276 = vector.extract_strided_slice %5 {offsets = [14, 2, 0], sizes = [1, 16, 48], strides = [1, 1, 1]} : vector<18x18x48xbf16> to vector<1x16x48xbf16>
    %277 = vector.shape_cast %276 : vector<1x16x48xbf16> to vector<16x48xbf16>
    %278 = vector.extract_strided_slice %5 {offsets = [15, 0, 0], sizes = [1, 16, 48], strides = [1, 1, 1]} : vector<18x18x48xbf16> to vector<1x16x48xbf16>
    %279 = vector.shape_cast %278 : vector<1x16x48xbf16> to vector<16x48xbf16>
    %280 = vector.extract_strided_slice %5 {offsets = [15, 1, 0], sizes = [1, 16, 48], strides = [1, 1, 1]} : vector<18x18x48xbf16> to vector<1x16x48xbf16>
    %281 = vector.shape_cast %280 : vector<1x16x48xbf16> to vector<16x48xbf16>
    %282 = vector.extract_strided_slice %5 {offsets = [15, 2, 0], sizes = [1, 16, 48], strides = [1, 1, 1]} : vector<18x18x48xbf16> to vector<1x16x48xbf16>
    %283 = vector.shape_cast %282 : vector<1x16x48xbf16> to vector<16x48xbf16>
    %284 = vector.extract_strided_slice %5 {offsets = [16, 0, 0], sizes = [1, 16, 48], strides = [1, 1, 1]} : vector<18x18x48xbf16> to vector<1x16x48xbf16>
    %285 = vector.shape_cast %284 : vector<1x16x48xbf16> to vector<16x48xbf16>
    %286 = vector.extract_strided_slice %5 {offsets = [16, 1, 0], sizes = [1, 16, 48], strides = [1, 1, 1]} : vector<18x18x48xbf16> to vector<1x16x48xbf16>
    %287 = vector.shape_cast %286 : vector<1x16x48xbf16> to vector<16x48xbf16>
    %288 = vector.extract_strided_slice %5 {offsets = [16, 2, 0], sizes = [1, 16, 48], strides = [1, 1, 1]} : vector<18x18x48xbf16> to vector<1x16x48xbf16>
    %289 = vector.shape_cast %288 : vector<1x16x48xbf16> to vector<16x48xbf16>
    %290 = tpu.concatenate %273, %275, %277, %279, %281, %283, %285, %287, %289 in 1 : vector<16x48xbf16>, vector<16x48xbf16>, vector<16x48xbf16>, vector<16x48xbf16>, vector<16x48xbf16>, vector<16x48xbf16>, vector<16x48xbf16>, vector<16x48xbf16>, vector<16x48xbf16> -> vector<16x432xbf16>
    %291 = vector.extract_strided_slice %5 {offsets = [15, 0, 0], sizes = [1, 16, 48], strides = [1, 1, 1]} : vector<18x18x48xbf16> to vector<1x16x48xbf16>
    %292 = vector.shape_cast %291 : vector<1x16x48xbf16> to vector<16x48xbf16>
    %293 = vector.extract_strided_slice %5 {offsets = [15, 1, 0], sizes = [1, 16, 48], strides = [1, 1, 1]} : vector<18x18x48xbf16> to vector<1x16x48xbf16>
    %294 = vector.shape_cast %293 : vector<1x16x48xbf16> to vector<16x48xbf16>
    %295 = vector.extract_strided_slice %5 {offsets = [15, 2, 0], sizes = [1, 16, 48], strides = [1, 1, 1]} : vector<18x18x48xbf16> to vector<1x16x48xbf16>
    %296 = vector.shape_cast %295 : vector<1x16x48xbf16> to vector<16x48xbf16>
    %297 = vector.extract_strided_slice %5 {offsets = [16, 0, 0], sizes = [1, 16, 48], strides = [1, 1, 1]} : vector<18x18x48xbf16> to vector<1x16x48xbf16>
    %298 = vector.shape_cast %297 : vector<1x16x48xbf16> to vector<16x48xbf16>
    %299 = vector.extract_strided_slice %5 {offsets = [16, 1, 0], sizes = [1, 16, 48], strides = [1, 1, 1]} : vector<18x18x48xbf16> to vector<1x16x48xbf16>
    %300 = vector.shape_cast %299 : vector<1x16x48xbf16> to vector<16x48xbf16>
    %301 = vector.extract_strided_slice %5 {offsets = [16, 2, 0], sizes = [1, 16, 48], strides = [1, 1, 1]} : vector<18x18x48xbf16> to vector<1x16x48xbf16>
    %302 = vector.shape_cast %301 : vector<1x16x48xbf16> to vector<16x48xbf16>
    %303 = vector.extract_strided_slice %5 {offsets = [17, 0, 0], sizes = [1, 16, 48], strides = [1, 1, 1]} : vector<18x18x48xbf16> to vector<1x16x48xbf16>
    %304 = vector.shape_cast %303 : vector<1x16x48xbf16> to vector<16x48xbf16>
    %305 = vector.extract_strided_slice %5 {offsets = [17, 1, 0], sizes = [1, 16, 48], strides = [1, 1, 1]} : vector<18x18x48xbf16> to vector<1x16x48xbf16>
    %306 = vector.shape_cast %305 : vector<1x16x48xbf16> to vector<16x48xbf16>
    %307 = vector.extract_strided_slice %5 {offsets = [17, 2, 0], sizes = [1, 16, 48], strides = [1, 1, 1]} : vector<18x18x48xbf16> to vector<1x16x48xbf16>
    %308 = vector.shape_cast %307 : vector<1x16x48xbf16> to vector<16x48xbf16>
    %309 = tpu.concatenate %292, %294, %296, %298, %300, %302, %304, %306, %308 in 1 : vector<16x48xbf16>, vector<16x48xbf16>, vector<16x48xbf16>, vector<16x48xbf16>, vector<16x48xbf16>, vector<16x48xbf16>, vector<16x48xbf16>, vector<16x48xbf16>, vector<16x48xbf16> -> vector<16x432xbf16>
    %310 = tpu.concatenate %24, %43, %62, %81, %100, %119, %138, %157, %176, %195, %214, %233, %252, %271, %290, %309 in 0 : vector<16x432xbf16>, vector<16x432xbf16>, vector<16x432xbf16>, vector<16x432xbf16>, vector<16x432xbf16>, vector<16x432xbf16>, vector<16x432xbf16>, vector<16x432xbf16>, vector<16x432xbf16>, vector<16x432xbf16>, vector<16x432xbf16>, vector<16x432xbf16>, vector<16x432xbf16>, vector<16x432xbf16>, vector<16x432xbf16>, vector<16x432xbf16> -> vector<256x432xbf16>
    %cst = arith.constant dense<0.000000e+00> : vector<256x24xf32>
    %311 = tpu.matmul %310, %2, %cst {dimension_numbers = #tpu.dot_dimension_numbers<[1], [0], [0], [1], [0, 0, 1, 1], [], []>} : vector<256x432xbf16>, vector<432x24xbf16>, vector<256x24xf32> -> vector<256x24xf32>
    %c0_4 = arith.constant 0 : index
    %c0_5 = arith.constant 0 : index
    %312 = vector.load %arg4[%c0_4, %c0_5] : memref<256x24xf32, #tpu.memory_space<vmem>>, vector<256x24xf32>
    tpu.vector_store %arg4[%c0_4, %c0_5], %311 {strides = array<i32>} : memref<256x24xf32, #tpu.memory_space<vmem>>, vector<256x24xf32>,
    %cst_6 = arith.constant dense<0.000000e+00> : vector<24xf32>
    %313 = vector.multi_reduction <add>, %311, %cst_6 [0] : vector<256x24xf32> to vector<24xf32>
    %314 = vector.shape_cast %313 : vector<24xf32> to vector<1x24xf32>
    %315 = arith.mulf %311, %311 : vector<256x24xf32>
    %cst_7 = arith.constant dense<0.000000e+00> : vector<24xf32>
    %316 = vector.multi_reduction <add>, %315, %cst_7 [0] : vector<256x24xf32> to vector<24xf32>
    %317 = vector.shape_cast %316 : vector<24xf32> to vector<1x24xf32>
    %cst_8 = arith.constant 0.000000e+00 : f32
    %318 = vector.broadcast %cst_8 : f32 to vector<6x24xf32>
    %319 = tpu.concatenate %314, %317, %318 in 0 : vector<1x24xf32>, vector<1x24xf32>, vector<6x24xf32> -> vector<8x24xf32>
    %c0_9 = arith.constant 0 : index
    %c0_10 = arith.constant 0 : index
    %c0_11 = arith.constant 0 : index
    %320 = vector.load %arg5[%c0_9, %c0_10, %c0_11] : memref<1x8x24xf32, #tpu.memory_space<vmem>>, vector<1x8x24xf32>
    %321 = vector.shape_cast %320 : vector<1x8x24xf32> to vector<8x24xf32>
    %322 = vector.shape_cast %319 : vector<8x24xf32> to vector<1x8x24xf32>
    tpu.vector_store %arg5[%c0_9, %c0_10, %c0_11], %322 {strides = array<i32>} : memref<1x8x24xf32, #tpu.memory_space<vmem>>, vector<1x8x24xf32>,
    return
  }
  func.func @transform_0(%arg0: i32, %arg1: i32) -> (i32, i32, i32, i32) {
    %c0_i32 = arith.constant 0 : i32
    %c0_i32_0 = arith.constant 0 : i32
    %c0_i32_1 = arith.constant 0 : i32
    %c0_i32_2 = arith.constant 0 : i32
    return %arg0, %c0_i32, %c0_i32_0, %c0_i32_1 : i32, i32, i32, i32
  }
  func.func @transform_1(%arg0: i32, %arg1: i32) -> (i32, i32) {
    %c0_i32 = arith.constant 0 : i32
    %c0_i32_0 = arith.constant 0 : i32
    %c0_i32_1 = arith.constant 0 : i32
    return %c0_i32, %c0_i32_0 : i32, i32
  }
  func.func @transform_2(%arg0: i32, %arg1: i32) -> (i32, i32) {
    %c1_i32 = arith.constant 1 : i32
    %0 = arith.muli %arg0, %c1_i32 : i32
    %1 = arith.addi %0, %arg1 : i32
    %c0_i32 = arith.constant 0 : i32
    %c0_i32_0 = arith.constant 0 : i32
    return %1, %c0_i32 : i32, i32
  }
  func.func @transform_3(%arg0: i32, %arg1: i32) -> (i32, i32, i32) {
    %c1_i32 = arith.constant 1 : i32
    %0 = arith.muli %arg0, %c1_i32 : i32
    %1 = arith.addi %0, %arg1 : i32
    %c0_i32 = arith.constant 0 : i32
    %c0_i32_0 = arith.constant 0 : i32
    %c0_i32_1 = arith.constant 0 : i32
    return %1, %c0_i32, %c0_i32_0 : i32, i32, i32
  }
}

module attributes {stable_mosaic.version = 11 : i64} {
  func.func @_matmul_bias_kernel(%arg0: i32, %arg1: memref<256x24xbf16, #tpu.memory_space<vmem>>, %arg2: memref<24x3xbf16, #tpu.memory_space<vmem>>, %arg3: memref<1x3xf32, #tpu.memory_space<vmem>>, %arg4: memref<256x3xf32, #tpu.memory_space<vmem>>) attributes {dimension_semantics = [#tpu.dimension_semantics<parallel>], iteration_bounds = array<i64: 2>, scalar_prefetch = 0 : i64, scratch_operands = 0 : i64, tpu.core_type = #tpu.core_type<tc>, window_params = [{transform_indices = @transform_0, window_bounds = array<i64: 256, 24>}, {pipeline_mode = #tpu.pipeline_mode<synchronous>, transform_indices = @transform_1, window_bounds = array<i64: 24, 3>}, {pipeline_mode = #tpu.pipeline_mode<synchronous>, transform_indices = @transform_2, window_bounds = array<i64: 1, 3>}, {transform_indices = @transform_3, window_bounds = array<i64: 256, 3>}]} {
    %c0 = arith.constant 0 : index
    %c0_0 = arith.constant 0 : index
    %0 = vector.load %arg1[%c0, %c0_0] : memref<256x24xbf16, #tpu.memory_space<vmem>>, vector<256x24xbf16>
    %c0_1 = arith.constant 0 : index
    %c0_2 = arith.constant 0 : index
    %1 = vector.load %arg2[%c0_1, %c0_2] : memref<24x3xbf16, #tpu.memory_space<vmem>>, vector<24x3xbf16>
    %cst = arith.constant dense<0.000000e+00> : vector<256x3xf32>
    %2 = tpu.matmul %0, %1, %cst {dimension_numbers = #tpu.dot_dimension_numbers<[1], [0], [0], [1], [0, 0, 1, 1], [], []>} : vector<256x24xbf16>, vector<24x3xbf16>, vector<256x3xf32> -> vector<256x3xf32>
    %c0_3 = arith.constant 0 : index
    %c0_4 = arith.constant 0 : index
    %3 = vector.load %arg3[%c0_3, %c0_4] : memref<1x3xf32, #tpu.memory_space<vmem>>, vector<1x3xf32>
    %4 = vector.broadcast %3 : vector<1x3xf32> to vector<256x3xf32>
    %5 = arith.addf %2, %4 : vector<256x3xf32>
    %c0_5 = arith.constant 0 : index
    %c0_6 = arith.constant 0 : index
    %6 = vector.load %arg4[%c0_5, %c0_6] : memref<256x3xf32, #tpu.memory_space<vmem>>, vector<256x3xf32>
    tpu.vector_store %arg4[%c0_5, %c0_6], %5 {strides = array<i32>} : memref<256x3xf32, #tpu.memory_space<vmem>>, vector<256x3xf32>,
    return
  }
  func.func @transform_0(%arg0: i32) -> (i32, i32) {
    %c0_i32 = arith.constant 0 : i32
    %c0_i32_0 = arith.constant 0 : i32
    return %arg0, %c0_i32 : i32, i32
  }
  func.func @transform_1(%arg0: i32) -> (i32, i32) {
    %c0_i32 = arith.constant 0 : i32
    %c0_i32_0 = arith.constant 0 : i32
    %c0_i32_1 = arith.constant 0 : i32
    return %c0_i32, %c0_i32_0 : i32, i32
  }
  func.func @transform_2(%arg0: i32) -> (i32, i32) {
    %c0_i32 = arith.constant 0 : i32
    %c0_i32_0 = arith.constant 0 : i32
    %c0_i32_1 = arith.constant 0 : i32
    return %c0_i32, %c0_i32_0 : i32, i32
  }
  func.func @transform_3(%arg0: i32) -> (i32, i32) {
    %c0_i32 = arith.constant 0 : i32
    %c0_i32_0 = arith.constant 0 : i32
    return %arg0, %c0_i32 : i32, i32
  }
}

</mosaic_0001>

<bundles_post_ra>
// kernel: tile.63
= control target key start
LH: loop header
LB: loop body
LE: loop exit
PB: predicated region body
PF: predicated region fallthrough
CT: control target
= control target key end

     0   :  { %s28_s0 = inlined_call_operand.vmem [shape: f32[24], index: 0, kind: input, shape index: {}]   ;;  %s29_s1 = inlined_call_operand.vmem [shape: f32[16,24], index: 1, kind: output, shape index: {}]  }
   0x1   :  { %v4_v0 = vld [vmem:[%s28_s0] ss:$0 sm:$0xff] }
   0x2   :  { %5 = vst [vmem:[%s29_s1] sm:$0xff] %v4_v0  ;;  %8 = vst [vmem:[%s29_s1 + $0x8] sm:$0xff] %v4_v0 }

// kernel: tile.64
= control target key start
LH: loop header
LB: loop body
LE: loop exit
PB: predicated region body
PF: predicated region fallthrough
CT: control target
= control target key end

     0   :  { %vm9_vm0 = vcmask 64512   ;;  %vm13_vm1 = vcmask 130048   ;;  %s175_s14 = smov 120   ;;  %s176_s15 = smov 104   ;;  %vm3_vm2 = vcmask 195584   ;;  %vm16_vm3 = vcmask 1048512   ;;  %s267_s0 = inlined_call_operand.vmem [shape: f32[16,24], index: 0, kind: input, shape index: {}]   ;;  %s268_s1 = inlined_call_operand.vmem [shape: f32[1,384], index: 1, kind: output, shape index: {}]  }
   0x1   :  { %v141_v0 = vld [vmem:[%s267_s0 + $0x5] sm:$0x1]   ;;  %v145_v3 = vld [vmem:[%s267_s0 + $0xf] sm:$0x1]   ;;  %v143_v4 = vld [vmem:[%s267_s0 + $0xa] sm:$0x1]  }
   0x2   :  { %v142_v1 = vld [vmem:[%s267_s0 + $0x5] sm:$0x1]   ;;  %34 = vrot.lane.b32.xlu1 %v145_v3, %s176_s15  ;;  %v144_v5 = vld [vmem:[%s267_s0 + $0xa] sm:$0x1]   ;;  %v146_v7 = vld [vmem:[%s267_s0 + $0x4] sm:$0x1]  }
   0x3   :  { %v10_v2 = vsel %vm9_vm0, %v142_v1, %v141_v0  ;;  %v23_v6 = vsel %vm13_vm1, %v144_v5, %v143_v4  ;;  %s177_s20 = smov 112   ;;  %s178_s21 = smov 96   ;;  %v147_v8 = vld [vmem:[%s267_s0 + $0x9] sm:$0x1]   ;;  %v148_v9 = vld [vmem:[%s267_s0 + $0xe] sm:$0x1]  }
   0x4   :  { %11 = vrot.lane.b32.xlu0 %v10_v2, %s175_s14  ;;  %v2_v10 = vld [vmem:[%s267_s0] sm:$0x1]   ;;  %s179_s28 = smov 88   ;;  %s180_s29 = smov 80   ;;  %v149_v11 = vld [vmem:[%s267_s0 + $0x3] sm:$0x1]  }
   0x5   :  { %4 = vst.msk [vmem:[#allocation0] sm:$0x1] %vm3_vm2, %v2_v10   ;;  %v150_v12 = vld [vmem:[%s267_s0 + $0x8] sm:$0x1]   ;;  %s181_s5 = smov 72   ;;  %s182_s6 = smov 64  }
   0x6   :  { %41 = vrot.lane.b32.xlu1 %v146_v7, %s178_s21  ;;  %v151_v13 = vld [vmem:[%s267_s0 + $0xd] sm:$0x1]   ;;  %v152_v14 = vld [vmem:[%s267_s0 + $0x2] sm:$0x1]   ;;  %s183_s11 = smov 56   ;;  %s184_s12 = smov 48  }
   0x7   :  { %v153_v15 = vld [vmem:[%s267_s0 + $0x7] sm:$0x1]   ;;  %v154_v16 = vld [vmem:[%s267_s0 + $0xc] sm:$0x1]   ;;  %s185_s17 = smov 40   ;;  %s186_s18 = smov 32  }
   0x8   :  { %24 = vrot.lane.b32.xlu0 %v23_v6, %s177_s20  ;;  %v155_v17 = vld [vmem:[%s267_s0 + $0x1] sm:$0x1]   ;;  %v156_v18 = vld [vmem:[%s267_s0 + $0x6] sm:$0x1]   ;;  %s187_s23 = smov 24   ;;  %s188_s24 = smov 16  }
   0x9   :  { %v157_v19 = vld [vmem:[%s267_s0 + $0xb] sm:$0x1]   ;;  %s189_s0 = smov 8   ;;  %vm29_vm4 = vcmask 1048448   ;;  %vm43_vm5 = vcmask 982784   ;;  %vm36_vm6 = vcmask 1048384  }
   0xa   :  { %54 = vrot.lane.b32.xlu1 %v148_v9, %s180_s29  ;;  %vm49_vm7 = vcmask 917184   ;;  %vm56_vm8 = vcmask 851584   ;;  %vm63_vm9 = vcmask 785984   ;;  %vm69_vm10 = vcmask 720384  }
   0xb   :  { %vm76_vm11 = vcmask 654784   ;;  %vm83_vm12 = vcmask 589184   ;;  %vm89_vm13 = vcmask 523584   ;;  %vm96_vm14 = vcmask 457984  }
   0xc   :  { %47 = vrot.lane.b32.xlu0 %v147_v8, %s179_s28  ;;  %vm103_vm15 = vcmask 392384  }
   0xe   :  { %67 = vrot.lane.b32.xlu1 %v150_v12, %s182_s6 }
  0x10   :  { %61 = vrot.lane.b32.xlu0 %v149_v11, %s181_s5 }
  0x12   :  { %81 = vrot.lane.b32.xlu1 %v152_v14, %s184_s12 }
  0x14   :  { %74 = vrot.lane.b32.xlu0 %v151_v13, %s183_s11 }
  0x16   :  { %94 = vrot.lane.b32.xlu1 %v154_v16, %s186_s18 }
  0x18   :  { %87 = vrot.lane.b32.xlu0 %v153_v15, %s185_s17 }
  0x1a   :  { %107 = vrot.lane.b32.xlu1 %v156_v18, %s188_s24 }
  0x1c   :  { %101 = vrot.lane.b32.xlu0 %v155_v17, %s187_s23 }
  0x20   :  { %114 = vrot.lane.b32.xlu0 %v157_v19, %s189_s0 }
  0x74   :  { %v35_v21 = vpop.permute.xlu1 %34  }
  0x76   :  { %v12_v20 = vpop.permute.xlu0 %11  }
  0x77   :  { %15 = vst.msk [vmem:[#allocation0 + $0x8] sm:$0x1] %vm13_vm1, %v12_v20   ;;  %vm116_vm1 = vcmask 261184  }
  0x78   :  { %17 = vst.msk [vmem:[#allocation0] sm:$0x1] %vm16_vm3, %v12_v20   ;;  %v42_v23 = vpop.permute.xlu1 %41  }
  0x79   :  { %44 = vst.msk [vmem:[#allocation0] sm:$0x1] %vm43_vm5, %v42_v23  }
  0x7a   :  { %v25_v22 = vpop.permute.xlu0 %24  }
  0x7b   :  { %28 = vst.msk [vmem:[#allocation0 + $0x10] sm:$0x1] %vm9_vm0, %v25_v22   ;;  %vm109_vm0 = vcmask 326784  }
  0x7c   :  { %31 = vst.msk [vmem:[#allocation0 + $0x8] sm:$0x1] %vm29_vm4, %v25_v22   ;;  %v55_v25 = vpop.permute.xlu1 %54  }
  0x7d   :  { %38 = vst.msk [vmem:[#allocation0 + $0x10] sm:$0x1] %vm36_vm6, %v35_v21  }
  0x7e   :  { %v48_v24 = vpop.permute.xlu0 %47   ;;  %58 = vst.msk [vmem:[#allocation0 + $0x10] sm:$0x1] %vm56_vm8, %v55_v25  }
  0x7f   :  { %51 = vst.msk [vmem:[#allocation0 + $0x8] sm:$0x1] %vm49_vm7, %v48_v24  }
  0x80   :  { %v68_v27 = vpop.permute.xlu1 %67  }
  0x81   :  { %71 = vst.msk [vmem:[#allocation0 + $0x8] sm:$0x1] %vm69_vm10, %v68_v27  }
  0x82   :  { %v62_v26 = vpop.permute.xlu0 %61  }
  0x83   :  { %64 = vst.msk [vmem:[#allocation0] sm:$0x1] %vm63_vm9, %v62_v26  }
  0x84   :  { %v82_v29 = vpop.permute.xlu1 %81  }
  0x85   :  { %84 = vst.msk [vmem:[#allocation0] sm:$0x1] %vm83_vm12, %v82_v29  }
  0x86   :  { %v75_v28 = vpop.permute.xlu0 %74  }
  0x87   :  { %78 = vst.msk [vmem:[#allocation0 + $0x10] sm:$0x1] %vm76_vm11, %v75_v28  }
  0x88   :  { %v95_v31 = vpop.permute.xlu1 %94  }
  0x89   :  { %98 = vst.msk [vmem:[#allocation0 + $0x10] sm:$0x1] %vm96_vm14, %v95_v31  }
  0x8a   :  { %v88_v30 = vpop.permute.xlu0 %87  }
  0x8b   :  { %91 = vst.msk [vmem:[#allocation0 + $0x8] sm:$0x1] %vm89_vm13, %v88_v30  }
  0x8c   :  { %v108_v33 = vpop.permute.xlu1 %107  }
  0x8d   :  { %111 = vst.msk [vmem:[#allocation0 + $0x8] sm:$0x1] %vm109_vm0, %v108_v33  }
  0x8e   :  { %v102_v32 = vpop.permute.xlu0 %101  }
  0x8f   :  { %104 = vst.msk [vmem:[#allocation0] sm:$0x1] %vm103_vm15, %v102_v32  }
  0x92   :  { %v115_v34 = vpop.permute.xlu0 %114  }
  0x93   :  { %118 = vst.msk [vmem:[#allocation0 + $0x10] sm:$0x1] %vm116_vm1, %v115_v34  }
  0x94   :  { %v128_v36 = vld [vmem:[#allocation0 + $0x8] sm:$0x1] }
  0x95   :  { %158 = vst [vmem:[%s268_s1 + $0x1] sm:$0x1] %v128_v36 }
  0x96   :  { %v123_v35 = vld [vmem:[#allocation0] sm:$0x1] }
  0x97   :  { %126 = vst [vmem:[%s268_s1] sm:$0x1] %v123_v35 }
  0x9a   :  { %v134_v37 = vld [vmem:[#allocation0 + $0x10] sm:$0x1] }
  0x9b   :  { %159 = vst [vmem:[%s268_s1 + $0x2] sm:$0x1] %v134_v37 }

// kernel: unet_small_forward.15
= control target key start
LH: loop header
LB: loop body
LE: loop exit
PB: predicated region body
PF: predicated region fallthrough
CT: control target
= control target key end

     0   :  { %v28_v0 = vlaneseq  ;;  %s210_s1 = inlined_call_operand.vmem [shape: f32[1,384], index: 1, kind: input, shape index: {}]   ;;  %s211_s2 = inlined_call_operand.vmem [shape: f32[1,384], index: 2, kind: input, shape index: {}]   ;;  %s212_s0 = inlined_call_operand.vmem [shape: f32[32,384], index: 0, kind: input, shape index: {}]   ;;  %s213_s3 = inlined_call_operand.vmem [shape: f32[32,384], index: 3, kind: output, shape index: {}]  }
   0x1   :  { %v26_v2 = vld [vmem:[%s210_s1] sm:$0x7]  ;;  %v15_v6 = vld [vmem:[%s212_s0 + $0x8] sm:$0xff]  ;;  %v16_v9 = vld [vmem:[%s212_s0 + $0x10] sm:$0xff] }
   0x2   :  { %v29_v1 = vshrl.u32 %v28_v0, 7  ;;  %v55_v3 = vld [vmem:[%s211_s2] sm:$0x7]  ;;  %v17_v10 = vld [vmem:[%s212_s0 + $0x18] sm:$0xff]  ;;  %v19_v16 = vld [vmem:[%s212_s0 + $0x28] sm:$0xff] }
   0x3   :  { %v14_v4 = vld [vmem:[%s212_s0] sm:$0xff]  ;;  %v20_v17 = vld [vmem:[%s212_s0 + $0x30] sm:$0xff]  ;;  %v21_v18 = vld [vmem:[%s212_s0 + $0x38] sm:$0xff] }
   0x4   :  { %v30_v5 = vsub.s32 0, %v29_v1  ;;  %v34_v7 = vsub.s32 1, %v29_v1  ;;  %v38_v8 = vsub.s32 2, %v29_v1  ;;  %v18_v11 = vld [vmem:[%s212_s0 + $0x20] sm:$0xff]  ;;  %v23_v38 = vld [vmem:[%s212_s0 + $0x48] sm:$0xff]  ;;  %v24_v39 = vld [vmem:[%s212_s0 + $0x50] sm:$0xff] }
   0x5   :  { %v22_v33 = vld [vmem:[%s212_s0 + $0x40] sm:$0xff]  ;;  %v25_v40 = vld [vmem:[%s212_s0 + $0x58] sm:$0xff] }
   0x6   :  { %v31_v12 = vrot.slane %v26_v2, %v30_v5  ;;  %v60_v13 = vrot.slane %v55_v3, %v30_v5  ;;  %v35_v14 = vrot.slane %v26_v2, %v34_v7  ;;  %v64_v15 = vrot.slane %v55_v3, %v34_v7 }
   0x7   :  { %v39_v19 = vrot.slane %v26_v2, %v38_v8  ;;  %v68_v20 = vrot.slane %v55_v3, %v38_v8 }
   0x8   :  { %v43_v21 = vmul.f32 %v31_v12, %v14_v4  ;;  %v44_v22 = vmul.f32 %v35_v14, %v15_v6  ;;  %v46_v23 = vmul.f32 %v31_v12, %v17_v10  ;;  %v47_v24 = vmul.f32 %v35_v14, %v18_v11 }
   0x9   :  { %v45_v25 = vmul.f32 %v39_v19, %v16_v9  ;;  %v48_v26 = vmul.f32 %v39_v19, %v19_v16  ;;  %v49_v27 = vmul.f32 %v31_v12, %v20_v17  ;;  %v50_v28 = vmul.f32 %v35_v14, %v21_v18 }
   0xa   :  { %v72_v29 = vadd.f32 %v60_v13, %v43_v21  ;;  %v73_v30 = vadd.f32 %v64_v15, %v44_v22  ;;  %v75_v31 = vadd.f32 %v60_v13, %v46_v23  ;;  %v76_v32 = vadd.f32 %v64_v15, %v47_v24 }
   0xb   :  { %v74_v34 = vadd.f32 %v68_v20, %v45_v25  ;;  %v77_v35 = vadd.f32 %v68_v20, %v48_v26  ;;  %v78_v36 = vadd.f32 %v60_v13, %v49_v27  ;;  %v79_v37 = vadd.f32 %v64_v15, %v50_v28 }
   0xc   :  { %v84_v41 = vmax.f32 %v72_v29, 0.0  ;;  %v85_v42 = vmax.f32 %v73_v30, 0.0  ;;  %v87_v43 = vmax.f32 %v75_v31, 0.0  ;;  %v88_v44 = vmax.f32 %v76_v32, 0.0 }
   0xd   :  { %v86_v45 = vmax.f32 %v74_v34, 0.0  ;;  %v89_v46 = vmax.f32 %v77_v35, 0.0  ;;  %v90_v47 = vmax.f32 %v78_v36, 0.0  ;;  %v91_v48 = vmax.f32 %v79_v37, 0.0 }
   0xe   :  { %96 = vst [vmem:[%s213_s3] sm:$0xff] %v84_v41  ;;  %97 = vst [vmem:[%s213_s3 + $0x8] sm:$0xff] %v85_v42  ;;  %v51_v49 = vmul.f32 %v39_v19, %v22_v33  ;;  %v52_v50 = vmul.f32 %v31_v12, %v23_v38  ;;  %v53_v51 = vmul.f32 %v35_v14, %v24_v39 }
   0xf   :  { %99 = vst [vmem:[%s213_s3 + $0x18] sm:$0xff] %v87_v43  ;;  %100 = vst [vmem:[%s213_s3 + $0x20] sm:$0xff] %v88_v44  ;;  %v54_v52 = vmul.f32 %v39_v19, %v25_v40 }
  0x10   :  { %98 = vst [vmem:[%s213_s3 + $0x10] sm:$0xff] %v86_v45  ;;  %101 = vst [vmem:[%s213_s3 + $0x28] sm:$0xff] %v89_v46  ;;  %v80_v53 = vadd.f32 %v68_v20, %v51_v49  ;;  %v81_v54 = vadd.f32 %v60_v13, %v52_v50  ;;  %v82_v55 = vadd.f32 %v64_v15, %v53_v51 }
  0x11   :  { %102 = vst [vmem:[%s213_s3 + $0x30] sm:$0xff] %v90_v47  ;;  %103 = vst [vmem:[%s213_s3 + $0x38] sm:$0xff] %v91_v48  ;;  %v83_v56 = vadd.f32 %v68_v20, %v54_v52 }
  0x12   :  { %v92_v57 = vmax.f32 %v80_v53, 0.0  ;;  %v93_v58 = vmax.f32 %v81_v54, 0.0  ;;  %v94_v59 = vmax.f32 %v82_v55, 0.0 }
  0x13   :  { %v95_v60 = vmax.f32 %v83_v56, 0.0 }
  0x14   :  { %104 = vst [vmem:[%s213_s3 + $0x40] sm:$0xff] %v92_v57  ;;  %105 = vst [vmem:[%s213_s3 + $0x48] sm:$0xff] %v93_v58 }
  0x15   :  { %106 = vst [vmem:[%s213_s3 + $0x50] sm:$0xff] %v94_v59  ;;  %107 = vst [vmem:[%s213_s3 + $0x58] sm:$0xff] %v95_v60 }

// kernel: unet_small_forward.18
= control target key start
LH: loop header
LB: loop body
LE: loop exit
PB: predicated region body
PF: predicated region fallthrough
CT: control target
= control target key end

     0   :  { %s293_s6 = smov 0   ;;  %s322_s0 = inlined_call_operand.vmem [shape: f32[16,2,8,48], index: 0, kind: input, shape index: {}]   ;;  %s323_s1 = inlined_call_operand.vmem [shape: f32[16,8,24], index: 1, kind: output, shape index: {}]  }
   0x1 LB: > { %s252_s7 = sadd.s32 4294967295, %s280_s6   ;;  %p256_p0 = scmp.ge.s32.totalorder %s280_s6, 1  ;;  %s280_s6 = sphi %s293_s6, %s11_s6  }
   0x2   : > { %p89_p1 = scmp.lt.s32.totalorder %s280_s6, 3 }
   0x4   : > { %p90_p2 = pnand %p256_p0, %p89_p1 }
   0x5   : > { %s257_s8 = sshll.u32 (!%p90_p2), %s252_s7, 3  ;;  %s282_s13 = smov (!%p90_p2), 104  }
   0x6   : > { %93 = sbr.rel (%p90_p2) target bundleno = 148 (0x94), region = 24  ;;  %p111_p3 = scmp.lt.s32.totalorder (!%p90_p2), %s257_s8, 15 }
   0xb   : > { %s325_s8 = smov (!%p111_p3, %s257_s8), 15  ;;  %vm187_vm0 = vcmask 195584  }
   0xc   : > { %s264_s9 = sshll.u32 %s325_s8, 4  ;;  %s261_s14 = sshll.u32 %s325_s8, 3 }
   0xd   : > { %s115_s12 = scalar_lea.vmem %s322_s0, %s264_s9  ;;  %s121_s17 = scalar_lea.vmem %s323_s1, %s261_s14 }
   0xe   : > { %v127_v0 = vld [vmem:[%s115_s12 + $0x20] sm:$0xff]  ;;  %v128_v1 = vld [vmem:[%s115_s12 + $0x28] sm:$0xff]  ;;  %v129_v5 = vld [vmem:[%s115_s12 + $0x30] sm:$0xff] }
   0xf   : > { %v123_v2 = vld [vmem:[%s115_s12] sm:$0xff]  ;;  %v141_v3 = vmax.f32 %v127_v0, %v128_v1  ;;  %v124_v4 = vld [vmem:[%s115_s12 + $0x8] sm:$0xff]  ;;  %v130_v6 = vld [vmem:[%s115_s12 + $0x38] sm:$0xff] }
  0x10   : > { %v139_v7 = vmax.f32 %v123_v2, %v124_v4  ;;  %v125_v8 = vld [vmem:[%s115_s12 + $0x10] sm:$0xff]  ;;  %v126_v9 = vld [vmem:[%s115_s12 + $0x18] sm:$0xff]  ;;  %v142_v10 = vmax.f32 %v129_v5, %v130_v6  ;;  %v131_v14 = vld [vmem:[%s115_s12 + $0x40] sm:$0xff] }
  0x11   : > { %159 = vrot.lane.b32.xlu1 %v141_v3, %s282_s13  ;;  %v140_v11 = vmax.f32 %v125_v8, %v126_v9  ;;  %v133_v12 = vld [vmem:[%s115_s12 + $0x50] sm:$0xff]  ;;  %v134_v13 = vld [vmem:[%s115_s12 + $0x58] sm:$0xff]  ;;  %v132_v15 = vld [vmem:[%s115_s12 + $0x48] sm:$0xff] }
  0x12   : > { %155 = vrot.lane.b32.xlu0 %v139_v7, %s282_s13  ;;  %v144_v16 = vmax.f32 %v133_v12, %v134_v13  ;;  %v143_v17 = vmax.f32 %v131_v14, %v132_v15  ;;  %v137_v18 = vld [vmem:[%s115_s12 + $0x70] sm:$0xff]  ;;  %v138_v19 = vld [vmem:[%s115_s12 + $0x78] sm:$0xff]  ;;  %v135_v20 = vld [vmem:[%s115_s12 + $0x60] sm:$0xff] }
  0x13   : > { %v136_v21 = vld [vmem:[%s115_s12 + $0x68] sm:$0xff]  ;;  %v146_v22 = vmax.f32 %v137_v18, %v138_v19 }
  0x14   : > { %v145_v23 = vmax.f32 %v135_v20, %v136_v21 }
  0x15   : > { %161 = vrot.lane.b32.xlu1 %v142_v10, %s282_s13 }
  0x16   : > { %157 = vrot.lane.b32.xlu0 %v140_v11, %s282_s13 }
  0x19   : > { %165 = vrot.lane.b32.xlu1 %v144_v16, %s282_s13 }
  0x1a   : > { %163 = vrot.lane.b32.xlu0 %v143_v17, %s282_s13 }
  0x1d   : > { %169 = vrot.lane.b32.xlu1 %v146_v22, %s282_s13 }
  0x1e   : > { %167 = vrot.lane.b32.xlu0 %v145_v23, %s282_s13 }
  0x83   : > { %v160_v24 = vpop.permute.xlu1 %159 }
  0x84   : > { %v181_v25 = vmax.f32 %v141_v3, %v160_v24  ;;  %v156_v26 = vpop.permute.xlu0 %155 }
  0x85   : > { %v179_v27 = vmax.f32 %v139_v7, %v156_v26 }
  0x86   : > { %190 = vst.msk [vmem:[%s121_s17 + $0x10] sm:$0xff] %vm187_vm0, %v181_v25 }
  0x87   : > { %188 = vst.msk [vmem:[%s121_s17] sm:$0xff] %vm187_vm0, %v179_v27  ;;  %v162_v28 = vpop.permute.xlu1 %161 }
  0x88   : > { %v182_v29 = vmax.f32 %v142_v10, %v162_v28  ;;  %v158_v30 = vpop.permute.xlu0 %157 }
  0x89   : > { %v180_v31 = vmax.f32 %v140_v11, %v158_v30 }
  0x8a   : > { %191 = vst.msk [vmem:[%s121_s17 + $0x18] sm:$0xff] %vm187_vm0, %v182_v29 }
  0x8b   : > { %189 = vst.msk [vmem:[%s121_s17 + $0x8] sm:$0xff] %vm187_vm0, %v180_v31  ;;  %v166_v32 = vpop.permute.xlu1 %165 }
  0x8c   : > { %v184_v33 = vmax.f32 %v144_v16, %v166_v32  ;;  %v164_v34 = vpop.permute.xlu0 %163 }
  0x8d   : > { %v183_v35 = vmax.f32 %v143_v17, %v164_v34 }
  0x8e   : > { %193 = vst.msk [vmem:[%s121_s17 + $0x28] sm:$0xff] %vm187_vm0, %v184_v33 }
  0x8f   : > { %192 = vst.msk [vmem:[%s121_s17 + $0x20] sm:$0xff] %vm187_vm0, %v183_v35  ;;  %v170_v36 = vpop.permute.xlu1 %169 }
  0x90   : > { %v186_v37 = vmax.f32 %v146_v22, %v170_v36  ;;  %v168_v38 = vpop.permute.xlu0 %167 }
  0x91   : > { %v185_v39 = vmax.f32 %v145_v23, %v168_v38 }
  0x92   : > { %195 = vst.msk [vmem:[%s121_s17 + $0x38] sm:$0xff] %vm187_vm0, %v186_v37 }
  0x93   : > { %194 = vst.msk [vmem:[%s121_s17 + $0x30] sm:$0xff] %vm187_vm0, %v185_v39 }
  0x94 PF: > { %s11_s6 = sadd.s32 1, %s280_s6  }
  0x95   : > { %p8_p4 = scmp.ge.s32.totalorder %s11_s6, 4  }
  0x97   :  { %10 = sbr.rel (!%p8_p4) target bundleno = 1 (0x1), region = 54 }

// kernel: unet_small_forward.14
= control target key start
LH: loop header
LB: loop body
LE: loop exit
PB: predicated region body
PF: predicated region fallthrough
CT: control target
= control target key end

     0   :  { %s1975_s12 = smov 0   ;;  %s1977_s13 = smov 0   ;;  %s2628_s0 = inlined_call_operand.vmem [shape: bf16[2,18,18,3], index: 0, kind: input, shape index: {}]   ;;  %s2629_s1 = inlined_call_operand.vmem [shape: bf16[27,24], index: 1, kind: input, shape index: {}]   ;;  %s2630_s2 = inlined_call_operand.vmem [shape: f32[512,24], index: 2, kind: output, shape index: {0}]   ;;  %s2631_s3 = inlined_call_operand.vmem [shape: f32[2,8,24], index: 3, kind: output, shape index: {1}]  }
   0x1   :  { %s1979_s14 = smov 0  }
   0x2 LB: > { %s26_s15 = sadd.s32 1, %s1940_s13  ;;  %p1731_p0 = scmp.ge.s32.totalorder %s1944_s14, 1  ;;  %s1944_s14 = sphi %s1979_s14, %s14_s14   ;;  %s1940_s13 = sphi %s1977_s13, %s2633_s13   ;;  %s1936_s12 = sphi %s1975_s12, %s2632_s12  }
   0x3   : > { %p28_p1 = scmp.ge.s32.totalorder %s26_s15, 2  ;;  %p156_p2 = scmp.lt.s32.totalorder %s1944_s14, 3 }
   0x5   : > { %s2635_s15 = smov (%p28_p1, %s26_s15), 0  ;;  %p157_p3 = pnand %p1731_p0, %p156_p2 }
   0x6   : > { %p186_p4 = scmp.lt.s32.totalorder (!%p157_p3), %s1936_s12, 1  ;;  %s1946_s21 = smov (!%p157_p3), 9  }
   0x7   : > { %160 = sbr.rel (%p157_p3) target bundleno = 611 (0x263), region = 28  ;;  %s1947_s22 = smov (!%p157_p3), 18  }
   0x8   : > { %s1948_s23 = smov (!%p157_p3), 6   ;;  %s1949_s24 = smov (!%p157_p3), 15  }
   0x9   : > { %s1950_s25 = smov (!%p157_p3), 3   ;;  %s1951_s26 = smov (!%p157_p3), 12  }
   0xa   : > { %s1952_s27 = smov (!%p157_p3), 21   ;;  %s1953_s28 = smov (!%p157_p3), 24  }
   0xb   : > { %s1733_s6 = sshll.u32 (!%p157_p3), %s1936_s12, 5 }
   0xc   : > { %s1997_s16 = scalar_select %p186_p4, %s1936_s12, 1  ;;  %vm291_vm0 = vcmask 1046528   ;;  %vm276_vm1 = vsmask.f32 7424  ;;  %v1904_v49 = vld [vmem:[%s2629_s1 + $0x8] sm:$0x3f]  }
   0xd   : > { %vm1248_vm2 = vcmask 1044480   ;;  %vm1249_vm3 = vcmask 1045504   ;;  %v1954_v50 = vmov 65535   ;;  %v1906_v56 = vld [vmem:[%s2629_s1] sm:$0xff]   ;;  %vm355_vm4 = vcmask 23552   ;;  %p193_p5 = scmp.lt.s32.totalorder %s1733_s6, 63 }
   0xe   : > { %s1850_s17 = smul.u32 216, %s1997_s16  ;;  %v1250_v51 = vsel %vm1248_vm2, 4294967295, %v1954_v50  ;;  %vm358_vm5 = vcmask 48128   ;;  %vm361_vm6 = vcmask 72704   ;;  %vm364_vm7 = vcmask 97280   ;;  %s1735_s11 = sshll.u32 %s1997_s16, 3 }
   0xf   : > { %v1251_v52 = vsel %vm1249_vm3, %v1250_v51, 0  ;;  %vm367_vm8 = vcmask 121856   ;;  %vm370_vm9 = vcmask 146432   ;;  %vm373_vm10 = vcmask 171008   ;;  %s2637_s6 = smov (!%p193_p5, %s1733_s6), 63  ;;  %s203_s18 = scalar_lea.vmem %s2631_s3, %s1735_s11 }
  0x10   : > { %s2003_s20 = scalar_lea.vmem %s2628_s0, %s1850_s17  ;;  %v1253_v55 = vand.u32 %v1904_v49, %v1251_v52  ;;  %vm376_vm11 = vcmask 195584   ;;  %vm1215_vm12 = vcmask 220160   ;;  %s1734_s7 = sshll.u32 %s2637_s6, 3  ;;  %vm1618_vm13 = vcmask 1040384  }
  0x11   : > { %v2006_v0 = vld [vmem:[%s2003_s20 + $0x18] sm:$0xff]   ;;  %v2009_v1 = vld [vmem:[%s2003_s20 + $0xc] sm:$0xff]   ;;  %v2016_v2 = vld [vmem:[%s2003_s20] sm:$0xff]   ;;  %s2462_s10 = scalar_lea.vmem %s2630_s2, %s1734_s7  ;;  %vm1620_vm14 = vcmask 1041408  }
  0x12   : > { %383 = vrot.lane.b32.xlu0 %v2006_v0, %s1946_s21  ;;  %302 = vrot.lane.b32.xlu1 %v2009_v1, %s1946_s21  ;;  %v1887_v3 = vld [vmem:[%s2003_s20 + $0x8] ss:$0 sps:$4 sm:$0x11]   ;;  %v1888_v4 = vld [vmem:[%s2003_s20 + $0x14] ss:$0 sps:$4 sm:$0x11]  }
  0x13   : > { %v321_v5 = vrot.slane %v2009_v1, 1  ;;  %v308_v6 = vshrl.u32 %v2009_v1, 16  ;;  %v310_v7 = vshll.u32 %v2009_v1, 16  ;;  %v292_v8 = vrot.slane %v2016_v2, 1  ;;  %v2039_v32 = vld [vmem:[%s2003_s20 + $0x24] sm:$0xff]   ;;  %v2061_v48 = vld [vmem:[%s2003_s20 + $0x30] sm:$0xff]   ;;  %1810 = vmatprep.subr.bf16.mxu0 %v1253_v55  ;;  %1846 = vmatprep.subr.bf16.mxu1 %v1253_v55 }
  0x14   : > { %v293_v9 = vrot.slane %v1887_v3, 1  ;;  %v278_v10 = vshrl.u32 %v2016_v2, 16  ;;  %v280_v11 = vshll.u32 %v2016_v2, 16  ;;  %v322_v12 = vrot.slane %v1888_v4, 1  ;;  %1811 = vmatpush3.bf16.msra.mxu0 %v1253_v55  ;;  %1848 = vmatpush3.bf16.msra.mxu1 %v1253_v55  ;;  %v2081_v62 = vld [vmem:[%s2003_s20 + $0x3c] sm:$0xff]   ;;  %v2157_v51 = vld [vmem:[%s2003_s20 + $0x6c] sm:$0xff]  }
  0x15   : > { %v312_v13 = vrot.slane %v310_v7, 1  ;;  %v315_v14 = vshll.u32 %v1888_v4, 16  ;;  %v285_v15 = vshll.u32 %v1887_v3, 16  ;;  %v1889_v18 = vld [vmem:[%s2003_s20 + $0x20] ss:$0 sps:$4 sm:$0x11]   ;;  %1812 = vmatprep.subr.bf16.mxu0 %v1906_v56  ;;  %1847 = vmatprep.subr.bf16.mxu1 %v1906_v56 }
  0x16   : > { %331 = vrot.lane.b32.xlu1 %v2006_v0, %s1947_s22  ;;  %v294_v16 = vsel %vm291_vm0, %v292_v8, %v293_v9  ;;  %v282_v17 = vrot.slane %v280_v11, 1  ;;  %v339_v19 = vshll.u32 %v2006_v0, 16  ;;  %v323_v20 = vsel %vm291_vm0, %v321_v5, %v322_v12  ;;  %v1891_v34 = vld [vmem:[%s2003_s20 + $0x2c] ss:$0 sps:$4 sm:$0x11]  }
  0x17   : > { %295 = vrot.lane.b32.xlu0 %v294_v16, %s1948_s23  ;;  %v313_v21 = vor.u32 %v312_v13, %v308_v6  ;;  %v317_v22 = vrot.slane %v315_v14, 1  ;;  %v337_v23 = vshrl.u32 %v2006_v0, 16  ;;  %v287_v25 = vrot.slane %v285_v15, 1  ;;  %v1893_v53 = vld [vmem:[%s2003_s20 + $0x38] ss:$0 sps:$4 sm:$0x11]  }
  0x18   : > { %v283_v24 = vor.u32 %v282_v17, %v278_v10  ;;  %v341_v26 = vrot.slane %v339_v19, 1  ;;  %v344_v27 = vshll.u32 %v1889_v18, 16  ;;  %v350_v33 = vrot.slane %v2006_v0, 1  ;;  %1813 = vmatpush3.bf16.msra.mxu0 %v1906_v56  ;;  %1849 = vmatpush3.bf16.msra.mxu1 %v1906_v56  ;;  %v1895_v5 = vld [vmem:[%s2003_s20 + $0x44] ss:$0 sps:$4 sm:$0x11]  }
  0x19   : > { %v318_v28 = vsel %vm276_vm1, %v313_v21, %v317_v22  ;;  %v351_v36 = vrot.slane %v1889_v18, 1  ;;  %v402_v37 = vshll.u32 %v2039_v32, 16  ;;  %v400_v39 = vshrl.u32 %v2039_v32, 16  ;;  %v2106_v17 = vld [vmem:[%s2003_s20 + $0x48] sm:$0xff]  }
  0x1a   : > { %324 = vrot.lane.b32.xlu1 %v323_v20, %s1949_s24  ;;  %v288_v29 = vsel %vm276_vm1, %v283_v24, %v287_v25  ;;  %v342_v30 = vor.u32 %v341_v26, %v337_v23  ;;  %v346_v31 = vrot.slane %v344_v27, 1  ;;  %v407_v41 = vshll.u32 %v1891_v34, 16  ;;  %v1897_v18 = vld [vmem:[%s2003_s20 + $0x50] ss:$0 sps:$4 sm:$0x11]   ;;  %v2119_v25 = vld [vmem:[%s2003_s20 + $0x54] sm:$0xff]  }
  0x1b   : > { %381 = vrot.lane.b32.xlu0 %v323_v20, %s1948_s23  ;;  %v352_v38 = vsel %vm291_vm0, %v350_v33, %v351_v36  ;;  %v404_v40 = vrot.slane %v402_v37, 1  ;;  %v413_v42 = vrot.slane %v2039_v32, 1  ;;  %v414_v43 = vrot.slane %v1891_v34, 1  ;;  %v1903_v55 = vld [vmem:[%s2003_s20 + $0x74] ss:$0 sps:$4 sm:$0x11]  }
  0x1c   : > { %v347_v35 = vsel %vm276_vm1, %v342_v30, %v346_v31  ;;  %v409_v45 = vrot.slane %v407_v41, 1  ;;  %v457_v54 = vshll.u32 %v2061_v48, 16  ;;  %v455_v57 = vshrl.u32 %v2061_v48, 16 }
  0x1d   : > { %v405_v44 = vor.u32 %v404_v40, %v400_v39  ;;  %v415_v46 = vsel %vm291_vm0, %v413_v42, %v414_v43  ;;  %v462_v59 = vshll.u32 %v1893_v53, 16  ;;  %v468_v3 = vrot.slane %v2061_v48, 1  ;;  %v2144_v42 = vld [vmem:[%s2003_s20 + $0x60] sm:$0xff]   ;;  %v1901_v43 = vld [vmem:[%s2003_s20 + $0x68] ss:$0 sps:$4 sm:$0x11]  }
  0x1e   : > { %379 = vrot.lane.b32.xlu1 %v318_v28, %s1950_s25  ;;  %v459_v58 = vrot.slane %v457_v54, 1  ;;  %v469_v4 = vrot.slane %v1893_v53, 1  ;;  %v512_v6 = vshll.u32 %v2081_v62, 16  ;;  %v510_v8 = vshrl.u32 %v2081_v62, 16 }
  0x1f   : > { %289 = vrot.lane.b32.xlu0 %v288_v29, %s1950_s25  ;;  %v410_v47 = vsel %vm276_vm1, %v405_v44, %v409_v45  ;;  %v464_v61 = vrot.slane %v462_v59, 1  ;;  %v517_v10 = vshll.u32 %v1895_v5, 16  ;;  %v523_v11 = vrot.slane %v2081_v62, 1  ;;  %v1899_v29 = vld [vmem:[%s2003_s20 + $0x5c] ss:$0 sps:$4 sm:$0x11]  }
  0x20   : > { %v460_v60 = vor.u32 %v459_v58, %v455_v57  ;;  %v470_v7 = vsel %vm291_vm0, %v468_v3, %v469_v4  ;;  %v514_v9 = vrot.slane %v512_v6, 1  ;;  %v524_v12 = vrot.slane %v1895_v5, 1 }
  0x21   : > { %v519_v14 = vrot.slane %v517_v10, 1  ;;  %v567_v19 = vshll.u32 %v2106_v17, 16  ;;  %v565_v20 = vshrl.u32 %v2106_v17, 16  ;;  %v572_v22 = vshll.u32 %v1897_v18, 16 }
  0x22   : > { %319 = vrot.lane.b32.xlu1 %v318_v28, %s1951_s26  ;;  %v465_v63 = vsel %vm276_vm1, %v460_v60, %v464_v61  ;;  %v515_v13 = vor.u32 %v514_v9, %v510_v8  ;;  %v525_v15 = vsel %vm291_vm0, %v523_v11, %v524_v12  ;;  %v578_v27 = vrot.slane %v2106_v17, 1 }
  0x23   : > { %385 = vrot.lane.b32.xlu0 %v347_v35, %s1951_s26  ;;  %v569_v21 = vrot.slane %v567_v19, 1  ;;  %v574_v24 = vrot.slane %v572_v22, 1  ;;  %v579_v28 = vrot.slane %v1897_v18, 1  ;;  %v622_v30 = vshll.u32 %v2119_v25, 16 }
  0x24   : > { %v520_v16 = vsel %vm276_vm1, %v515_v13, %v519_v14  ;;  %v620_v33 = vshrl.u32 %v2119_v25, 16  ;;  %v633_v36 = vrot.slane %v2119_v25, 1  ;;  %v634_v37 = vrot.slane %v1899_v29, 1  ;;  %v2182_v14 = vld [vmem:[%s2003_s20 + $0x78] sm:$0xff]  }
  0x25   : > { %v570_v23 = vor.u32 %v569_v21, %v565_v20  ;;  %v580_v31 = vsel %vm291_vm0, %v578_v27, %v579_v28  ;;  %v624_v34 = vrot.slane %v622_v30, 1  ;;  %v677_v44 = vshll.u32 %v2144_v42, 16  ;;  %v1907_v21 = vld [vmem:[%s2003_s20 + $0x80] ss:$0 sps:$4 sm:$0x11]  }
  0x26   : > { %348 = vrot.lane.b32.xlu1 %v347_v35, %s1952_s27  ;;  %v635_v40 = vsel %vm291_vm0, %v633_v36, %v634_v37  ;;  %v675_v45 = vshrl.u32 %v2144_v42, 16  ;;  %v688_v53 = vrot.slane %v2144_v42, 1  ;;  %v689_v54 = vrot.slane %v1901_v43, 1 }
  0x27   : > { %387 = vrot.lane.b32.xlu0 %v352_v38, %s1949_s24  ;;  %v575_v26 = vsel %vm276_vm1, %v570_v23, %v574_v24  ;;  %v732_v56 = vshll.u32 %v2157_v51, 16  ;;  %v730_v60 = vshrl.u32 %v2157_v51, 16  ;;  %v743_v3 = vrot.slane %v2157_v51, 1 }
  0x28   : > { %v690_v59 = vsel %vm291_vm0, %v688_v53, %v689_v54  ;;  %v744_v4 = vrot.slane %v1903_v55, 1  ;;  %v787_v22 = vshll.u32 %v2182_v14, 16  ;;  %v785_v28 = vshrl.u32 %v2182_v14, 16 }
  0x29   : > { %v734_v61 = vrot.slane %v732_v56, 1  ;;  %v792_v30 = vshll.u32 %v1907_v21, 16 }
  0x2a   : > { %353 = vrot.lane.b32.xlu1 %v352_v38, %s1953_s28  ;;  %v745_v9 = vsel %vm291_vm0, %v743_v3, %v744_v4 }
  0x2b   : > { %394 = vrot.lane.b32.xlu0 %v2039_v32, %s1947_s22  ;;  %v735_v6 = vor.u32 %v734_v61, %v730_v60 }
  0x2e   : > { %416 = vrot.lane.b32.xlu1 %v415_v46, %s1953_s28 }
  0x2f   : > { %411 = vrot.lane.b32.xlu0 %v410_v47, %s1952_s27 }
  0x32   : > { %436 = vrot.lane.b32.xlu1 %v352_v38, %s1948_s23  ;;  %v625_v38 = vor.u32 %v624_v34, %v620_v33 }
  0x33   : > { %434 = vrot.lane.b32.xlu0 %v347_v35, %s1950_s25  ;;  %v627_v35 = vshll.u32 %v1899_v29, 16  ;;  %v789_v29 = vrot.slane %v787_v22, 1 }
  0x35   : > { %v629_v39 = vrot.slane %v627_v35, 1  ;;  %v790_v37 = vor.u32 %v789_v29, %v785_v28 }
  0x36   : > { %438 = vrot.lane.b32.xlu1 %v2039_v32, %s1946_s21 }
  0x37   : > { %489 = vrot.lane.b32.xlu0 %v410_v47, %s1950_s25  ;;  %v630_v41 = vsel %vm276_vm1, %v625_v38, %v629_v39  ;;  %v794_v38 = vrot.slane %v792_v30, 1  ;;  %v2207_v39 = vld [vmem:[%s2003_s20 + $0x84] sm:$0xff]  }
  0x38   : > { %v853_v3 = vrot.slane %v2207_v39, 1 }
  0x3a   : > { %440 = vrot.lane.b32.xlu1 %v410_v47, %s1951_s26  ;;  %v682_v47 = vshll.u32 %v1901_v43, 16 }
  0x3b   : > { %491 = vrot.lane.b32.xlu0 %v415_v46, %s1948_s23 }
  0x3c   : > { %v684_v50 = vrot.slane %v682_v47, 1  ;;  %v795_v47 = vsel %vm276_vm1, %v790_v37, %v794_v38  ;;  %v2263_v37 = vld [vmem:[%s2003_s20 + $0x9c] sm:$0xff]  }
  0x3e   : > { %442 = vrot.lane.b32.xlu1 %v415_v46, %s1949_s24  ;;  %v679_v46 = vrot.slane %v677_v44, 1  ;;  %v798_v44 = vrot.slane %v2182_v14, 1 }
  0x3f   : > { %493 = vrot.lane.b32.xlu0 %v2061_v48, %s1946_s21 }
  0x40   : > { %v680_v49 = vor.u32 %v679_v46, %v675_v45 }
  0x42   : > { %449 = vrot.lane.b32.xlu1 %v2061_v48, %s1947_s22  ;;  %v685_v52 = vsel %vm276_vm1, %v680_v49, %v684_v50  ;;  %v799_v49 = vrot.slane %v1907_v21, 1  ;;  %v1909_v50 = vld [vmem:[%s2003_s20 + $0x8c] ss:$0 sps:$4 sm:$0x11]  }
  0x43   : > { %495 = vrot.lane.b32.xlu0 %v465_v63, %s1951_s26  ;;  %v847_v61 = vshll.u32 %v1909_v50, 16  ;;  %v854_v4 = vrot.slane %v1909_v50, 1  ;;  %v1913_v50 = vld [vmem:[%s2003_s20 + $0xa4] ss:$0 sps:$4 sm:$0x11]  }
  0x46   : > { %466 = vrot.lane.b32.xlu1 %v465_v63, %s1952_s27 }
  0x47   : > { %497 = vrot.lane.b32.xlu0 %v470_v7, %s1949_s24 }
  0x4a   : > { %471 = vrot.lane.b32.xlu1 %v470_v7, %s1953_s28 }
  0x4b   : > { %504 = vrot.lane.b32.xlu0 %v2081_v62, %s1947_s22 }
  0x4e   : > { %526 = vrot.lane.b32.xlu1 %v525_v15, %s1953_s28 }
  0x4f   : > { %521 = vrot.lane.b32.xlu0 %v520_v16, %s1952_s27 }
  0x52   : > { %546 = vrot.lane.b32.xlu1 %v470_v7, %s1948_s23 }
  0x53   : > { %544 = vrot.lane.b32.xlu0 %v465_v63, %s1950_s25  ;;  %v737_v63 = vshll.u32 %v1903_v55, 16 }
  0x55   : > { %v739_v7 = vrot.slane %v737_v63, 1 }
  0x56   : > { %548 = vrot.lane.b32.xlu1 %v2081_v62, %s1946_s21 }
  0x57   : > { %599 = vrot.lane.b32.xlu0 %v520_v16, %s1950_s25  ;;  %v740_v11 = vsel %vm276_vm1, %v735_v6, %v739_v7  ;;  %v849_v7 = vrot.slane %v847_v61, 1  ;;  %v957_v61 = vshll.u32 %v1913_v50, 16 }
  0x5a   : > { %550 = vrot.lane.b32.xlu1 %v520_v16, %s1951_s26 }
  0x5b   : > { %601 = vrot.lane.b32.xlu0 %v525_v15, %s1948_s23 }
  0x5e   : > { %552 = vrot.lane.b32.xlu1 %v525_v15, %s1949_s24 }
  0x5f   : > { %603 = vrot.lane.b32.xlu0 %v2106_v17, %s1946_s21 }
  0x62   : > { %559 = vrot.lane.b32.xlu1 %v2106_v17, %s1947_s22 }
  0x63   : > { %605 = vrot.lane.b32.xlu0 %v575_v26, %s1951_s26 }
  0x66   : > { %576 = vrot.lane.b32.xlu1 %v575_v26, %s1952_s27 }
  0x67   : > { %607 = vrot.lane.b32.xlu0 %v580_v31, %s1949_s24 }
  0x6a   : > { %581 = vrot.lane.b32.xlu1 %v580_v31, %s1953_s28 }
  0x6b   : > { %614 = vrot.lane.b32.xlu0 %v2119_v25, %s1947_s22 }
  0x6e   : > { %636 = vrot.lane.b32.xlu1 %v635_v40, %s1953_s28 }
  0x6f   : > { %631 = vrot.lane.b32.xlu0 %v630_v41, %s1952_s27 }
  0x72   : > { %656 = vrot.lane.b32.xlu1 %v580_v31, %s1948_s23 }
  0x73   : > { %654 = vrot.lane.b32.xlu0 %v575_v26, %s1950_s25 }
  0x76   : > { %658 = vrot.lane.b32.xlu1 %v2119_v25, %s1946_s21 }
  0x77   : > { %709 = vrot.lane.b32.xlu0 %v630_v41, %s1950_s25 }
  0x7a   : > { %660 = vrot.lane.b32.xlu1 %v630_v41, %s1951_s26 }
  0x7b   : > { %711 = vrot.lane.b32.xlu0 %v635_v40, %s1948_s23 }
  0x7e   : > { %662 = vrot.lane.b32.xlu1 %v635_v40, %s1949_s24 }
  0x7f   : > { %713 = vrot.lane.b32.xlu0 %v2144_v42, %s1946_s21 }
  0x82   : > { %669 = vrot.lane.b32.xlu1 %v2144_v42, %s1947_s22 }
  0x83   : > { %715 = vrot.lane.b32.xlu0 %v685_v52, %s1951_s26 }
  0x84   : > { %v384_v57 = vpop.permute.xlu0 %383  ;;  %v303_v58 = vpop.permute.xlu1 %302 }
  0x86   : > { %686 = vrot.lane.b32.xlu1 %v685_v52, %s1952_s27 }
  0x87   : > { %717 = vrot.lane.b32.xlu0 %v690_v59, %s1949_s24 }
  0x88   : > { %v332_v5 = vpop.permute.xlu1 %331 }
  0x89   : > { %v296_v8 = vpop.permute.xlu0 %295 }
  0x8a   : > { %691 = vrot.lane.b32.xlu1 %v690_v59, %s1953_s28 }
  0x8b   : > { %724 = vrot.lane.b32.xlu0 %v2157_v51, %s1947_s22 }
  0x8c   : > { %v325_v10 = vpop.permute.xlu1 %324 }
  0x8d   : > { %v382_v12 = vpop.permute.xlu0 %381 }
  0x8e   : > { %746 = vrot.lane.b32.xlu1 %v745_v9, %s1953_s28 }
  0x8f   : > { %741 = vrot.lane.b32.xlu0 %v740_v11, %s1952_s27 }
  0x90   : > { %v380_v13 = vpop.permute.xlu1 %379 }
  0x91   : > { %v290_v15 = vpop.permute.xlu0 %289 }
  0x92   : > { %v357_v16 = vsel %vm355_vm4, %v2016_v2, %v290_v15  ;;  %766 = vrot.lane.b32.xlu1 %v690_v59, %s1948_s23  ;;  %v419_v2 = vsel %vm355_vm4, %v2009_v1, %v380_v13  ;;  %v840_v59 = vshrl.u32 %v2207_v39, 16  ;;  %v2240_v13 = vld [vmem:[%s2003_s20 + $0x90] sm:$0xff]  }
  0x93   : > { %v360_v18 = vsel %vm358_vm5, %v357_v16, %v296_v8  ;;  %764 = vrot.lane.b32.xlu0 %v685_v52, %s1950_s25  ;;  %v421_v31 = vsel %vm358_vm5, %v419_v2, %v382_v12  ;;  %v842_v52 = vshll.u32 %v2207_v39, 16 }
  0x94   : > { %v320_v19 = vpop.permute.xlu1 %319  ;;  %v363_v20 = vsel %vm361_vm6, %v360_v18, %v303_v58  ;;  %v423_v34 = vsel %vm361_vm6, %v421_v31, %v384_v57  ;;  %v800_v58 = vsel %vm291_vm0, %v798_v44, %v799_v49  ;;  %v1911_v18 = vld [vmem:[%s2003_s20 + $0x98] ss:$0 sps:$4 sm:$0x11]  }
  0x95   : > { %v366_v23 = vsel %vm364_vm7, %v363_v20, %v320_v19  ;;  %v386_v24 = vpop.permute.xlu0 %385  ;;  %v844_v60 = vrot.slane %v842_v52, 1  ;;  %v897_v19 = vshll.u32 %v2240_v13, 16  ;;  %v909_v49 = vrot.slane %v1911_v18, 1 }
  0x96   : > { %v369_v26 = vsel %vm367_vm8, %v366_v23, %v325_v10  ;;  %768 = vrot.lane.b32.xlu1 %v2157_v51, %s1946_s21  ;;  %v425_v43 = vsel %vm364_vm7, %v423_v34, %v386_v24  ;;  %v895_v24 = vshrl.u32 %v2240_v13, 16  ;;  %v952_v52 = vshll.u32 %v2263_v37, 16 }
  0x97   : > { %819 = vrot.lane.b32.xlu0 %v740_v11, %s1950_s25  ;;  %v372_v33 = vsel %vm370_vm9, %v369_v26, %v332_v5  ;;  %v845_v6 = vor.u32 %v844_v60, %v840_v59  ;;  %v899_v2 = vrot.slane %v897_v19, 1  ;;  %v902_v26 = vshll.u32 %v1911_v18, 16  ;;  %v1915_v19 = vld [vmem:[%s2003_s20 + $0xb0] ss:$0 sps:$4 sm:$0x11]  }
  0x98   : > { %v349_v27 = vpop.permute.xlu1 %348  ;;  %v950_v59 = vshrl.u32 %v2263_v37, 16  ;;  %v954_v60 = vrot.slane %v952_v52, 1 }
  0x99   : > { %v388_v1 = vpop.permute.xlu0 %387  ;;  %v375_v35 = vsel %vm373_vm10, %v372_v33, %v349_v27  ;;  %v900_v33 = vor.u32 %v899_v2, %v895_v24 }
  0x9a   : > { %770 = vrot.lane.b32.xlu1 %v740_v11, %s1951_s26  ;;  %v427_v45 = vsel %vm367_vm8, %v425_v43, %v388_v1  ;;  %v850_v11 = vsel %vm276_vm1, %v845_v6, %v849_v7  ;;  %v904_v1 = vrot.slane %v902_v26, 1  ;;  %v955_v6 = vor.u32 %v954_v60, %v950_v59 }
  0x9b   : > { %821 = vrot.lane.b32.xlu0 %v745_v9, %s1948_s23  ;;  %v959_v7 = vrot.slane %v957_v61, 1 }
  0x9c   : > { %v354_v36 = vpop.permute.xlu1 %353 }
  0x9d   : > { %v395_v40 = vpop.permute.xlu0 %394  ;;  %v378_v41 = vsel %vm376_vm11, %v375_v35, %v354_v36 }
  0x9e   : > { %772 = vrot.lane.b32.xlu1 %v745_v9, %s1949_s24  ;;  %1814 = vmatprep.mubr.msk.bf16.mxu0 %vm1215_vm12, %v378_v41  ;;  %v429_v53 = vsel %vm370_vm9, %v427_v45, %v395_v40  ;;  %v855_v9 = vsel %vm291_vm0, %v853_v3, %v854_v4  ;;  %v963_v3 = vrot.slane %v2263_v37, 1  ;;  %v964_v4 = vrot.slane %v1913_v50, 1  ;;  %v1917_v50 = vld [vmem:[%s2003_s20 + $0xbc] ss:$0 sps:$4 sm:$0x11]  }
  0x9f   : > { %823 = vrot.lane.b32.xlu0 %v2182_v14, %s1946_s21  ;;  %v1067_v61 = vshll.u32 %v1917_v50, 16 }
  0xa0   : > { %v417_v46 = vpop.permute.xlu1 %416 }
  0xa1   : > { %v412_v54 = vpop.permute.xlu0 %411 }
  0xa2   : > { %v431_v55 = vsel %vm373_vm10, %v429_v53, %v412_v54  ;;  %779 = vrot.lane.b32.xlu1 %v2182_v14, %s1947_s22 }
  0xa3   : > { %825 = vrot.lane.b32.xlu0 %v795_v47, %s1951_s26  ;;  %v433_v56 = vsel %vm376_vm11, %v431_v55, %v417_v46 }
  0xa4   : > { %1815 = vmatmul.mubr.msk.bf16.vlgmr.msra.gmra.mxu0 %vm1215_vm12, %v433_v56  ;;  %v437_v57 = vpop.permute.xlu1 %436 }
  0xa5   : > { %v435_v63 = vpop.permute.xlu0 %434 }
  0xa6   : > { %796 = vrot.lane.b32.xlu1 %v795_v47, %s1952_s27  ;;  %v474_v20 = vsel %vm355_vm4, %v2006_v0, %v435_v63 }
  0xa7   : > { %827 = vrot.lane.b32.xlu0 %v800_v58, %s1949_s24  ;;  %v476_v23 = vsel %vm358_vm5, %v474_v20, %v437_v57 }
  0xa8   : > { %v439_v5 = vpop.permute.xlu1 %438 }
  0xa9   : > { %v490_v8 = vpop.permute.xlu0 %489  ;;  %v478_v27 = vsel %vm361_vm6, %v476_v23, %v439_v5 }
  0xaa   : > { %801 = vrot.lane.b32.xlu1 %v800_v58, %s1953_s28  ;;  %v529_v34 = vsel %vm355_vm4, %v2039_v32, %v490_v8  ;;  %v905_v32 = vsel %vm276_vm1, %v900_v33, %v904_v1 }
  0xab   : > { %834 = vrot.lane.b32.xlu0 %v2207_v39, %s1947_s22 }
  0xac   : > { %v441_v10 = vpop.permute.xlu1 %440 }
  0xad   : > { %v492_v12 = vpop.permute.xlu0 %491  ;;  %v480_v29 = vsel %vm364_vm7, %v478_v27, %v441_v10  ;;  %v1012_v27 = vshll.u32 %v1915_v19, 16 }
  0xae   : > { %856 = vrot.lane.b32.xlu1 %v855_v9, %s1953_s28  ;;  %v531_v38 = vsel %vm358_vm5, %v529_v34, %v492_v12 }
  0xaf   : > { %851 = vrot.lane.b32.xlu0 %v850_v11, %s1952_s27  ;;  %v1014_v1 = vrot.slane %v1012_v27, 1 }
  0xb0   : > { %v443_v15 = vpop.permute.xlu1 %442 }
  0xb1   : > { %v494_v16 = vpop.permute.xlu0 %493  ;;  %v482_v30 = vsel %vm367_vm8, %v480_v29, %v443_v15  ;;  %v2298_v15 = vld [vmem:[%s2003_s20 + $0xa8] sm:$0xff]  }
  0xb2   : > { %876 = vrot.lane.b32.xlu1 %v800_v58, %s1948_s23  ;;  %v533_v43 = vsel %vm361_vm6, %v531_v38, %v494_v16  ;;  %v1007_v20 = vshll.u32 %v2298_v15, 16  ;;  %v1005_v2 = vshrl.u32 %v2298_v15, 16  ;;  %v2321_v38 = vld [vmem:[%s2003_s20 + $0xb4] sm:$0xff]  }
  0xb3   : > { %874 = vrot.lane.b32.xlu0 %v795_v47, %s1950_s25  ;;  %v908_v47 = vrot.slane %v2240_v13, 1  ;;  %v1062_v52 = vshll.u32 %v2321_v38, 16  ;;  %v1060_v59 = vshrl.u32 %v2321_v38, 16 }
  0xb4   : > { %v450_v21 = vpop.permute.xlu1 %449  ;;  %v1009_v26 = vrot.slane %v1007_v20, 1  ;;  %v1919_v20 = vld [vmem:[%s2003_s20 + $0xc8] ss:$0 sps:$4 sm:$0x11]  }
  0xb5   : > { %v496_v22 = vpop.permute.xlu0 %495  ;;  %v484_v31 = vsel %vm370_vm9, %v482_v30, %v450_v21  ;;  %v910_v58 = vsel %vm291_vm0, %v908_v47, %v909_v49  ;;  %v1018_v47 = vrot.slane %v2298_v15, 1  ;;  %v1019_v49 = vrot.slane %v1915_v19, 1 }
  0xb6   : > { %878 = vrot.lane.b32.xlu1 %v2207_v39, %s1946_s21  ;;  %v535_v44 = vsel %vm364_vm7, %v533_v43, %v496_v22  ;;  %v1010_v33 = vor.u32 %v1009_v26, %v1005_v2  ;;  %v1064_v60 = vrot.slane %v1062_v52, 1 }
  0xb7   : > { %929 = vrot.lane.b32.xlu0 %v850_v11, %s1950_s25 }
  0xb8   : > { %v467_v28 = vpop.permute.xlu1 %466 }
  0xb9   : > { %v498_v0 = vpop.permute.xlu0 %497  ;;  %v486_v35 = vsel %vm373_vm10, %v484_v31, %v467_v28 }
  0xba   : > { %880 = vrot.lane.b32.xlu1 %v850_v11, %s1951_s26  ;;  %v537_v45 = vsel %vm367_vm8, %v535_v44, %v498_v0  ;;  %v960_v11 = vsel %vm276_vm1, %v955_v6, %v959_v7  ;;  %v1065_v6 = vor.u32 %v1064_v60, %v1060_v59  ;;  %v1069_v7 = vrot.slane %v1067_v61, 1 }
  0xbb   : > { %931 = vrot.lane.b32.xlu0 %v855_v9, %s1948_s23 }
  0xbc   : > { %v472_v36 = vpop.permute.xlu1 %471 }
  0xbd   : > { %v488_v40 = vsel %vm376_vm11, %v486_v35, %v472_v36  ;;  %v505_v41 = vpop.permute.xlu0 %504 }
  0xbe   : > { %882 = vrot.lane.b32.xlu1 %v855_v9, %s1949_s24  ;;  %1818 = vmatprep.mubr.msk.bf16.mxu0 %vm1215_vm12, %v488_v40  ;;  %v539_v53 = vsel %vm370_vm9, %v537_v45, %v505_v41  ;;  %v965_v9 = vsel %vm291_vm0, %v963_v3, %v964_v4  ;;  %v1073_v3 = vrot.slane %v2321_v38, 1  ;;  %v1074_v4 = vrot.slane %v1917_v50, 1  ;;  %v1921_v50 = vld [vmem:[%s2003_s20 + $0xd4] ss:$0 sps:$4 sm:$0x11]  }
  0xbf   : > { %933 = vrot.lane.b32.xlu0 %v2240_v13, %s1946_s21  ;;  %v1177_v61 = vshll.u32 %v1921_v50, 16 }
  0xc0   : > { %v527_v46 = vpop.permute.xlu1 %526 }
  0xc1   : > { %v522_v54 = vpop.permute.xlu0 %521 }
  0xc2   : > { %v541_v55 = vsel %vm373_vm10, %v539_v53, %v522_v54  ;;  %889 = vrot.lane.b32.xlu1 %v2240_v13, %s1947_s22 }
  0xc3   : > { %935 = vrot.lane.b32.xlu0 %v905_v32, %s1951_s26  ;;  %v543_v56 = vsel %vm376_vm11, %v541_v55, %v527_v46 }
  0xc4   : > { %1819 = vmatmul.mubr.msk.bf16.gmra.mxu0 %vm1215_vm12, %v543_v56  ;;  %v547_v57 = vpop.permute.xlu1 %546 }
  0xc5   : > { %v545_v63 = vpop.permute.xlu0 %544 }
  0xc6   : > { %906 = vrot.lane.b32.xlu1 %v905_v32, %s1952_s27  ;;  %v584_v21 = vsel %vm355_vm4, %v2061_v48, %v545_v63 }
  0xc7   : > { %937 = vrot.lane.b32.xlu0 %v910_v58, %s1949_s24  ;;  %v586_v24 = vsel %vm358_vm5, %v584_v21, %v547_v57 }
  0xc8   : > { %v549_v5 = vpop.permute.xlu1 %548 }
  0xc9   : > { %v600_v8 = vpop.permute.xlu0 %599  ;;  %v588_v28 = vsel %vm361_vm6, %v586_v24, %v549_v5 }
  0xca   : > { %911 = vrot.lane.b32.xlu1 %v910_v58, %s1953_s28  ;;  %v639_v34 = vsel %vm355_vm4, %v2081_v62, %v600_v8  ;;  %v1015_v62 = vsel %vm276_vm1, %v1010_v33, %v1014_v1 }
  0xcb   : > { %944 = vrot.lane.b32.xlu0 %v2263_v37, %s1947_s22 }
  0xcc   : > { %v551_v10 = vpop.permute.xlu1 %550 }
  0xcd   : > { %v602_v12 = vpop.permute.xlu0 %601  ;;  %v590_v0 = vsel %vm364_vm7, %v588_v28, %v551_v10  ;;  %v1122_v28 = vshll.u32 %v1919_v20, 16 }
  0xce   : > { %966 = vrot.lane.b32.xlu1 %v965_v9, %s1953_s28  ;;  %v641_v40 = vsel %vm358_vm5, %v639_v34, %v602_v12 }
  0xcf   : > { %961 = vrot.lane.b32.xlu0 %v960_v11, %s1952_s27  ;;  %v1124_v1 = vrot.slane %v1122_v28, 1 }
  0xd0   : > { %v553_v16 = vpop.permute.xlu1 %552 }
  0xd1   : > { %v604_v18 = vpop.permute.xlu0 %603  ;;  %v592_v30 = vsel %vm367_vm8, %v590_v0, %v553_v16  ;;  %v1918_v16 = vld [vmem:[%s2003_s20 + $0xc0] sm:$0xff]  }
  0xd2   : > { %986 = vrot.lane.b32.xlu1 %v910_v58, %s1948_s23  ;;  %v643_v44 = vsel %vm361_vm6, %v641_v40, %v604_v18  ;;  %v1020_v58 = vsel %vm291_vm0, %v1018_v47, %v1019_v49  ;;  %v1117_v21 = vshll.u32 %v1918_v16, 16  ;;  %v1115_v26 = vshrl.u32 %v1918_v16, 16  ;;  %v1920_v40 = vld [vmem:[%s2003_s20 + $0xcc] sm:$0xff]  }
  0xd3   : > { %984 = vrot.lane.b32.xlu0 %v905_v32, %s1950_s25  ;;  %v1128_v47 = vrot.slane %v1918_v16, 1  ;;  %v1129_v49 = vrot.slane %v1919_v20, 1  ;;  %v1172_v52 = vshll.u32 %v1920_v40, 16  ;;  %v1170_v59 = vshrl.u32 %v1920_v40, 16 }
  0xd4   : > { %v560_v22 = vpop.permute.xlu1 %559  ;;  %v1119_v27 = vrot.slane %v1117_v21, 1 }
  0xd5   : > { %v606_v23 = vpop.permute.xlu0 %605  ;;  %v594_v31 = vsel %vm370_vm9, %v592_v30, %v560_v22  ;;  %v1174_v60 = vrot.slane %v1172_v52, 1 }
  0xd6   : > { %988 = vrot.lane.b32.xlu1 %v2263_v37, %s1946_s21  ;;  %v645_v32 = vsel %vm364_vm7, %v643_v44, %v606_v23  ;;  %v1120_v33 = vor.u32 %v1119_v27, %v1115_v26 }
  0xd7   : > { %1039 = vrot.lane.b32.xlu0 %v960_v11, %s1950_s25 }
  0xd8   : > { %v577_v29 = vpop.permute.xlu1 %576 }
  0xd9   : > { %v608_v48 = vpop.permute.xlu0 %607  ;;  %v596_v35 = vsel %vm373_vm10, %v594_v31, %v577_v29 }
  0xda   : > { %990 = vrot.lane.b32.xlu1 %v960_v11, %s1951_s26  ;;  %v647_v45 = vsel %vm367_vm8, %v645_v32, %v608_v48  ;;  %v1070_v11 = vsel %vm276_vm1, %v1065_v6, %v1069_v7  ;;  %v1175_v6 = vor.u32 %v1174_v60, %v1170_v59  ;;  %v1179_v7 = vrot.slane %v1177_v61, 1 }
  0xdb   : > { %1041 = vrot.lane.b32.xlu0 %v965_v9, %s1948_s23 }
  0xdc   : > { %v582_v36 = vpop.permute.xlu1 %581 }
  0xdd   : > { %v598_v41 = vsel %vm376_vm11, %v596_v35, %v582_v36  ;;  %v615_v43 = vpop.permute.xlu0 %614 }
  0xde   : > { %992 = vrot.lane.b32.xlu1 %v965_v9, %s1949_s24  ;;  %1822 = vmatprep.mubr.msk.bf16.mxu0 %vm1215_vm12, %v598_v41  ;;  %v649_v53 = vsel %vm370_vm9, %v647_v45, %v615_v43  ;;  %v1075_v9 = vsel %vm291_vm0, %v1073_v3, %v1074_v4  ;;  %v1183_v3 = vrot.slane %v1920_v40, 1  ;;  %v1184_v4 = vrot.slane %v1921_v50, 1 }
  0xdf   : > { %1043 = vrot.lane.b32.xlu0 %v2298_v15, %s1946_s21 }
  0xe0   : > { %v637_v46 = vpop.permute.xlu1 %636 }
  0xe1   : > { %v632_v54 = vpop.permute.xlu0 %631 }
  0xe2   : > { %v651_v55 = vsel %vm373_vm10, %v649_v53, %v632_v54  ;;  %999 = vrot.lane.b32.xlu1 %v2298_v15, %s1947_s22 }
  0xe3   : > { %1045 = vrot.lane.b32.xlu0 %v1015_v62, %s1951_s26  ;;  %v653_v56 = vsel %vm376_vm11, %v651_v55, %v637_v46 }
  0xe4   : > { %1823 = vmatmul.mubr.msk.bf16.gmra.mxu0 %vm1215_vm12, %v653_v56  ;;  %v657_v57 = vpop.permute.xlu1 %656 }
  0xe5   : > { %v655_v63 = vpop.permute.xlu0 %654 }
  0xe6   : > { %1016 = vrot.lane.b32.xlu1 %v1015_v62, %s1952_s27  ;;  %v694_v22 = vsel %vm355_vm4, %v2106_v17, %v655_v63 }
  0xe7   : > { %1047 = vrot.lane.b32.xlu0 %v1020_v58, %s1949_s24  ;;  %v696_v2 = vsel %vm358_vm5, %v694_v22, %v657_v57 }
  0xe8   : > { %v659_v5 = vpop.permute.xlu1 %658 }
  0xe9   : > { %v710_v8 = vpop.permute.xlu0 %709  ;;  %v698_v29 = vsel %vm361_vm6, %v696_v2, %v659_v5 }
  0xea   : > { %1021 = vrot.lane.b32.xlu1 %v1020_v58, %s1953_s28  ;;  %v749_v34 = vsel %vm355_vm4, %v2119_v25, %v710_v8  ;;  %v1125_v25 = vsel %vm276_vm1, %v1120_v33, %v1124_v1 }
  0xeb   : > { %1054 = vrot.lane.b32.xlu0 %v2321_v38, %s1947_s22 }
  0xec   : > { %v661_v10 = vpop.permute.xlu1 %660 }
  0xed   : > { %v712_v12 = vpop.permute.xlu0 %711  ;;  %v700_v48 = vsel %vm364_vm7, %v698_v29, %v661_v10 }
  0xee   : > { %1076 = vrot.lane.b32.xlu1 %v1075_v9, %s1953_s28  ;;  %v751_v41 = vsel %vm358_vm5, %v749_v34, %v712_v12 }
  0xef   : > { %1071 = vrot.lane.b32.xlu0 %v1070_v11, %s1952_s27 }
  0xf0   : > { %v663_v18 = vpop.permute.xlu1 %662 }
  0xf1   : > { %v714_v19 = vpop.permute.xlu0 %713  ;;  %v702_v17 = vsel %vm367_vm8, %v700_v48, %v663_v18 }
  0xf2   : > { %1096 = vrot.lane.b32.xlu1 %v1020_v58, %s1948_s23  ;;  %v753_v32 = vsel %vm361_vm6, %v751_v41, %v714_v19  ;;  %v1130_v58 = vsel %vm291_vm0, %v1128_v47, %v1129_v49 }
  0xf3   : > { %1094 = vrot.lane.b32.xlu0 %v1015_v62, %s1950_s25 }
  0xf4   : > { %v670_v23 = vpop.permute.xlu1 %669 }
  0xf5   : > { %v716_v24 = vpop.permute.xlu0 %715  ;;  %v704_v31 = vsel %vm370_vm9, %v702_v17, %v670_v23 }
  0xf6   : > { %1098 = vrot.lane.b32.xlu1 %v2321_v38, %s1946_s21  ;;  %v755_v62 = vsel %vm364_vm7, %v753_v32, %v716_v24 }
  0xf7   : > { %1149 = vrot.lane.b32.xlu0 %v1070_v11, %s1950_s25 }
  0xf8   : > { %v687_v0 = vpop.permute.xlu1 %686 }
  0xf9   : > { %v718_v30 = vpop.permute.xlu0 %717  ;;  %v706_v35 = vsel %vm373_vm10, %v704_v31, %v687_v0 }
  0xfa   : > { %1100 = vrot.lane.b32.xlu1 %v1070_v11, %s1951_s26  ;;  %v757_v45 = vsel %vm367_vm8, %v755_v62, %v718_v30  ;;  %v1180_v11 = vsel %vm276_vm1, %v1175_v6, %v1179_v7 }
  0xfb   : > { %1151 = vrot.lane.b32.xlu0 %v1075_v9, %s1948_s23 }
  0xfc   : > { %v692_v36 = vpop.permute.xlu1 %691 }
  0xfd   : > { %v708_v43 = vsel %vm376_vm11, %v706_v35, %v692_v36  ;;  %v725_v44 = vpop.permute.xlu0 %724 }
  0xfe   : > { %1102 = vrot.lane.b32.xlu1 %v1075_v9, %s1949_s24  ;;  %1826 = vmatprep.mubr.msk.bf16.mxu0 %vm1215_vm12, %v708_v43  ;;  %v759_v53 = vsel %vm370_vm9, %v757_v45, %v725_v44  ;;  %v1185_v9 = vsel %vm291_vm0, %v1183_v3, %v1184_v4 }
  0xff   : > { %1153 = vrot.lane.b32.xlu0 %v1918_v16, %s1946_s21 }
 0x100   : > { %v747_v46 = vpop.permute.xlu1 %746 }
 0x101   : > { %v742_v54 = vpop.permute.xlu0 %741 }
 0x102   : > { %v761_v55 = vsel %vm373_vm10, %v759_v53, %v742_v54  ;;  %1109 = vrot.lane.b32.xlu1 %v1918_v16, %s1947_s22 }
 0x103   : > { %1155 = vrot.lane.b32.xlu0 %v1125_v25, %s1951_s26  ;;  %v763_v56 = vsel %vm376_vm11, %v761_v55, %v747_v46 }
 0x104   : > { %1827 = vmatmul.mubr.msk.bf16.gmra.mxu0 %vm1215_vm12, %v763_v56  ;;  %v767_v57 = vpop.permute.xlu1 %766 }
 0x105   : > { %v765_v63 = vpop.permute.xlu0 %764 }
 0x106   : > { %1126 = vrot.lane.b32.xlu1 %v1125_v25, %s1952_s27  ;;  %v804_v19 = vsel %vm355_vm4, %v2144_v42, %v765_v63 }
 0x107   : > { %1157 = vrot.lane.b32.xlu0 %v1130_v58, %s1949_s24  ;;  %v806_v22 = vsel %vm358_vm5, %v804_v19, %v767_v57 }
 0x108   : > { %v769_v5 = vpop.permute.xlu1 %768 }
 0x109   : > { %v820_v8 = vpop.permute.xlu0 %819  ;;  %v808_v23 = vsel %vm361_vm6, %v806_v22, %v769_v5 }
 0x10a   : > { %1131 = vrot.lane.b32.xlu1 %v1130_v58, %s1953_s28  ;;  %v859_v29 = vsel %vm355_vm4, %v2157_v51, %v820_v8 }
 0x10b   : > { %1164 = vrot.lane.b32.xlu0 %v1920_v40, %s1947_s22 }
 0x10c   : > { %v771_v10 = vpop.permute.xlu1 %770 }
 0x10d   : > { %v822_v12 = vpop.permute.xlu0 %821  ;;  %v810_v2 = vsel %vm364_vm7, %v808_v23, %v771_v10 }
 0x10e   : > { %1186 = vrot.lane.b32.xlu1 %v1185_v9, %s1953_s28  ;;  %v861_v48 = vsel %vm358_vm5, %v859_v29, %v822_v12 }
 0x10f   : > { %1181 = vrot.lane.b32.xlu0 %v1180_v11, %s1952_s27 }
 0x110   : > { %v773_v16 = vpop.permute.xlu1 %772 }
 0x111   : > { %v824_v18 = vpop.permute.xlu0 %823  ;;  %v812_v27 = vsel %vm367_vm8, %v810_v2, %v773_v16 }
 0x112   : > { %v863_v31 = vsel %vm361_vm6, %v861_v48, %v824_v18 }
 0x114   : > { %v780_v20 = vpop.permute.xlu1 %779 }
 0x115   : > { %v826_v21 = vpop.permute.xlu0 %825  ;;  %v814_v28 = vsel %vm370_vm9, %v812_v27, %v780_v20 }
 0x116   : > { %v865_v33 = vsel %vm364_vm7, %v863_v31, %v826_v21 }
 0x118   : > { %v797_v24 = vpop.permute.xlu1 %796 }
 0x119   : > { %v828_v26 = vpop.permute.xlu0 %827  ;;  %v816_v0 = vsel %vm373_vm10, %v814_v28, %v797_v24 }
 0x11a   : > { %v867_v1 = vsel %vm367_vm8, %v865_v33, %v828_v26 }
 0x11c   : > { %v802_v42 = vpop.permute.xlu1 %801 }
 0x11d   : > { %v835_v30 = vpop.permute.xlu0 %834  ;;  %v818_v17 = vsel %vm376_vm11, %v816_v0, %v802_v42 }
 0x11e   : > { %1830 = vmatprep.mubr.msk.bf16.mxu1 %vm1215_vm12, %v818_v17  ;;  %v869_v35 = vsel %vm370_vm9, %v867_v1, %v835_v30 }
 0x120   : > { %v857_v34 = vpop.permute.xlu1 %856 }
 0x121   : > { %v852_v51 = vpop.permute.xlu0 %851 }
 0x122   : > { %v871_v36 = vsel %vm373_vm10, %v869_v35, %v852_v51 }
 0x123   : > { %v873_v40 = vsel %vm376_vm11, %v871_v36, %v857_v34 }
 0x124   : > { %1831 = vmatmul.mubr.msk.bf16.vlgmr.msra.gmra.mxu1 %vm1215_vm12, %v873_v40  ;;  %v877_v41 = vpop.permute.xlu1 %876 }
 0x125   : > { %v875_v43 = vpop.permute.xlu0 %874 }
 0x126   : > { %v914_v47 = vsel %vm355_vm4, %v2182_v14, %v875_v43 }
 0x127   : > { %v916_v52 = vsel %vm358_vm5, %v914_v47, %v877_v41 }
 0x128   : > { %v879_v44 = vpop.permute.xlu1 %878 }
 0x129   : > { %v930_v32 = vpop.permute.xlu0 %929  ;;  %v918_v53 = vsel %vm361_vm6, %v916_v52, %v879_v44 }
 0x12a   : > { %v969_v59 = vsel %vm355_vm4, %v2207_v39, %v930_v32 }
 0x12c   : > { %v881_v62 = vpop.permute.xlu1 %880 }
 0x12d   : > { %v932_v25 = vpop.permute.xlu0 %931  ;;  %v920_v55 = vsel %vm364_vm7, %v918_v53, %v881_v62 }
 0x12e   : > { %v971_v61 = vsel %vm358_vm5, %v969_v59, %v932_v25 }
 0x130   : > { %v883_v45 = vpop.permute.xlu1 %882 }
 0x131   : > { %v934_v46 = vpop.permute.xlu0 %933  ;;  %v922_v57 = vsel %vm367_vm8, %v920_v55, %v883_v45 }
 0x132   : > { %v973_v4 = vsel %vm361_vm6, %v971_v61, %v934_v46 }
 0x134   : > { %v890_v49 = vpop.permute.xlu1 %889 }
 0x135   : > { %v936_v50 = vpop.permute.xlu0 %935  ;;  %v924_v58 = vsel %vm370_vm9, %v922_v57, %v890_v49 }
 0x136   : > { %v975_v5 = vsel %vm364_vm7, %v973_v4, %v936_v50 }
 0x138   : > { %v907_v54 = vpop.permute.xlu1 %906 }
 0x139   : > { %v938_v56 = vpop.permute.xlu0 %937  ;;  %v926_v60 = vsel %vm373_vm10, %v924_v58, %v907_v54 }
 0x13a   : > { %v977_v6 = vsel %vm367_vm8, %v975_v5, %v938_v56 }
 0x13c   : > { %v912_v14 = vpop.permute.xlu1 %911 }
 0x13d   : > { %v928_v63 = vsel %vm376_vm11, %v926_v60, %v912_v14  ;;  %v945_v3 = vpop.permute.xlu0 %944 }
 0x13e   : > { %1834 = vmatprep.mubr.msk.bf16.mxu1 %vm1215_vm12, %v928_v63  ;;  %v979_v39 = vsel %vm370_vm9, %v977_v6, %v945_v3 }
 0x140   : > { %v967_v7 = vpop.permute.xlu1 %966 }
 0x141   : > { %v962_v8 = vpop.permute.xlu0 %961 }
 0x142   : > { %v981_v9 = vsel %vm373_vm10, %v979_v39, %v962_v8 }
 0x143   : > { %v983_v10 = vsel %vm376_vm11, %v981_v9, %v967_v7 }
 0x144   : > { %1835 = vmatmul.mubr.msk.bf16.gmra.mxu1 %vm1215_vm12, %v983_v10  ;;  %v987_v11 = vpop.permute.xlu1 %986 }
 0x145   : > { %v985_v12 = vpop.permute.xlu0 %984 }
 0x146   : > { %v1024_v23 = vsel %vm355_vm4, %v2240_v13, %v985_v12 }
 0x147   : > { %v1026_v26 = vsel %vm358_vm5, %v1024_v23, %v987_v11 }
 0x148   : > { %v989_v16 = vpop.permute.xlu1 %988 }
 0x149   : > { %v1040_v18 = vpop.permute.xlu0 %1039  ;;  %v1028_v27 = vsel %vm361_vm6, %v1026_v26, %v989_v16 }
 0x14a   : > { %v1079_v13 = vsel %vm355_vm4, %v2263_v37, %v1040_v18 }
 0x14c   : > { %v991_v19 = vpop.permute.xlu1 %990 }
 0x14d   : > { %v1042_v20 = vpop.permute.xlu0 %1041  ;;  %v1030_v29 = vsel %vm364_vm7, %v1028_v27, %v991_v19 }
 0x14e   : > { %v1081_v31 = vsel %vm358_vm5, %v1079_v13, %v1042_v20 }
 0x150   : > { %v993_v21 = vpop.permute.xlu1 %992 }
 0x151   : > { %v1044_v22 = vpop.permute.xlu0 %1043  ;;  %v1032_v42 = vsel %vm367_vm8, %v1030_v29, %v993_v21 }
 0x152   : > { %v1083_v34 = vsel %vm361_vm6, %v1081_v31, %v1044_v22 }
 0x154   : > { %v1000_v24 = vpop.permute.xlu1 %999 }
 0x155   : > { %v1046_v2 = vpop.permute.xlu0 %1045  ;;  %v1034_v48 = vsel %vm370_vm9, %v1032_v42, %v1000_v24 }
 0x156   : > { %v1085_v35 = vsel %vm364_vm7, %v1083_v34, %v1046_v2 }
 0x158   : > { %v1017_v28 = vpop.permute.xlu1 %1016 }
 0x159   : > { %v1048_v0 = vpop.permute.xlu0 %1047  ;;  %v1036_v30 = vsel %vm373_vm10, %v1034_v48, %v1017_v28 }
 0x15a   : > { %v1087_v51 = vsel %vm367_vm8, %v1085_v35, %v1048_v0 }
 0x15c   : > { %v1022_v17 = vpop.permute.xlu1 %1021 }
 0x15d   : > { %v1038_v33 = vsel %vm376_vm11, %v1036_v30, %v1022_v17  ;;  %v1055_v1 = vpop.permute.xlu0 %1054 }
 0x15e   : > { %1838 = vmatprep.mubr.msk.bf16.mxu1 %vm1215_vm12, %v1038_v33  ;;  %v1089_v37 = vsel %vm370_vm9, %v1087_v51, %v1055_v1 }
 0x160   : > { %v1077_v36 = vpop.permute.xlu1 %1076 }
 0x161   : > { %v1072_v40 = vpop.permute.xlu0 %1071 }
 0x162   : > { %v1091_v41 = vsel %vm373_vm10, %v1089_v37, %v1072_v40 }
 0x163   : > { %v1093_v43 = vsel %vm376_vm11, %v1091_v41, %v1077_v36 }
 0x164   : > { %v1816_v44 = vpop.f32.mrf.mxu0  ;;  %1839 = vmatmul.mubr.msk.bf16.gmra.mxu1 %vm1215_vm12, %v1093_v43  ;;  %v1097_v32 = vpop.permute.xlu1 %1096 }
 0x165   : > { %1418 = vst.msk [vmem:[%s2462_s10 + $0x10] sm:$0xff] %vm376_vm11, %v1816_v44  ;;  %v1095_v62 = vpop.permute.xlu0 %1094  ;;  %v1519_v52 = vmul.f32 %v1816_v44, %v1816_v44  ;;  %v1451_v58 = vsel %vm376_vm11, %v1816_v44, 0.0 }
 0x166   : > { %v1289_v25 = vpop.f32.mrf.mxu0  ;;  %v1134_v11 = vsel %vm355_vm4, %v2298_v15, %v1095_v62 }
 0x167   : > { %1416 = vst.msk [vmem:[%s2462_s10] sm:$0xff] %vm376_vm11, %v1289_v25  ;;  %v1517_v47 = vmul.f32 %v1289_v25, %v1289_v25  ;;  %v1448_v53 = vsel %vm376_vm11, %v1289_v25, 0.0  ;;  %v1552_v4 = vsel %vm376_vm11, %v1519_v52, 0.0  ;;  %v1136_v18 = vsel %vm358_vm5, %v1134_v11, %v1097_v32 }
 0x168   : > { %v1817_v45 = vpop.f32.mrf.mxu0  ;;  %v1099_v46 = vpop.permute.xlu1 %1098 }
 0x169   : > { %1419 = vst.msk [vmem:[%s2462_s10 + $0x18] sm:$0xff] %vm376_vm11, %v1817_v45  ;;  %v1150_v49 = vpop.permute.xlu0 %1149  ;;  %v1549_v59 = vsel %vm376_vm11, %v1517_v47, 0.0  ;;  %v1520_v60 = vmul.f32 %v1817_v45, %v1817_v45  ;;  %v1453_v5 = vsel %vm376_vm11, %v1817_v45, 0.0  ;;  %v1138_v19 = vsel %vm361_vm6, %v1136_v18, %v1099_v46 }
 0x16a   : > { %v1292_v50 = vpop.f32.mrf.mxu0  ;;  %v1189_v2 = vsel %vm355_vm4, %v2321_v38, %v1150_v49 }
 0x16b   : > { %1417 = vst.msk [vmem:[%s2462_s10 + $0x8] sm:$0xff] %vm376_vm11, %v1292_v50  ;;  %v1449_v54 = vsel %vm376_vm11, %v1292_v50, 0.0  ;;  %v1518_v55 = vmul.f32 %v1292_v50, %v1292_v50  ;;  %v1554_v8 = vsel %vm376_vm11, %v1520_v60, 0.0 }
 0x16c   : > { %v1450_v56 = vadd.f32 %v1449_v54, %v1448_v53  ;;  %v1101_v57 = vpop.permute.xlu1 %1100 }
 0x16d   : > { %v1550_v14 = vsel %vm376_vm11, %v1518_v55, 0.0  ;;  %v1152_v61 = vpop.permute.xlu0 %1151  ;;  %v1140_v21 = vsel %vm364_vm7, %v1138_v19, %v1101_v57 }
 0x16e   : > { %v1452_v63 = vadd.f32 %v1451_v58, %v1450_v56  ;;  %v1551_v3 = vadd.f32 %v1550_v14, %v1549_v59  ;;  %v1191_v27 = vsel %vm358_vm5, %v1189_v2, %v1152_v61 }
 0x170   : > { %v1553_v6 = vadd.f32 %v1552_v4, %v1551_v3  ;;  %v1103_v7 = vpop.permute.xlu1 %1102  ;;  %v1454_v39 = vadd.f32 %v1453_v5, %v1452_v63 }
 0x171   : > { %v1154_v9 = vpop.permute.xlu0 %1153  ;;  %v1142_v23 = vsel %vm367_vm8, %v1140_v21, %v1103_v7 }
 0x172   : > { %v1555_v10 = vadd.f32 %v1554_v8, %v1553_v6  ;;  %v1193_v0 = vsel %vm361_vm6, %v1191_v27, %v1154_v9 }
 0x174   : > { %v1110_v12 = vpop.permute.xlu1 %1109 }
 0x175   : > { %v1156_v16 = vpop.permute.xlu0 %1155  ;;  %v1144_v24 = vsel %vm370_vm9, %v1142_v23, %v1110_v12 }
 0x176   : > { %v1195_v42 = vsel %vm364_vm7, %v1193_v0, %v1156_v16 }
 0x178   : > { %v1127_v20 = vpop.permute.xlu1 %1126 }
 0x179   : > { %v1158_v22 = vpop.permute.xlu0 %1157  ;;  %v1146_v26 = vsel %vm373_vm10, %v1144_v24, %v1127_v20 }
 0x17a   : > { %v1197_v48 = vsel %vm367_vm8, %v1195_v42, %v1158_v22 }
 0x17c   : > { %v1132_v15 = vpop.permute.xlu1 %1131 }
 0x17d   : > { %v1148_v28 = vsel %vm376_vm11, %v1146_v26, %v1132_v15  ;;  %v1165_v29 = vpop.permute.xlu0 %1164 }
 0x17e   : > { %1842 = vmatprep.mubr.msk.bf16.mxu1 %vm1215_vm12, %v1148_v28  ;;  %v1199_v13 = vsel %vm370_vm9, %v1197_v48, %v1165_v29 }
 0x180   : > { %v1187_v38 = vpop.permute.xlu1 %1186 }
 0x181   : > { %v1182_v30 = vpop.permute.xlu0 %1181 }
 0x182   : > { %v1201_v17 = vsel %vm373_vm10, %v1199_v13, %v1182_v30 }
 0x183   : > { %v1203_v31 = vsel %vm376_vm11, %v1201_v17, %v1187_v38 }
 0x184   : > { %v1820_v33 = vpop.f32.mrf.mxu0  ;;  %1843 = vmatmul.mubr.msk.bf16.gmra.mxu1 %vm1215_vm12, %v1203_v31 }
 0x185   : > { %1422 = vst.msk [vmem:[%s2462_s10 + $0x30] sm:$0xff] %vm376_vm11, %v1820_v33  ;;  %v1523_v43 = vmul.f32 %v1820_v33, %v1820_v33  ;;  %v1459_v25 = vsel %vm376_vm11, %v1820_v33, 0.0 }
 0x186   : > { %v1305_v1 = vpop.f32.mrf.mxu0 }
 0x187   : > { %1420 = vst.msk [vmem:[%s2462_s10 + $0x20] sm:$0xff] %vm376_vm11, %v1305_v1  ;;  %v1455_v34 = vsel %vm376_vm11, %v1305_v1, 0.0  ;;  %v1521_v35 = vmul.f32 %v1305_v1, %v1305_v1  ;;  %v1560_v50 = vsel %vm376_vm11, %v1523_v43, 0.0 }
 0x188   : > { %v1456_v51 = vadd.f32 %v1455_v34, %v1454_v39  ;;  %v1821_v36 = vpop.f32.mrf.mxu0 }
 0x189   : > { %v1556_v37 = vsel %vm376_vm11, %v1521_v35, 0.0  ;;  %1423 = vst.msk [vmem:[%s2462_s10 + $0x38] sm:$0xff] %vm376_vm11, %v1821_v36  ;;  %v1524_v45 = vmul.f32 %v1821_v36, %v1821_v36  ;;  %v1461_v52 = vsel %vm376_vm11, %v1821_v36, 0.0 }
 0x18a   : > { %v1557_v40 = vadd.f32 %v1556_v37, %v1555_v10  ;;  %v1308_v41 = vpop.f32.mrf.mxu0 }
 0x18b   : > { %1421 = vst.msk [vmem:[%s2462_s10 + $0x28] sm:$0xff] %vm376_vm11, %v1308_v41  ;;  %v1457_v44 = vsel %vm376_vm11, %v1308_v41, 0.0  ;;  %v1522_v32 = vmul.f32 %v1308_v41, %v1308_v41  ;;  %v1562_v55 = vsel %vm376_vm11, %v1524_v45, 0.0 }
 0x18c   : > { %v1458_v62 = vadd.f32 %v1457_v44, %v1456_v51 }
 0x18d   : > { %v1558_v46 = vsel %vm376_vm11, %v1522_v32, 0.0 }
 0x18e   : > { %v1460_v47 = vadd.f32 %v1459_v25, %v1458_v62  ;;  %v1559_v49 = vadd.f32 %v1558_v46, %v1557_v40 }
 0x190   : > { %v1561_v53 = vadd.f32 %v1560_v50, %v1559_v49  ;;  %v1462_v54 = vadd.f32 %v1461_v52, %v1460_v47 }
 0x192   : > { %v1563_v56 = vadd.f32 %v1562_v55, %v1561_v53 }
 0x1a4   : > { %v1824_v57 = vpop.f32.mrf.mxu0 }
 0x1a5   : > { %1426 = vst.msk [vmem:[%s2462_s10 + $0x50] sm:$0xff] %vm376_vm11, %v1824_v57  ;;  %v1527_v5 = vmul.f32 %v1824_v57, %v1824_v57  ;;  %v1467_v8 = vsel %vm376_vm11, %v1824_v57, 0.0 }
 0x1a6   : > { %v1321_v58 = vpop.f32.mrf.mxu0 }
 0x1a7   : > { %1424 = vst.msk [vmem:[%s2462_s10 + $0x40] sm:$0xff] %vm376_vm11, %v1321_v58  ;;  %v1463_v59 = vsel %vm376_vm11, %v1321_v58, 0.0  ;;  %v1525_v60 = vmul.f32 %v1321_v58, %v1321_v58  ;;  %v1568_v16 = vsel %vm376_vm11, %v1527_v5, 0.0 }
 0x1a8   : > { %v1464_v14 = vadd.f32 %v1463_v59, %v1462_v54  ;;  %v1825_v61 = vpop.f32.mrf.mxu0 }
 0x1a9   : > { %v1564_v63 = vsel %vm376_vm11, %v1525_v60, 0.0  ;;  %1427 = vst.msk [vmem:[%s2462_s10 + $0x58] sm:$0xff] %vm376_vm11, %v1825_v61  ;;  %v1528_v9 = vmul.f32 %v1825_v61, %v1825_v61  ;;  %v1469_v18 = vsel %vm376_vm11, %v1825_v61, 0.0 }
 0x1aa   : > { %v1565_v3 = vadd.f32 %v1564_v63, %v1563_v56  ;;  %v1324_v4 = vpop.f32.mrf.mxu0 }
 0x1ab   : > { %1425 = vst.msk [vmem:[%s2462_s10 + $0x48] sm:$0xff] %vm376_vm11, %v1324_v4  ;;  %v1465_v6 = vsel %vm376_vm11, %v1324_v4, 0.0  ;;  %v1526_v7 = vmul.f32 %v1324_v4, %v1324_v4  ;;  %v1570_v21 = vsel %vm376_vm11, %v1528_v9, 0.0 }
 0x1ac   : > { %v1466_v39 = vadd.f32 %v1465_v6, %v1464_v14 }
 0x1ad   : > { %v1566_v10 = vsel %vm376_vm11, %v1526_v7, 0.0 }
 0x1ae   : > { %v1468_v11 = vadd.f32 %v1467_v8, %v1466_v39  ;;  %v1567_v12 = vadd.f32 %v1566_v10, %v1565_v3 }
 0x1b0   : > { %v1569_v19 = vadd.f32 %v1568_v16, %v1567_v12  ;;  %v1470_v20 = vadd.f32 %v1469_v18, %v1468_v11 }
 0x1b2   : > { %v1571_v22 = vadd.f32 %v1570_v21, %v1569_v19 }
 0x1c4   : > { %v1828_v23 = vpop.f32.mrf.mxu0 }
 0x1c5   : > { %1430 = vst.msk [vmem:[%s2462_s10 + $0x70] sm:$0xff] %vm376_vm11, %v1828_v23  ;;  %v1531_v42 = vmul.f32 %v1828_v23, %v1828_v23  ;;  %v1475_v30 = vsel %vm376_vm11, %v1828_v23, 0.0 }
 0x1c6   : > { %v1337_v24 = vpop.f32.mrf.mxu0 }
 0x1c7   : > { %1428 = vst.msk [vmem:[%s2462_s10 + $0x60] sm:$0xff] %vm376_vm11, %v1337_v24  ;;  %v1471_v2 = vsel %vm376_vm11, %v1337_v24, 0.0  ;;  %v1529_v26 = vmul.f32 %v1337_v24, %v1337_v24  ;;  %v1576_v34 = vsel %vm376_vm11, %v1531_v42, 0.0 }
 0x1c8   : > { %v1472_v15 = vadd.f32 %v1471_v2, %v1470_v20  ;;  %v1829_v27 = vpop.f32.mrf.mxu0 }
 0x1c9   : > { %v1572_v28 = vsel %vm376_vm11, %v1529_v26, 0.0  ;;  %1431 = vst.msk [vmem:[%s2462_s10 + $0x78] sm:$0xff] %vm376_vm11, %v1829_v27  ;;  %v1532_v17 = vmul.f32 %v1829_v27, %v1829_v27  ;;  %v1477_v35 = vsel %vm376_vm11, %v1829_v27, 0.0 }
 0x1ca   : > { %v1573_v29 = vadd.f32 %v1572_v28, %v1571_v22  ;;  %v1340_v0 = vpop.f32.mrf.mxu0 }
 0x1cb   : > { %1429 = vst.msk [vmem:[%s2462_s10 + $0x68] sm:$0xff] %vm376_vm11, %v1340_v0  ;;  %v1473_v48 = vsel %vm376_vm11, %v1340_v0, 0.0  ;;  %v1530_v38 = vmul.f32 %v1340_v0, %v1340_v0  ;;  %v1578_v37 = vsel %vm376_vm11, %v1532_v17, 0.0 }
 0x1cc   : > { %v1474_v13 = vadd.f32 %v1473_v48, %v1472_v15 }
 0x1cd   : > { %v1574_v31 = vsel %vm376_vm11, %v1530_v38, 0.0 }
 0x1ce   : > { %v1476_v33 = vadd.f32 %v1475_v30, %v1474_v13  ;;  %v1575_v1 = vadd.f32 %v1574_v31, %v1573_v29 }
 0x1d0   : > { %v1577_v51 = vadd.f32 %v1576_v34, %v1575_v1  ;;  %v1478_v36 = vadd.f32 %v1477_v35, %v1476_v33 }
 0x1d2   : > { %v1579_v40 = vadd.f32 %v1578_v37, %v1577_v51 }
 0x1e4   : > { %v1832_v41 = vpop.f32.mrf.mxu1 }
 0x1e5   : > { %1434 = vst.msk [vmem:[%s2462_s10 + $0x90] sm:$0xff] %vm376_vm11, %v1832_v41  ;;  %v1535_v49 = vmul.f32 %v1832_v41, %v1832_v41  ;;  %v1483_v54 = vsel %vm376_vm11, %v1832_v41, 0.0 }
 0x1e6   : > { %v1353_v43 = vpop.f32.mrf.mxu1 }
 0x1e7   : > { %1432 = vst.msk [vmem:[%s2462_s10 + $0x80] sm:$0xff] %vm376_vm11, %v1353_v43  ;;  %v1479_v44 = vsel %vm376_vm11, %v1353_v43, 0.0  ;;  %v1533_v32 = vmul.f32 %v1353_v43, %v1353_v43  ;;  %v1584_v59 = vsel %vm376_vm11, %v1535_v49, 0.0 }
 0x1e8   : > { %v1480_v62 = vadd.f32 %v1479_v44, %v1478_v36  ;;  %v1833_v25 = vpop.f32.mrf.mxu1 }
 0x1e9   : > { %v1580_v45 = vsel %vm376_vm11, %v1533_v32, 0.0  ;;  %1435 = vst.msk [vmem:[%s2462_s10 + $0x98] sm:$0xff] %vm376_vm11, %v1833_v25  ;;  %v1536_v55 = vmul.f32 %v1833_v25, %v1833_v25  ;;  %v1485_v60 = vsel %vm376_vm11, %v1833_v25, 0.0 }
 0x1ea   : > { %v1581_v46 = vadd.f32 %v1580_v45, %v1579_v40  ;;  %v1356_v47 = vpop.f32.mrf.mxu1 }
 0x1eb   : > { %1433 = vst.msk [vmem:[%s2462_s10 + $0x88] sm:$0xff] %vm376_vm11, %v1356_v47  ;;  %v1481_v50 = vsel %vm376_vm11, %v1356_v47, 0.0  ;;  %v1534_v52 = vmul.f32 %v1356_v47, %v1356_v47  ;;  %v1586_v63 = vsel %vm376_vm11, %v1536_v55, 0.0 }
 0x1ec   : > { %v1482_v53 = vadd.f32 %v1481_v50, %v1480_v62 }
 0x1ed   : > { %v1582_v56 = vsel %vm376_vm11, %v1534_v52, 0.0 }
 0x1ee   : > { %v1484_v57 = vadd.f32 %v1483_v54, %v1482_v53  ;;  %v1583_v58 = vadd.f32 %v1582_v56, %v1581_v46 }
 0x1f0   : > { %v1585_v14 = vadd.f32 %v1584_v59, %v1583_v58  ;;  %v1486_v61 = vadd.f32 %v1485_v60, %v1484_v57 }
 0x1f2   : > { %v1587_v3 = vadd.f32 %v1586_v63, %v1585_v14 }
 0x204   : > { %v1836_v4 = vpop.f32.mrf.mxu1 }
 0x205   : > { %1438 = vst.msk [vmem:[%s2462_s10 + $0xb0] sm:$0xff] %vm376_vm11, %v1836_v4  ;;  %v1539_v24 = vmul.f32 %v1836_v4, %v1836_v4  ;;  %v1491_v26 = vsel %vm376_vm11, %v1836_v4, 0.0 }
 0x206   : > { %v1369_v5 = vpop.f32.mrf.mxu1 }
 0x207   : > { %1436 = vst.msk [vmem:[%s2462_s10 + $0xa0] sm:$0xff] %vm376_vm11, %v1369_v5  ;;  %v1537_v11 = vmul.f32 %v1369_v5, %v1369_v5  ;;  %v1487_v12 = vsel %vm376_vm11, %v1369_v5, 0.0  ;;  %v1592_v27 = vsel %vm376_vm11, %v1539_v24, 0.0 }
 0x208   : > { %v1837_v6 = vpop.f32.mrf.mxu1  ;;  %v1488_v20 = vadd.f32 %v1487_v12, %v1486_v61 }
 0x209   : > { %1439 = vst.msk [vmem:[%s2462_s10 + $0xb8] sm:$0xff] %vm376_vm11, %v1837_v6  ;;  %v1588_v18 = vsel %vm376_vm11, %v1537_v11, 0.0  ;;  %v1540_v28 = vmul.f32 %v1837_v6, %v1837_v6  ;;  %v1493_v42 = vsel %vm376_vm11, %v1837_v6, 0.0 }
 0x20a   : > { %v1372_v7 = vpop.f32.mrf.mxu1  ;;  %v1589_v22 = vadd.f32 %v1588_v18, %v1587_v3 }
 0x20b   : > { %1437 = vst.msk [vmem:[%s2462_s10 + $0xa8] sm:$0xff] %vm376_vm11, %v1372_v7  ;;  %v1538_v16 = vmul.f32 %v1372_v7, %v1372_v7  ;;  %v1489_v19 = vsel %vm376_vm11, %v1372_v7, 0.0  ;;  %v1594_v30 = vsel %vm376_vm11, %v1540_v28, 0.0 }
 0x20c   : > { %v1490_v23 = vadd.f32 %v1489_v19, %v1488_v20 }
 0x20d   : > { %v1590_v21 = vsel %vm376_vm11, %v1538_v16, 0.0 }
 0x20e   : > { %v1591_v2 = vadd.f32 %v1590_v21, %v1589_v22  ;;  %v1492_v15 = vadd.f32 %v1491_v26, %v1490_v23 }
 0x210   : > { %v1593_v0 = vadd.f32 %v1592_v27, %v1591_v2  ;;  %v1494_v13 = vadd.f32 %v1493_v42, %v1492_v15 }
 0x212   : > { %v1595_v1 = vadd.f32 %v1594_v30, %v1593_v0 }
 0x224   : > { %v1840_v39 = vpop.f32.mrf.mxu1 }
 0x225   : > { %1442 = vst.msk [vmem:[%s2462_s10 + $0xd0] sm:$0xff] %vm376_vm11, %v1840_v39  ;;  %v1543_v36 = vmul.f32 %v1840_v39, %v1840_v39  ;;  %v1499_v40 = vsel %vm376_vm11, %v1840_v39, 0.0 }
 0x226   : > { %v1385_v8 = vpop.f32.mrf.mxu1 }
 0x227   : > { %1440 = vst.msk [vmem:[%s2462_s10 + $0xc0] sm:$0xff] %vm376_vm11, %v1385_v8  ;;  %v1541_v29 = vmul.f32 %v1385_v8, %v1385_v8  ;;  %v1495_v48 = vsel %vm376_vm11, %v1385_v8, 0.0  ;;  %v1600_v44 = vsel %vm376_vm11, %v1543_v36, 0.0 }
 0x228   : > { %v1841_v9 = vpop.f32.mrf.mxu1  ;;  %v1496_v33 = vadd.f32 %v1495_v48, %v1494_v13 }
 0x229   : > { %1443 = vst.msk [vmem:[%s2462_s10 + $0xd8] sm:$0xff] %vm376_vm11, %v1841_v9  ;;  %v1596_v17 = vsel %vm376_vm11, %v1541_v29, 0.0  ;;  %v1544_v32 = vmul.f32 %v1841_v9, %v1841_v9  ;;  %v1501_v45 = vsel %vm376_vm11, %v1841_v9, 0.0 }
 0x22a   : > { %v1388_v10 = vpop.f32.mrf.mxu1  ;;  %v1597_v35 = vadd.f32 %v1596_v17, %v1595_v1 }
 0x22b   : > { %1441 = vst.msk [vmem:[%s2462_s10 + $0xc8] sm:$0xff] %vm376_vm11, %v1388_v10  ;;  %v1542_v38 = vmul.f32 %v1388_v10, %v1388_v10  ;;  %v1497_v31 = vsel %vm376_vm11, %v1388_v10, 0.0  ;;  %v1602_v52 = vsel %vm376_vm11, %v1544_v32, 0.0 }
 0x22c   : > { %v1498_v51 = vadd.f32 %v1497_v31, %v1496_v33 }
 0x22d   : > { %v1598_v34 = vsel %vm376_vm11, %v1542_v38, 0.0 }
 0x22e   : > { %v1599_v37 = vadd.f32 %v1598_v34, %v1597_v35  ;;  %v1500_v41 = vadd.f32 %v1499_v40, %v1498_v51 }
 0x230   : > { %v1601_v62 = vadd.f32 %v1600_v44, %v1599_v37  ;;  %v1502_v49 = vadd.f32 %v1501_v45, %v1500_v41 }
 0x232   : > { %v1603_v55 = vadd.f32 %v1602_v52, %v1601_v62 }
 0x244   : > { %v1844_v43 = vpop.f32.mrf.mxu1 }
 0x245   : > { %1446 = vst.msk [vmem:[%s2462_s10 + $0xf0] sm:$0xff] %vm376_vm11, %v1844_v43  ;;  %v1547_v57 = vmul.f32 %v1844_v43, %v1844_v43  ;;  %v1507_v61 = vsel %vm376_vm11, %v1844_v43, 0.0 }
 0x246   : > { %v1401_v25 = vpop.f32.mrf.mxu1 }
 0x247   : > { %1444 = vst.msk [vmem:[%s2462_s10 + $0xe0] sm:$0xff] %vm376_vm11, %v1401_v25  ;;  %v1503_v46 = vsel %vm376_vm11, %v1401_v25, 0.0  ;;  %v1545_v47 = vmul.f32 %v1401_v25, %v1401_v25  ;;  %v1608_v6 = vsel %vm376_vm11, %v1547_v57, 0.0 }
 0x248   : > { %v1845_v50 = vpop.f32.mrf.mxu1  ;;  %v1504_v54 = vadd.f32 %v1503_v46, %v1502_v49 }
 0x249   : > { %v1604_v53 = vsel %vm376_vm11, %v1545_v47, 0.0  ;;  %1447 = vst.msk [vmem:[%s2462_s10 + $0xf8] sm:$0xff] %vm376_vm11, %v1845_v50  ;;  %v1548_v63 = vmul.f32 %v1845_v50, %v1845_v50  ;;  %v1509_v7 = vsel %vm376_vm11, %v1845_v50, 0.0 }
 0x24a   : > { %v1404_v56 = vpop.f32.mrf.mxu1  ;;  %v1605_v60 = vadd.f32 %v1604_v53, %v1603_v55 }
 0x24b   : > { %1445 = vst.msk [vmem:[%s2462_s10 + $0xe8] sm:$0xff] %vm376_vm11, %v1404_v56  ;;  %v1505_v58 = vsel %vm376_vm11, %v1404_v56, 0.0  ;;  %v1546_v59 = vmul.f32 %v1404_v56, %v1404_v56  ;;  %v1610_v9 = vsel %vm376_vm11, %v1548_v63, 0.0 }
 0x24c   : > { %v1506_v14 = vadd.f32 %v1505_v58, %v1504_v54 }
 0x24d   : > { %v1606_v3 = vsel %vm376_vm11, %v1546_v59, 0.0 }
 0x24e   : > { %v1508_v4 = vadd.f32 %v1507_v61, %v1506_v14  ;;  %v1607_v5 = vadd.f32 %v1606_v3, %v1605_v60 }
 0x250   : > { %v1510_v39 = vadd.f32 %v1509_v7, %v1508_v4  ;;  %v1609_v8 = vadd.f32 %v1608_v6, %v1607_v5 }
 0x252   : > { %v1511_v10 = vrot.slane %v1510_v39, 4  ;;  %v1611_v11 = vadd.f32 %v1610_v9, %v1609_v8 }
 0x254   : > { %v1512_v12 = vadd.f32 %v1511_v10, %v1510_v39  ;;  %v1612_v16 = vrot.slane %v1611_v11, 4 }
 0x256   : > { %v1513_v18 = vrot.slane %v1512_v12, 2  ;;  %v1613_v19 = vadd.f32 %v1612_v16, %v1611_v11 }
 0x258   : > { %v1514_v20 = vadd.f32 %v1513_v18, %v1512_v12  ;;  %v1614_v21 = vrot.slane %v1613_v19, 2 }
 0x25a   : > { %v1515_v22 = vrot.slane %v1514_v20, 1  ;;  %v1615_v23 = vadd.f32 %v1614_v21, %v1613_v19 }
 0x25c   : > { %v1616_v24 = vrot.slane %v1615_v23, 1  ;;  %v1516_v2 = vadd.f32 %v1515_v22, %v1514_v20 }
 0x25e   : > { %v1617_v26 = vadd.f32 %v1616_v24, %v1615_v23 }
 0x260   : > { %v1619_v15 = vsel %vm1618_vm13, %v1516_v2, %v1617_v26 }
 0x261   : > { %v1621_v27 = vsel %vm1620_vm14, %v1619_v15, 0.0 }
 0x262   : > { %1622 = vst.msk [vmem:[%s203_s18] sm:$0xff] %vm376_vm11, %v1621_v27 }
 0x263 PF: > { %s14_s14 = sadd.s32 1, %s1944_s14   ;;  %s2632_s12 = smov %s1940_s13 }
 0x264   : > { %p11_p6 = scmp.ge.s32.totalorder %s14_s14, 4   ;;  %s2633_s13 = smov %s2635_s15 }
 0x266   :  { %13 = sbr.rel (!%p11_p6) target bundleno = 2 (0x2), region = 71 }

// kernel: unet_small_forward.20
= control target key start
LH: loop header
LB: loop body
LE: loop exit
PB: predicated region body
PF: predicated region fallthrough
CT: control target
= control target key end

     0   :  { %v19_v0 = vlaneseq  ;;  %s111_s1 = inlined_call_operand.vmem [shape: f32[1,384], index: 1, kind: input, shape index: {}]   ;;  %s112_s2 = inlined_call_operand.vmem [shape: f32[1,384], index: 2, kind: input, shape index: {}]   ;;  %s113_s0 = inlined_call_operand.vmem [shape: f32[8,384], index: 0, kind: input, shape index: {}]   ;;  %s114_s3 = inlined_call_operand.vmem [shape: f32[8,384], index: 3, kind: output, shape index: {}]  }
   0x1   :  { %v17_v2 = vld [vmem:[%s111_s1] sm:$0x7]  ;;  %v15_v8 = vld [vmem:[%s113_s0 + $0x8] sm:$0xff]  ;;  %v16_v13 = vld [vmem:[%s113_s0 + $0x10] sm:$0xff] }
   0x2   :  { %v20_v1 = vshrl.u32 %v19_v0, 7  ;;  %v37_v3 = vld [vmem:[%s112_s2] sm:$0x7] }
   0x3   :  { %v14_v7 = vld [vmem:[%s113_s0] sm:$0xff] }
   0x4   :  { %v21_v4 = vsub.s32 0, %v20_v1  ;;  %v25_v5 = vsub.s32 1, %v20_v1  ;;  %v29_v6 = vsub.s32 2, %v20_v1 }
   0x6   :  { %v22_v9 = vrot.slane %v17_v2, %v21_v4  ;;  %v42_v10 = vrot.slane %v37_v3, %v21_v4  ;;  %v26_v11 = vrot.slane %v17_v2, %v25_v5  ;;  %v46_v12 = vrot.slane %v37_v3, %v25_v5 }
   0x7   :  { %v30_v14 = vrot.slane %v17_v2, %v29_v6  ;;  %v50_v15 = vrot.slane %v37_v3, %v29_v6 }
   0x8   :  { %v34_v16 = vmul.f32 %v22_v9, %v14_v7  ;;  %v35_v17 = vmul.f32 %v26_v11, %v15_v8 }
   0x9   :  { %v36_v18 = vmul.f32 %v30_v14, %v16_v13 }
   0xa   :  { %v54_v19 = vadd.f32 %v42_v10, %v34_v16  ;;  %v55_v20 = vadd.f32 %v46_v12, %v35_v17 }
   0xb   :  { %v56_v21 = vadd.f32 %v50_v15, %v36_v18 }
   0xc   :  { %v57_v22 = vmax.f32 %v54_v19, 0.0  ;;  %v58_v23 = vmax.f32 %v55_v20, 0.0 }
   0xd   :  { %v59_v24 = vmax.f32 %v56_v21, 0.0 }
   0xe   :  { %60 = vst [vmem:[%s114_s3] sm:$0xff] %v57_v22  ;;  %61 = vst [vmem:[%s114_s3 + $0x8] sm:$0xff] %v58_v23 }
   0xf   :  { %62 = vst [vmem:[%s114_s3 + $0x10] sm:$0xff] %v59_v24 }

// kernel: unet_small_forward.19
= control target key start
LH: loop header
LB: loop body
LE: loop exit
PB: predicated region body
PF: predicated region fallthrough
CT: control target
= control target key end

     0   :  { %s1226_s12 = smov 0   ;;  %s1228_s13 = smov 0   ;;  %s1637_s0 = inlined_call_operand.vmem [shape: bf16[2,10,10,24], index: 0, kind: input, shape index: {}]   ;;  %s1638_s1 = inlined_call_operand.vmem [shape: bf16[216,24], index: 1, kind: input, shape index: {}]   ;;  %s1639_s2 = inlined_call_operand.vmem [shape: f32[128,24], index: 2, kind: output, shape index: {0}]   ;;  %s1640_s3 = inlined_call_operand.vmem [shape: f32[2,8,24], index: 3, kind: output, shape index: {1}]  }
   0x1   :  { %s1230_s14 = smov 0  }
   0x2 LB: > { %s26_s15 = sadd.s32 1, %s1191_s13  ;;  %p1034_p0 = scmp.ge.s32.totalorder %s1195_s14, 1  ;;  %s1195_s14 = sphi %s1230_s14, %s14_s14   ;;  %s1191_s13 = sphi %s1228_s13, %s1642_s13   ;;  %s1187_s12 = sphi %s1226_s12, %s1641_s12  }
   0x3   : > { %p28_p1 = scmp.ge.s32.totalorder %s26_s15, 2  ;;  %p156_p2 = scmp.lt.s32.totalorder %s1195_s14, 3 }
   0x5   : > { %s1644_s15 = smov (%p28_p1, %s26_s15), 0  ;;  %p157_p3 = pnand %p1034_p0, %p156_p2 }
   0x6   : > { %p186_p4 = scmp.lt.s32.totalorder (!%p157_p3), %s1187_s12, 1  ;;  %s1198_s27 = smov (!%p157_p3), 16  }
   0x7   : > { %160 = sbr.rel (%p157_p3) target bundleno = 483 (0x1e3), region = 28  ;;  %s1199_s30 = smov (!%p157_p3), 48  }
   0x8   : > { %s1200_s4 = smov (!%p157_p3), 72   ;;  %s1201_s7 = smov (!%p157_p3), 120  }
   0x9   : > { %s1202_s10 = smov (!%p157_p3), 24   ;;  %s1203_s22 = smov (!%p157_p3), 40  }
   0xa   : > { %s1204_s23 = smov (!%p157_p3), 64   ;;  %s1205_s25 = smov (!%p157_p3), 96  }
   0xc   : > { %v1155_v0 = vld [vmem:[%s1638_s1 + $0x38] sm:$0xff]   ;;  %v1197_v1 = vmov 0   ;;  %s1253_s18 = scalar_select %p186_p4, %s1187_s12, 1  ;;  %v1156_v2 = vld [vmem:[%s1638_s1 + $0x30] sm:$0xff]   ;;  %v1159_v3 = vld [vmem:[%s1638_s1 + $0x28] sm:$0xff]   ;;  %vm684_vm0 = vcmask 1043456  }
   0xd   : > { %798 = vmatprep.subr.bf16.mxu0 %v1197_v1  ;;  %1078 = vmatprep.subr.bf16.mxu1 %v1197_v1  ;;  %v1162_v17 = vld [vmem:[%s1638_s1 + $0x20] sm:$0xff]   ;;  %v1163_v25 = vld [vmem:[%s1638_s1 + $0x18] sm:$0xff]   ;;  %v1164_v31 = vld [vmem:[%s1638_s1 + $0x10] sm:$0xff]   ;;  %vm314_vm1 = vcmask 195584   ;;  %vm330_vm2 = vcmask 130048   ;;  %vm318_vm3 = vcmask 392192  }
   0xe   : > { %799 = vmatpush1.bf16.msra.mxu0 %v1155_v0  ;;  %1092 = vmatpush1.bf16.msra.mxu1 %v1155_v0  ;;  %s1106_s21 = smul.u32 80, %s1253_s18  ;;  %v1165_v36 = vld [vmem:[%s1638_s1 + $0x8] sm:$0xff]   ;;  %v1166_v44 = vld [vmem:[%s1638_s1] sm:$0xff]   ;;  %v1169_v57 = vld [vmem:[%s1638_s1 + $0x58] sm:$0xff]   ;;  %vm333_vm4 = vcmask 326656   ;;  %vm336_vm5 = vcmask 523264  }
   0xf   : > { %800 = vmatprep.subr.bf16.mxu0 %v1197_v1  ;;  %1079 = vmatprep.subr.bf16.mxu1 %v1197_v1  ;;  %v1167_v45 = vld [vmem:[%s1638_s1 + $0x68] ss:$0 sps:$4 sm:$0xff]   ;;  %v1168_v52 = vld [vmem:[%s1638_s1 + $0x60] sm:$0xff]   ;;  %v1170_v59 = vld [vmem:[%s1638_s1 + $0x50] sm:$0xff]   ;;  %vm321_vm6 = vcmask 588800   ;;  %vm324_vm7 = vcmask 785408  }
  0x10   : > { %s1264_s24 = scalar_lea.vmem %s1637_s0, %s1106_s21  ;;  %v796_v48 = vsel %vm684_vm0, %v1167_v45, 0  ;;  %v1171_v63 = vld [vmem:[%s1638_s1 + $0x48] sm:$0xff]   ;;  %vm327_vm8 = vcmask 982016   ;;  %vm786_vm9 = vcmask 719872   ;;  %vm921_vm10 = vcmask 1040384  }
  0x11   : > { %v1270_v4 = vld [vmem:[%s1264_s24 + $0x18] sm:$0xf]  ;;  %v1273_v5 = vld [vmem:[%s1264_s24 + $0x8] sm:$0xf]  ;;  %v240_v7 = vld [vmem:[%s1264_s24 + $0xc] sm:$0x1] }
  0x12   : > { %801 = vmatpush1.bf16.msra.mxu0 %v1156_v2  ;;  %1093 = vmatpush1.bf16.msra.mxu1 %v1156_v2  ;;  %v1279_v6 = vcombine.low %v1270_v4, %v1270_v4  ;;  %v1283_v8 = vld [vmem:[%s1264_s24 + $0x10] sm:$0xf]  ;;  %v242_v9 = vld [vmem:[%s1264_s24 + $0x14] sm:$0x1]  ;;  %v1041_v10 = vcombine.low %v1273_v5, %v240_v7  ;;  %v1288_v11 = vld [vmem:[%s1264_s24] sm:$0xf]  ;;  %v1040_v49 = vcombine.low %v1273_v5, %v1273_v5 }
  0x13   : > { %802 = vmatprep.subr.bf16.mxu0 %v1197_v1  ;;  %1080 = vmatprep.subr.bf16.mxu1 %v1197_v1  ;;  %v238_v12 = vld [vmem:[%s1264_s24 + $0x4] sm:$0x1]  ;;  %v244_v13 = vld [vmem:[%s1264_s24 + $0x1c] sm:$0x1]  ;;  %v1042_v14 = vcombine.low %v1283_v8, %v1283_v8  ;;  %v1297_v15 = vcombine.low %v1283_v8, %v242_v9  ;;  %v1334_v37 = vld [vmem:[%s1264_s24 + $0x28] sm:$0xf] }
  0x14   : > { %352 = vrot.lane.b32.xlu1 %v1279_v6, %s1198_s27  ;;  %v1039_v16 = vcombine.low %v1288_v11, %v238_v12  ;;  %v291_v18 = vrot.slane %v1041_v10, 1  ;;  %v285_v19 = vshll.u32 %v1041_v10, 16  ;;  %v1045_v20 = vcombine.low %v1270_v4, %v244_v13  ;;  %v248_v38 = vld [vmem:[%s1264_s24 + $0x2c] sm:$0x1]  ;;  %v1374_v53 = vld [vmem:[%s1264_s24 + $0x20] sm:$0xf] }
  0x15   : > { %v283_v21 = vshrl.u32 %v1041_v10, 16  ;;  %v1309_v24 = vrot.slane %v1297_v15, 1  ;;  %v305_v35 = vshll.u32 %v1297_v15, 16  ;;  %v303_v40 = vshrl.u32 %v1297_v15, 16  ;;  %v246_v54 = vld [vmem:[%s1264_s24 + $0x24] sm:$0x1] }
  0x16   : > { %803 = vmatpush1.bf16.msra.mxu0 %v1159_v3  ;;  %1094 = vmatpush1.bf16.msra.mxu1 %v1159_v3  ;;  %v287_v22 = vrot.slane %v285_v19, 1  ;;  %v265_v23 = vshll.u32 %v1039_v16, 16  ;;  %v263_v27 = vshrl.u32 %v1039_v16, 16  ;;  %v360_v29 = vshll.u32 %v1045_v20, 16  ;;  %v1406_v61 = vld [vmem:[%s1264_s24 + $0x30] sm:$0xf] }
  0x17   : > { %804 = vmatprep.subr.bf16.mxu0 %v1197_v1  ;;  %1081 = vmatprep.subr.bf16.mxu1 %v1197_v1  ;;  %v271_v30 = vrot.slane %v1039_v16, 1  ;;  %v358_v33 = vshrl.u32 %v1045_v20, 16  ;;  %v307_v41 = vrot.slane %v305_v35, 1  ;;  %v1344_v42 = vrot.slane %v1045_v20, 1  ;;  %v250_v62 = vld [vmem:[%s1264_s24 + $0x34] sm:$0x1] }
  0x18   : > { %341 = vrot.lane.b32.xlu0 %v291_v18, %s1199_s30  ;;  %343 = vrot.lane.b32.xlu1 %v1042_v14, %s1200_s4  ;;  %v1317_v26 = vor.u32 %v287_v22, %v283_v21  ;;  %v267_v28 = vrot.slane %v265_v23, 1  ;;  %v362_v34 = vrot.slane %v360_v29, 1  ;;  %v1049_v43 = vcombine.low %v1334_v37, %v248_v38  ;;  %v1413_v0 = vld [vmem:[%s1264_s24 + $0x38] sm:$0xf]  ;;  %v252_v2 = vld [vmem:[%s1264_s24 + $0x3c] sm:$0x1] }
  0x19   : > { %v1357_v46 = vor.u32 %v307_v41, %v303_v40  ;;  %v1047_v56 = vcombine.low %v1374_v53, %v246_v54  ;;  %v1048_v3 = vcombine.low %v1334_v37, %v1334_v37  ;;  %v1051_v7 = vcombine.low %v1406_v61, %v250_v62  ;;  %v1172_v13 = vld [vmem:[%s1638_s1 + $0x40] sm:$0xff]  }
  0x1a   : > { %805 = vmatpush1.bf16.msra.mxu0 %v1162_v17  ;;  %1095 = vmatpush1.bf16.msra.mxu1 %v1162_v17  ;;  %v268_v32 = vor.u32 %v267_v28, %v263_v27  ;;  %v1340_v39 = vor.u32 %v362_v34, %v358_v33  ;;  %v454_v47 = vshll.u32 %v1049_v43, 16  ;;  %v452_v50 = vshrl.u32 %v1049_v43, 16  ;;  %v256_v28 = vld [vmem:[%s1264_s24 + $0x4c] sm:$0x1]  ;;  %v253_v29 = vld [vmem:[%s1264_s24 + $0x40] sm:$0xf] }
  0x1b   : > { %806 = vmatprep.subr.bf16.mxu0 %v1197_v1  ;;  %1082 = vmatprep.subr.bf16.mxu1 %v1197_v1  ;;  %v1394_v58 = vrot.slane %v1047_v56, 1  ;;  %v460_v60 = vrot.slane %v1049_v43, 1  ;;  %v1426_v9 = vcombine.low %v1413_v0, %v1413_v0  ;;  %v1053_v10 = vcombine.low %v1413_v0, %v252_v2 }
  0x1c   : > { %292 = vrot.lane.b32.xlu0 %v291_v18, %s1201_s7  ;;  %347 = vrot.lane.b32.xlu1 %v1309_v24, %s1201_s7  ;;  %v456_v51 = vrot.slane %v454_v47, 1  ;;  %v407_v12 = vshll.u32 %v1047_v56, 16  ;;  %v1046_v15 = vcombine.low %v1374_v53, %v1374_v53  ;;  %v405_v16 = vshrl.u32 %v1047_v56, 16 }
  0x1d   : > { %v548_v18 = vshll.u32 %v1053_v10, 16  ;;  %v1050_v22 = vcombine.low %v1406_v61, %v1406_v61  ;;  %v501_v23 = vshll.u32 %v1051_v7, 16  ;;  %v554_v27 = vrot.slane %v1053_v10, 1 }
  0x1e   : > { %807 = vmatpush1.bf16.msra.mxu0 %v1163_v25  ;;  %1096 = vmatpush1.bf16.msra.mxu1 %v1163_v25  ;;  %v1382_v55 = vor.u32 %v456_v51, %v452_v50  ;;  %v409_v17 = vrot.slane %v407_v12, 1  ;;  %v499_v25 = vshrl.u32 %v1051_v7, 16  ;;  %vm923_vm11 = vcmask 1041408  }
  0x1f   : > { %808 = vmatprep.subr.bf16.mxu0 %v1197_v1  ;;  %1083 = vmatprep.subr.bf16.mxu1 %v1197_v1  ;;  %v550_v20 = vrot.slane %v548_v18, 1 }
  0x20   : > { %339 = vrot.lane.b32.xlu0 %v1317_v26, %s1202_s10  ;;  %272 = vrot.lane.b32.xlu1 %v271_v30, %s1199_s30  ;;  %v410_v19 = vor.u32 %v409_v17, %v405_v16  ;;  %v254_v30 = vld [vmem:[%s1264_s24 + $0x44] sm:$0x1] }
  0x22   : > { %809 = vmatpush1.bf16.msra.mxu0 %v1164_v31  ;;  %1097 = vmatpush1.bf16.msra.mxu1 %v1164_v31  ;;  %v255_v31 = vld [vmem:[%s1264_s24 + $0x48] sm:$0xf]  ;;  %s1036_s24 = sshll.u32 %s1187_s12, 3  ;;  %s1038_s12 = sshll.u32 %s1253_s18, 3 }
  0x23   : > { %810 = vmatprep.subr.bf16.mxu0 %v1197_v1  ;;  %1084 = vmatprep.subr.bf16.mxu1 %v1197_v1  ;;  %v1056_v33 = vcombine.low %v255_v31, %v255_v31  ;;  %p193_p5 = scmp.lt.s32.totalorder %s1036_s24, 15  ;;  %s203_s20 = scalar_lea.vmem %s1640_s3, %s1038_s12 }
  0x24   : > { %269 = vrot.lane.b32.xlu0 %v268_v32, %s1202_s10  ;;  %297 = vrot.lane.b32.xlu1 %v1042_v14, %s1198_s27  ;;  %v507_v14 = vrot.slane %v1051_v7, 1  ;;  %v1055_v32 = vcombine.low %v253_v29, %v254_v30 }
  0x25   : > { %s1646_s24 = smov (!%p193_p5, %s1036_s24), 15 }
  0x26   : > { %811 = vmatpush1.bf16.msra.mxu0 %v1165_v36  ;;  %1098 = vmatpush1.bf16.msra.mxu1 %v1165_v36  ;;  %v601_v34 = vrot.slane %v1055_v32, 1  ;;  %v1054_v36 = vcombine.low %v253_v29, %v253_v29  ;;  %v595_v41 = vshll.u32 %v1055_v32, 16 }
  0x27   : > { %812 = vmatprep.subr.bf16.mxu0 %v1197_v1  ;;  %1085 = vmatprep.subr.bf16.mxu1 %v1197_v1 }
  0x28   : > { %364 = vrot.lane.b32.xlu0 %v1340_v39, %s1203_s22  ;;  %367 = vrot.lane.b32.xlu1 %v1344_v42, %s1204_s23  ;;  %v597_v43 = vrot.slane %v595_v41, 1 }
  0x2a   : > { %813 = vmatpush1.bf16.msra.mxu0 %v1166_v44  ;;  %1099 = vmatpush1.bf16.msra.mxu1 %v1166_v44 }
  0x2b   : > { %818 = vmatprep.subr.bf16.mxu0 %v1197_v1  ;;  %1086 = vmatprep.subr.bf16.mxu1 %v1197_v1 }
  0x2c   : > { %345 = vrot.lane.b32.xlu0 %v1357_v46, %s1205_s25  ;;  %309 = vrot.lane.b32.xlu1 %v1357_v46, %s1203_s22 }
  0x2e   : > { %819 = vmatpush2.bf16.msra.mxu0 %v796_v48  ;;  %1100 = vmatpush2.bf16.msra.mxu1 %v796_v48 }
  0x2f   : > { %820 = vmatprep.subr.bf16.mxu0 %v1197_v1  ;;  %1087 = vmatprep.subr.bf16.mxu1 %v1197_v1 }
  0x30   : > { %277 = vrot.lane.b32.xlu0 %v1040_v49, %s1200_s4  ;;  %312 = vrot.lane.b32.xlu1 %v1309_v24, %s1204_s23 }
  0x32   : > { %821 = vmatpush2.bf16.msra.mxu0 %v1168_v52  ;;  %1101 = vmatpush2.bf16.msra.mxu1 %v1168_v52 }
  0x33   : > { %822 = vmatprep.subr.bf16.mxu0 %v1197_v1  ;;  %1088 = vmatprep.subr.bf16.mxu1 %v1197_v1 }
  0x34   : > { %289 = vrot.lane.b32.xlu0 %v1317_v26, %s1205_s25  ;;  %527 = vrot.lane.b32.xlu1 %v1382_v55, %s1202_s10  ;;  %v503_v26 = vrot.slane %v501_v23, 1 }
  0x36   : > { %823 = vmatpush2.bf16.msra.mxu0 %v1169_v57  ;;  %1102 = vmatpush2.bf16.msra.mxu1 %v1169_v57 }
  0x37   : > { %824 = vmatprep.subr.bf16.mxu0 %v1197_v1  ;;  %1089 = vmatprep.subr.bf16.mxu1 %v1197_v1 }
  0x38   : > { %433 = vrot.lane.b32.xlu0 %v1340_v39, %s1202_s10  ;;  %441 = vrot.lane.b32.xlu1 %v1394_v58, %s1201_s7 }
  0x3a   : > { %825 = vmatpush2.bf16.msra.mxu0 %v1170_v59  ;;  %1103 = vmatpush2.bf16.msra.mxu1 %v1170_v59 }
  0x3b   : > { %826 = vmatprep.subr.bf16.mxu0 %v1197_v1  ;;  %1090 = vmatprep.subr.bf16.mxu1 %v1197_v1 }
  0x3c   : > { %435 = vrot.lane.b32.xlu0 %v1344_v42, %s1199_s30  ;;  %529 = vrot.lane.b32.xlu1 %v460_v60, %s1199_s30 }
  0x3e   : > { %827 = vmatpush2.bf16.msra.mxu0 %v1171_v63  ;;  %1104 = vmatpush2.bf16.msra.mxu1 %v1171_v63 }
  0x3f   : > { %828 = vmatprep.subr.bf16.mxu0 %v1197_v1  ;;  %1091 = vmatprep.subr.bf16.mxu1 %v1197_v1  ;;  %v546_v1 = vshrl.u32 %v1053_v10, 16 }
  0x40   : > { %446 = vrot.lane.b32.xlu0 %v1048_v3, %s1198_s27  ;;  %540 = vrot.lane.b32.xlu1 %v1426_v9, %s1198_s27 }
  0x41   : > { %v1444_v21 = vor.u32 %v550_v20, %v546_v1 }
  0x42   : > { %829 = vmatpush2.bf16.msra.mxu0 %v1172_v13  ;;  %1105 = vmatpush2.bf16.msra.mxu1 %v1172_v13 }
  0x44   : > { %535 = vrot.lane.b32.xlu0 %v507_v14, %s1201_s7  ;;  %437 = vrot.lane.b32.xlu1 %v1046_v15, %s1200_s4 }
  0x48   : > { %386 = vrot.lane.b32.xlu0 %v1357_v46, %s1202_s10  ;;  %480 = vrot.lane.b32.xlu1 %v410_v19, %s1202_s10 }
  0x4c   : > { %458 = vrot.lane.b32.xlu0 %v1382_v55, %s1203_s22  ;;  %552 = vrot.lane.b32.xlu1 %v1444_v21, %s1203_s22 }
  0x50   : > { %531 = vrot.lane.b32.xlu0 %v1050_v22, %s1200_s4  ;;  %394 = vrot.lane.b32.xlu1 %v1344_v42, %s1201_s7  ;;  %v593_v42 = vshrl.u32 %v1055_v32, 16 }
  0x52   : > { %v598_v46 = vor.u32 %v597_v43, %v593_v42 }
  0x54   : > { %388 = vrot.lane.b32.xlu0 %v1309_v24, %s1199_s30  ;;  %439 = vrot.lane.b32.xlu1 %v410_v19, %s1205_s25  ;;  %v504_v24 = vor.u32 %v503_v26, %v499_v25 }
  0x58   : > { %399 = vrot.lane.b32.xlu0 %v1046_v15, %s1198_s27  ;;  %482 = vrot.lane.b32.xlu1 %v1394_v58, %s1199_s30 }
  0x5c   : > { %461 = vrot.lane.b32.xlu0 %v460_v60, %s1204_s23  ;;  %493 = vrot.lane.b32.xlu1 %v1050_v22, %s1198_s27 }
  0x60   : > { %488 = vrot.lane.b32.xlu0 %v460_v60, %s1201_s7  ;;  %555 = vrot.lane.b32.xlu1 %v554_v27, %s1204_s23 }
  0x64   : > { %533 = vrot.lane.b32.xlu0 %v504_v24, %s1205_s25  ;;  %411 = vrot.lane.b32.xlu1 %v410_v19, %s1203_s22 }
  0x68   : > { %390 = vrot.lane.b32.xlu0 %v1279_v6, %s1200_s4  ;;  %505 = vrot.lane.b32.xlu1 %v504_v24, %s1203_s22  ;;  %v1057_v6 = vcombine.low %v255_v31, %v256_v28 }
  0x6a   : > { %v642_v35 = vshll.u32 %v1057_v6, 16  ;;  %v640_v38 = vshrl.u32 %v1057_v6, 16  ;;  %v648_v44 = vrot.slane %v1057_v6, 1 }
  0x6c   : > { %484 = vrot.lane.b32.xlu0 %v1048_v3, %s1200_s4  ;;  %414 = vrot.lane.b32.xlu1 %v1394_v58, %s1204_s23 }
  0x70   : > { %392 = vrot.lane.b32.xlu0 %v1340_v39, %s1205_s25  ;;  %508 = vrot.lane.b32.xlu1 %v507_v14, %s1204_s23  ;;  %v644_v39 = vrot.slane %v642_v35, 1 }
  0x72   : > { %v645_v40 = vor.u32 %v644_v39, %v640_v38 }
  0x74   : > { %486 = vrot.lane.b32.xlu0 %v1382_v55, %s1205_s25  ;;  %623 = vrot.lane.b32.xlu1 %v554_v27, %s1199_s30 }
  0x78   : > { %621 = vrot.lane.b32.xlu0 %v1444_v21, %s1202_s10  ;;  %634 = vrot.lane.b32.xlu1 %v1056_v33, %s1198_s27 }
  0x7c   : > { %629 = vrot.lane.b32.xlu0 %v601_v34, %s1201_s7  ;;  %625 = vrot.lane.b32.xlu1 %v1054_v36, %s1200_s4 }
  0x80   : > { %574 = vrot.lane.b32.xlu0 %v504_v24, %s1202_s10  ;;  %576 = vrot.lane.b32.xlu1 %v507_v14, %s1199_s30 }
  0x84   : > { %646 = vrot.lane.b32.xlu0 %v645_v40, %s1203_s22  ;;  %587 = vrot.lane.b32.xlu1 %v1054_v36, %s1198_s27  ;;  %s1037_s27 = sshll.u32 %s1646_s24, 3 }
  0x86   : > { %v353_v45 = vpop.permute.xlu1 %352 }
  0x88   : > { %582 = vrot.lane.b32.xlu0 %v554_v27, %s1201_s7  ;;  %649 = vrot.lane.b32.xlu1 %v648_v44, %s1204_s23  ;;  %s1589_s7 = scalar_lea.vmem %s1639_s2, %s1037_s27 }
  0x8a   : > { %v342_v47 = vpop.permute.xlu0 %341  ;;  %v344_v48 = vpop.permute.xlu1 %343 }
  0x8c   : > { %627 = vrot.lane.b32.xlu0 %v598_v46, %s1205_s25  ;;  %599 = vrot.lane.b32.xlu1 %v598_v46, %s1203_s22 }
  0x8e   : > { %v293_v49 = vpop.permute.xlu0 %292  ;;  %v348_v50 = vpop.permute.xlu1 %347 }
  0x8f   : > { %v381_v59 = vsel %vm330_vm2, %v348_v50, %v353_v45 }
  0x90   : > { %578 = vrot.lane.b32.xlu0 %v1426_v9, %s1200_s4  ;;  %602 = vrot.lane.b32.xlu1 %v601_v34, %s1204_s23 }
  0x92   : > { %v340_v51 = vpop.permute.xlu0 %339  ;;  %v273_v52 = vpop.permute.xlu1 %272 }
  0x93   : > { %v371_v56 = vsel %vm314_vm1, %v1273_v5, %v340_v51 }
  0x94   : > { %580 = vrot.lane.b32.xlu0 %v1444_v21, %s1205_s25  ;;  %v373_v60 = vsel %vm318_vm3, %v371_v56, %v342_v47 }
  0x95   : > { %v375_v7 = vsel %vm321_vm6, %v373_v60, %v344_v48 }
  0x96   : > { %v270_v54 = vpop.permute.xlu0 %269  ;;  %v298_v55 = vpop.permute.xlu1 %297 }
  0x97   : > { %v317_v9 = vsel %vm314_vm1, %v1288_v11, %v270_v54  ;;  %v332_v10 = vsel %vm330_vm2, %v293_v49, %v298_v55 }
  0x98   : > { %v320_v18 = vsel %vm318_vm3, %v317_v9, %v273_v52 }
  0x9a   : > { %v365_v57 = vpop.permute.xlu0 %364  ;;  %v368_v58 = vpop.permute.xlu1 %367 }
  0x9b   : > { %v383_v62 = vsel %vm333_vm4, %v381_v59, %v365_v57 }
  0x9c   : > { %v385_v3 = vsel %vm336_vm5, %v383_v62, %v368_v58 }
  0x9d   : > { %v671_v13 = vrot.slane %v385_v3, 4 }
  0x9e   : > { %v346_v63 = vpop.permute.xlu0 %345  ;;  %v310_v2 = vpop.permute.xlu1 %309 }
  0x9f   : > { %v377_v5 = vsel %vm324_vm7, %v375_v7, %v346_v63  ;;  %v335_v14 = vsel %vm333_vm4, %v332_v10, %v310_v2 }
  0xa0   : > { %v379_v16 = vsel %vm327_vm8, %v377_v5, %v348_v50 }
  0xa1   : > { %v670_v11 = vrot.slane %v379_v16, 4 }
  0xa2   : > { %v278_v12 = vpop.permute.xlu0 %277  ;;  %v313_v15 = vpop.permute.xlu1 %312 }
  0xa3   : > { %v338_v17 = vsel %vm336_vm5, %v335_v14, %v313_v15  ;;  %v323_v1 = vsel %vm321_vm6, %v320_v18, %v278_v12 }
  0xa4   : > { %v689_v19 = vsel %vm684_vm0, %v338_v17, %v671_v13 }
  0xa5   : > { %1072 = vmatprep.mubr.msk.bf16.mxu0 %vm786_vm9, %v689_v19 }
  0xa6   : > { %v290_v20 = vpop.permute.xlu0 %289  ;;  %v528_v22 = vpop.permute.xlu1 %527 }
  0xa7   : > { %v326_v21 = vsel %vm324_vm7, %v323_v1, %v290_v20  ;;  %v559_v58 = vsel %vm314_vm1, %v1334_v37, %v528_v22 }
  0xa8   : > { %v329_v23 = vsel %vm327_vm8, %v326_v21, %v293_v49 }
  0xa9   : > { %v686_v25 = vsel %vm684_vm0, %v329_v23, %v670_v11 }
  0xaa   : > { %831 = vmatmul.mubr.bf16.vlgmr.msra.gmra.mxu0 %v686_v25  ;;  %v434_v26 = vpop.permute.xlu0 %433  ;;  %v442_v27 = vpop.permute.xlu1 %441 }
  0xab   : > { %v465_v49 = vsel %vm314_vm1, %v1270_v4, %v434_v26 }
  0xae   : > { %v436_v24 = vpop.permute.xlu0 %435  ;;  %v530_v28 = vpop.permute.xlu1 %529 }
  0xaf   : > { %v467_v52 = vsel %vm318_vm3, %v465_v49, %v436_v24  ;;  %v561_v60 = vsel %vm318_vm3, %v559_v58, %v530_v28 }
  0xb2   : > { %v447_v29 = vpop.permute.xlu0 %446  ;;  %v541_v30 = vpop.permute.xlu1 %540 }
  0xb3   : > { %v475_v50 = vsel %vm330_vm2, %v442_v27, %v447_v29 }
  0xb6   : > { %v536_v31 = vpop.permute.xlu0 %535  ;;  %v438_v6 = vpop.permute.xlu1 %437 }
  0xb7   : > { %v469_v56 = vsel %vm321_vm6, %v467_v52, %v438_v6  ;;  %v569_v4 = vsel %vm330_vm2, %v536_v31, %v541_v30 }
  0xba   : > { %v387_v32 = vpop.permute.xlu0 %386  ;;  %v481_v33 = vpop.permute.xlu1 %480 }
  0xbb   : > { %v418_v2 = vsel %vm314_vm1, %v1283_v8, %v387_v32  ;;  %v512_v22 = vsel %vm314_vm1, %v1374_v53, %v481_v33 }
  0xbe   : > { %v459_v34 = vpop.permute.xlu0 %458  ;;  %v553_v35 = vpop.permute.xlu1 %552 }
  0xbf   : > { %v477_v54 = vsel %vm333_vm4, %v475_v50, %v459_v34  ;;  %v571_v3 = vsel %vm333_vm4, %v569_v4, %v553_v35 }
  0xc2   : > { %v532_v36 = vpop.permute.xlu0 %531  ;;  %v395_v38 = vpop.permute.xlu1 %394 }
  0xc3   : > { %v563_v37 = vsel %vm321_vm6, %v561_v60, %v532_v36 }
  0xc6   : > { %v389_v39 = vpop.permute.xlu0 %388  ;;  %v440_v40 = vpop.permute.xlu1 %439 }
  0xc7   : > { %v471_v59 = vsel %vm324_vm7, %v469_v56, %v440_v40  ;;  %v420_v14 = vsel %vm318_vm3, %v418_v2, %v389_v39 }
  0xc8   : > { %v473_v10 = vsel %vm327_vm8, %v471_v59, %v442_v27 }
  0xc9   : > { %v674_v19 = vrot.slane %v473_v10, 4 }
  0xca   : > { %v400_v41 = vpop.permute.xlu0 %399  ;;  %v483_v42 = vpop.permute.xlu1 %482 }
  0xcb   : > { %v428_v62 = vsel %vm330_vm2, %v395_v38, %v400_v41  ;;  %v514_v27 = vsel %vm318_vm3, %v512_v22, %v483_v42 }
  0xce   : > { %v462_v43 = vpop.permute.xlu0 %461  ;;  %v494_v44 = vpop.permute.xlu1 %493 }
  0xcf   : > { %v479_v57 = vsel %vm336_vm5, %v477_v54, %v462_v43 }
  0xd0   : > { %v675_v7 = vrot.slane %v479_v57, 4 }
  0xd2   : > { %v489_v45 = vpop.permute.xlu0 %488  ;;  %v556_v46 = vpop.permute.xlu1 %555 }
  0xd3   : > { %v573_v12 = vsel %vm336_vm5, %v571_v3, %v556_v46  ;;  %v522_v16 = vsel %vm330_vm2, %v489_v45, %v494_v44 }
  0xd4   : > { %v679_v1 = vrot.slane %v573_v12, 4 }
  0xd6   : > { %v534_v47 = vpop.permute.xlu0 %533  ;;  %v412_v48 = vpop.permute.xlu1 %411 }
  0xd7   : > { %v430_v5 = vsel %vm333_vm4, %v428_v62, %v412_v48  ;;  %v565_v15 = vsel %vm324_vm7, %v563_v37, %v534_v47 }
  0xd8   : > { %v567_v23 = vsel %vm327_vm8, %v565_v15, %v536_v31 }
  0xd9   : > { %v678_v6 = vrot.slane %v567_v23, 4 }
  0xda   : > { %v391_v51 = vpop.permute.xlu0 %390  ;;  %v506_v55 = vpop.permute.xlu1 %505 }
  0xdb   : > { %v422_v17 = vsel %vm321_vm6, %v420_v14, %v391_v51  ;;  %v524_v20 = vsel %vm333_vm4, %v522_v16, %v506_v55 }
  0xde   : > { %v485_v63 = vpop.permute.xlu0 %484  ;;  %v415_v9 = vpop.permute.xlu1 %414 }
  0xdf   : > { %v432_v13 = vsel %vm336_vm5, %v430_v5, %v415_v9  ;;  %v516_v29 = vsel %vm321_vm6, %v514_v27, %v485_v63 }
  0xe0   : > { %v694_v8 = vsel %vm684_vm0, %v432_v13, %v675_v7 }
  0xe1   : > { %1073 = vmatprep.mubr.msk.bf16.mxu0 %vm786_vm9, %v694_v8 }
  0xe2   : > { %v393_v18 = vpop.permute.xlu0 %392  ;;  %v509_v21 = vpop.permute.xlu1 %508 }
  0xe3   : > { %v424_v11 = vsel %vm324_vm7, %v422_v17, %v393_v18  ;;  %v526_v25 = vsel %vm336_vm5, %v524_v20, %v509_v21 }
  0xe4   : > { %v426_v26 = vsel %vm327_vm8, %v424_v11, %v395_v38  ;;  %v699_v28 = vsel %vm684_vm0, %v526_v25, %v679_v1 }
  0xe5   : > { %v691_v24 = vsel %vm684_vm0, %v426_v26, %v674_v19  ;;  %1074 = vmatprep.mubr.msk.bf16.mxu1 %vm786_vm9, %v699_v28 }
  0xe6   : > { %839 = vmatmul.mubr.bf16.gmra.mxu0 %v691_v24  ;;  %v487_v30 = vpop.permute.xlu0 %486  ;;  %v624_v31 = vpop.permute.xlu1 %623 }
  0xe7   : > { %v518_v53 = vsel %vm324_vm7, %v516_v29, %v487_v30 }
  0xe8   : > { %v520_v32 = vsel %vm327_vm8, %v518_v53, %v489_v45 }
  0xe9   : > { %v696_v33 = vsel %vm684_vm0, %v520_v32, %v678_v6 }
  0xea   : > { %847 = vmatmul.mubr.bf16.vlgmr.msra.gmra.mxu1 %v696_v33  ;;  %v622_v34 = vpop.permute.xlu0 %621  ;;  %v635_v35 = vpop.permute.xlu1 %634 }
  0xeb   : > { %v653_v46 = vsel %vm314_vm1, %v1413_v0, %v622_v34 }
  0xec   : > { %v655_v45 = vsel %vm318_vm3, %v653_v46, %v624_v31 }
  0xee   : > { %v630_v36 = vpop.permute.xlu0 %629  ;;  %v626_v38 = vpop.permute.xlu1 %625 }
  0xef   : > { %v663_v47 = vsel %vm330_vm2, %v630_v36, %v635_v35  ;;  %v657_v51 = vsel %vm321_vm6, %v655_v45, %v626_v38 }
  0xf2   : > { %v575_v39 = vpop.permute.xlu0 %574  ;;  %v577_v40 = vpop.permute.xlu1 %576 }
  0xf3   : > { %v606_v55 = vsel %vm314_vm1, %v1406_v61, %v575_v39 }
  0xf4   : > { %v608_v62 = vsel %vm318_vm3, %v606_v55, %v577_v40 }
  0xf6   : > { %v647_v41 = vpop.permute.xlu0 %646  ;;  %v588_v42 = vpop.permute.xlu1 %587 }
  0xf7   : > { %v665_v49 = vsel %vm333_vm4, %v663_v47, %v647_v41 }
  0xfa   : > { %v583_v43 = vpop.permute.xlu0 %582  ;;  %v650_v44 = vpop.permute.xlu1 %649 }
  0xfb   : > { %v667_v52 = vsel %vm336_vm5, %v665_v49, %v650_v44  ;;  %v616_v56 = vsel %vm330_vm2, %v583_v43, %v588_v42 }
  0xfc   : > { %v683_v57 = vrot.slane %v667_v52, 4 }
  0xfe   : > { %v628_v48 = vpop.permute.xlu0 %627  ;;  %v600_v50 = vpop.permute.xlu1 %599 }
  0xff   : > { %v659_v54 = vsel %vm324_vm7, %v657_v51, %v628_v48  ;;  %v618_v58 = vsel %vm333_vm4, %v616_v56, %v600_v50 }
 0x100   : > { %v661_v60 = vsel %vm327_vm8, %v659_v54, %v630_v36 }
 0x101   : > { %v682_v61 = vrot.slane %v661_v60, 4 }
 0x102   : > { %v579_v0 = vpop.permute.xlu0 %578  ;;  %v603_v59 = vpop.permute.xlu1 %602 }
 0x103   : > { %v620_v4 = vsel %vm336_vm5, %v618_v58, %v603_v59  ;;  %v610_v2 = vsel %vm321_vm6, %v608_v62, %v579_v0 }
 0x104   : > { %v704_v63 = vsel %vm684_vm0, %v620_v4, %v683_v57 }
 0x105   : > { %1075 = vmatprep.mubr.msk.bf16.mxu1 %vm786_vm9, %v704_v63 }
 0x106   : > { %v581_v3 = vpop.permute.xlu0 %580 }
 0x107   : > { %v612_v7 = vsel %vm324_vm7, %v610_v2, %v581_v3 }
 0x108   : > { %v614_v5 = vsel %vm327_vm8, %v612_v7, %v583_v43 }
 0x109   : > { %v701_v9 = vsel %vm684_vm0, %v614_v5, %v682_v61 }
 0x10a   : > { %855 = vmatmul.mubr.bf16.gmra.mxu1 %v701_v9 }
 0x16a   : > { %v832_v37 = vpop.f32.mrf.mxu0 }
 0x16b   : > { %863 = vst.msk [vmem:[%s1589_s7] sm:$0xff] %vm314_vm1, %v832_v37  ;;  %v892_v12 = vmul.f32 %v832_v37, %v832_v37  ;;  %v871_v14 = vsel %vm314_vm1, %v832_v37, 0.0 }
 0x16c   : > { %v834_v10 = vpop.f32.mrf.mxu0 }
 0x16d   : > { %v900_v18 = vsel %vm314_vm1, %v892_v12, 0.0 }
 0x16e   : > { %v835_v13 = vpop.f32.mrf.mxu0 }
 0x16f   : > { %864 = vst.msk [vmem:[%s1589_s7 + $0x8] sm:$0xff] %vm314_vm1, %v835_v13  ;;  %v872_v15 = vsel %vm314_vm1, %v835_v13, 0.0  ;;  %v893_v8 = vmul.f32 %v835_v13, %v835_v13 }
 0x170   : > { %v873_v16 = vadd.f32 %v872_v15, %v871_v14  ;;  %v837_v17 = vpop.f32.mrf.mxu0 }
 0x171   : > { %v901_v19 = vsel %vm314_vm1, %v893_v8, 0.0 }
 0x172   : > { %v902_v1 = vadd.f32 %v901_v19, %v900_v18 }
 0x1a6   : > { %v840_v20 = vpop.f32.mrf.mxu0 }
 0x1a7   : > { %865 = vst.msk [vmem:[%s1589_s7 + $0x10] sm:$0xff] %vm314_vm1, %v840_v20  ;;  %v894_v24 = vmul.f32 %v840_v20, %v840_v20  ;;  %v874_v28 = vsel %vm314_vm1, %v840_v20, 0.0 }
 0x1a8   : > { %v842_v11 = vpop.f32.mrf.mxu0  ;;  %v875_v53 = vadd.f32 %v874_v28, %v873_v16 }
 0x1a9   : > { %v903_v30 = vsel %vm314_vm1, %v894_v24, 0.0 }
 0x1aa   : > { %v843_v21 = vpop.f32.mrf.mxu0  ;;  %v848_v22 = vpop.f32.mrf.mxu1  ;;  %v904_v32 = vadd.f32 %v903_v30, %v902_v1 }
 0x1ab   : > { %866 = vst.msk [vmem:[%s1589_s7 + $0x18] sm:$0xff] %vm314_vm1, %v843_v21  ;;  %867 = vst.msk [vmem:[%s1589_s7 + $0x20] sm:$0xff] %vm314_vm1, %v848_v22  ;;  %v895_v29 = vmul.f32 %v843_v21, %v843_v21  ;;  %v876_v6 = vsel %vm314_vm1, %v843_v21, 0.0  ;;  %v896_v34 = vmul.f32 %v848_v22, %v848_v22  ;;  %v878_v36 = vsel %vm314_vm1, %v848_v22, 0.0 }
 0x1ac   : > { %v845_v23 = vpop.f32.mrf.mxu0  ;;  %v850_v25 = vpop.f32.mrf.mxu1  ;;  %v877_v33 = vadd.f32 %v876_v6, %v875_v53 }
 0x1ad   : > { %v905_v31 = vsel %vm314_vm1, %v895_v29, 0.0  ;;  %v907_v40 = vsel %vm314_vm1, %v896_v34, 0.0 }
 0x1ae   : > { %v851_v26 = vpop.f32.mrf.mxu1  ;;  %v906_v35 = vadd.f32 %v905_v31, %v904_v32  ;;  %v879_v39 = vadd.f32 %v878_v36, %v877_v33 }
 0x1af   : > { %868 = vst.msk [vmem:[%s1589_s7 + $0x28] sm:$0xff] %vm314_vm1, %v851_v26  ;;  %v897_v38 = vmul.f32 %v851_v26, %v851_v26  ;;  %v880_v41 = vsel %vm314_vm1, %v851_v26, 0.0 }
 0x1b0   : > { %v853_v27 = vpop.f32.mrf.mxu1  ;;  %v908_v42 = vadd.f32 %v907_v40, %v906_v35  ;;  %v881_v48 = vadd.f32 %v880_v41, %v879_v39 }
 0x1b1   : > { %v909_v44 = vsel %vm314_vm1, %v897_v38, 0.0 }
 0x1b2   : > { %v910_v50 = vadd.f32 %v909_v44, %v908_v42 }
 0x1ca   : > { %v856_v43 = vpop.f32.mrf.mxu1 }
 0x1cb   : > { %869 = vst.msk [vmem:[%s1589_s7 + $0x30] sm:$0xff] %vm314_vm1, %v856_v43  ;;  %v882_v46 = vsel %vm314_vm1, %v856_v43, 0.0  ;;  %v898_v47 = vmul.f32 %v856_v43, %v856_v43 }
 0x1cc   : > { %v858_v45 = vpop.f32.mrf.mxu1  ;;  %v883_v51 = vadd.f32 %v882_v46, %v881_v48 }
 0x1cd   : > { %v911_v49 = vsel %vm314_vm1, %v898_v47, 0.0 }
 0x1ce   : > { %v859_v52 = vpop.f32.mrf.mxu1  ;;  %v912_v56 = vadd.f32 %v911_v49, %v910_v50 }
 0x1cf   : > { %870 = vst.msk [vmem:[%s1589_s7 + $0x38] sm:$0xff] %vm314_vm1, %v859_v52  ;;  %v884_v54 = vsel %vm314_vm1, %v859_v52, 0.0  ;;  %v899_v55 = vmul.f32 %v859_v52, %v859_v52 }
 0x1d0   : > { %v885_v0 = vadd.f32 %v884_v54, %v883_v51  ;;  %v861_v57 = vpop.f32.mrf.mxu1 }
 0x1d1   : > { %v913_v58 = vsel %vm314_vm1, %v899_v55, 0.0 }
 0x1d2   : > { %v886_v59 = vrot.slane %v885_v0, 4  ;;  %v914_v60 = vadd.f32 %v913_v58, %v912_v56 }
 0x1d4   : > { %v887_v4 = vadd.f32 %v886_v59, %v885_v0  ;;  %v915_v62 = vrot.slane %v914_v60, 4 }
 0x1d6   : > { %v888_v63 = vrot.slane %v887_v4, 2  ;;  %v916_v2 = vadd.f32 %v915_v62, %v914_v60 }
 0x1d8   : > { %v889_v3 = vadd.f32 %v888_v63, %v887_v4  ;;  %v917_v61 = vrot.slane %v916_v2, 2 }
 0x1da   : > { %v890_v7 = vrot.slane %v889_v3, 1  ;;  %v918_v5 = vadd.f32 %v917_v61, %v916_v2 }
 0x1dc   : > { %v919_v9 = vrot.slane %v918_v5, 1  ;;  %v891_v37 = vadd.f32 %v890_v7, %v889_v3 }
 0x1de   : > { %v920_v10 = vadd.f32 %v919_v9, %v918_v5 }
 0x1e0   : > { %v922_v12 = vsel %vm921_vm10, %v891_v37, %v920_v10 }
 0x1e1   : > { %v924_v13 = vsel %vm923_vm11, %v922_v12, 0.0 }
 0x1e2   : > { %925 = vst.msk [vmem:[%s203_s20] sm:$0xff] %vm314_vm1, %v924_v13 }
 0x1e3 PF: > { %s14_s14 = sadd.s32 1, %s1195_s14   ;;  %s1641_s12 = smov %s1191_s13 }
 0x1e4   : > { %p11_p6 = scmp.ge.s32.totalorder %s14_s14, 4   ;;  %s1642_s13 = smov %s1644_s15 }
 0x1e6   :  { %13 = sbr.rel (!%p11_p6) target bundleno = 2 (0x2), region = 71 }

// kernel: unet_small_forward.16
= control target key start
LH: loop header
LB: loop body
LE: loop exit
PB: predicated region body
PF: predicated region fallthrough
CT: control target
= control target key end

     0   :  { %s2075_s12 = smov 0   ;;  %s2077_s13 = smov 0   ;;  %s2932_s0 = inlined_call_operand.vmem [shape: bf16[2,18,18,24], index: 0, kind: input, shape index: {}]   ;;  %s2933_s1 = inlined_call_operand.vmem [shape: bf16[216,24], index: 1, kind: input, shape index: {}]   ;;  %s2934_s2 = inlined_call_operand.vmem [shape: f32[512,24], index: 2, kind: output, shape index: {0}]   ;;  %s2935_s3 = inlined_call_operand.vmem [shape: f32[2,8,24], index: 3, kind: output, shape index: {1}]  }
   0x1   :  { %s2079_s14 = smov 0  }
   0x2 LB: > { %s26_s15 = sadd.s32 1, %s2040_s13  ;;  %p1837_p0 = scmp.ge.s32.totalorder %s2044_s14, 1  ;;  %s2044_s14 = sphi %s2079_s14, %s14_s14   ;;  %s2040_s13 = sphi %s2077_s13, %s2937_s13   ;;  %s2036_s12 = sphi %s2075_s12, %s2936_s12  }
   0x3   : > { %p28_p1 = scmp.ge.s32.totalorder %s26_s15, 2  ;;  %p156_p2 = scmp.lt.s32.totalorder %s2044_s14, 3 }
   0x5   : > { %s2939_s15 = smov (%p28_p1, %s26_s15), 0  ;;  %p157_p3 = pnand %p1837_p0, %p156_p2 }
   0x6   : > { %p186_p4 = scmp.lt.s32.totalorder (!%p157_p3), %s2036_s12, 1  ;;  %s2047_s27 = smov (!%p157_p3), 16  }
   0x7   : > { %160 = sbr.rel (%p157_p3) target bundleno = 607 (0x25f), region = 28  ;;  %s2048_s28 = smov (!%p157_p3), 72  }
   0x8   : > { %s2049_s4 = smov (!%p157_p3), 120   ;;  %s2050_s5 = smov (!%p157_p3), 48  }
   0x9   : > { %s2051_s8 = smov (!%p157_p3), 64   ;;  %s2052_s9 = smov (!%p157_p3), 24  }
   0xa   : > { %s2053_s10 = smov (!%p157_p3), 96   ;;  %s2054_s18 = smov (!%p157_p3), 40  }
   0xc   : > { %v2046_v0 = vmov 0   ;;  %s2099_s16 = scalar_select %p186_p4, %s2036_s12, 1  ;;  %v1990_v1 = vld [vmem:[%s2933_s1 + $0x38] sm:$0xff]   ;;  %v1992_v2 = vld [vmem:[%s2933_s1 + $0x30] sm:$0xff]   ;;  %vm314_vm0 = vcmask 1046528   ;;  %v1994_v3 = vld [vmem:[%s2933_s1 + $0x28] sm:$0xff]  }
   0xd   : > { %1361 = vmatprep.subr.bf16.mxu0 %v2046_v0  ;;  %1910 = vmatprep.subr.bf16.mxu1 %v2046_v0  ;;  %vm299_vm1 = vsmask.f32 7424  ;;  %v1995_v10 = vld [vmem:[%s2933_s1 + $0x20] sm:$0xff]   ;;  %v1996_v32 = vld [vmem:[%s2933_s1 + $0x18] sm:$0xff]   ;;  %v1997_v48 = vld [vmem:[%s2933_s1 + $0x10] sm:$0xff]   ;;  %vm1357_vm2 = vcmask 1043456  }
   0xe   : > { %s1938_s19 = smul.u32 216, %s2099_s16  ;;  %1362 = vmatpush1.bf16.msra.mxu0 %v1990_v1  ;;  %1924 = vmatpush1.bf16.msra.mxu1 %v1990_v1  ;;  %v1998_v51 = vld [vmem:[%s2933_s1 + $0x8] sm:$0xff]   ;;  %v2000_v56 = vld [vmem:[%s2933_s1] sm:$0xff]   ;;  %vm378_vm3 = vcmask 195584   ;;  %vm381_vm4 = vcmask 392192   ;;  %vm384_vm5 = vcmask 588800  }
   0xf   : > { %1363 = vmatprep.subr.bf16.mxu0 %v2046_v0  ;;  %1911 = vmatprep.subr.bf16.mxu1 %v2046_v0  ;;  %v2002_v63 = vld [vmem:[%s2933_s1 + $0x68] ss:$0 sps:$4 sm:$0xff]   ;;  %vm394_vm6 = vcmask 130048   ;;  %vm387_vm7 = vcmask 785408   ;;  %vm397_vm8 = vcmask 326656   ;;  %vm400_vm9 = vcmask 523264  }
  0x10   : > { %s2113_s24 = scalar_lea.vmem %s2932_s0, %s1938_s19  ;;  %v1359_v1 = vsel %vm1357_vm2, %v2002_v63, 0  ;;  %vm1324_vm10 = vcmask 719872   ;;  %vm390_vm11 = vcmask 982016   ;;  %vm1724_vm12 = vcmask 1040384  }
  0x11   : > { %v2119_v4 = vld [vmem:[%s2113_s24 + $0x18] sm:$0xff]   ;;  %v2122_v5 = vld [vmem:[%s2113_s24 + $0xc] sm:$0xff]   ;;  %v1974_v6 = vld [vmem:[%s2113_s24 + $0x14] ss:$0 sps:$4 sm:$0x11]   ;;  %vm1726_vm13 = vcmask 1041408  }
  0x12   : > { %1364 = vmatpush1.bf16.msra.mxu0 %v1992_v2  ;;  %1925 = vmatpush1.bf16.msra.mxu1 %v1992_v2  ;;  %v2128_v7 = vld [vmem:[%s2113_s24] sm:$0xff]   ;;  %v344_v8 = vrot.slane %v2122_v5, 1  ;;  %v373_v9 = vrot.slane %v2119_v4, 1  ;;  %v345_v11 = vrot.slane %v1974_v6, 1  ;;  %v331_v21 = vshrl.u32 %v2122_v5, 16  ;;  %v2195_v55 = vld [vmem:[%s2113_s24 + $0x30] sm:$0xff]  }
  0x13   : > { %354 = vrot.lane.b32.xlu1 %v2119_v4, %s2047_s27  ;;  %1365 = vmatprep.subr.bf16.mxu0 %v2046_v0  ;;  %v1976_v12 = vld [vmem:[%s2113_s24 + $0x8] ss:$0 sps:$4 sm:$0x11]   ;;  %v315_v13 = vrot.slane %v2128_v7, 1  ;;  %v301_v17 = vshrl.u32 %v2128_v7, 16  ;;  %v303_v18 = vshll.u32 %v2128_v7, 16 }
  0x14   : > { %325 = vrot.lane.b32.xlu0 %v2122_v5, %s2048_s28  ;;  %1912 = vmatprep.subr.bf16.mxu1 %v2046_v0  ;;  %v1977_v14 = vld [vmem:[%s2113_s24 + $0x20] ss:$0 sps:$4 sm:$0x11]   ;;  %v346_v15 = vsel %vm314_vm0, %v344_v8, %v345_v11  ;;  %v316_v16 = vrot.slane %v1976_v12, 1  ;;  %v308_v20 = vshll.u32 %v1976_v12, 16  ;;  %v333_v22 = vshll.u32 %v2122_v5, 16 }
  0x15   : > { %v374_v19 = vrot.slane %v1977_v14, 1  ;;  %v305_v24 = vrot.slane %v303_v18, 1  ;;  %v338_v25 = vshll.u32 %v1974_v6, 16  ;;  %v360_v26 = vshrl.u32 %v2119_v4, 16  ;;  %v2153_v27 = vld [vmem:[%s2113_s24 + $0x24] sm:$0xff]   ;;  %v2227_v8 = vld [vmem:[%s2113_s24 + $0x3c] sm:$0xff]  }
  0x16   : > { %1366 = vmatpush1.bf16.msra.mxu0 %v1994_v3  ;;  %1926 = vmatpush1.bf16.msra.mxu1 %v1994_v3  ;;  %v317_v23 = vsel %vm314_vm0, %v315_v13, %v316_v16  ;;  %v310_v29 = vrot.slane %v308_v20, 1  ;;  %v335_v30 = vrot.slane %v333_v22, 1  ;;  %v362_v31 = vshll.u32 %v2119_v4, 16  ;;  %v1979_v38 = vld [vmem:[%s2113_s24 + $0x2c] ss:$0 sps:$4 sm:$0x11]  }
  0x17   : > { %1367 = vmatprep.subr.bf16.mxu0 %v2046_v0  ;;  %1913 = vmatprep.subr.bf16.mxu1 %v2046_v0  ;;  %v2157_v28 = vsel %vm314_vm0, %v373_v9, %v374_v19  ;;  %v306_v33 = vor.u32 %v305_v24, %v301_v17  ;;  %v340_v34 = vrot.slane %v338_v25, 1  ;;  %v367_v35 = vshll.u32 %v1977_v14, 16  ;;  %v1981_v58 = vld [vmem:[%s2113_s24 + $0x38] ss:$0 sps:$4 sm:$0x11]   ;;  %v2004_v6 = vld [vmem:[%s2933_s1 + $0x60] sm:$0xff]  }
  0x18   : > { %347 = vrot.lane.b32.xlu1 %v346_v15, %s2049_s4  ;;  %318 = vrot.lane.b32.xlu0 %v317_v23, %s2050_s5  ;;  %v336_v36 = vor.u32 %v335_v30, %v331_v21  ;;  %v364_v37 = vrot.slane %v362_v31, 1  ;;  %v426_v41 = vshll.u32 %v2153_v27, 16  ;;  %v424_v45 = vshrl.u32 %v2153_v27, 16  ;;  %v2006_v12 = vld [vmem:[%s2933_s1 + $0x58] sm:$0xff]   ;;  %v2007_v16 = vld [vmem:[%s2933_s1 + $0x50] sm:$0xff]  }
  0x19   : > { %v311_v39 = vsel %vm299_vm1, %v306_v33, %v310_v29  ;;  %v369_v40 = vrot.slane %v367_v35, 1  ;;  %v431_v47 = vshll.u32 %v1979_v38, 16  ;;  %v437_v53 = vrot.slane %v2153_v27, 1  ;;  %v2256_v17 = vld [vmem:[%s2113_s24 + $0x60] sm:$0xff]   ;;  %v2008_v21 = vld [vmem:[%s2933_s1 + $0x48] sm:$0xff]  }
  0x1a   : > { %1368 = vmatpush1.bf16.msra.mxu0 %v1995_v10  ;;  %1927 = vmatpush1.bf16.msra.mxu1 %v1995_v10  ;;  %v365_v42 = vor.u32 %v364_v37, %v360_v26  ;;  %v341_v43 = vsel %vm299_vm1, %v336_v36, %v340_v34  ;;  %v428_v46 = vrot.slane %v426_v41, 1  ;;  %v438_v54 = vrot.slane %v1979_v38, 1  ;;  %v1985_v24 = vld [vmem:[%s2113_s24 + $0x68] ss:$0 sps:$4 sm:$0x11]   ;;  %v2009_v26 = vld [vmem:[%s2933_s1 + $0x40] sm:$0xff]  }
  0x1b   : > { %1369 = vmatprep.subr.bf16.mxu0 %v2046_v0  ;;  %1914 = vmatprep.subr.bf16.mxu1 %v2046_v0  ;;  %v433_v50 = vrot.slane %v431_v47, 1  ;;  %v482_v59 = vshll.u32 %v2195_v55, 16  ;;  %v480_v60 = vshrl.u32 %v2195_v55, 16  ;;  %v487_v62 = vshll.u32 %v1981_v58, 16  ;;  %v2301_v37 = vld [vmem:[%s2113_s24 + $0x48] sm:$0xff]   ;;  %v2308_v38 = vld [vmem:[%s2113_s24 + $0x78] sm:$0xff]  }
  0x1c   : > { %376 = vrot.lane.b32.xlu1 %v2157_v28, %s2051_s8  ;;  %312 = vrot.lane.b32.xlu0 %v311_v39, %s2052_s9  ;;  %v370_v44 = vsel %vm299_vm1, %v365_v42, %v369_v40  ;;  %v429_v49 = vor.u32 %v428_v46, %v424_v45  ;;  %v439_v57 = vsel %vm314_vm0, %v437_v53, %v438_v54  ;;  %v493_v9 = vrot.slane %v2195_v55, 1  ;;  %v1991_v41 = vld [vmem:[%s2113_s24 + $0x50] ss:$0 sps:$4 sm:$0x11]  }
  0x1d   : > { %v484_v61 = vrot.slane %v482_v59, 1  ;;  %v489_v3 = vrot.slane %v487_v62, 1  ;;  %v494_v11 = vrot.slane %v1981_v58, 1  ;;  %v538_v13 = vshll.u32 %v2227_v8, 16 }
  0x1e   : > { %1370 = vmatpush1.bf16.msra.mxu0 %v1996_v32  ;;  %1928 = vmatpush1.bf16.msra.mxu1 %v1996_v32  ;;  %v2191_v52 = vsel %vm299_vm1, %v429_v49, %v433_v50  ;;  %v536_v18 = vshrl.u32 %v2227_v8, 16  ;;  %v706_v25 = vshll.u32 %v2256_v17, 16  ;;  %v704_v31 = vshrl.u32 %v2256_v17, 16  ;;  %v1993_v49 = vld [vmem:[%s2113_s24 + $0x80] ss:$0 sps:$4 sm:$0x11]  }
  0x1f   : > { %1371 = vmatprep.subr.bf16.mxu0 %v2046_v0  ;;  %1915 = vmatprep.subr.bf16.mxu1 %v2046_v0  ;;  %v485_v2 = vor.u32 %v484_v61, %v480_v60  ;;  %v2246_v14 = vsel %vm314_vm0, %v493_v9, %v494_v11  ;;  %v540_v19 = vrot.slane %v538_v13, 1  ;;  %v711_v33 = vshll.u32 %v1985_v24, 16 }
  0x20   : > { %405 = vrot.lane.b32.xlu1 %v346_v15, %s2050_s5  ;;  %342 = vrot.lane.b32.xlu0 %v341_v43, %s2053_s10  ;;  %v1983_v15 = vld [vmem:[%s2113_s24 + $0x44] ss:$0 sps:$4 sm:$0x11]   ;;  %v708_v32 = vrot.slane %v706_v25, 1  ;;  %v717_v39 = vrot.slane %v2256_v17, 1  ;;  %v718_v40 = vrot.slane %v1985_v24, 1 }
  0x21   : > { %v2234_v10 = vsel %vm299_vm1, %v485_v2, %v489_v3  ;;  %v543_v20 = vshll.u32 %v1983_v15, 16  ;;  %v541_v22 = vor.u32 %v540_v19, %v536_v18  ;;  %v550_v29 = vrot.slane %v1983_v15, 1  ;;  %v2376_v19 = vld [vmem:[%s2113_s24 + $0x54] sm:$0xff]  }
  0x22   : > { %1372 = vmatpush1.bf16.msra.mxu0 %v1997_v48  ;;  %1929 = vmatpush1.bf16.msra.mxu1 %v1997_v48  ;;  %v709_v34 = vor.u32 %v708_v32, %v704_v31  ;;  %v713_v35 = vrot.slane %v711_v33, 1  ;;  %v594_v42 = vshll.u32 %v2301_v37, 16  ;;  %v592_v45 = vshrl.u32 %v2301_v37, 16 }
  0x23   : > { %1373 = vmatprep.subr.bf16.mxu0 %v2046_v0  ;;  %1916 = vmatprep.subr.bf16.mxu1 %v2046_v0  ;;  %v545_v23 = vrot.slane %v543_v20, 1  ;;  %v2323_v46 = vsel %vm314_vm0, %v717_v39, %v718_v40  ;;  %v599_v48 = vshll.u32 %v1991_v41, 16  ;;  %v818_v50 = vshll.u32 %v2308_v38, 16  ;;  %v2383_v20 = vld [vmem:[%s2113_s24 + $0x84] sm:$0xff]  }
  0x24   : > { %371 = vrot.lane.b32.xlu1 %v370_v44, %s2054_s18  ;;  %403 = vrot.lane.b32.xlu0 %v341_v43, %s2052_s9  ;;  %v2298_v36 = vsel %vm299_vm1, %v709_v34, %v713_v35  ;;  %v2316_v43 = vld [vmem:[%s2113_s24 + $0x6c] sm:$0xff]   ;;  %v596_v47 = vrot.slane %v594_v42, 1  ;;  %v816_v53 = vshrl.u32 %v2308_v38, 16  ;;  %v823_v58 = vshll.u32 %v1993_v49, 16 }
  0x25   : > { %v2283_v30 = vsel %vm299_vm1, %v541_v22, %v545_v23  ;;  %v762_v63 = vshll.u32 %v2316_v43, 16  ;;  %v605_v2 = vrot.slane %v2301_v37, 1  ;;  %v606_v3 = vrot.slane %v1991_v41, 1 }
  0x26   : > { %1374 = vmatpush1.bf16.msra.mxu0 %v1998_v51  ;;  %1930 = vmatpush1.bf16.msra.mxu1 %v1998_v51  ;;  %v773_v51 = vrot.slane %v2316_v43, 1  ;;  %v597_v54 = vor.u32 %v596_v47, %v592_v45  ;;  %v825_v62 = vrot.slane %v823_v58, 1  ;;  %v830_v13 = vrot.slane %v1993_v49, 1 }
  0x27   : > { %1375 = vmatprep.subr.bf16.mxu0 %v2046_v0  ;;  %1917 = vmatprep.subr.bf16.mxu1 %v2046_v0  ;;  %v764_v9 = vrot.slane %v762_v63, 1  ;;  %v2358_v11 = vsel %vm314_vm0, %v605_v2, %v606_v3  ;;  %v650_v22 = vshll.u32 %v2376_v19, 16  ;;  %v648_v23 = vshrl.u32 %v2376_v19, 16 }
  0x28   : > { %418 = vrot.lane.b32.xlu1 %v2153_v27, %s2047_s27  ;;  %411 = vrot.lane.b32.xlu0 %v2157_v28, %s2049_s4  ;;  %v661_v41 = vrot.slane %v2376_v19, 1  ;;  %v885_v47 = vrot.slane %v2383_v20, 1 }
  0x29   : > { %v652_v24 = vrot.slane %v650_v22, 1 }
  0x2a   : > { %1376 = vmatpush1.bf16.msra.mxu0 %v2000_v56  ;;  %1931 = vmatpush1.bf16.msra.mxu1 %v2000_v56  ;;  %v601_v56 = vrot.slane %v599_v48, 1 }
  0x2b   : > { %1381 = vmatprep.subr.bf16.mxu0 %v2046_v0  ;;  %1918 = vmatprep.subr.bf16.mxu1 %v2046_v0  ;;  %v653_v31 = vor.u32 %v652_v24, %v648_v23 }
  0x2c   : > { %435 = vrot.lane.b32.xlu1 %v2191_v52, %s2054_s18  ;;  %407 = vrot.lane.b32.xlu0 %v2119_v4, %s2048_s28  ;;  %v2341_v60 = vsel %vm299_vm1, %v597_v54, %v601_v56 }
  0x2e   : > { %1382 = vmatpush2.bf16.msra.mxu0 %v1359_v1  ;;  %1932 = vmatpush2.bf16.msra.mxu1 %v1359_v1 }
  0x2f   : > { %1383 = vmatprep.subr.bf16.mxu0 %v2046_v0  ;;  %1919 = vmatprep.subr.bf16.mxu1 %v2046_v0 }
  0x30   : > { %440 = vrot.lane.b32.xlu1 %v439_v57, %s2051_s8  ;;  %409 = vrot.lane.b32.xlu0 %v370_v44, %s2053_s10 }
  0x32   : > { %1384 = vmatpush2.bf16.msra.mxu0 %v2004_v6  ;;  %1933 = vmatpush2.bf16.msra.mxu1 %v2004_v6  ;;  %v760_v6 = vshrl.u32 %v2316_v43, 16 }
  0x33   : > { %1385 = vmatprep.subr.bf16.mxu0 %v2046_v0  ;;  %1920 = vmatprep.subr.bf16.mxu1 %v2046_v0 }
  0x34   : > { %461 = vrot.lane.b32.xlu1 %v2157_v28, %s2050_s5  ;;  %459 = vrot.lane.b32.xlu0 %v370_v44, %s2052_s9  ;;  %v549_v28 = vrot.slane %v2227_v8, 1  ;;  %v1989_v44 = vld [vmem:[%s2113_s24 + $0x74] ss:$0 sps:$4 sm:$0x11]  }
  0x36   : > { %1386 = vmatpush2.bf16.msra.mxu0 %v2006_v12  ;;  %1934 = vmatpush2.bf16.msra.mxu1 %v2006_v12  ;;  %v829_v12 = vrot.slane %v2308_v38, 1 }
  0x37   : > { %1387 = vmatprep.subr.bf16.mxu0 %v2046_v0  ;;  %1921 = vmatprep.subr.bf16.mxu1 %v2046_v0 }
  0x38   : > { %474 = vrot.lane.b32.xlu1 %v2195_v55, %s2047_s27  ;;  %467 = vrot.lane.b32.xlu0 %v439_v57, %s2049_s4 }
  0x3a   : > { %1388 = vmatpush2.bf16.msra.mxu0 %v2007_v16  ;;  %1935 = vmatpush2.bf16.msra.mxu1 %v2007_v16  ;;  %v2366_v16 = vsel %vm314_vm0, %v829_v12, %v830_v13 }
  0x3b   : > { %1389 = vmatprep.subr.bf16.mxu0 %v2046_v0  ;;  %1922 = vmatprep.subr.bf16.mxu1 %v2046_v0 }
  0x3c   : > { %491 = vrot.lane.b32.xlu1 %v2234_v10, %s2054_s18  ;;  %463 = vrot.lane.b32.xlu0 %v2153_v27, %s2048_s28 }
  0x3e   : > { %1390 = vmatpush2.bf16.msra.mxu0 %v2008_v21  ;;  %1936 = vmatpush2.bf16.msra.mxu1 %v2008_v21  ;;  %v2003_v21 = vld [vmem:[%s2113_s24 + $0x5c] ss:$0 sps:$4 sm:$0x11]  }
  0x3f   : > { %1391 = vmatprep.subr.bf16.mxu0 %v2046_v0  ;;  %1923 = vmatprep.subr.bf16.mxu1 %v2046_v0  ;;  %v2291_v0 = vsel %vm314_vm0, %v549_v28, %v550_v29  ;;  %v655_v25 = vshll.u32 %v2003_v21, 16  ;;  %v874_v28 = vshll.u32 %v2383_v20, 16  ;;  %v872_v29 = vshrl.u32 %v2383_v20, 16 }
  0x40   : > { %496 = vrot.lane.b32.xlu1 %v2246_v14, %s2051_s8  ;;  %465 = vrot.lane.b32.xlu0 %v2191_v52, %s2053_s10  ;;  %v662_v42 = vrot.slane %v2003_v21, 1 }
  0x41   : > { %v876_v32 = vrot.slane %v874_v28, 1 }
  0x42   : > { %1392 = vmatpush2.bf16.msra.mxu0 %v2009_v26  ;;  %1937 = vmatpush2.bf16.msra.mxu1 %v2009_v26  ;;  %v2005_v26 = vld [vmem:[%s2113_s24 + $0x8c] ss:$0 sps:$4 sm:$0x11]   ;;  %v2419_v45 = vsel %vm314_vm0, %v661_v41, %v662_v42 }
  0x43   : > { %v879_v33 = vshll.u32 %v2005_v26, 16  ;;  %v877_v35 = vor.u32 %v876_v32, %v872_v29  ;;  %v886_v48 = vrot.slane %v2005_v26, 1 }
  0x44   : > { %517 = vrot.lane.b32.xlu1 %v439_v57, %s2050_s5  ;;  %515 = vrot.lane.b32.xlu0 %v2191_v52, %s2052_s9  ;;  %v774_v52 = vrot.slane %v1989_v44, 1  ;;  %v820_v57 = vrot.slane %v818_v50, 1 }
  0x46   : > { %v2336_v59 = vsel %vm314_vm0, %v773_v51, %v774_v52  ;;  %v821_v61 = vor.u32 %v820_v57, %v816_v53  ;;  %v2427_v51 = vsel %vm314_vm0, %v885_v47, %v886_v48 }
  0x48   : > { %530 = vrot.lane.b32.xlu1 %v2227_v8, %s2047_s27  ;;  %523 = vrot.lane.b32.xlu0 %v2246_v14, %s2049_s4  ;;  %v2349_v1 = vsel %vm299_vm1, %v821_v61, %v825_v62  ;;  %v2442_v62 = vld [vmem:[%s2113_s24 + $0x90] sm:$0xff]  }
  0x49   : > { %v930_v12 = vshll.u32 %v2442_v62, 16  ;;  %v941_v41 = vrot.slane %v2442_v62, 1 }
  0x4c   : > { %547 = vrot.lane.b32.xlu1 %v2283_v30, %s2054_s18  ;;  %519 = vrot.lane.b32.xlu0 %v2195_v55, %s2048_s28 }
  0x50   : > { %552 = vrot.lane.b32.xlu1 %v2291_v0, %s2051_s8  ;;  %521 = vrot.lane.b32.xlu0 %v2234_v10, %s2053_s10 }
  0x54   : > { %795 = vrot.lane.b32.xlu1 %v2298_v36, %s2052_s9  ;;  %571 = vrot.lane.b32.xlu0 %v2234_v10, %s2052_s9  ;;  %v767_v10 = vshll.u32 %v1989_v44, 16 }
  0x56   : > { %v769_v15 = vrot.slane %v767_v10, 1  ;;  %v2011_v10 = vld [vmem:[%s2113_s24 + $0x98] ss:$0 sps:$4 sm:$0x11]  }
  0x57   : > { %v935_v21 = vshll.u32 %v2011_v10, 16  ;;  %v942_v42 = vrot.slane %v2011_v10, 1 }
  0x58   : > { %579 = vrot.lane.b32.xlu1 %v2291_v0, %s2049_s4  ;;  %573 = vrot.lane.b32.xlu0 %v2246_v14, %s2050_s5  ;;  %v765_v14 = vor.u32 %v764_v9, %v760_v6 }
  0x59   : > { %v937_v26 = vrot.slane %v935_v21, 1  ;;  %v2492_v48 = vsel %vm314_vm0, %v941_v41, %v942_v42 }
  0x5a   : > { %v2371_v18 = vsel %vm299_vm1, %v765_v14, %v769_v15  ;;  %v928_v14 = vshrl.u32 %v2442_v62, 16  ;;  %v932_v15 = vrot.slane %v930_v12, 1 }
  0x5c   : > { %797 = vrot.lane.b32.xlu1 %v2323_v46, %s2050_s5  ;;  %586 = vrot.lane.b32.xlu0 %v2301_v37, %s2047_s27 }
  0x60   : > { %810 = vrot.lane.b32.xlu1 %v2308_v38, %s2047_s27  ;;  %803 = vrot.lane.b32.xlu0 %v2336_v59, %s2049_s4 }
  0x64   : > { %603 = vrot.lane.b32.xlu1 %v2341_v60, %s2054_s18  ;;  %575 = vrot.lane.b32.xlu0 %v2227_v8, %s2048_s28 }
  0x68   : > { %827 = vrot.lane.b32.xlu1 %v2349_v1, %s2054_s18  ;;  %799 = vrot.lane.b32.xlu0 %v2316_v43, %s2048_s28 }
  0x6c   : > { %608 = vrot.lane.b32.xlu1 %v2358_v11, %s2051_s8  ;;  %577 = vrot.lane.b32.xlu0 %v2283_v30, %s2053_s10 }
  0x70   : > { %832 = vrot.lane.b32.xlu1 %v2366_v16, %s2051_s8  ;;  %801 = vrot.lane.b32.xlu0 %v2371_v18, %s2053_s10 }
  0x74   : > { %851 = vrot.lane.b32.xlu1 %v2371_v18, %s2052_s9  ;;  %627 = vrot.lane.b32.xlu0 %v2283_v30, %s2052_s9  ;;  %v657_v30 = vrot.slane %v655_v25, 1  ;;  %v933_v25 = vor.u32 %v932_v15, %v928_v14 }
  0x76   : > { %v2404_v34 = vsel %vm299_vm1, %v653_v31, %v657_v30 }
  0x78   : > { %635 = vrot.lane.b32.xlu1 %v2358_v11, %s2049_s4  ;;  %629 = vrot.lane.b32.xlu0 %v2291_v0, %s2050_s5  ;;  %v881_v0 = vrot.slane %v879_v33, 1  ;;  %v2479_v33 = vsel %vm299_vm1, %v933_v25, %v937_v26 }
  0x7a   : > { %v2411_v40 = vsel %vm299_vm1, %v877_v35, %v881_v0 }
  0x7c   : > { %853 = vrot.lane.b32.xlu1 %v2336_v59, %s2050_s5  ;;  %642 = vrot.lane.b32.xlu0 %v2376_v19, %s2047_s27 }
  0x80   : > { %866 = vrot.lane.b32.xlu1 %v2383_v20, %s2047_s27  ;;  %859 = vrot.lane.b32.xlu0 %v2366_v16, %s2049_s4 }
  0x84   : > { %659 = vrot.lane.b32.xlu1 %v2404_v34, %s2054_s18  ;;  %631 = vrot.lane.b32.xlu0 %v2301_v37, %s2048_s28 }
  0x85   : > { %v355_v39 = vpop.permute.xlu1 %354 }
  0x86   : > { %v326_v44 = vpop.permute.xlu0 %325 }
  0x88   : > { %883 = vrot.lane.b32.xlu1 %v2411_v40, %s2054_s18  ;;  %855 = vrot.lane.b32.xlu0 %v2308_v38, %s2048_s28 }
  0x8a   : > { %v348_v49 = vpop.permute.xlu1 %347  ;;  %v319_v50 = vpop.permute.xlu0 %318 }
  0x8c   : > { %664 = vrot.lane.b32.xlu1 %v2419_v45, %s2051_s8  ;;  %633 = vrot.lane.b32.xlu0 %v2341_v60, %s2053_s10 }
  0x8e   : > { %v377_v52 = vpop.permute.xlu1 %376  ;;  %v313_v53 = vpop.permute.xlu0 %312 }
  0x8f   : > { %v380_v54 = vsel %vm378_vm3, %v2128_v7, %v313_v53  ;;  %v396_v7 = vsel %vm394_vm6, %v348_v49, %v355_v39 }
  0x90   : > { %888 = vrot.lane.b32.xlu1 %v2427_v51, %s2051_s8  ;;  %v383_v56 = vsel %vm381_vm4, %v380_v54, %v319_v50  ;;  %857 = vrot.lane.b32.xlu0 %v2349_v1, %s2053_s10 }
  0x91   : > { %v386_v58 = vsel %vm384_vm5, %v383_v56, %v326_v44 }
  0x92   : > { %v406_v57 = vpop.permute.xlu1 %405  ;;  %v343_v61 = vpop.permute.xlu0 %342 }
  0x93   : > { %v389_v63 = vsel %vm387_vm7, %v386_v58, %v343_v61 }
  0x94   : > { %907 = vrot.lane.b32.xlu1 %v2349_v1, %s2052_s9  ;;  %683 = vrot.lane.b32.xlu0 %v2341_v60, %s2052_s9  ;;  %v392_v9 = vsel %vm390_vm11, %v389_v63, %v348_v49  ;;  %v2512_v63 = vld [vmem:[%s2113_s24 + $0x9c] sm:$0xff]  }
  0x96   : > { %v372_v2 = vpop.permute.xlu1 %371  ;;  %v404_v6 = vpop.permute.xlu0 %403 }
  0x97   : > { %v399_v3 = vsel %vm397_vm8, %v396_v7, %v372_v2  ;;  %v443_v23 = vsel %vm378_vm3, %v2122_v5, %v404_v6 }
  0x98   : > { %691 = vrot.lane.b32.xlu1 %v2419_v45, %s2049_s4  ;;  %v402_v1 = vsel %vm400_vm9, %v399_v3, %v377_v52  ;;  %685 = vrot.lane.b32.xlu0 %v2358_v11, %s2050_s5  ;;  %v445_v29 = vsel %vm381_vm4, %v443_v23, %v406_v57 }
  0x99   : > { %1892 = vmatprep.mubr.msk.bf16.mxu0 %vm1324_vm10, %v402_v1  ;;  %v2013_v1 = vld [vmem:[%s2113_s24 + $0xa4] ss:$0 sps:$4 sm:$0x11]  }
  0x9a   : > { %v419_v60 = vpop.permute.xlu1 %418  ;;  %1394 = vmatmul.mubr.bf16.vlgmr.msra.gmra.mxu0 %v392_v9  ;;  %v412_v13 = vpop.permute.xlu0 %411 }
  0x9b   : > { %v454_v11 = vsel %vm394_vm6, %v412_v13, %v419_v60  ;;  %v991_v60 = vshll.u32 %v2013_v1, 16 }
  0x9c   : > { %909 = vrot.lane.b32.xlu1 %v2366_v16, %s2050_s5  ;;  %698 = vrot.lane.b32.xlu0 %v2256_v17, %s2047_s27 }
  0x9d   : > { %v993_v21 = vrot.slane %v991_v60, 1 }
  0x9e   : > { %v436_v22 = vpop.permute.xlu1 %435  ;;  %v408_v24 = vpop.permute.xlu0 %407 }
  0x9f   : > { %v456_v16 = vsel %vm397_vm8, %v454_v11, %v436_v22  ;;  %v447_v5 = vsel %vm384_vm5, %v445_v29, %v408_v24 }
  0xa0   : > { %922 = vrot.lane.b32.xlu1 %v2442_v62, %s2047_s27  ;;  %915 = vrot.lane.b32.xlu0 %v2427_v51, %s2049_s4 }
  0xa2   : > { %v441_v28 = vpop.permute.xlu1 %440  ;;  %v410_v30 = vpop.permute.xlu0 %409 }
  0xa3   : > { %v458_v31 = vsel %vm400_vm9, %v456_v16, %v441_v28  ;;  %v449_v32 = vsel %vm387_vm7, %v447_v5, %v410_v30  ;;  %v2553_v5 = vld [vmem:[%s2113_s24 + $0xa8] sm:$0xff]  }
  0xa4   : > { %715 = vrot.lane.b32.xlu1 %v2298_v36, %s2054_s18  ;;  %1893 = vmatprep.mubr.msk.bf16.mxu0 %vm1324_vm10, %v458_v31  ;;  %v451_v35 = vsel %vm390_vm11, %v449_v32, %v412_v13  ;;  %v998_v31 = vrot.slane %v2013_v1, 1 }
  0xa5   : > { %687 = vrot.lane.b32.xlu0 %v2376_v19, %s2048_s28  ;;  %1402 = vmatmul.mubr.bf16.gmra.mxu0 %v451_v35 }
  0xa6   : > { %v462_v0 = vpop.permute.xlu1 %461  ;;  %v460_v39 = vpop.permute.xlu0 %459 }
  0xa7   : > { %v499_v50 = vsel %vm378_vm3, %v2119_v4, %v460_v39  ;;  %v1042_v39 = vshll.u32 %v2553_v5, 16 }
  0xa8   : > { %939 = vrot.lane.b32.xlu1 %v2479_v33, %s2054_s18  ;;  %v501_v57 = vsel %vm381_vm4, %v499_v50, %v462_v0  ;;  %v2015_v0 = vld [vmem:[%s2113_s24 + $0xb0] ss:$0 sps:$4 sm:$0x11]  }
  0xa9   : > { %911 = vrot.lane.b32.xlu0 %v2383_v20, %s2048_s28 }
  0xaa   : > { %v475_v44 = vpop.permute.xlu1 %474  ;;  %v468_v47 = vpop.permute.xlu0 %467 }
  0xab   : > { %v510_v53 = vsel %vm394_vm6, %v468_v47, %v475_v44  ;;  %v1040_v44 = vshrl.u32 %v2553_v5, 16 }
  0xac   : > { %720 = vrot.lane.b32.xlu1 %v2323_v46, %s2051_s8 }
  0xad   : > { %689 = vrot.lane.b32.xlu0 %v2404_v34, %s2053_s10 }
  0xae   : > { %v492_v49 = vpop.permute.xlu1 %491  ;;  %v464_v52 = vpop.permute.xlu0 %463 }
  0xaf   : > { %v512_v54 = vsel %vm397_vm8, %v510_v53, %v492_v49  ;;  %v503_v61 = vsel %vm384_vm5, %v501_v57, %v464_v52  ;;  %v1047_v49 = vshll.u32 %v2015_v0, 16  ;;  %v1053_v57 = vrot.slane %v2553_v5, 1 }
  0xb0   : > { %944 = vrot.lane.b32.xlu1 %v2492_v48, %s2051_s8 }
  0xb1   : > { %913 = vrot.lane.b32.xlu0 %v2411_v40, %s2053_s10 }
  0xb2   : > { %v497_v56 = vpop.permute.xlu1 %496  ;;  %v466_v4 = vpop.permute.xlu0 %465 }
  0xb3   : > { %v514_v58 = vsel %vm400_vm9, %v512_v54, %v497_v56  ;;  %v505_v7 = vsel %vm387_vm7, %v503_v61, %v466_v4  ;;  %v2579_v61 = vld [vmem:[%s2113_s24 + $0xb4] sm:$0xff]  }
  0xb4   : > { %963 = vrot.lane.b32.xlu1 %v2411_v40, %s2052_s9  ;;  %1894 = vmatprep.mubr.msk.bf16.mxu0 %vm1324_vm10, %v514_v58  ;;  %v507_v2 = vsel %vm390_vm11, %v505_v7, %v468_v47  ;;  %v986_v40 = vshll.u32 %v2512_v63, 16  ;;  %v1044_v47 = vrot.slane %v1042_v39, 1  ;;  %v1054_v58 = vrot.slane %v2015_v0, 1  ;;  %v2019_v39 = vld [vmem:[%s2113_s24 + $0xc8] ss:$0 sps:$4 sm:$0x11]  }
  0xb5   : > { %739 = vrot.lane.b32.xlu0 %v2404_v34, %s2052_s9  ;;  %1410 = vmatmul.mubr.bf16.gmra.mxu0 %v507_v2  ;;  %v984_v34 = vshrl.u32 %v2512_v63, 16  ;;  %v2017_v2 = vld [vmem:[%s2113_s24 + $0xbc] ss:$0 sps:$4 sm:$0x11]   ;;  %v1096_v60 = vshrl.u32 %v2579_v61, 16 }
  0xb6   : > { %v518_v3 = vpop.permute.xlu1 %517  ;;  %v516_v6 = vpop.permute.xlu0 %515  ;;  %v988_v12 = vrot.slane %v986_v40, 1  ;;  %v1045_v52 = vor.u32 %v1044_v47, %v1040_v44  ;;  %v1055_v7 = vsel %vm314_vm0, %v1053_v57, %v1054_v58 }
  0xb8   : > { %747 = vrot.lane.b32.xlu1 %v2323_v46, %s2049_s4  ;;  %v555_v46 = vsel %vm378_vm3, %v2153_v27, %v516_v6  ;;  %v989_v15 = vor.u32 %v988_v12, %v984_v34 }
  0xb9   : > { %741 = vrot.lane.b32.xlu0 %v2419_v45, %s2050_s5  ;;  %v557_v23 = vsel %vm381_vm4, %v555_v46, %v518_v3  ;;  %v1098_v3 = vshll.u32 %v2579_v61, 16 }
  0xba   : > { %v531_v9 = vpop.permute.xlu1 %530  ;;  %v524_v10 = vpop.permute.xlu0 %523  ;;  %v2544_v26 = vsel %vm299_vm1, %v989_v15, %v993_v21 }
  0xbb   : > { %v566_v45 = vsel %vm394_vm6, %v524_v10, %v531_v9  ;;  %v1100_v46 = vrot.slane %v1098_v3, 1 }
  0xbc   : > { %965 = vrot.lane.b32.xlu1 %v2427_v51, %s2050_s5 }
  0xbd   : > { %754 = vrot.lane.b32.xlu0 %v2316_v43, %s2047_s27 }
  0xbe   : > { %v548_v13 = vpop.permute.xlu1 %547  ;;  %v520_v14 = vpop.permute.xlu0 %519 }
  0xbf   : > { %v568_v51 = vsel %vm397_vm8, %v566_v45, %v548_v13  ;;  %v559_v27 = vsel %vm384_vm5, %v557_v23, %v520_v14  ;;  %v1103_v14 = vshll.u32 %v2017_v2, 16 }
  0xc0   : > { %978 = vrot.lane.b32.xlu1 %v2512_v63, %s2047_s27 }
  0xc1   : > { %971 = vrot.lane.b32.xlu0 %v2492_v48, %s2049_s4 }
  0xc2   : > { %v553_v22 = vpop.permute.xlu1 %552  ;;  %v522_v11 = vpop.permute.xlu0 %521 }
  0xc3   : > { %v570_v24 = vsel %vm400_vm9, %v568_v51, %v553_v22  ;;  %v561_v25 = vsel %vm387_vm7, %v559_v27, %v522_v11  ;;  %v1101_v11 = vor.u32 %v1100_v46, %v1096_v60 }
  0xc4   : > { %771 = vrot.lane.b32.xlu1 %v2371_v18, %s2054_s18  ;;  %1895 = vmatprep.mubr.msk.bf16.mxu0 %vm1324_vm10, %v570_v24  ;;  %v563_v16 = vsel %vm390_vm11, %v561_v25, %v524_v10  ;;  %v997_v18 = vrot.slane %v2512_v63, 1  ;;  %v1105_v25 = vrot.slane %v1103_v14, 1 }
  0xc5   : > { %743 = vrot.lane.b32.xlu0 %v2256_v17, %s2048_s28  ;;  %1418 = vmatmul.mubr.bf16.gmra.mxu0 %v563_v16 }
  0xc6   : > { %v796_v28 = vpop.permute.xlu1 %795  ;;  %v572_v29 = vpop.permute.xlu0 %571  ;;  %v999_v35 = vsel %vm314_vm0, %v997_v18, %v998_v31  ;;  %v2619_v18 = vsel %vm299_vm1, %v1101_v11, %v1105_v25  ;;  %v1109_v31 = vrot.slane %v2579_v61, 1 }
  0xc7   : > { %v611_v6 = vsel %vm378_vm3, %v2195_v55, %v572_v29  ;;  %v835_v45 = vsel %vm378_vm3, %v2256_v17, %v796_v28 }
  0xc8   : > { %995 = vrot.lane.b32.xlu1 %v2544_v26, %s2054_s18 }
  0xc9   : > { %967 = vrot.lane.b32.xlu0 %v2442_v62, %s2048_s28 }
  0xca   : > { %v580_v30 = vpop.permute.xlu1 %579  ;;  %v574_v32 = vpop.permute.xlu0 %573 }
  0xcb   : > { %v613_v9 = vsel %vm381_vm4, %v611_v6, %v574_v32  ;;  %v2623_v32 = vld [vmem:[%s2113_s24 + $0xc0] sm:$0xff]   ;;  %v2021_v6 = vld [vmem:[%s2113_s24 + $0xd4] ss:$0 sps:$4 sm:$0x11]  }
  0xcc   : > { %776 = vrot.lane.b32.xlu1 %v2336_v59, %s2051_s8  ;;  %v1152_v47 = vshrl.u32 %v2623_v32, 16 }
  0xcd   : > { %745 = vrot.lane.b32.xlu0 %v2298_v36, %s2053_s10  ;;  %v1049_v36 = vrot.slane %v1047_v49, 1 }
  0xce   : > { %v798_v41 = vpop.permute.xlu1 %797  ;;  %v587_v42 = vpop.permute.xlu0 %586 }
  0xcf   : > { %v2575_v56 = vsel %vm299_vm1, %v1045_v52, %v1049_v36  ;;  %v837_v22 = vsel %vm381_vm4, %v835_v45, %v798_v41  ;;  %v1154_v41 = vshll.u32 %v2623_v32, 16  ;;  %v1215_v45 = vshll.u32 %v2021_v6, 16 }
  0xd0   : > { %1000 = vrot.lane.b32.xlu1 %v999_v35, %s2051_s8 }
  0xd1   : > { %969 = vrot.lane.b32.xlu0 %v2479_v33, %s2053_s10  ;;  %v1156_v49 = vrot.slane %v1154_v41, 1  ;;  %v1217_v25 = vrot.slane %v1215_v45, 1 }
  0xd2   : > { %v811_v59 = vpop.permute.xlu1 %810  ;;  %v804_v50 = vpop.permute.xlu0 %803 }
  0xd3   : > { %v846_v55 = vsel %vm394_vm6, %v804_v50, %v811_v59  ;;  %v1159_v59 = vshll.u32 %v2019_v39, 16  ;;  %v1157_v36 = vor.u32 %v1156_v49, %v1152_v47 }
  0xd4   : > { %1021 = vrot.lane.b32.xlu1 %v2492_v48, %s2050_s5 }
  0xd5   : > { %1019 = vrot.lane.b32.xlu0 %v2479_v33, %s2052_s9  ;;  %v622_v33 = vsel %vm394_vm6, %v580_v30, %v587_v42 }
  0xd6   : > { %v604_v53 = vpop.permute.xlu1 %603  ;;  %v576_v54 = vpop.permute.xlu0 %575 }
  0xd7   : > { %v624_v1 = vsel %vm397_vm8, %v622_v33, %v604_v53  ;;  %v615_v34 = vsel %vm384_vm5, %v613_v9, %v576_v54  ;;  %v1161_v53 = vrot.slane %v1159_v59, 1  ;;  %v2020_v33 = vld [vmem:[%s2113_s24 + $0xcc] sm:$0xff]   ;;  %s1839_s24 = sshll.u32 %s2036_s12, 5 }
  0xd8   : > { %1034 = vrot.lane.b32.xlu1 %v2553_v5, %s2047_s27  ;;  %p193_p5 = scmp.lt.s32.totalorder %s1839_s24, 63 }
  0xd9   : > { %1027 = vrot.lane.b32.xlu0 %v999_v35, %s2049_s4  ;;  %v1162_v58 = vsel %vm299_vm1, %v1157_v36, %v1161_v53 }
  0xda   : > { %v828_v48 = vpop.permute.xlu1 %827  ;;  %v800_v4 = vpop.permute.xlu0 %799  ;;  %s2941_s24 = smov (!%p193_p5, %s1839_s24), 63 }
  0xdb   : > { %v848_v15 = vsel %vm397_vm8, %v846_v55, %v828_v48  ;;  %v839_v24 = vsel %vm384_vm5, %v837_v22, %v800_v4  ;;  %v1165_v48 = vrot.slane %v2623_v32, 1  ;;  %v1166_v4 = vrot.slane %v2019_v39, 1  ;;  %s1840_s12 = sshll.u32 %s2941_s24, 3 }
  0xdc   : > { %1051 = vrot.lane.b32.xlu1 %v2575_v56, %s2054_s18 }
  0xdd   : > { %1023 = vrot.lane.b32.xlu0 %v2512_v63, %s2048_s28 }
  0xde   : > { %v609_v40 = vpop.permute.xlu1 %608  ;;  %v578_v12 = vpop.permute.xlu0 %577 }
  0xdf   : > { %v626_v10 = vsel %vm400_vm9, %v624_v1, %v609_v40  ;;  %v617_v13 = vsel %vm387_vm7, %v615_v34, %v578_v12  ;;  %v1210_v1 = vshll.u32 %v2020_v33, 16 }
  0xe0   : > { %1056 = vrot.lane.b32.xlu1 %v1055_v7, %s2051_s8  ;;  %1896 = vmatprep.mubr.msk.bf16.mxu0 %vm1324_vm10, %v626_v10  ;;  %v619_v21 = vsel %vm390_vm11, %v617_v13, %v580_v30  ;;  %v1110_v30 = vrot.slane %v2017_v2, 1  ;;  %v1208_v13 = vshrl.u32 %v2020_v33, 16 }
  0xe1   : > { %1025 = vrot.lane.b32.xlu0 %v2544_v26, %s2053_s10  ;;  %1426 = vmatmul.mubr.bf16.gmra.mxu0 %v619_v21  ;;  %v1212_v14 = vrot.slane %v1210_v1, 1 }
  0xe2   : > { %v833_v51 = vpop.permute.xlu1 %832  ;;  %v802_v27 = vpop.permute.xlu0 %801  ;;  %v1111_v0 = vsel %vm314_vm0, %v1109_v31, %v1110_v30  ;;  %v1221_v30 = vrot.slane %v2020_v33, 1 }
  0xe3   : > { %v850_v23 = vsel %vm400_vm9, %v848_v15, %v833_v51  ;;  %v841_v17 = vsel %vm387_vm7, %v839_v24, %v802_v27  ;;  %v1213_v11 = vor.u32 %v1212_v14, %v1208_v13 }
  0xe4   : > { %1077 = vrot.lane.b32.xlu1 %v999_v35, %s2050_s5  ;;  %1900 = vmatprep.mubr.msk.bf16.mxu1 %vm1324_vm10, %v850_v23  ;;  %v843_v16 = vsel %vm390_vm11, %v841_v17, %v804_v50 }
  0xe5   : > { %1075 = vrot.lane.b32.xlu0 %v2544_v26, %s2052_s9  ;;  %1458 = vmatmul.mubr.bf16.vlgmr.msra.gmra.mxu1 %v843_v16  ;;  %v1218_v31 = vsel %vm299_vm1, %v1213_v11, %v1217_v25 }
  0xe6   : > { %v852_v28 = vpop.permute.xlu1 %851  ;;  %v628_v29 = vpop.permute.xlu0 %627 }
  0xe7   : > { %v667_v40 = vsel %vm378_vm3, %v2227_v8, %v628_v29  ;;  %v891_v15 = vsel %vm378_vm3, %v2316_v43, %v852_v28 }
  0xe8   : > { %1090 = vrot.lane.b32.xlu1 %v2579_v61, %s2047_s27 }
  0xe9   : > { %1083 = vrot.lane.b32.xlu0 %v1055_v7, %s2049_s4 }
  0xea   : > { %v636_v35 = vpop.permute.xlu1 %635  ;;  %v630_v26 = vpop.permute.xlu0 %629 }
  0xeb   : > { %v669_v34 = vsel %vm381_vm4, %v667_v40, %v630_v26 }
  0xec   : > { %1107 = vrot.lane.b32.xlu1 %v2619_v18, %s2054_s18 }
  0xed   : > { %1079 = vrot.lane.b32.xlu0 %v2553_v5, %s2048_s28 }
  0xee   : > { %v854_v42 = vpop.permute.xlu1 %853  ;;  %v643_v44 = vpop.permute.xlu0 %642 }
  0xef   : > { %v678_v3 = vsel %vm394_vm6, %v636_v35, %v643_v44  ;;  %v893_v23 = vsel %vm381_vm4, %v891_v15, %v854_v42 }
  0xf0   : > { %1112 = vrot.lane.b32.xlu1 %v1111_v0, %s2051_s8 }
  0xf1   : > { %1081 = vrot.lane.b32.xlu0 %v2575_v56, %s2053_s10 }
  0xf2   : > { %v867_v50 = vpop.permute.xlu1 %866  ;;  %v860_v52 = vpop.permute.xlu0 %859 }
  0xf3   : > { %v902_v8 = vsel %vm394_vm6, %v860_v52, %v867_v50 }
  0xf4   : > { %1133 = vrot.lane.b32.xlu1 %v1055_v7, %s2050_s5 }
  0xf5   : > { %1131 = vrot.lane.b32.xlu0 %v2575_v56, %s2052_s9  ;;  %v1167_v56 = vsel %vm314_vm0, %v1165_v48, %v1166_v4 }
  0xf6   : > { %v660_v54 = vpop.permute.xlu1 %659  ;;  %v632_v57 = vpop.permute.xlu0 %631 }
  0xf7   : > { %v680_v9 = vsel %vm397_vm8, %v678_v3, %v660_v54  ;;  %v671_v60 = vsel %vm384_vm5, %v669_v34, %v632_v57 }
  0xf8   : > { %1146 = vrot.lane.b32.xlu1 %v2623_v32, %s2047_s27 }
  0xf9   : > { %1139 = vrot.lane.b32.xlu0 %v1111_v0, %s2049_s4 }
  0xfa   : > { %v884_v7 = vpop.permute.xlu1 %883  ;;  %v856_v2 = vpop.permute.xlu0 %855 }
  0xfb   : > { %v904_v21 = vsel %vm397_vm8, %v902_v8, %v884_v7  ;;  %v895_v27 = vsel %vm384_vm5, %v893_v23, %v856_v2 }
  0xfc   : > { %1163 = vrot.lane.b32.xlu1 %v1162_v58, %s2054_s18 }
  0xfd   : > { %1135 = vrot.lane.b32.xlu0 %v2579_v61, %s2048_s28 }
  0xfe   : > { %v665_v10 = vpop.permute.xlu1 %664  ;;  %v634_v55 = vpop.permute.xlu0 %633 }
  0xff   : > { %v682_v12 = vsel %vm400_vm9, %v680_v9, %v665_v10  ;;  %v673_v46 = vsel %vm387_vm7, %v671_v60, %v634_v55 }
 0x100   : > { %1168 = vrot.lane.b32.xlu1 %v1167_v56, %s2051_s8  ;;  %1897 = vmatprep.mubr.msk.bf16.mxu0 %vm1324_vm10, %v682_v12  ;;  %v675_v51 = vsel %vm390_vm11, %v673_v46, %v636_v35  ;;  %v1222_v35 = vrot.slane %v2021_v6, 1 }
 0x101   : > { %1137 = vrot.lane.b32.xlu0 %v2619_v18, %s2053_s10  ;;  %1434 = vmatmul.mubr.bf16.gmra.mxu0 %v675_v51 }
 0x102   : > { %v889_v22 = vpop.permute.xlu1 %888  ;;  %v858_v17 = vpop.permute.xlu0 %857  ;;  %v1223_v39 = vsel %vm314_vm0, %v1221_v30, %v1222_v35 }
 0x103   : > { %v906_v24 = vsel %vm400_vm9, %v904_v21, %v889_v22  ;;  %v897_v43 = vsel %vm387_vm7, %v895_v27, %v858_v17 }
 0x104   : > { %1189 = vrot.lane.b32.xlu1 %v1111_v0, %s2050_s5  ;;  %1901 = vmatprep.mubr.msk.bf16.mxu1 %vm1324_vm10, %v906_v24  ;;  %v899_v16 = vsel %vm390_vm11, %v897_v43, %v860_v52  ;;  %s1841_s5 = sshll.u32 %s2099_s16, 3 }
 0x105   : > { %1187 = vrot.lane.b32.xlu0 %v2619_v18, %s2052_s9  ;;  %1466 = vmatmul.mubr.bf16.gmra.mxu1 %v899_v16 }
 0x106   : > { %v908_v28 = vpop.permute.xlu1 %907  ;;  %v684_v29 = vpop.permute.xlu0 %683 }
 0x107   : > { %v723_v36 = vsel %vm378_vm3, %v2301_v37, %v684_v29  ;;  %v947_v7 = vsel %vm378_vm3, %v2308_v38, %v908_v28 }
 0x108   : > { %1202 = vrot.lane.b32.xlu1 %v2020_v33, %s2047_s27 }
 0x109   : > { %1195 = vrot.lane.b32.xlu0 %v1167_v56, %s2049_s4  ;;  %s2740_s4 = scalar_lea.vmem %s2934_s2, %s1840_s12 }
 0x10a   : > { %v692_v26 = vpop.permute.xlu1 %691  ;;  %v686_v0 = vpop.permute.xlu0 %685 }
 0x10b   : > { %v725_v54 = vsel %vm381_vm4, %v723_v36, %v686_v0 }
 0x10c   : > { %1219 = vrot.lane.b32.xlu1 %v1218_v31, %s2054_s18 }
 0x10d   : > { %1191 = vrot.lane.b32.xlu0 %v2623_v32, %s2048_s28 }
 0x10e   : > { %v910_v18 = vpop.permute.xlu1 %909  ;;  %v699_v41 = vpop.permute.xlu0 %698 }
 0x10f   : > { %v734_v52 = vsel %vm394_vm6, %v692_v26, %v699_v41  ;;  %v949_v56 = vsel %vm381_vm4, %v947_v7, %v910_v18 }
 0x110   : > { %1224 = vrot.lane.b32.xlu1 %v1223_v39, %s2051_s8 }
 0x111   : > { %1193 = vrot.lane.b32.xlu0 %v1162_v58, %s2053_s10  ;;  %s203_s10 = scalar_lea.vmem %s2935_s3, %s1841_s5 }
 0x112   : > { %v923_v42 = vpop.permute.xlu1 %922  ;;  %v916_v44 = vpop.permute.xlu0 %915 }
 0x113   : > { %v958_v4 = vsel %vm394_vm6, %v916_v44, %v923_v42 }
 0x116   : > { %v716_v47 = vpop.permute.xlu1 %715 }
 0x117   : > { %v688_v49 = vpop.permute.xlu0 %687  ;;  %v736_v53 = vsel %vm397_vm8, %v734_v52, %v716_v47 }
 0x118   : > { %v727_v58 = vsel %vm384_vm5, %v725_v54, %v688_v49 }
 0x11a   : > { %v940_v59 = vpop.permute.xlu1 %939 }
 0x11b   : > { %v912_v50 = vpop.permute.xlu0 %911  ;;  %v960_v37 = vsel %vm397_vm8, %v958_v4, %v940_v59 }
 0x11c   : > { %v951_v1 = vsel %vm384_vm5, %v949_v56, %v912_v50 }
 0x11e   : > { %v721_v32 = vpop.permute.xlu1 %720 }
 0x11f   : > { %v738_v57 = vsel %vm400_vm9, %v736_v53, %v721_v32  ;;  %v690_v48 = vpop.permute.xlu0 %689 }
 0x120   : > { %1898 = vmatprep.mubr.msk.bf16.mxu0 %vm1324_vm10, %v738_v57  ;;  %v729_v33 = vsel %vm387_vm7, %v727_v58, %v690_v48 }
 0x121   : > { %v731_v2 = vsel %vm390_vm11, %v729_v33, %v692_v26 }
 0x122   : > { %v945_v3 = vpop.permute.xlu1 %944  ;;  %1442 = vmatmul.mubr.bf16.gmra.mxu0 %v731_v2 }
 0x123   : > { %v962_v6 = vsel %vm400_vm9, %v960_v37, %v945_v3  ;;  %v914_v40 = vpop.permute.xlu0 %913 }
 0x124   : > { %1902 = vmatprep.mubr.msk.bf16.mxu1 %vm1324_vm10, %v962_v6  ;;  %v953_v9 = vsel %vm387_vm7, %v951_v1, %v914_v40 }
 0x125   : > { %v955_v10 = vsel %vm390_vm11, %v953_v9, %v916_v44 }
 0x126   : > { %v964_v38 = vpop.permute.xlu1 %963  ;;  %1474 = vmatmul.mubr.bf16.gmra.mxu1 %v955_v10 }
 0x127   : > { %v740_v34 = vpop.permute.xlu0 %739  ;;  %v1003_v28 = vsel %vm378_vm3, %v2383_v20, %v964_v38 }
 0x128   : > { %v779_v22 = vsel %vm378_vm3, %v2376_v19, %v740_v34 }
 0x12a   : > { %v748_v12 = vpop.permute.xlu1 %747 }
 0x12b   : > { %v742_v60 = vpop.permute.xlu0 %741 }
 0x12c   : > { %v781_v27 = vsel %vm381_vm4, %v779_v22, %v742_v60 }
 0x12e   : > { %v966_v55 = vpop.permute.xlu1 %965 }
 0x12f   : > { %v755_v13 = vpop.permute.xlu0 %754  ;;  %v1005_v30 = vsel %vm381_vm4, %v1003_v28, %v966_v55 }
 0x130   : > { %v790_v51 = vsel %vm394_vm6, %v748_v12, %v755_v13 }
 0x132   : > { %v979_v8 = vpop.permute.xlu1 %978 }
 0x133   : > { %v972_v46 = vpop.permute.xlu0 %971 }
 0x134   : > { %v1014_v25 = vsel %vm394_vm6, %v972_v46, %v979_v8 }
 0x136   : > { %v772_v14 = vpop.permute.xlu1 %771 }
 0x137   : > { %v744_v45 = vpop.permute.xlu0 %743  ;;  %v792_v23 = vsel %vm397_vm8, %v790_v51, %v772_v14 }
 0x138   : > { %v783_v43 = vsel %vm384_vm5, %v781_v27, %v744_v45 }
 0x13a   : > { %v996_v15 = vpop.permute.xlu1 %995 }
 0x13b   : > { %v968_v21 = vpop.permute.xlu0 %967  ;;  %v1016_v19 = vsel %vm397_vm8, %v1014_v25, %v996_v15 }
 0x13c   : > { %v1007_v26 = vsel %vm384_vm5, %v1005_v30, %v968_v21 }
 0x13e   : > { %v777_v24 = vpop.permute.xlu1 %776 }
 0x13f   : > { %v794_v17 = vsel %vm400_vm9, %v792_v23, %v777_v24  ;;  %v746_v11 = vpop.permute.xlu0 %745 }
 0x140   : > { %1899 = vmatprep.mubr.msk.bf16.mxu0 %vm1324_vm10, %v794_v17  ;;  %v785_v16 = vsel %vm387_vm7, %v783_v43, %v746_v11 }
 0x141   : > { %v787_v29 = vsel %vm390_vm11, %v785_v16, %v748_v12 }
 0x142   : > { %v1001_v31 = vpop.permute.xlu1 %1000  ;;  %1450 = vmatmul.mubr.bf16.gmra.mxu0 %v787_v29 }
 0x143   : > { %v1018_v35 = vsel %vm400_vm9, %v1016_v19, %v1001_v31  ;;  %v970_v0 = vpop.permute.xlu0 %969 }
 0x144   : > { %1903 = vmatprep.mubr.msk.bf16.mxu1 %vm1324_vm10, %v1018_v35  ;;  %v1009_v39 = vsel %vm387_vm7, %v1007_v26, %v970_v0 }
 0x145   : > { %v1011_v20 = vsel %vm390_vm11, %v1009_v39, %v972_v46 }
 0x146   : > { %v1022_v18 = vpop.permute.xlu1 %1021  ;;  %1482 = vmatmul.mubr.bf16.gmra.mxu1 %v1011_v20 }
 0x147   : > { %v1020_v41 = vpop.permute.xlu0 %1019 }
 0x148   : > { %v1059_v49 = vsel %vm378_vm3, %v2442_v62, %v1020_v41 }
 0x149   : > { %v1061_v53 = vsel %vm381_vm4, %v1059_v49, %v1022_v18 }
 0x14a   : > { %v1035_v42 = vpop.permute.xlu1 %1034 }
 0x14b   : > { %v1028_v44 = vpop.permute.xlu0 %1027 }
 0x14c   : > { %v1070_v50 = vsel %vm394_vm6, %v1028_v44, %v1035_v42 }
 0x14e   : > { %v1052_v47 = vpop.permute.xlu1 %1051 }
 0x14f   : > { %v1024_v59 = vpop.permute.xlu0 %1023  ;;  %v1072_v52 = vsel %vm397_vm8, %v1070_v50, %v1052_v47 }
 0x150   : > { %v1063_v54 = vsel %vm384_vm5, %v1061_v53, %v1024_v59 }
 0x152   : > { %v1057_v36 = vpop.permute.xlu1 %1056 }
 0x153   : > { %v1074_v32 = vsel %vm400_vm9, %v1072_v52, %v1057_v36  ;;  %v1026_v57 = vpop.permute.xlu0 %1025 }
 0x154   : > { %1904 = vmatprep.mubr.msk.bf16.mxu1 %vm1324_vm10, %v1074_v32  ;;  %v1065_v58 = vsel %vm387_vm7, %v1063_v54, %v1026_v57 }
 0x155   : > { %v1067_v62 = vsel %vm390_vm11, %v1065_v58, %v1028_v44 }
 0x156   : > { %v1078_v48 = vpop.permute.xlu1 %1077  ;;  %1490 = vmatmul.mubr.bf16.gmra.mxu1 %v1067_v62 }
 0x157   : > { %v1076_v4 = vpop.permute.xlu0 %1075 }
 0x158   : > { %v1115_v10 = vsel %vm378_vm3, %v2512_v63, %v1076_v4 }
 0x159   : > { %v1117_v45 = vsel %vm381_vm4, %v1115_v10, %v1078_v48 }
 0x15a   : > { %v1091_v33 = vpop.permute.xlu1 %1090  ;;  %v1395_v7 = vpop.f32.mrf.mxu0 }
 0x15b   : > { %1522 = vst.msk [vmem:[%s2740_s4] sm:$0xff] %vm378_vm3, %v1395_v7  ;;  %v1084_v37 = vpop.permute.xlu0 %1083  ;;  %v1623_v3 = vmul.f32 %v1395_v7, %v1395_v7  ;;  %v1554_v1 = vsel %vm378_vm3, %v1395_v7, 0.0 }
 0x15c   : > { %v1397_v2 = vpop.f32.mrf.mxu0  ;;  %v1126_v55 = vsel %vm394_vm6, %v1084_v37, %v1091_v33 }
 0x15d   : > { %v1655_v60 = vsel %vm378_vm3, %v1623_v3, 0.0 }
 0x15e   : > { %v1108_v56 = vpop.permute.xlu1 %1107  ;;  %v1398_v6 = vpop.f32.mrf.mxu0 }
 0x15f   : > { %1523 = vst.msk [vmem:[%s2740_s4 + $0x8] sm:$0xff] %vm378_vm3, %v1398_v6  ;;  %v1555_v40 = vsel %vm378_vm3, %v1398_v6, 0.0  ;;  %v1624_v9 = vmul.f32 %v1398_v6, %v1398_v6  ;;  %v1080_v34 = vpop.permute.xlu0 %1079  ;;  %v1128_v8 = vsel %vm397_vm8, %v1126_v55, %v1108_v56 }
 0x160   : > { %v1556_v38 = vadd.f32 %v1555_v40, %v1554_v1  ;;  %v1400_v12 = vpop.f32.mrf.mxu0  ;;  %v1119_v63 = vsel %vm384_vm5, %v1117_v45, %v1080_v34 }
 0x161   : > { %v1656_v13 = vsel %vm378_vm3, %v1624_v9, 0.0 }
 0x162   : > { %v1657_v46 = vadd.f32 %v1656_v13, %v1655_v60  ;;  %v1113_v14 = vpop.permute.xlu1 %1112 }
 0x163   : > { %v1130_v15 = vsel %vm400_vm9, %v1128_v8, %v1113_v14  ;;  %v1082_v21 = vpop.permute.xlu0 %1081 }
 0x164   : > { %1905 = vmatprep.mubr.msk.bf16.mxu1 %vm1324_vm10, %v1130_v15  ;;  %v1121_v51 = vsel %vm387_vm7, %v1119_v63, %v1082_v21 }
 0x165   : > { %v1123_v22 = vsel %vm390_vm11, %v1121_v51, %v1084_v37  ;;  %v1403_v24 = vpop.f32.mrf.mxu0 }
 0x166   : > { %v1134_v23 = vpop.permute.xlu1 %1133  ;;  %1498 = vmatmul.mubr.bf16.gmra.mxu1 %v1123_v22  ;;  %1524 = vst.msk [vmem:[%s2740_s4 + $0x10] sm:$0xff] %vm378_vm3, %v1403_v24  ;;  %v1557_v27 = vsel %vm378_vm3, %v1403_v24, 0.0  ;;  %v1625_v17 = vmul.f32 %v1403_v24, %v1403_v24 }
 0x167   : > { %v1132_v43 = vpop.permute.xlu0 %1131  ;;  %v1558_v11 = vadd.f32 %v1557_v27, %v1556_v38  ;;  %v1405_v25 = vpop.f32.mrf.mxu0 }
 0x168   : > { %v1658_v16 = vsel %vm378_vm3, %v1625_v17, 0.0  ;;  %v1171_v41 = vsel %vm378_vm3, %v2553_v5, %v1132_v43 }
 0x169   : > { %v1659_v19 = vadd.f32 %v1658_v16, %v1657_v46  ;;  %v1406_v29 = vpop.f32.mrf.mxu0  ;;  %v1173_v59 = vsel %vm381_vm4, %v1171_v41, %v1134_v23 }
 0x16a   : > { %v1147_v28 = vpop.permute.xlu1 %1146  ;;  %1525 = vst.msk [vmem:[%s2740_s4 + $0x18] sm:$0xff] %vm378_vm3, %v1406_v29  ;;  %v1559_v31 = vsel %vm378_vm3, %v1406_v29, 0.0  ;;  %v1626_v30 = vmul.f32 %v1406_v29, %v1406_v29 }
 0x16b   : > { %v1140_v35 = vpop.permute.xlu0 %1139  ;;  %v1560_v26 = vadd.f32 %v1559_v31, %v1558_v11  ;;  %v1408_v0 = vpop.f32.mrf.mxu0 }
 0x16c   : > { %v1660_v39 = vsel %vm378_vm3, %v1626_v30, 0.0  ;;  %v1182_v44 = vsel %vm394_vm6, %v1140_v35, %v1147_v28 }
 0x16d   : > { %v1661_v18 = vadd.f32 %v1660_v39, %v1659_v19 }
 0x16e   : > { %v1164_v20 = vpop.permute.xlu1 %1163 }
 0x16f   : > { %v1136_v42 = vpop.permute.xlu0 %1135  ;;  %v1184_v47 = vsel %vm397_vm8, %v1182_v44, %v1164_v20 }
 0x170   : > { %v1175_v52 = vsel %vm384_vm5, %v1173_v59, %v1136_v42 }
 0x172   : > { %v1169_v49 = vpop.permute.xlu1 %1168 }
 0x173   : > { %v1186_v50 = vsel %vm400_vm9, %v1184_v47, %v1169_v49  ;;  %v1138_v36 = vpop.permute.xlu0 %1137 }
 0x174   : > { %1906 = vmatprep.mubr.msk.bf16.mxu1 %vm1324_vm10, %v1186_v50  ;;  %v1177_v53 = vsel %vm387_vm7, %v1175_v52, %v1138_v36 }
 0x175   : > { %v1179_v5 = vsel %vm390_vm11, %v1177_v53, %v1140_v35  ;;  %v1411_v54 = vpop.f32.mrf.mxu0 }
 0x176   : > { %v1190_v32 = vpop.permute.xlu1 %1189  ;;  %1506 = vmatmul.mubr.bf16.gmra.mxu1 %v1179_v5  ;;  %1526 = vst.msk [vmem:[%s2740_s4 + $0x20] sm:$0xff] %vm378_vm3, %v1411_v54  ;;  %v1561_v57 = vsel %vm378_vm3, %v1411_v54, 0.0  ;;  %v1627_v58 = vmul.f32 %v1411_v54, %v1411_v54 }
 0x177   : > { %v1188_v62 = vpop.permute.xlu0 %1187  ;;  %v1562_v48 = vadd.f32 %v1561_v57, %v1560_v26  ;;  %v1413_v4 = vpop.f32.mrf.mxu0 }
 0x178   : > { %v1662_v33 = vsel %vm378_vm3, %v1627_v58, 0.0  ;;  %v1227_v34 = vsel %vm378_vm3, %v2579_v61, %v1188_v62 }
 0x179   : > { %v1663_v37 = vadd.f32 %v1662_v33, %v1661_v18  ;;  %v1414_v2 = vpop.f32.mrf.mxu0  ;;  %v1229_v8 = vsel %vm381_vm4, %v1227_v34, %v1190_v32 }
 0x17a   : > { %v1203_v7 = vpop.permute.xlu1 %1202  ;;  %1527 = vst.msk [vmem:[%s2740_s4 + $0x28] sm:$0xff] %vm378_vm3, %v1414_v2  ;;  %v1563_v3 = vsel %vm378_vm3, %v1414_v2, 0.0  ;;  %v1628_v56 = vmul.f32 %v1414_v2, %v1414_v2 }
 0x17b   : > { %v1196_v6 = vpop.permute.xlu0 %1195  ;;  %v1564_v1 = vadd.f32 %v1563_v3, %v1562_v48  ;;  %v1416_v40 = vpop.f32.mrf.mxu0 }
 0x17c   : > { %v1664_v9 = vsel %vm378_vm3, %v1628_v56, 0.0  ;;  %v1238_v60 = vsel %vm394_vm6, %v1196_v6, %v1203_v7 }
 0x17d   : > { %v1665_v38 = vadd.f32 %v1664_v9, %v1663_v37 }
 0x17e   : > { %v1220_v10 = vpop.permute.xlu1 %1219 }
 0x17f   : > { %v1192_v12 = vpop.permute.xlu0 %1191  ;;  %v1240_v55 = vsel %vm397_vm8, %v1238_v60, %v1220_v10 }
 0x180   : > { %v1231_v14 = vsel %vm384_vm5, %v1229_v8, %v1192_v12 }
 0x182   : > { %v1225_v13 = vpop.permute.xlu1 %1224 }
 0x183   : > { %v1242_v46 = vsel %vm400_vm9, %v1240_v55, %v1225_v13  ;;  %v1194_v45 = vpop.permute.xlu0 %1193 }
 0x184   : > { %1907 = vmatprep.mubr.msk.bf16.mxu1 %vm1324_vm10, %v1242_v46  ;;  %v1233_v15 = vsel %vm387_vm7, %v1231_v14, %v1194_v45 }
 0x185   : > { %v1235_v61 = vsel %vm390_vm11, %v1233_v15, %v1196_v6  ;;  %v1419_v63 = vpop.f32.mrf.mxu0 }
 0x186   : > { %1514 = vmatmul.mubr.bf16.gmra.mxu1 %v1235_v61  ;;  %1528 = vst.msk [vmem:[%s2740_s4 + $0x30] sm:$0xff] %vm378_vm3, %v1419_v63  ;;  %v1565_v21 = vsel %vm378_vm3, %v1419_v63, 0.0  ;;  %v1629_v51 = vmul.f32 %v1419_v63, %v1419_v63 }
 0x187   : > { %v1566_v22 = vadd.f32 %v1565_v21, %v1564_v1  ;;  %v1421_v23 = vpop.f32.mrf.mxu0 }
 0x188   : > { %v1666_v24 = vsel %vm378_vm3, %v1629_v51, 0.0 }
 0x189   : > { %v1667_v27 = vadd.f32 %v1666_v24, %v1665_v38  ;;  %v1422_v17 = vpop.f32.mrf.mxu0 }
 0x18a   : > { %1529 = vst.msk [vmem:[%s2740_s4 + $0x38] sm:$0xff] %vm378_vm3, %v1422_v17  ;;  %v1567_v43 = vsel %vm378_vm3, %v1422_v17, 0.0  ;;  %v1630_v11 = vmul.f32 %v1422_v17, %v1422_v17 }
 0x18b   : > { %v1568_v25 = vadd.f32 %v1567_v43, %v1566_v22  ;;  %v1424_v16 = vpop.f32.mrf.mxu0 }
 0x18c   : > { %v1668_v28 = vsel %vm378_vm3, %v1630_v11, 0.0 }
 0x18d   : > { %v1669_v19 = vadd.f32 %v1668_v28, %v1667_v27 }
 0x1a1   : > { %v1427_v29 = vpop.f32.mrf.mxu0 }
 0x1a2   : > { %1530 = vst.msk [vmem:[%s2740_s4 + $0x40] sm:$0xff] %vm378_vm3, %v1427_v29  ;;  %v1569_v31 = vsel %vm378_vm3, %v1427_v29, 0.0  ;;  %v1631_v30 = vmul.f32 %v1427_v29, %v1427_v29 }
 0x1a3   : > { %v1570_v35 = vadd.f32 %v1569_v31, %v1568_v25  ;;  %v1429_v26 = vpop.f32.mrf.mxu0 }
 0x1a4   : > { %v1670_v0 = vsel %vm378_vm3, %v1631_v30, 0.0 }
 0x1a5   : > { %v1671_v39 = vadd.f32 %v1670_v0, %v1669_v19  ;;  %v1430_v20 = vpop.f32.mrf.mxu0  ;;  %v2808_v18 = vpop.f32.mrf.mxu1 }
 0x1a6   : > { %1531 = vst.msk [vmem:[%s2740_s4 + $0x48] sm:$0xff] %vm378_vm3, %v1430_v20  ;;  %v1571_v41 = vsel %vm378_vm3, %v1430_v20, 0.0  ;;  %v1632_v42 = vmul.f32 %v1430_v20, %v1430_v20  ;;  %1538 = vst.msk [vmem:[%s2740_s4 + $0x80] sm:$0xff] %vm378_vm3, %v2808_v18  ;;  %v1639_v28 = vmul.f32 %v2808_v18, %v2808_v18  ;;  %v1585_v0 = vsel %vm378_vm3, %v2808_v18, 0.0 }
 0x1a7   : > { %v1572_v44 = vadd.f32 %v1571_v41, %v1570_v35  ;;  %v1432_v47 = vpop.f32.mrf.mxu0  ;;  %v1461_v49 = vpop.f32.mrf.mxu1 }
 0x1a8   : > { %v1672_v59 = vsel %vm378_vm3, %v1632_v42, 0.0  ;;  %v1686_v47 = vsel %vm378_vm3, %v1639_v28, 0.0 }
 0x1a9   : > { %v1673_v50 = vadd.f32 %v1672_v59, %v1671_v39  ;;  %v2817_v52 = vpop.f32.mrf.mxu1 }
 0x1aa   : > { %1539 = vst.msk [vmem:[%s2740_s4 + $0x88] sm:$0xff] %vm378_vm3, %v2817_v52  ;;  %v1640_v39 = vmul.f32 %v2817_v52, %v2817_v52  ;;  %v1587_v49 = vsel %vm378_vm3, %v2817_v52, 0.0 }
 0x1ab   : > { %v1464_v36 = vpop.f32.mrf.mxu1 }
 0x1c1   : > { %v1435_v53 = vpop.f32.mrf.mxu0 }
 0x1c2   : > { %1532 = vst.msk [vmem:[%s2740_s4 + $0x50] sm:$0xff] %vm378_vm3, %v1435_v53  ;;  %v1573_v5 = vsel %vm378_vm3, %v1435_v53, 0.0  ;;  %v1633_v32 = vmul.f32 %v1435_v53, %v1435_v53  ;;  %v1688_v53 = vsel %vm378_vm3, %v1640_v39, 0.0 }
 0x1c3   : > { %v1574_v54 = vadd.f32 %v1573_v5, %v1572_v44  ;;  %v1437_v57 = vpop.f32.mrf.mxu0 }
 0x1c4   : > { %v1674_v58 = vsel %vm378_vm3, %v1633_v32, 0.0 }
 0x1c5   : > { %v1675_v62 = vadd.f32 %v1674_v58, %v1673_v50  ;;  %v1438_v48 = vpop.f32.mrf.mxu0  ;;  %v2826_v4 = vpop.f32.mrf.mxu1 }
 0x1c6   : > { %1533 = vst.msk [vmem:[%s2740_s4 + $0x58] sm:$0xff] %vm378_vm3, %v1438_v48  ;;  %v1575_v33 = vsel %vm378_vm3, %v1438_v48, 0.0  ;;  %v1634_v7 = vmul.f32 %v1438_v48, %v1438_v48  ;;  %1540 = vst.msk [vmem:[%s2740_s4 + $0x90] sm:$0xff] %vm378_vm3, %v2826_v4  ;;  %v1641_v59 = vmul.f32 %v2826_v4, %v2826_v4  ;;  %v1589_v5 = vsel %vm378_vm3, %v2826_v4, 0.0 }
 0x1c7   : > { %v1576_v37 = vadd.f32 %v1575_v33, %v1574_v54  ;;  %v1440_v2 = vpop.f32.mrf.mxu0  ;;  %v1469_v3 = vpop.f32.mrf.mxu1 }
 0x1c8   : > { %v1676_v56 = vsel %vm378_vm3, %v1634_v7, 0.0  ;;  %v1690_v58 = vsel %vm378_vm3, %v1641_v59, 0.0 }
 0x1c9   : > { %v1677_v6 = vadd.f32 %v1676_v56, %v1675_v62  ;;  %v1470_v1 = vpop.f32.mrf.mxu1 }
 0x1ca   : > { %1541 = vst.msk [vmem:[%s2740_s4 + $0x98] sm:$0xff] %vm378_vm3, %v1470_v1  ;;  %v1642_v32 = vmul.f32 %v1470_v1, %v1470_v1  ;;  %v1591_v52 = vsel %vm378_vm3, %v1470_v1, 0.0 }
 0x1cb   : > { %v1472_v40 = vpop.f32.mrf.mxu1 }
 0x1cc   : > { %v1692_v7 = vsel %vm378_vm3, %v1642_v32, 0.0 }
 0x1e2   : > { %v1443_v9 = vpop.f32.mrf.mxu0 }
 0x1e3   : > { %1534 = vst.msk [vmem:[%s2740_s4 + $0x60] sm:$0xff] %vm378_vm3, %v1443_v9  ;;  %v1577_v10 = vsel %vm378_vm3, %v1443_v9, 0.0  ;;  %v1635_v38 = vmul.f32 %v1443_v9, %v1443_v9 }
 0x1e4   : > { %v1578_v34 = vadd.f32 %v1577_v10, %v1576_v37  ;;  %v1445_v12 = vpop.f32.mrf.mxu0 }
 0x1e5   : > { %v1678_v60 = vsel %vm378_vm3, %v1635_v38, 0.0 }
 0x1e6   : > { %v1679_v55 = vadd.f32 %v1678_v60, %v1677_v6  ;;  %v1446_v13 = vpop.f32.mrf.mxu0  ;;  %v1475_v8 = vpop.f32.mrf.mxu1 }
 0x1e7   : > { %1535 = vst.msk [vmem:[%s2740_s4 + $0x68] sm:$0xff] %vm378_vm3, %v1446_v13  ;;  %v1579_v46 = vsel %vm378_vm3, %v1446_v13, 0.0  ;;  %v1636_v14 = vmul.f32 %v1446_v13, %v1446_v13  ;;  %1542 = vst.msk [vmem:[%s2740_s4 + $0xa0] sm:$0xff] %vm378_vm3, %v1475_v8  ;;  %v1643_v62 = vmul.f32 %v1475_v8, %v1475_v8  ;;  %v1593_v37 = vsel %vm378_vm3, %v1475_v8, 0.0 }
 0x1e8   : > { %v1580_v45 = vadd.f32 %v1579_v46, %v1578_v34  ;;  %v1448_v15 = vpop.f32.mrf.mxu0  ;;  %v1477_v61 = vpop.f32.mrf.mxu1 }
 0x1e9   : > { %v1680_v63 = vsel %vm378_vm3, %v1636_v14, 0.0  ;;  %v1694_v56 = vsel %vm378_vm3, %v1643_v62, 0.0 }
 0x1ea   : > { %v1681_v21 = vadd.f32 %v1680_v63, %v1679_v55  ;;  %v1478_v51 = vpop.f32.mrf.mxu1 }
 0x1eb   : > { %1543 = vst.msk [vmem:[%s2740_s4 + $0xa8] sm:$0xff] %vm378_vm3, %v1478_v51  ;;  %v1644_v2 = vmul.f32 %v1478_v51, %v1478_v51  ;;  %v1595_v6 = vsel %vm378_vm3, %v1478_v51, 0.0 }
 0x1ec   : > { %v1480_v22 = vpop.f32.mrf.mxu1 }
 0x1ed   : > { %v1696_v9 = vsel %vm378_vm3, %v1644_v2, 0.0 }
 0x202   : > { %v1451_v23 = vpop.f32.mrf.mxu0 }
 0x203   : > { %1536 = vst.msk [vmem:[%s2740_s4 + $0x70] sm:$0xff] %vm378_vm3, %v1451_v23  ;;  %v1581_v24 = vsel %vm378_vm3, %v1451_v23, 0.0  ;;  %v1637_v27 = vmul.f32 %v1451_v23, %v1451_v23 }
 0x204   : > { %v1453_v17 = vpop.f32.mrf.mxu0  ;;  %v1582_v11 = vadd.f32 %v1581_v24, %v1580_v45 }
 0x205   : > { %v1682_v43 = vsel %vm378_vm3, %v1637_v27, 0.0 }
 0x206   : > { %v1454_v25 = vpop.f32.mrf.mxu0  ;;  %v1483_v16 = vpop.f32.mrf.mxu1  ;;  %v1683_v31 = vadd.f32 %v1682_v43, %v1681_v21 }
 0x207   : > { %1537 = vst.msk [vmem:[%s2740_s4 + $0x78] sm:$0xff] %vm378_vm3, %v1454_v25  ;;  %v1583_v19 = vsel %vm378_vm3, %v1454_v25, 0.0  ;;  %v1638_v29 = vmul.f32 %v1454_v25, %v1454_v25  ;;  %1544 = vst.msk [vmem:[%s2740_s4 + $0xb0] sm:$0xff] %vm378_vm3, %v1483_v16  ;;  %v1645_v14 = vmul.f32 %v1483_v16, %v1483_v16  ;;  %v1597_v45 = vsel %vm378_vm3, %v1483_v16, 0.0 }
 0x208   : > { %v1584_v30 = vadd.f32 %v1583_v19, %v1582_v11  ;;  %v1456_v35 = vpop.f32.mrf.mxu0  ;;  %v1485_v26 = vpop.f32.mrf.mxu1 }
 0x209   : > { %v1684_v20 = vsel %vm378_vm3, %v1638_v29, 0.0  ;;  %v1698_v61 = vsel %vm378_vm3, %v1645_v14, 0.0 }
 0x20a   : > { %v1586_v41 = vadd.f32 %v1585_v0, %v1584_v30  ;;  %v1685_v42 = vadd.f32 %v1684_v20, %v1683_v31  ;;  %v1486_v44 = vpop.f32.mrf.mxu1 }
 0x20b   : > { %1545 = vst.msk [vmem:[%s2740_s4 + $0xb8] sm:$0xff] %vm378_vm3, %v1486_v44  ;;  %v1646_v63 = vmul.f32 %v1486_v44, %v1486_v44  ;;  %v1599_v22 = vsel %vm378_vm3, %v1486_v44, 0.0 }
 0x20c   : > { %v1588_v50 = vadd.f32 %v1587_v49, %v1586_v41  ;;  %v1687_v18 = vadd.f32 %v1686_v47, %v1685_v42  ;;  %v1488_v36 = vpop.f32.mrf.mxu1 }
 0x20d   : > { %v1700_v27 = vsel %vm378_vm3, %v1646_v63, 0.0 }
 0x20e   : > { %v1590_v54 = vadd.f32 %v1589_v5, %v1588_v50  ;;  %v1689_v57 = vadd.f32 %v1688_v53, %v1687_v18 }
 0x210   : > { %v1691_v48 = vadd.f32 %v1690_v58, %v1689_v57  ;;  %v1592_v33 = vadd.f32 %v1591_v52, %v1590_v54 }
 0x212   : > { %v1594_v3 = vadd.f32 %v1593_v37, %v1592_v33  ;;  %v1693_v4 = vadd.f32 %v1692_v7, %v1691_v48 }
 0x214   : > { %v1596_v40 = vadd.f32 %v1595_v6, %v1594_v3  ;;  %v1695_v1 = vadd.f32 %v1694_v56, %v1693_v4 }
 0x216   : > { %v1697_v10 = vadd.f32 %v1696_v9, %v1695_v1  ;;  %v1491_v38 = vpop.f32.mrf.mxu1  ;;  %v1598_v15 = vadd.f32 %v1597_v45, %v1596_v40 }
 0x217   : > { %1546 = vst.msk [vmem:[%s2740_s4 + $0xc0] sm:$0xff] %vm378_vm3, %v1491_v38  ;;  %v1647_v17 = vmul.f32 %v1491_v38, %v1491_v38  ;;  %v1601_v25 = vsel %vm378_vm3, %v1491_v38, 0.0 }
 0x218   : > { %v1493_v34 = vpop.f32.mrf.mxu1  ;;  %v1699_v21 = vadd.f32 %v1698_v61, %v1697_v10  ;;  %v1600_v23 = vadd.f32 %v1599_v22, %v1598_v15 }
 0x219   : > { %v1702_v29 = vsel %vm378_vm3, %v1647_v17, 0.0 }
 0x21a   : > { %v1494_v12 = vpop.f32.mrf.mxu1  ;;  %v1701_v43 = vadd.f32 %v1700_v27, %v1699_v21  ;;  %v1602_v28 = vadd.f32 %v1601_v25, %v1600_v23 }
 0x21b   : > { %1547 = vst.msk [vmem:[%s2740_s4 + $0xc8] sm:$0xff] %vm378_vm3, %v1494_v12  ;;  %v1648_v16 = vmul.f32 %v1494_v12, %v1494_v12  ;;  %v1603_v31 = vsel %vm378_vm3, %v1494_v12, 0.0 }
 0x21c   : > { %v1496_v60 = vpop.f32.mrf.mxu1  ;;  %v1703_v35 = vadd.f32 %v1702_v29, %v1701_v43  ;;  %v1604_v20 = vadd.f32 %v1603_v31, %v1602_v28 }
 0x21d   : > { %v1704_v26 = vsel %vm378_vm3, %v1648_v16, 0.0 }
 0x21e   : > { %v1705_v47 = vadd.f32 %v1704_v26, %v1703_v35 }
 0x226   : > { %v1499_v55 = vpop.f32.mrf.mxu1 }
 0x227   : > { %1548 = vst.msk [vmem:[%s2740_s4 + $0xd0] sm:$0xff] %vm378_vm3, %v1499_v55  ;;  %v1649_v30 = vmul.f32 %v1499_v55, %v1499_v55  ;;  %v1605_v0 = vsel %vm378_vm3, %v1499_v55, 0.0 }
 0x228   : > { %v1501_v13 = vpop.f32.mrf.mxu1  ;;  %v1606_v49 = vadd.f32 %v1605_v0, %v1604_v20 }
 0x229   : > { %v1706_v41 = vsel %vm378_vm3, %v1649_v30, 0.0 }
 0x22a   : > { %v1502_v8 = vpop.f32.mrf.mxu1  ;;  %v1707_v36 = vadd.f32 %v1706_v41, %v1705_v47 }
 0x22b   : > { %1549 = vst.msk [vmem:[%s2740_s4 + $0xd8] sm:$0xff] %vm378_vm3, %v1502_v8  ;;  %v1650_v39 = vmul.f32 %v1502_v8, %v1502_v8  ;;  %v1607_v42 = vsel %vm378_vm3, %v1502_v8, 0.0 }
 0x22c   : > { %v1504_v46 = vpop.f32.mrf.mxu1  ;;  %v1608_v53 = vadd.f32 %v1607_v42, %v1606_v49 }
 0x22d   : > { %v1708_v59 = vsel %vm378_vm3, %v1650_v39, 0.0 }
 0x22e   : > { %v1709_v54 = vadd.f32 %v1708_v59, %v1707_v36 }
 0x236   : > { %v1507_v51 = vpop.f32.mrf.mxu1 }
 0x237   : > { %1550 = vst.msk [vmem:[%s2740_s4 + $0xe0] sm:$0xff] %vm378_vm3, %v1507_v51  ;;  %v1651_v44 = vmul.f32 %v1507_v51, %v1507_v51  ;;  %v1609_v50 = vsel %vm378_vm3, %v1507_v51, 0.0 }
 0x238   : > { %v1509_v24 = vpop.f32.mrf.mxu1  ;;  %v1610_v57 = vadd.f32 %v1609_v50, %v1608_v53 }
 0x239   : > { %v1710_v5 = vsel %vm378_vm3, %v1651_v44, 0.0 }
 0x23a   : > { %v1510_v11 = vpop.f32.mrf.mxu1  ;;  %v1711_v33 = vadd.f32 %v1710_v5, %v1709_v54 }
 0x23b   : > { %1551 = vst.msk [vmem:[%s2740_s4 + $0xe8] sm:$0xff] %vm378_vm3, %v1510_v11  ;;  %v1652_v18 = vmul.f32 %v1510_v11, %v1510_v11  ;;  %v1611_v32 = vsel %vm378_vm3, %v1510_v11, 0.0 }
 0x23c   : > { %v1512_v19 = vpop.f32.mrf.mxu1  ;;  %v1612_v7 = vadd.f32 %v1611_v32, %v1610_v57 }
 0x23d   : > { %v1712_v52 = vsel %vm378_vm3, %v1652_v18, 0.0 }
 0x23e   : > { %v1713_v3 = vadd.f32 %v1712_v52, %v1711_v33 }
 0x246   : > { %v1515_v58 = vpop.f32.mrf.mxu1 }
 0x247   : > { %1552 = vst.msk [vmem:[%s2740_s4 + $0xf0] sm:$0xff] %vm378_vm3, %v1515_v58  ;;  %v1613_v62 = vsel %vm378_vm3, %v1515_v58, 0.0  ;;  %v1653_v48 = vmul.f32 %v1515_v58, %v1515_v58 }
 0x248   : > { %v1517_v37 = vpop.f32.mrf.mxu1  ;;  %v1614_v4 = vadd.f32 %v1613_v62, %v1612_v7 }
 0x249   : > { %v1714_v2 = vsel %vm378_vm3, %v1653_v48, 0.0 }
 0x24a   : > { %v1518_v56 = vpop.f32.mrf.mxu1  ;;  %v1715_v1 = vadd.f32 %v1714_v2, %v1713_v3 }
 0x24b   : > { %1553 = vst.msk [vmem:[%s2740_s4 + $0xf8] sm:$0xff] %vm378_vm3, %v1518_v56  ;;  %v1615_v6 = vsel %vm378_vm3, %v1518_v56, 0.0  ;;  %v1654_v40 = vmul.f32 %v1518_v56, %v1518_v56 }
 0x24c   : > { %v1616_v9 = vadd.f32 %v1615_v6, %v1614_v4  ;;  %v1520_v10 = vpop.f32.mrf.mxu1 }
 0x24d   : > { %v1716_v38 = vsel %vm378_vm3, %v1654_v40, 0.0 }
 0x24e   : > { %v1617_v34 = vrot.slane %v1616_v9, 4  ;;  %v1717_v12 = vadd.f32 %v1716_v38, %v1715_v1 }
 0x250   : > { %v1618_v60 = vadd.f32 %v1617_v34, %v1616_v9  ;;  %v1718_v55 = vrot.slane %v1717_v12, 4 }
 0x252   : > { %v1619_v13 = vrot.slane %v1618_v60, 2  ;;  %v1719_v8 = vadd.f32 %v1718_v55, %v1717_v12 }
 0x254   : > { %v1620_v46 = vadd.f32 %v1619_v13, %v1618_v60  ;;  %v1720_v14 = vrot.slane %v1719_v8, 2 }
 0x256   : > { %v1621_v45 = vrot.slane %v1620_v46, 1  ;;  %v1721_v15 = vadd.f32 %v1720_v14, %v1719_v8 }
 0x258   : > { %v1722_v61 = vrot.slane %v1721_v15, 1  ;;  %v1622_v63 = vadd.f32 %v1621_v45, %v1620_v46 }
 0x25a   : > { %v1723_v21 = vadd.f32 %v1722_v61, %v1721_v15 }
 0x25c   : > { %v1725_v51 = vsel %vm1724_vm12, %v1622_v63, %v1723_v21 }
 0x25d   : > { %v1727_v22 = vsel %vm1726_vm13, %v1725_v51, 0.0 }
 0x25e   : > { %1728 = vst.msk [vmem:[%s203_s10] sm:$0xff] %vm378_vm3, %v1727_v22 }
 0x25f PF: > { %s14_s14 = sadd.s32 1, %s2044_s14   ;;  %s2936_s12 = smov %s2040_s13 }
 0x260   : > { %p11_p6 = scmp.ge.s32.totalorder %s14_s14, 4   ;;  %s2937_s13 = smov %s2939_s15 }
 0x262   :  { %13 = sbr.rel (!%p11_p6) target bundleno = 2 (0x2), region = 71 }

// kernel: unet_small_forward.27
= control target key start
LH: loop header
LB: loop body
LE: loop exit
PB: predicated region body
PF: predicated region fallthrough
CT: control target
= control target key end

     0   :  { %s769_s12 = smov 0   ;;  %s933_s0 = inlined_call_operand.vmem [shape: bf16[512,24], index: 0, kind: input, shape index: {}]   ;;  %s934_s1 = inlined_call_operand.vmem [shape: bf16[24,3], index: 1, kind: input, shape index: {}]   ;;  %s935_s2 = inlined_call_operand.vmem [shape: f32[1,3], index: 2, kind: input, shape index: {}]   ;;  %s936_s3 = inlined_call_operand.vmem [shape: f32[512,3], index: 3, kind: output, shape index: {}]  }
   0x1 LB: > { %s609_s13 = sadd.s32 4294967295, %s747_s12   ;;  %p613_p0 = scmp.ge.s32.totalorder %s747_s12, 1  ;;  %s747_s12 = sphi %s769_s12, %s13_s12  }
   0x2   : > { %p138_p1 = scmp.lt.s32.totalorder %s747_s12, 3 }
   0x4   : > { %p139_p2 = pnand %p613_p0, %p138_p1 }
   0x5   : > { %s614_s18 = sshll.u32 (!%p139_p2), %s609_s13, 5 }
   0x6   : > { %142 = sbr.rel (%p139_p2) target bundleno = 246 (0xf6), region = 32  ;;  %p163_p3 = scmp.lt.s32.totalorder (!%p139_p2), %s614_s18, 63 }
   0xb   : > { %v723_v0 = vld [vmem:[%s934_s1 + $0x8] ss:$0 sps:$4 sm:$0xff]   ;;  %vm355_vm0 = vcmask 1043456   ;;  %v724_v1 = vld [vmem:[%s934_s1] sm:$0xff]   ;;  %s938_s18 = smov (!%p163_p3, %s614_s18), 63  ;;  %vm306_vm1 = vcmask 195584  }
   0xc   : > { %713 = vmatprep.subr.msk.bf16.mxu0 %vm355_vm0, %v723_v0  ;;  %714 = vmatprep.subr.msk.bf16.mxu1 %vm355_vm0, %v723_v0  ;;  %v357_v2 = vsel %vm355_vm0, %v723_v0, 0  ;;  %s615_s19 = sshll.u32 %s938_s18, 2  ;;  %s617_s23 = sshll.u32 %s938_s18, 3  ;;  %v827_v19 = vld [vmem:[%s935_s2] ss:$0 sm:$0xff]  ;;  %vm520_vm2 = vcmask 23552  }
   0xd   : > { %674 = vmatpush3.bf16.msra.mxu0 %v357_v2  ;;  %711 = vmatpush3.bf16.msra.mxu1 %v357_v2  ;;  %s789_s22 = scalar_lea.vmem %s933_s0, %s615_s19  ;;  %s832_s28 = scalar_lea.vmem %s936_s3, %s617_s23 }
   0xe   : > { %675 = vmatprep.subr.bf16.mxu0 %v724_v1  ;;  %710 = vmatprep.subr.bf16.mxu1 %v724_v1  ;;  %v725_v3 = vld [vmem:[%s789_s22] sm:$0xff]   ;;  %v727_v5 = vld [vmem:[%s789_s22 + $0x8] sm:$0xff]   ;;  %v729_v7 = vld [vmem:[%s789_s22 + $0x10] sm:$0xff]  }
   0xf   : > { %v726_v4 = vld [vmem:[%s789_s22 + $0x40] sm:$0xff]   ;;  %677 = vmatprep.mubr.msk.bf16.mxu0 %vm306_vm1, %v725_v3  ;;  %v728_v6 = vld [vmem:[%s789_s22 + $0x48] sm:$0xff]   ;;  %v730_v8 = vld [vmem:[%s789_s22 + $0x50] sm:$0xff]  }
  0x10   : > { %693 = vmatprep.mubr.msk.bf16.mxu1 %vm306_vm1, %v726_v4  ;;  %v731_v9 = vld [vmem:[%s789_s22 + $0x18] sm:$0xff]   ;;  %v733_v11 = vld [vmem:[%s789_s22 + $0x20] sm:$0xff]   ;;  %v735_v13 = vld [vmem:[%s789_s22 + $0x28] sm:$0xff]  }
  0x11   : > { %676 = vmatpush3.bf16.msra.mxu0 %v724_v1  ;;  %712 = vmatpush3.bf16.msra.mxu1 %v724_v1  ;;  %v732_v10 = vld [vmem:[%s789_s22 + $0x58] sm:$0xff]   ;;  %v734_v12 = vld [vmem:[%s789_s22 + $0x60] sm:$0xff]   ;;  %v736_v14 = vld [vmem:[%s789_s22 + $0x68] sm:$0xff]  }
  0x12   : > { %v737_v15 = vld [vmem:[%s789_s22 + $0x30] sm:$0xff]   ;;  %v739_v17 = vld [vmem:[%s789_s22 + $0x38] sm:$0xff]  }
  0x13   : > { %v738_v16 = vld [vmem:[%s789_s22 + $0x70] sm:$0xff]   ;;  %v740_v18 = vld [vmem:[%s789_s22 + $0x78] sm:$0xff]  }
  0x14   : > { %678 = vmatmul.mubr.msk.bf16.vlgmr.msra.gmra.mxu0 %vm306_vm1, %v727_v5  ;;  %694 = vmatmul.mubr.msk.bf16.vlgmr.msra.gmra.mxu1 %vm306_vm1, %v728_v6 }
  0x15   : > { %681 = vmatprep.mubr.msk.bf16.mxu0 %vm306_vm1, %v729_v7  ;;  %697 = vmatprep.mubr.msk.bf16.mxu1 %vm306_vm1, %v730_v8 }
  0x1c   : > { %682 = vmatmul.mubr.msk.bf16.gmra.mxu0 %vm306_vm1, %v731_v9  ;;  %698 = vmatmul.mubr.msk.bf16.gmra.mxu1 %vm306_vm1, %v732_v10 }
  0x1d   : > { %685 = vmatprep.mubr.msk.bf16.mxu0 %vm306_vm1, %v733_v11  ;;  %701 = vmatprep.mubr.msk.bf16.mxu1 %vm306_vm1, %v734_v12 }
  0x24   : > { %686 = vmatmul.mubr.msk.bf16.gmra.mxu0 %vm306_vm1, %v735_v13  ;;  %702 = vmatmul.mubr.msk.bf16.gmra.mxu1 %vm306_vm1, %v736_v14 }
  0x25   : > { %689 = vmatprep.mubr.msk.bf16.mxu0 %vm306_vm1, %v737_v15  ;;  %705 = vmatprep.mubr.msk.bf16.mxu1 %vm306_vm1, %v738_v16 }
  0x2c   : > { %690 = vmatmul.mubr.msk.bf16.gmra.mxu0 %vm306_vm1, %v739_v17  ;;  %706 = vmatmul.mubr.msk.bf16.gmra.mxu1 %vm306_vm1, %v740_v18 }
  0xd4   : > { %v679_v20 = vpop.f32.mrf.mxu0  ;;  %v695_v22 = vpop.f32.mrf.mxu1 }
  0xd5   : > { %v402_v21 = vadd.f32 %v679_v20, %v827_v19  ;;  %v466_v23 = vadd.f32 %v695_v22, %v827_v19 }
  0xd6   : > { %v393_v24 = vpop.f32.mrf.mxu0  ;;  %v457_v26 = vpop.f32.mrf.mxu1 }
  0xd7   : > { %523 = vst.msk [vmem:[%s832_s28 + $0x10] sm:$0xff] %vm520_vm2, %v402_v21  ;;  %v394_v25 = vadd.f32 %v827_v19, %v393_v24  ;;  %539 = vst.msk [vmem:[%s832_s28 + $0x90] sm:$0xff] %vm520_vm2, %v466_v23  ;;  %v458_v27 = vadd.f32 %v827_v19, %v457_v26 }
  0xd8   : > { %v680_v28 = vpop.f32.mrf.mxu0  ;;  %v696_v30 = vpop.f32.mrf.mxu1 }
  0xd9   : > { %521 = vst.msk [vmem:[%s832_s28] sm:$0xff] %vm520_vm2, %v394_v25  ;;  %v405_v29 = vadd.f32 %v680_v28, %v827_v19  ;;  %537 = vst.msk [vmem:[%s832_s28 + $0x80] sm:$0xff] %vm520_vm2, %v458_v27  ;;  %v469_v31 = vadd.f32 %v696_v30, %v827_v19 }
  0xda   : > { %v396_v32 = vpop.f32.mrf.mxu0  ;;  %v460_v34 = vpop.f32.mrf.mxu1 }
  0xdb   : > { %524 = vst.msk [vmem:[%s832_s28 + $0x18] sm:$0xff] %vm520_vm2, %v405_v29  ;;  %v397_v33 = vadd.f32 %v827_v19, %v396_v32  ;;  %540 = vst.msk [vmem:[%s832_s28 + $0x98] sm:$0xff] %vm520_vm2, %v469_v31  ;;  %v461_v35 = vadd.f32 %v827_v19, %v460_v34 }
  0xdc   : > { %v683_v36 = vpop.f32.mrf.mxu0  ;;  %v699_v38 = vpop.f32.mrf.mxu1 }
  0xdd   : > { %522 = vst.msk [vmem:[%s832_s28 + $0x8] sm:$0xff] %vm520_vm2, %v397_v33  ;;  %v418_v37 = vadd.f32 %v683_v36, %v827_v19  ;;  %538 = vst.msk [vmem:[%s832_s28 + $0x88] sm:$0xff] %vm520_vm2, %v461_v35  ;;  %v482_v39 = vadd.f32 %v699_v38, %v827_v19 }
  0xde   : > { %v409_v40 = vpop.f32.mrf.mxu0  ;;  %v473_v42 = vpop.f32.mrf.mxu1 }
  0xdf   : > { %527 = vst.msk [vmem:[%s832_s28 + $0x30] sm:$0xff] %vm520_vm2, %v418_v37  ;;  %v410_v41 = vadd.f32 %v827_v19, %v409_v40  ;;  %543 = vst.msk [vmem:[%s832_s28 + $0xb0] sm:$0xff] %vm520_vm2, %v482_v39  ;;  %v474_v43 = vadd.f32 %v827_v19, %v473_v42 }
  0xe0   : > { %v684_v44 = vpop.f32.mrf.mxu0  ;;  %v700_v46 = vpop.f32.mrf.mxu1 }
  0xe1   : > { %525 = vst.msk [vmem:[%s832_s28 + $0x20] sm:$0xff] %vm520_vm2, %v410_v41  ;;  %v421_v45 = vadd.f32 %v684_v44, %v827_v19  ;;  %541 = vst.msk [vmem:[%s832_s28 + $0xa0] sm:$0xff] %vm520_vm2, %v474_v43  ;;  %v485_v47 = vadd.f32 %v700_v46, %v827_v19 }
  0xe2   : > { %v412_v48 = vpop.f32.mrf.mxu0  ;;  %v476_v50 = vpop.f32.mrf.mxu1 }
  0xe3   : > { %528 = vst.msk [vmem:[%s832_s28 + $0x38] sm:$0xff] %vm520_vm2, %v421_v45  ;;  %v413_v49 = vadd.f32 %v827_v19, %v412_v48  ;;  %544 = vst.msk [vmem:[%s832_s28 + $0xb8] sm:$0xff] %vm520_vm2, %v485_v47  ;;  %v477_v51 = vadd.f32 %v827_v19, %v476_v50 }
  0xe4   : > { %v687_v52 = vpop.f32.mrf.mxu0  ;;  %v703_v54 = vpop.f32.mrf.mxu1 }
  0xe5   : > { %526 = vst.msk [vmem:[%s832_s28 + $0x28] sm:$0xff] %vm520_vm2, %v413_v49  ;;  %v434_v53 = vadd.f32 %v687_v52, %v827_v19  ;;  %542 = vst.msk [vmem:[%s832_s28 + $0xa8] sm:$0xff] %vm520_vm2, %v477_v51  ;;  %v498_v55 = vadd.f32 %v703_v54, %v827_v19 }
  0xe6   : > { %v425_v56 = vpop.f32.mrf.mxu0  ;;  %v489_v58 = vpop.f32.mrf.mxu1 }
  0xe7   : > { %531 = vst.msk [vmem:[%s832_s28 + $0x50] sm:$0xff] %vm520_vm2, %v434_v53  ;;  %v426_v57 = vadd.f32 %v827_v19, %v425_v56  ;;  %547 = vst.msk [vmem:[%s832_s28 + $0xd0] sm:$0xff] %vm520_vm2, %v498_v55  ;;  %v490_v59 = vadd.f32 %v827_v19, %v489_v58 }
  0xe8   : > { %v688_v60 = vpop.f32.mrf.mxu0  ;;  %v704_v62 = vpop.f32.mrf.mxu1 }
  0xe9   : > { %529 = vst.msk [vmem:[%s832_s28 + $0x40] sm:$0xff] %vm520_vm2, %v426_v57  ;;  %v437_v61 = vadd.f32 %v688_v60, %v827_v19  ;;  %545 = vst.msk [vmem:[%s832_s28 + $0xc0] sm:$0xff] %vm520_vm2, %v490_v59  ;;  %v501_v63 = vadd.f32 %v704_v62, %v827_v19 }
  0xea   : > { %v428_v0 = vpop.f32.mrf.mxu0  ;;  %v492_v2 = vpop.f32.mrf.mxu1 }
  0xeb   : > { %532 = vst.msk [vmem:[%s832_s28 + $0x58] sm:$0xff] %vm520_vm2, %v437_v61  ;;  %v429_v1 = vadd.f32 %v827_v19, %v428_v0  ;;  %548 = vst.msk [vmem:[%s832_s28 + $0xd8] sm:$0xff] %vm520_vm2, %v501_v63  ;;  %v493_v3 = vadd.f32 %v827_v19, %v492_v2 }
  0xec   : > { %v691_v4 = vpop.f32.mrf.mxu0  ;;  %v707_v6 = vpop.f32.mrf.mxu1 }
  0xed   : > { %530 = vst.msk [vmem:[%s832_s28 + $0x48] sm:$0xff] %vm520_vm2, %v429_v1  ;;  %v450_v5 = vadd.f32 %v691_v4, %v827_v19  ;;  %546 = vst.msk [vmem:[%s832_s28 + $0xc8] sm:$0xff] %vm520_vm2, %v493_v3  ;;  %v514_v7 = vadd.f32 %v707_v6, %v827_v19 }
  0xee   : > { %v441_v8 = vpop.f32.mrf.mxu0  ;;  %v505_v10 = vpop.f32.mrf.mxu1 }
  0xef   : > { %535 = vst.msk [vmem:[%s832_s28 + $0x70] sm:$0xff] %vm520_vm2, %v450_v5  ;;  %v442_v9 = vadd.f32 %v827_v19, %v441_v8  ;;  %551 = vst.msk [vmem:[%s832_s28 + $0xf0] sm:$0xff] %vm520_vm2, %v514_v7  ;;  %v506_v11 = vadd.f32 %v827_v19, %v505_v10 }
  0xf0   : > { %v692_v12 = vpop.f32.mrf.mxu0  ;;  %v708_v14 = vpop.f32.mrf.mxu1 }
  0xf1   : > { %533 = vst.msk [vmem:[%s832_s28 + $0x60] sm:$0xff] %vm520_vm2, %v442_v9  ;;  %v453_v13 = vadd.f32 %v692_v12, %v827_v19  ;;  %549 = vst.msk [vmem:[%s832_s28 + $0xe0] sm:$0xff] %vm520_vm2, %v506_v11  ;;  %v517_v15 = vadd.f32 %v708_v14, %v827_v19 }
  0xf2   : > { %v444_v16 = vpop.f32.mrf.mxu0  ;;  %v508_v18 = vpop.f32.mrf.mxu1 }
  0xf3   : > { %536 = vst.msk [vmem:[%s832_s28 + $0x78] sm:$0xff] %vm520_vm2, %v453_v13  ;;  %v445_v17 = vadd.f32 %v827_v19, %v444_v16  ;;  %552 = vst.msk [vmem:[%s832_s28 + $0xf8] sm:$0xff] %vm520_vm2, %v517_v15  ;;  %v509_v20 = vadd.f32 %v827_v19, %v508_v18 }
  0xf5   : > { %534 = vst.msk [vmem:[%s832_s28 + $0x68] sm:$0xff] %vm520_vm2, %v445_v17  ;;  %550 = vst.msk [vmem:[%s832_s28 + $0xe8] sm:$0xff] %vm520_vm2, %v509_v20 }
  0xf6 PF: > { %s13_s12 = sadd.s32 1, %s747_s12  }
  0xf7   : > { %p10_p4 = scmp.ge.s32.totalorder %s13_s12, 4  }
  0xf9   :  { %12 = sbr.rel (!%p10_p4) target bundleno = 1 (0x1), region = 62 }

// kernel: unet_small_forward.21
= control target key start
LH: loop header
LB: loop body
LE: loop exit
PB: predicated region body
PF: predicated region fallthrough
CT: control target
= control target key end

     0   :  { %s2431_s12 = smov 0   ;;  %s2433_s13 = smov 0   ;;  %s3273_s0 = inlined_call_operand.vmem [shape: bf16[2,18,18,48], index: 0, kind: input, shape index: {}]   ;;  %s3274_s1 = inlined_call_operand.vmem [shape: bf16[432,24], index: 1, kind: input, shape index: {}]   ;;  %s3275_s2 = inlined_call_operand.vmem [shape: f32[512,24], index: 2, kind: output, shape index: {0}]   ;;  %s3276_s3 = inlined_call_operand.vmem [shape: f32[2,8,24], index: 3, kind: output, shape index: {1}]  }
   0x1   :  { %s2435_s14 = smov 0  }
   0x2 LB: > { %s26_s15 = sadd.s32 1, %s2397_s13  ;;  %p2085_p0 = scmp.ge.s32.totalorder %s2401_s14, 1  ;;  %s2401_s14 = sphi %s2435_s14, %s14_s14   ;;  %s2397_s13 = sphi %s2433_s13, %s3278_s13   ;;  %s2393_s12 = sphi %s2431_s12, %s3277_s12  }
   0x3   : > { %p28_p1 = scmp.ge.s32.totalorder %s26_s15, 2  ;;  %p156_p2 = scmp.lt.s32.totalorder %s2401_s14, 3 }
   0x5   : > { %s3280_s15 = smov (%p28_p1, %s26_s15), 0  ;;  %p157_p3 = pnand %p2085_p0, %p156_p2 }
   0x6   : > { %p186_p4 = scmp.lt.s32.totalorder (!%p157_p3), %s2393_s12, 1  ;;  %s2404_s4 = smov (!%p157_p3), 32  }
   0x7   : > { %160 = sbr.rel (%p157_p3) target bundleno = 575 (0x23f), region = 28  ;;  %s2405_s5 = smov (!%p157_p3), 16  }
   0x8   : > { %s2406_s6 = smov (!%p157_p3), 96   ;;  %s2407_s7 = smov (!%p157_p3), 64  }
   0x9   : > { %s2408_s8 = smov (!%p157_p3), 112   ;;  %s2409_s9 = smov (!%p157_p3), 48  }
   0xa   : > { %s2410_s10 = smov (!%p157_p3), 80  }
   0xc   : > { %v2403_v0 = vmov 0   ;;  %s2454_s16 = scalar_select %p186_p4, %s2393_s12, 1  ;;  %v2332_v1 = vld [vmem:[%s3274_s1 + $0xb8] sm:$0xff]   ;;  %vm341_vm0 = vcmask 1046528   ;;  %v2334_v3 = vld [vmem:[%s3274_s1 + $0xb0] sm:$0xff]   ;;  %v2337_v4 = vld [vmem:[%s3274_s1 + $0xa8] sm:$0xff]  }
   0xd   : > { %1608 = vmatprep.subr.bf16.mxu1 %v2403_v0  ;;  %v2336_v2 = vld [vmem:[%s3274_s1 + $0x78] sm:$0xff]   ;;  %vm326_vm1 = vsmask.f32 7424  ;;  %vm403_vm2 = vcmask 392192   ;;  %v2339_v50 = vld [vmem:[%s3274_s1 + $0x70] sm:$0xff]   ;;  %v2340_v53 = vld [vmem:[%s3274_s1 + $0xa0] sm:$0xff]  }
   0xe   : > { %s2283_s21 = smul.u32 216, %s2454_s16  ;;  %1609 = vmatpush1.bf16.msra.mxu1 %v2332_v1  ;;  %2171 = vmatprep.subr.bf16.mxu0 %v2336_v2  ;;  %v2338_v5 = vld [vmem:[%s3274_s1 + $0x38] sm:$0xff]   ;;  %v2341_v55 = vld [vmem:[%s3274_s1 + $0x30] sm:$0xff]   ;;  %v2342_v57 = vld [vmem:[%s3274_s1 + $0x68] sm:$0xff]   ;;  %vm410_vm3 = vcmask 130048   ;;  %vm413_vm4 = vcmask 523264  }
   0xf   : > { %1610 = vmatprep.subr.bf16.mxu1 %v2403_v0  ;;  %2172 = vmatpush3.bf16.msra.mxu0 %v2338_v5  ;;  %v2343_v58 = vld [vmem:[%s3274_s1 + $0x98] sm:$0xff]   ;;  %v2344_v59 = vld [vmem:[%s3274_s1 + $0x28] sm:$0xff]   ;;  %v2347_v2 = vld [vmem:[%s3274_s1 + $0x60] sm:$0xff]   ;;  %vm416_vm5 = vcmask 916480   ;;  %vm406_vm6 = vcmask 785408   ;;  %vm420_vm7 = vcmask 261120  }
  0x10   : > { %s2470_s26 = scalar_lea.vmem %s3273_s0, %s2283_s21  ;;  %2173 = vmatprep.subr.bf16.mxu0 %v2339_v50  ;;  %vm423_vm8 = vcmask 654336   ;;  %vm1769_vm9 = vcmask 195584   ;;  %vm1972_vm10 = vcmask 1040384   ;;  %vm1974_vm11 = vcmask 1041408  }
  0x11   : > { %v2479_v6 = vld [vmem:[%s2470_s26 + $0x18] sm:$0xff]   ;;  %v2482_v7 = vld [vmem:[%s2470_s26 + $0xc] sm:$0xff]   ;;  %v2318_v8 = vld [vmem:[%s2470_s26 + $0x14] ss:$0 sps:$4 sm:$0x11]  }
  0x12   : > { %1611 = vmatpush1.bf16.msra.mxu1 %v2334_v3  ;;  %381 = vrot.lane.b32.xlu1 %v2479_v6, %s2404_s4  ;;  %v2488_v9 = vld [vmem:[%s2470_s26] sm:$0xff]   ;;  %v371_v10 = vrot.slane %v2482_v7, 1  ;;  %v358_v11 = vshrl.u32 %v2482_v7, 16  ;;  %v360_v12 = vshll.u32 %v2482_v7, 16  ;;  %v387_v13 = vshrl.u32 %v2479_v6, 16  ;;  %v2536_v52 = vld [vmem:[%s2470_s26 + $0x30] sm:$0xff]  }
  0x13   : > { %1612 = vmatprep.subr.bf16.mxu1 %v2403_v0  ;;  %352 = vrot.lane.b32.xlu0 %v2482_v7, %s2405_s5  ;;  %v372_v14 = vrot.slane %v2318_v8, 1  ;;  %v365_v15 = vshll.u32 %v2318_v8, 16  ;;  %v2320_v17 = vld [vmem:[%s2470_s26 + $0x8] ss:$0 sps:$4 sm:$0x11]   ;;  %v342_v18 = vrot.slane %v2488_v9, 1 }
  0x14   : > { %v362_v16 = vrot.slane %v360_v12, 1  ;;  %v328_v19 = vshrl.u32 %v2488_v9, 16  ;;  %v330_v22 = vshll.u32 %v2488_v9, 16  ;;  %v389_v23 = vshll.u32 %v2479_v6, 16  ;;  %v2504_v24 = vld [vmem:[%s2470_s26 + $0x24] sm:$0xff]   ;;  %2174 = vmatpush3.bf16.msra.mxu0 %v2341_v55  ;;  %v2573_v3 = vld [vmem:[%s2470_s26 + $0x3c] sm:$0xff]  }
  0x15   : > { %v373_v20 = vsel %vm341_vm0, %v371_v10, %v372_v14  ;;  %v367_v21 = vrot.slane %v365_v15, 1  ;;  %v343_v26 = vrot.slane %v2320_v17, 1  ;;  %v335_v27 = vshll.u32 %v2320_v17, 16  ;;  %v2321_v28 = vld [vmem:[%s2470_s26 + $0x20] ss:$0 sps:$4 sm:$0x11]   ;;  %2175 = vmatprep.subr.bf16.mxu0 %v2342_v57 }
  0x16   : > { %1613 = vmatpush1.bf16.msra.mxu1 %v2337_v4  ;;  %429 = vrot.lane.b32.xlu1 %v373_v20, %s2406_s6  ;;  %v363_v25 = vor.u32 %v362_v16, %v358_v11  ;;  %v400_v29 = vrot.slane %v2479_v6, 1  ;;  %v332_v30 = vrot.slane %v330_v22, 1  ;;  %v391_v31 = vrot.slane %v389_v23, 1  ;;  %v2323_v39 = vld [vmem:[%s2470_s26 + $0x2c] ss:$0 sps:$4 sm:$0x11]  }
  0x17   : > { %1614 = vmatprep.subr.bf16.mxu1 %v2403_v0  ;;  %431 = vrot.lane.b32.xlu0 %v2479_v6, %s2405_s5  ;;  %v344_v33 = vsel %vm341_vm0, %v342_v18, %v343_v26  ;;  %v337_v34 = vrot.slane %v335_v27, 1  ;;  %v394_v35 = vshll.u32 %v2321_v28, 16  ;;  %v401_v37 = vrot.slane %v2321_v28, 1  ;;  %v2542_v54 = vld [vmem:[%s2470_s26 + $0x38] ss:$0 sps:$4 sm:$0x11]  }
  0x18   : > { %v368_v32 = vsel %vm326_vm1, %v363_v25, %v367_v21  ;;  %v333_v36 = vor.u32 %v332_v30, %v328_v19  ;;  %v392_v38 = vor.u32 %v391_v31, %v387_v13  ;;  %v450_v43 = vshll.u32 %v2504_v24, 16  ;;  %2176 = vmatpush3.bf16.msra.mxu0 %v2344_v59  ;;  %v2348_v4 = vld [vmem:[%s3274_s1 + $0x90] sm:$0xff]   ;;  %v2349_v11 = vld [vmem:[%s3274_s1 + $0x20] sm:$0xff]   ;;  %v2350_v12 = vld [vmem:[%s3274_s1 + $0x58] sm:$0xff]  }
  0x19   : > { %v396_v41 = vrot.slane %v394_v35, 1  ;;  %v402_v42 = vsel %vm341_vm0, %v400_v29, %v401_v37  ;;  %v448_v45 = vshrl.u32 %v2504_v24, 16  ;;  %v455_v47 = vshll.u32 %v2323_v39, 16  ;;  %2177 = vmatprep.subr.bf16.mxu0 %v2347_v2  ;;  %v2592_v13 = vld [vmem:[%s2470_s26 + $0x44] ss:$0 sps:$4 sm:$0x11]  }
  0x1a   : > { %369 = vrot.lane.b32.xlu1 %v368_v32, %s2407_s7  ;;  %v338_v40 = vsel %vm326_vm1, %v333_v36, %v337_v34  ;;  %2153 = vmatprep.mubr.msk.bf16.mxu1 %vm403_vm2, %v402_v42  ;;  %v452_v46 = vrot.slane %v450_v43, 1  ;;  %v504_v56 = vshll.u32 %v2536_v52, 16  ;;  %v461_v60 = vrot.slane %v2504_v24, 1  ;;  %v2351_v14 = vld [vmem:[%s3274_s1 + $0x88] sm:$0xff]   ;;  %v2352_v15 = vld [vmem:[%s3274_s1 + $0x18] sm:$0xff]   ;;  %v2353_v18 = vld [vmem:[%s3274_s1 + $0x50] sm:$0xff]  }
  0x1b   : > { %345 = vrot.lane.b32.xlu0 %v344_v33, %s2406_s6  ;;  %v397_v44 = vsel %vm326_vm1, %v392_v38, %v396_v41  ;;  %v457_v49 = vrot.slane %v455_v47, 1  ;;  %1615 = vmatpush1.bf16.msra.mxu1 %v2340_v53  ;;  %v462_v61 = vrot.slane %v2323_v39, 1  ;;  %v502_v62 = vshrl.u32 %v2536_v52, 16  ;;  %v2354_v19 = vld [vmem:[%s3274_s1 + $0x80] sm:$0xff]   ;;  %v2355_v21 = vld [vmem:[%s3274_s1 + $0x10] sm:$0xff]   ;;  %v2357_v27 = vld [vmem:[%s3274_s1 + $0x48] sm:$0xff]  }
  0x1c   : > { %v453_v48 = vor.u32 %v452_v46, %v448_v45  ;;  %1616 = vmatprep.subr.bf16.mxu1 %v2403_v0  ;;  %v506_v63 = vrot.slane %v504_v56, 1  ;;  %v509_v1 = vshll.u32 %v2542_v54, 16  ;;  %2178 = vmatpush3.bf16.msra.mxu0 %v2349_v11  ;;  %v558_v17 = vshll.u32 %v2573_v3, 16  ;;  %v2358_v28 = vld [vmem:[%s3274_s1 + $0xd0] sm:$0xff]   ;;  %v2359_v29 = vld [vmem:[%s3274_s1 + $0x8] sm:$0xff]   ;;  %v2361_v33 = vld [vmem:[%s3274_s1 + $0x40] sm:$0xff]  }
  0x1d   : > { %v2582_v5 = vsel %vm341_vm0, %v461_v60, %v462_v61  ;;  %2179 = vmatprep.subr.bf16.mxu0 %v2350_v12  ;;  %v516_v22 = vrot.slane %v2542_v54, 1  ;;  %v556_v23 = vshrl.u32 %v2573_v3, 16  ;;  %v563_v26 = vshll.u32 %v2592_v13, 16  ;;  %v2362_v34 = vld [vmem:[%s3274_s1 + $0xc8] sm:$0xff]   ;;  %v2363_v36 = vld [vmem:[%s3274_s1] sm:$0xff]  }
  0x1e   : > { %339 = vrot.lane.b32.xlu1 %v338_v40, %s2409_s9  ;;  %v2533_v51 = vsel %vm326_vm1, %v453_v48, %v457_v49  ;;  %v507_v8 = vor.u32 %v506_v63, %v502_v62  ;;  %v511_v10 = vrot.slane %v509_v1, 1  ;;  %v560_v25 = vrot.slane %v558_v17, 1  ;;  %v2647_v35 = vld [vmem:[%s2470_s26 + $0x48] sm:$0xff]   ;;  %v2364_v38 = vld [vmem:[%s3274_s1 + $0xc0] sm:$0xff]   ;;  %v2679_v48 = vld [vmem:[%s2470_s26 + $0x54] sm:$0xff]  }
  0x1f   : > { %374 = vrot.lane.b32.xlu0 %v373_v20, %s2408_s8  ;;  %1617 = vmatpush1.bf16.msra.mxu1 %v2343_v58  ;;  %v515_v20 = vrot.slane %v2536_v52, 1  ;;  %v2329_v39 = vld [vmem:[%s2470_s26 + $0x50] ss:$0 sps:$4 sm:$0x11]   ;;  %v612_v40 = vshll.u32 %v2647_v35, 16  ;;  %v570_v41 = vrot.slane %v2592_v13, 1 }
  0x20   : > { %1618 = vmatprep.subr.bf16.mxu1 %v2403_v0  ;;  %v512_v16 = vsel %vm326_vm1, %v507_v8, %v511_v10  ;;  %2180 = vmatpush3.bf16.msra.mxu0 %v2352_v15  ;;  %v561_v31 = vor.u32 %v560_v25, %v556_v23  ;;  %v2331_v50 = vld [vmem:[%s2470_s26 + $0x5c] ss:$0 sps:$4 sm:$0x11]   ;;  %v623_v53 = vrot.slane %v2647_v35, 1  ;;  %v624_v54 = vrot.slane %v2329_v39, 1  ;;  %v2704_v62 = vld [vmem:[%s2470_s26 + $0x60] sm:$0xff]  }
  0x21   : > { %2181 = vmatprep.subr.bf16.mxu0 %v2353_v18  ;;  %v2637_v30 = vsel %vm341_vm0, %v515_v20, %v516_v22  ;;  %v614_v43 = vrot.slane %v612_v40, 1  ;;  %v664_v55 = vshrl.u32 %v2679_v48, 16  ;;  %v671_v57 = vshll.u32 %v2331_v50, 16  ;;  %v2335_v63 = vld [vmem:[%s2470_s26 + $0x68] ss:$0 sps:$4 sm:$0x11]  }
  0x22   : > { %433 = vrot.lane.b32.xlu1 %v397_v44, %s2407_s7  ;;  %v2697_v58 = vsel %vm341_vm0, %v623_v53, %v624_v54  ;;  %v720_v1 = vshll.u32 %v2704_v62, 16  ;;  %v677_v2 = vrot.slane %v2679_v48, 1  ;;  %v718_v8 = vshrl.u32 %v2704_v62, 16  ;;  %v2723_v15 = vld [vmem:[%s2470_s26 + $0x6c] sm:$0xff]  }
  0x23   : > { %398 = vrot.lane.b32.xlu0 %v397_v44, %s2410_s10  ;;  %1619 = vmatpush1.bf16.msra.mxu1 %v2348_v4  ;;  %v673_v60 = vrot.slane %v671_v57, 1  ;;  %v678_v4 = vrot.slane %v2331_v50, 1  ;;  %v725_v11 = vshll.u32 %v2335_v63, 16  ;;  %v2346_v17 = vld [vmem:[%s2470_s26 + $0x74] ss:$0 sps:$4 sm:$0x11]  }
  0x24   : > { %1620 = vmatprep.subr.bf16.mxu1 %v2403_v0  ;;  %2182 = vmatpush3.bf16.msra.mxu0 %v2355_v21  ;;  %v722_v10 = vrot.slane %v720_v1, 1  ;;  %v774_v18 = vshll.u32 %v2723_v15, 16  ;;  %v732_v20 = vrot.slane %v2335_v63, 1  ;;  %v772_v21 = vshrl.u32 %v2723_v15, 16 }
  0x25   : > { %2183 = vmatprep.subr.bf16.mxu0 %v2357_v27  ;;  %v2720_v12 = vsel %vm341_vm0, %v677_v2, %v678_v4  ;;  %v779_v23 = vshll.u32 %v2346_v17, 16 }
  0x26   : > { %435 = vrot.lane.b32.xlu1 %v402_v42, %s2408_s8  ;;  %v723_v13 = vor.u32 %v722_v10, %v718_v8  ;;  %v776_v22 = vrot.slane %v774_v18, 1 }
  0x27   : > { %427 = vrot.lane.b32.xlu0 %v368_v32, %s2409_s9  ;;  %1621 = vmatpush1.bf16.msra.mxu1 %v2351_v14  ;;  %v565_v32 = vrot.slane %v563_v26, 1  ;;  %v727_v14 = vrot.slane %v725_v11, 1  ;;  %v781_v27 = vrot.slane %v779_v23, 1 }
  0x28   : > { %1622 = vmatprep.subr.bf16.mxu1 %v2403_v0  ;;  %2184 = vmatpush3.bf16.msra.mxu0 %v2359_v29  ;;  %v777_v26 = vor.u32 %v776_v22, %v772_v21  ;;  %v2748_v29 = vld [vmem:[%s2470_s26 + $0x78] sm:$0xff]  }
  0x29   : > { %v566_v37 = vsel %vm326_vm1, %v561_v31, %v565_v32  ;;  %2185 = vmatprep.subr.bf16.mxu0 %v2361_v33  ;;  %v2360_v31 = vld [vmem:[%s2470_s26 + $0x80] ss:$0 sps:$4 sm:$0x11]   ;;  %v828_v32 = vshll.u32 %v2748_v29, 16  ;;  %v785_v33 = vrot.slane %v2723_v15, 1 }
  0x2a   : > { %459 = vrot.lane.b32.xlu1 %v2533_v51, %s2410_s10 }
  0x2b   : > { %442 = vrot.lane.b32.xlu0 %v2504_v24, %s2404_s4  ;;  %1623 = vmatpush1.bf16.msra.mxu1 %v2354_v19  ;;  %v731_v19 = vrot.slane %v2704_v62, 1 }
  0x2c   : > { %1634 = vmatprep.subr.bf16.mxu1 %v2403_v0  ;;  %2186 = vmatpush3.bf16.msra.mxu0 %v2363_v36  ;;  %v786_v36 = vrot.slane %v2346_v17, 1 }
  0x2d   : > { %v2741_v25 = vsel %vm341_vm0, %v731_v19, %v732_v20  ;;  %v2809_v19 = vld [vmem:[%s2470_s26 + $0x90] sm:$0xff]  }
  0x2e   : > { %485 = vrot.lane.b32.xlu1 %v2504_v24, %s2405_s5 }
  0x2f   : > { %483 = vrot.lane.b32.xlu0 %v402_v42, %s2406_s6  ;;  %1635 = vmatpush2.bf16.msra.mxu1 %v2358_v28  ;;  %v610_v42 = vshrl.u32 %v2647_v35, 16  ;;  %v782_v28 = vsel %vm326_vm1, %v777_v26, %v781_v27 }
  0x30   : > { %1636 = vmatprep.subr.bf16.mxu1 %v2403_v0 }
  0x31   : > { %v615_v46 = vor.u32 %v614_v43, %v610_v42 }
  0x32   : > { %481 = vrot.lane.b32.xlu1 %v397_v44, %s2409_s9  ;;  %v617_v44 = vshll.u32 %v2329_v39, 16  ;;  %v833_v39 = vshll.u32 %v2360_v31, 16 }
  0x33   : > { %487 = vrot.lane.b32.xlu0 %v2533_v51, %s2407_s7  ;;  %1637 = vmatpush2.bf16.msra.mxu1 %v2362_v34 }
  0x34   : > { %1638 = vmatprep.subr.bf16.mxu1 %v2403_v0  ;;  %v569_v0 = vrot.slane %v2573_v3, 1  ;;  %v619_v47 = vrot.slane %v617_v44, 1  ;;  %v835_v42 = vrot.slane %v833_v39, 1 }
  0x36   : > { %496 = vrot.lane.b32.xlu1 %v2536_v52, %s2404_s4  ;;  %v2676_v45 = vsel %vm341_vm0, %v569_v0, %v570_v41  ;;  %v620_v49 = vsel %vm326_vm1, %v615_v46, %v619_v47  ;;  %v2764_v0 = vsel %vm341_vm0, %v785_v33, %v786_v36  ;;  %v2767_v46 = vld [vmem:[%s2470_s26 + $0x84] sm:$0xff]  }
  0x37   : > { %489 = vrot.lane.b32.xlu0 %v2582_v5, %s2408_s8  ;;  %1639 = vmatpush2.bf16.msra.mxu1 %v2364_v38  ;;  %v830_v38 = vrot.slane %v828_v32, 1  ;;  %v882_v53 = vshll.u32 %v2767_v46, 16  ;;  %v893_v36 = vrot.slane %v2767_v46, 1 }
  0x39   : > { %v884_v63 = vrot.slane %v882_v53, 1  ;;  %v2844_v53 = vld [vmem:[%s2470_s26 + $0x9c] sm:$0xff]  }
  0x3a   : > { %537 = vrot.lane.b32.xlu1 %v2582_v5, %s2406_s6 }
  0x3b   : > { %513 = vrot.lane.b32.xlu0 %v512_v16, %s2410_s10 }
  0x3e   : > { %541 = vrot.lane.b32.xlu1 %v512_v16, %s2407_s7 }
  0x3f   : > { %539 = vrot.lane.b32.xlu0 %v2536_v52, %s2405_s5 }
  0x42   : > { %543 = vrot.lane.b32.xlu1 %v2637_v30, %s2408_s8 }
  0x43   : > { %535 = vrot.lane.b32.xlu0 %v2533_v51, %s2409_s9  ;;  %v666_v51 = vshll.u32 %v2679_v48, 16 }
  0x45   : > { %v668_v56 = vrot.slane %v666_v51, 1  ;;  %v2777_v51 = vld [vmem:[%s2470_s26 + $0x8c] ss:$0 sps:$4 sm:$0x11]  }
  0x46   : > { %567 = vrot.lane.b32.xlu1 %v566_v37, %s2410_s10  ;;  %v887_v1 = vshll.u32 %v2777_v51, 16 }
  0x47   : > { %550 = vrot.lane.b32.xlu0 %v2573_v3, %s2404_s4  ;;  %v669_v59 = vor.u32 %v668_v56, %v664_v55  ;;  %v839_v55 = vrot.slane %v2748_v29, 1  ;;  %v840_v56 = vrot.slane %v2360_v31, 1  ;;  %v936_v31 = vshll.u32 %v2809_v19, 16 }
  0x49   : > { %v674_v61 = vsel %vm326_vm1, %v669_v59, %v673_v60  ;;  %v938_v39 = vrot.slane %v936_v31, 1 }
  0x4a   : > { %593 = vrot.lane.b32.xlu1 %v2573_v3, %s2405_s5 }
  0x4b   : > { %591 = vrot.lane.b32.xlu0 %v2637_v30, %s2406_s6 }
  0x4e   : > { %589 = vrot.lane.b32.xlu1 %v512_v16, %s2409_s9  ;;  %v728_v16 = vsel %vm326_vm1, %v723_v13, %v727_v14 }
  0x4f   : > { %595 = vrot.lane.b32.xlu0 %v566_v37, %s2407_s7 }
  0x52   : > { %604 = vrot.lane.b32.xlu1 %v2647_v35, %s2404_s4 }
  0x53   : > { %597 = vrot.lane.b32.xlu0 %v2676_v45, %s2408_s8 }
  0x56   : > { %645 = vrot.lane.b32.xlu1 %v2676_v45, %s2406_s6 }
  0x57   : > { %621 = vrot.lane.b32.xlu0 %v620_v49, %s2410_s10 }
  0x5a   : > { %649 = vrot.lane.b32.xlu1 %v620_v49, %s2407_s7 }
  0x5b   : > { %647 = vrot.lane.b32.xlu0 %v2647_v35, %s2405_s5 }
  0x5e   : > { %651 = vrot.lane.b32.xlu1 %v2697_v58, %s2408_s8 }
  0x5f   : > { %643 = vrot.lane.b32.xlu0 %v566_v37, %s2409_s9  ;;  %v826_v37 = vshrl.u32 %v2748_v29, 16 }
  0x61   : > { %v831_v41 = vor.u32 %v830_v38, %v826_v37  ;;  %v894_v37 = vrot.slane %v2777_v51, 1  ;;  %v934_v38 = vshrl.u32 %v2809_v19, 16 }
  0x62   : > { %675 = vrot.lane.b32.xlu1 %v674_v61, %s2410_s10 }
  0x63   : > { %658 = vrot.lane.b32.xlu0 %v2679_v48, %s2404_s4  ;;  %v2774_v47 = vsel %vm326_vm1, %v831_v41, %v835_v42 }
  0x66   : > { %701 = vrot.lane.b32.xlu1 %v2679_v48, %s2405_s5 }
  0x67   : > { %699 = vrot.lane.b32.xlu0 %v2697_v58, %s2406_s6 }
  0x6a   : > { %697 = vrot.lane.b32.xlu1 %v620_v49, %s2409_s9 }
  0x6b   : > { %703 = vrot.lane.b32.xlu0 %v674_v61, %s2407_s7 }
  0x6e   : > { %712 = vrot.lane.b32.xlu1 %v2704_v62, %s2404_s4 }
  0x6f   : > { %705 = vrot.lane.b32.xlu0 %v2720_v12, %s2408_s8 }
  0x72   : > { %753 = vrot.lane.b32.xlu1 %v2720_v12, %s2406_s6 }
  0x73   : > { %729 = vrot.lane.b32.xlu0 %v728_v16, %s2410_s10 }
  0x76   : > { %757 = vrot.lane.b32.xlu1 %v728_v16, %s2407_s7 }
  0x77   : > { %755 = vrot.lane.b32.xlu0 %v2704_v62, %s2405_s5 }
  0x7a   : > { %759 = vrot.lane.b32.xlu1 %v2741_v25, %s2408_s8 }
  0x7b   : > { %751 = vrot.lane.b32.xlu0 %v674_v61, %s2409_s9  ;;  %v880_v61 = vshrl.u32 %v2767_v46, 16 }
  0x7d   : > { %v885_v14 = vor.u32 %v884_v63, %v880_v61 }
  0x7e   : > { %783 = vrot.lane.b32.xlu1 %v782_v28, %s2410_s10 }
  0x7f   : > { %766 = vrot.lane.b32.xlu0 %v2723_v15, %s2404_s4 }
  0x82   : > { %809 = vrot.lane.b32.xlu1 %v2723_v15, %s2405_s5 }
  0x83   : > { %807 = vrot.lane.b32.xlu0 %v2741_v25, %s2406_s6 }
  0x84   : > { %v382_v34 = vpop.permute.xlu1 %381 }
  0x85   : > { %v353_v40 = vpop.permute.xlu0 %352 }
  0x86   : > { %805 = vrot.lane.b32.xlu1 %v728_v16, %s2409_s9  ;;  %v889_v16 = vrot.slane %v887_v1, 1  ;;  %v988_v1 = vshrl.u32 %v2844_v53, 16 }
  0x87   : > { %811 = vrot.lane.b32.xlu0 %v782_v28, %s2407_s7 }
  0x88   : > { %v430_v44 = vpop.permute.xlu1 %429  ;;  %v2813_v23 = vsel %vm326_vm1, %v885_v14, %v889_v16 }
  0x89   : > { %v432_v43 = vpop.permute.xlu0 %431 }
  0x8a   : > { %820 = vrot.lane.b32.xlu1 %v2748_v29, %s2404_s4  ;;  %v470_v18 = vsel %vm410_vm3, %v430_v44, %v432_v43  ;;  %v2841_v43 = vsel %vm341_vm0, %v893_v36, %v894_v37 }
  0x8b   : > { %813 = vrot.lane.b32.xlu0 %v2764_v0, %s2408_s8 }
  0x8c   : > { %v370_v49 = vpop.permute.xlu1 %369 }
  0x8d   : > { %v346_v50 = vpop.permute.xlu0 %345 }
  0x8e   : > { %v412_v54 = vsel %vm410_vm3, %v346_v50, %v353_v40  ;;  %861 = vrot.lane.b32.xlu1 %v2764_v0, %s2406_s6 }
  0x8f   : > { %837 = vrot.lane.b32.xlu0 %v2774_v47, %s2410_s10  ;;  %v415_v60 = vsel %vm413_vm4, %v412_v54, %v370_v49 }
  0x90   : > { %v340_v59 = vpop.permute.xlu1 %339 }
  0x91   : > { %v375_v57 = vpop.permute.xlu0 %374  ;;  %v405_v2 = vsel %vm403_vm2, %v2488_v9, %v340_v59  ;;  %v2799_v9 = vsel %vm341_vm0, %v839_v55, %v840_v56  ;;  %v2370_v59 = vld [vmem:[%s2470_s26 + $0xa4] ss:$0 sps:$4 sm:$0x11]  }
  0x92   : > { %v418_v4 = vsel %vm416_vm5, %v415_v60, %v375_v57  ;;  %v408_v8 = vsel %vm406_vm6, %v405_v2, %v346_v50  ;;  %865 = vrot.lane.b32.xlu1 %v2774_v47, %s2407_s7  ;;  %v422_v10 = vsel %vm420_vm7, %v375_v57, %v382_v34  ;;  %v990_v60 = vshll.u32 %v2844_v53, 16 }
  0x93   : > { %863 = vrot.lane.b32.xlu0 %v2748_v29, %s2405_s5  ;;  %1479 = vmatprep.mubr.bf16.mxu0 %v418_v4 }
  0x94   : > { %1480 = vmatmul.mubr.bf16.vlgmr.msra.gmra.mxu0 %v408_v8  ;;  %v434_v13 = vpop.permute.xlu1 %433 }
  0x95   : > { %v399_v11 = vpop.permute.xlu0 %398  ;;  %v472_v20 = vsel %vm413_vm4, %v470_v18, %v434_v13  ;;  %v995_v13 = vshll.u32 %v2370_v59, 16 }
  0x96   : > { %v425_v17 = vsel %vm423_vm8, %v422_v10, %v399_v11  ;;  %867 = vrot.lane.b32.xlu1 %v2799_v9, %s2408_s8  ;;  %v992_v11 = vrot.slane %v990_v60, 1 }
  0x97   : > { %859 = vrot.lane.b32.xlu0 %v782_v28, %s2409_s9  ;;  %1641 = vmatmul.mubr.bf16.vlgmr.msra.gmra.mxu1 %v425_v17  ;;  %v2368_v28 = vld [vmem:[%s2470_s26 + $0x98] ss:$0 sps:$4 sm:$0x11]  }
  0x98   : > { %2154 = vmatprep.mubr.msk.bf16.mxu1 %vm403_vm2, %v2582_v5  ;;  %v436_v22 = vpop.permute.xlu1 %435  ;;  %v941_v40 = vshll.u32 %v2368_v28, 16  ;;  %v948_v10 = vrot.slane %v2368_v28, 1 }
  0x99   : > { %v428_v21 = vpop.permute.xlu0 %427  ;;  %v474_v27 = vsel %vm416_vm5, %v472_v20, %v436_v22  ;;  %v993_v20 = vor.u32 %v992_v11, %v988_v1 }
  0x9a   : > { %v465_v26 = vsel %vm403_vm2, %v2482_v7, %v428_v21  ;;  %1487 = vmatprep.mubr.bf16.mxu0 %v474_v27  ;;  %891 = vrot.lane.b32.xlu1 %v2813_v23, %s2410_s10  ;;  %v943_v49 = vrot.slane %v941_v40, 1  ;;  %v997_v21 = vrot.slane %v995_v13, 1 }
  0x9b   : > { %874 = vrot.lane.b32.xlu0 %v2767_v46, %s2404_s4  ;;  %v467_v5 = vsel %vm406_vm6, %v465_v26, %v430_v44  ;;  %v939_v44 = vor.u32 %v938_v39, %v934_v38  ;;  %v2880_v26 = vld [vmem:[%s2470_s26 + $0xa8] sm:$0xff]   ;;  %v1001_v38 = vrot.slane %v2844_v53, 1  ;;  %v1002_v39 = vrot.slane %v2370_v59, 1 }
  0x9c   : > { %1488 = vmatmul.mubr.bf16.gmra.mxu0 %v467_v5  ;;  %v460_v33 = vpop.permute.xlu1 %459  ;;  %v2884_v28 = vsel %vm326_vm1, %v993_v20, %v997_v21  ;;  %v1042_v40 = vshrl.u32 %v2880_v26, 16 }
  0x9d   : > { %v443_v32 = vpop.permute.xlu0 %442 }
  0x9e   : > { %v477_v34 = vsel %vm420_vm7, %v436_v22, %v443_v32  ;;  %917 = vrot.lane.b32.xlu1 %v2767_v46, %s2405_s5 }
  0x9f   : > { %915 = vrot.lane.b32.xlu0 %v2799_v9, %s2406_s6  ;;  %v479_v7 = vsel %vm423_vm8, %v477_v34, %v460_v33  ;;  %v2372_v33 = vld [vmem:[%s2470_s26 + $0xb0] ss:$0 sps:$4 sm:$0x11]   ;;  %v1044_v34 = vshll.u32 %v2880_v26, 16 }
  0xa0   : > { %1649 = vmatmul.mubr.bf16.gmra.mxu1 %v479_v7  ;;  %v486_v42 = vpop.permute.xlu1 %485 }
  0xa1   : > { %v484_v41 = vpop.permute.xlu0 %483  ;;  %2155 = vmatprep.mubr.msk.bf16.mxu1 %vm403_vm2, %v2637_v30 }
  0xa2   : > { %913 = vrot.lane.b32.xlu1 %v2774_v47, %s2409_s9  ;;  %v524_v30 = vsel %vm410_vm3, %v484_v41, %v486_v42  ;;  %v944_v47 = vsel %vm326_vm1, %v939_v44, %v943_v49  ;;  %v1049_v42 = vshll.u32 %v2372_v33, 16 }
  0xa3   : > { %919 = vrot.lane.b32.xlu0 %v2813_v23, %s2407_s7 }
  0xa4   : > { %v482_v51 = vpop.permute.xlu1 %481 }
  0xa5   : > { %v488_v50 = vpop.permute.xlu0 %487  ;;  %v519_v54 = vsel %vm403_vm2, %v2479_v6, %v482_v51  ;;  %v947_v6 = vrot.slane %v2809_v19, 1 }
  0xa6   : > { %928 = vrot.lane.b32.xlu1 %v2809_v19, %s2404_s4  ;;  %v526_v55 = vsel %vm413_vm4, %v524_v30, %v488_v50  ;;  %v521_v63 = vsel %vm406_vm6, %v519_v54, %v484_v41  ;;  %v1046_v41 = vrot.slane %v1044_v34, 1  ;;  %v2910_v50 = vsel %vm341_vm0, %v1001_v38, %v1002_v39 }
  0xa7   : > { %921 = vrot.lane.b32.xlu0 %v2841_v43, %s2408_s8  ;;  %v2872_v18 = vsel %vm341_vm0, %v947_v6, %v948_v10  ;;  %v1051_v30 = vrot.slane %v1049_v42, 1 }
  0xa8   : > { %v497_v57 = vpop.permute.xlu1 %496  ;;  %v1047_v51 = vor.u32 %v1046_v41, %v1042_v40 }
  0xa9   : > { %v490_v56 = vpop.permute.xlu0 %489 }
  0xaa   : > { %v528_v61 = vsel %vm416_vm5, %v526_v55, %v490_v56  ;;  %969 = vrot.lane.b32.xlu1 %v2841_v43, %s2406_s6  ;;  %v531_v2 = vsel %vm420_vm7, %v490_v56, %v497_v57  ;;  %v2913_v56 = vld [vmem:[%s2470_s26 + $0xb4] sm:$0xff]  }
  0xab   : > { %945 = vrot.lane.b32.xlu0 %v944_v47, %s2410_s10  ;;  %1495 = vmatprep.mubr.bf16.mxu0 %v528_v61  ;;  %v1098_v6 = vshll.u32 %v2913_v56, 16  ;;  %v1096_v13 = vshrl.u32 %v2913_v56, 16  ;;  %v1109_v40 = vrot.slane %v2913_v56, 1 }
  0xac   : > { %1496 = vmatmul.mubr.bf16.gmra.mxu0 %v521_v63  ;;  %v538_v8 = vpop.permute.xlu1 %537  ;;  %v2374_v63 = vld [vmem:[%s2470_s26 + $0xbc] ss:$0 sps:$4 sm:$0x11]  }
  0xad   : > { %v514_v4 = vpop.permute.xlu0 %513  ;;  %v1110_v41 = vrot.slane %v2374_v63, 1 }
  0xae   : > { %v533_v14 = vsel %vm423_vm8, %v531_v2, %v514_v4  ;;  %973 = vrot.lane.b32.xlu1 %v944_v47, %s2407_s7  ;;  %v1056_v4 = vrot.slane %v2372_v33, 1 }
  0xaf   : > { %971 = vrot.lane.b32.xlu0 %v2809_v19, %s2405_s5  ;;  %1657 = vmatmul.mubr.bf16.gmra.mxu1 %v533_v14  ;;  %v1100_v14 = vrot.slane %v1098_v6, 1 }
  0xb0   : > { %2156 = vmatprep.mubr.msk.bf16.mxu1 %vm403_vm2, %v2676_v45  ;;  %v542_v17 = vpop.permute.xlu1 %541 }
  0xb1   : > { %v540_v16 = vpop.permute.xlu0 %539 }
  0xb2   : > { %v578_v22 = vsel %vm410_vm3, %v538_v8, %v540_v16  ;;  %975 = vrot.lane.b32.xlu1 %v2872_v18, %s2408_s8  ;;  %v1103_v16 = vshll.u32 %v2374_v63, 16 }
  0xb3   : > { %967 = vrot.lane.b32.xlu0 %v2813_v23, %s2409_s9  ;;  %v580_v45 = vsel %vm413_vm4, %v578_v22, %v542_v17 }
  0xb4   : > { %v544_v5 = vpop.permute.xlu1 %543 }
  0xb5   : > { %v536_v27 = vpop.permute.xlu0 %535  ;;  %v582_v32 = vsel %vm416_vm5, %v580_v45, %v544_v5  ;;  %v1101_v45 = vor.u32 %v1100_v14, %v1096_v13 }
  0xb6   : > { %v573_v31 = vsel %vm403_vm2, %v2504_v24, %v536_v27  ;;  %1503 = vmatprep.mubr.bf16.mxu0 %v582_v32  ;;  %999 = vrot.lane.b32.xlu1 %v2884_v28, %s2410_s10  ;;  %v1105_v27 = vrot.slane %v1103_v16, 1 }
  0xb7   : > { %982 = vrot.lane.b32.xlu0 %v2844_v53, %s2404_s4  ;;  %v575_v23 = vsel %vm406_vm6, %v573_v31, %v538_v8  ;;  %v2949_v31 = vld [vmem:[%s2470_s26 + $0xc0] sm:$0xff]  }
  0xb8   : > { %1504 = vmatmul.mubr.bf16.gmra.mxu0 %v575_v23  ;;  %v568_v36 = vpop.permute.xlu1 %567  ;;  %v2953_v33 = vsel %vm326_vm1, %v1101_v45, %v1105_v27  ;;  %v1150_v42 = vshrl.u32 %v2949_v31, 16 }
  0xb9   : > { %v551_v7 = vpop.permute.xlu0 %550 }
  0xba   : > { %v585_v37 = vsel %vm420_vm7, %v544_v5, %v551_v7  ;;  %1025 = vrot.lane.b32.xlu1 %v2844_v53, %s2405_s5 }
  0xbb   : > { %1023 = vrot.lane.b32.xlu0 %v2872_v18, %s2406_s6  ;;  %v587_v24 = vsel %vm423_vm8, %v585_v37, %v568_v36  ;;  %v2376_v36 = vld [vmem:[%s2470_s26 + $0xc8] ss:$0 sps:$4 sm:$0x11]   ;;  %v1152_v37 = vshll.u32 %v2949_v31, 16 }
  0xbc   : > { %1665 = vmatmul.mubr.bf16.gmra.mxu1 %v587_v24  ;;  %v594_v49 = vpop.permute.xlu1 %593 }
  0xbd   : > { %v592_v44 = vpop.permute.xlu0 %591  ;;  %2157 = vmatprep.mubr.msk.bf16.mxu1 %vm403_vm2, %v2697_v58 }
  0xbe   : > { %1021 = vrot.lane.b32.xlu1 %v944_v47, %s2409_s9  ;;  %v632_v58 = vsel %vm410_vm3, %v592_v44, %v594_v49  ;;  %v1052_v47 = vsel %vm326_vm1, %v1047_v51, %v1051_v30  ;;  %v1157_v49 = vshll.u32 %v2376_v36, 16 }
  0xbf   : > { %1027 = vrot.lane.b32.xlu0 %v2884_v28, %s2407_s7 }
  0xc0   : > { %v590_v55 = vpop.permute.xlu1 %589 }
  0xc1   : > { %v596_v54 = vpop.permute.xlu0 %595  ;;  %v627_v57 = vsel %vm403_vm2, %v2536_v52, %v590_v55  ;;  %v1055_v52 = vrot.slane %v2880_v26, 1 }
  0xc2   : > { %1036 = vrot.lane.b32.xlu1 %v2880_v26, %s2404_s4  ;;  %v634_v59 = vsel %vm413_vm4, %v632_v58, %v596_v54  ;;  %v629_v2 = vsel %vm406_vm6, %v627_v57, %v592_v44  ;;  %v1154_v44 = vrot.slane %v1152_v37, 1  ;;  %v2979_v54 = vsel %vm341_vm0, %v1109_v40, %v1110_v41 }
  0xc3   : > { %1029 = vrot.lane.b32.xlu0 %v2910_v50, %s2408_s8  ;;  %v2941_v22 = vsel %vm341_vm0, %v1055_v52, %v1056_v4  ;;  %v1159_v58 = vrot.slane %v1157_v49, 1 }
  0xc4   : > { %v605_v61 = vpop.permute.xlu1 %604  ;;  %v1155_v55 = vor.u32 %v1154_v44, %v1150_v42 }
  0xc5   : > { %v598_v60 = vpop.permute.xlu0 %597 }
  0xc6   : > { %v636_v1 = vsel %vm416_vm5, %v634_v59, %v598_v60  ;;  %1077 = vrot.lane.b32.xlu1 %v2910_v50, %s2406_s6  ;;  %v639_v8 = vsel %vm420_vm7, %v598_v60, %v605_v61  ;;  %v2982_v60 = vld [vmem:[%s2470_s26 + $0xcc] sm:$0xff]  }
  0xc7   : > { %1053 = vrot.lane.b32.xlu0 %v1052_v47, %s2410_s10  ;;  %1511 = vmatprep.mubr.bf16.mxu0 %v636_v1  ;;  %v1206_v52 = vshll.u32 %v2982_v60, 16  ;;  %v1204_v16 = vshrl.u32 %v2982_v60, 16 }
  0xc8   : > { %1512 = vmatmul.mubr.bf16.gmra.mxu0 %v629_v2  ;;  %v646_v11 = vpop.permute.xlu1 %645  ;;  %v2994_v2 = vld [vmem:[%s2470_s26 + $0xd4] ss:$0 sps:$4 sm:$0x11]   ;;  %s2087_s26 = sshll.u32 %s2393_s12, 5 }
  0xc9   : > { %v622_v10 = vpop.permute.xlu0 %621  ;;  %p193_p5 = scmp.lt.s32.totalorder %s2087_s26, 63 }
  0xca   : > { %v641_v17 = vsel %vm423_vm8, %v639_v8, %v622_v10  ;;  %1081 = vrot.lane.b32.xlu1 %v1052_v47, %s2407_s7  ;;  %v1163_v8 = vrot.slane %v2949_v31, 1  ;;  %v1164_v10 = vrot.slane %v2376_v36, 1 }
  0xcb   : > { %1079 = vrot.lane.b32.xlu0 %v2880_v26, %s2405_s5  ;;  %1673 = vmatmul.mubr.bf16.gmra.mxu1 %v641_v17  ;;  %v1208_v17 = vrot.slane %v1206_v52, 1  ;;  %s3282_s26 = smov (!%p193_p5, %s2087_s26), 63 }
  0xcc   : > { %2158 = vmatprep.mubr.msk.bf16.mxu1 %vm403_vm2, %v2720_v12  ;;  %v650_v21 = vpop.permute.xlu1 %649  ;;  %s2088_s12 = sshll.u32 %s3282_s26, 3 }
  0xcd   : > { %v648_v20 = vpop.permute.xlu0 %647 }
  0xce   : > { %v686_v5 = vsel %vm410_vm3, %v646_v11, %v648_v20  ;;  %1083 = vrot.lane.b32.xlu1 %v2941_v22, %s2408_s8  ;;  %v1211_v20 = vshll.u32 %v2994_v2, 16 }
  0xcf   : > { %1075 = vrot.lane.b32.xlu0 %v2884_v28, %s2409_s9  ;;  %v688_v12 = vsel %vm413_vm4, %v686_v5, %v650_v21  ;;  %v3013_v5 = vsel %vm341_vm0, %v1163_v8, %v1164_v10 }
  0xd0   : > { %v652_v23 = vpop.permute.xlu1 %651 }
  0xd1   : > { %v644_v32 = vpop.permute.xlu0 %643  ;;  %v690_v7 = vsel %vm416_vm5, %v688_v12, %v652_v23  ;;  %v1209_v12 = vor.u32 %v1208_v17, %v1204_v16 }
  0xd2   : > { %v681_v34 = vsel %vm403_vm2, %v2573_v3, %v644_v32  ;;  %1519 = vmatprep.mubr.bf16.mxu0 %v690_v7  ;;  %1107 = vrot.lane.b32.xlu1 %v2953_v33, %s2410_s10  ;;  %v1213_v32 = vrot.slane %v1211_v20, 1 }
  0xd3   : > { %1090 = vrot.lane.b32.xlu0 %v2913_v56, %s2404_s4  ;;  %v683_v28 = vsel %vm406_vm6, %v681_v34, %v646_v11 }
  0xd4   : > { %1520 = vmatmul.mubr.bf16.gmra.mxu0 %v683_v28  ;;  %v676_v38 = vpop.permute.xlu1 %675 }
  0xd5   : > { %v659_v24 = vpop.permute.xlu0 %658 }
  0xd6   : > { %v693_v39 = vsel %vm420_vm7, %v652_v23, %v659_v24  ;;  %1133 = vrot.lane.b32.xlu1 %v2913_v56, %s2405_s5 }
  0xd7   : > { %1131 = vrot.lane.b32.xlu0 %v2941_v22, %s2406_s6  ;;  %v695_v3 = vsel %vm423_vm8, %v693_v39, %v676_v38 }
  0xd8   : > { %1681 = vmatmul.mubr.bf16.gmra.mxu1 %v695_v3  ;;  %v702_v30 = vpop.permute.xlu1 %701 }
  0xd9   : > { %v700_v51 = vpop.permute.xlu0 %699  ;;  %2159 = vmatprep.mubr.msk.bf16.mxu1 %vm403_vm2, %v2741_v25 }
  0xda   : > { %1129 = vrot.lane.b32.xlu1 %v1052_v47, %s2409_s9  ;;  %v740_v25 = vsel %vm410_vm3, %v700_v51, %v702_v30  ;;  %v1160_v47 = vsel %vm326_vm1, %v1155_v55, %v1159_v58 }
  0xdb   : > { %1135 = vrot.lane.b32.xlu0 %v2953_v33, %s2407_s7 }
  0xdc   : > { %v698_v59 = vpop.permute.xlu1 %697 }
  0xdd   : > { %v704_v57 = vpop.permute.xlu0 %703  ;;  %v735_v61 = vsel %vm403_vm2, %v2647_v35, %v698_v59 }
  0xde   : > { %1144 = vrot.lane.b32.xlu1 %v2949_v31, %s2404_s4  ;;  %v742_v63 = vsel %vm413_vm4, %v740_v25, %v704_v57  ;;  %v737_v35 = vsel %vm406_vm6, %v735_v61, %v700_v51 }
  0xdf   : > { %1137 = vrot.lane.b32.xlu0 %v2979_v54, %s2408_s8 }
  0xe0   : > { %v713_v1 = vpop.permute.xlu1 %712 }
  0xe1   : > { %v706_v6 = vpop.permute.xlu0 %705 }
  0xe2   : > { %v744_v4 = vsel %vm416_vm5, %v742_v63, %v706_v6  ;;  %1185 = vrot.lane.b32.xlu1 %v2979_v54, %s2406_s6  ;;  %v747_v11 = vsel %vm420_vm7, %v706_v6, %v713_v1  ;;  %s3108_s6 = scalar_lea.vmem %s3275_s2, %s2088_s12 }
  0xe3   : > { %1161 = vrot.lane.b32.xlu0 %v1160_v47, %s2410_s10  ;;  %1527 = vmatprep.mubr.bf16.mxu0 %v744_v4 }
  0xe4   : > { %1528 = vmatmul.mubr.bf16.gmra.mxu0 %v737_v35  ;;  %v754_v14 = vpop.permute.xlu1 %753 }
  0xe5   : > { %v730_v13 = vpop.permute.xlu0 %729 }
  0xe6   : > { %v749_v21 = vsel %vm423_vm8, %v747_v11, %v730_v13  ;;  %1189 = vrot.lane.b32.xlu1 %v1160_v47, %s2407_s7  ;;  %s2089_s7 = sshll.u32 %s2454_s16, 3 }
  0xe7   : > { %1187 = vrot.lane.b32.xlu0 %v2949_v31, %s2405_s5  ;;  %1689 = vmatmul.mubr.bf16.gmra.mxu1 %v749_v21 }
  0xe8   : > { %2160 = vmatprep.mubr.msk.bf16.mxu1 %vm403_vm2, %v2764_v0  ;;  %v758_v27 = vpop.permute.xlu1 %757  ;;  %v1214_v0 = vsel %vm326_vm1, %v1209_v12, %v1213_v32 }
  0xe9   : > { %v756_v45 = vpop.permute.xlu0 %755 }
  0xea   : > { %v794_v23 = vsel %vm410_vm3, %v754_v14, %v756_v45  ;;  %1191 = vrot.lane.b32.xlu1 %v3013_v5, %s2408_s8 }
  0xeb   : > { %1183 = vrot.lane.b32.xlu0 %v2953_v33, %s2409_s9  ;;  %v796_v31 = vsel %vm413_vm4, %v794_v23, %v758_v27 }
  0xec   : > { %v760_v7 = vpop.permute.xlu1 %759 }
  0xed   : > { %v752_v34 = vpop.permute.xlu0 %751  ;;  %v798_v36 = vsel %vm416_vm5, %v796_v31, %v760_v7 }
  0xee   : > { %v789_v28 = vsel %vm403_vm2, %v2679_v48, %v752_v34  ;;  %1535 = vmatprep.mubr.bf16.mxu0 %v798_v36  ;;  %1215 = vrot.lane.b32.xlu1 %v1214_v0, %s2410_s10  ;;  %s203_s10 = scalar_lea.vmem %s3276_s3, %s2089_s7 }
  0xef   : > { %1198 = vrot.lane.b32.xlu0 %v2982_v60, %s2404_s4  ;;  %v791_v33 = vsel %vm406_vm6, %v789_v28, %v754_v14 }
  0xf0   : > { %1536 = vmatmul.mubr.bf16.gmra.mxu0 %v791_v33  ;;  %v784_v24 = vpop.permute.xlu1 %783 }
  0xf1   : > { %v767_v37 = vpop.permute.xlu0 %766 }
  0xf2   : > { %v801_v38 = vsel %vm420_vm7, %v760_v7, %v767_v37 }
  0xf3   : > { %v803_v39 = vsel %vm423_vm8, %v801_v38, %v784_v24 }
  0xf4   : > { %1697 = vmatmul.mubr.bf16.gmra.mxu1 %v803_v39  ;;  %v810_v48 = vpop.permute.xlu1 %809 }
  0xf5   : > { %v808_v3 = vpop.permute.xlu0 %807  ;;  %2161 = vmatprep.mubr.msk.bf16.mxu1 %vm403_vm2, %v2799_v9 }
  0xf6   : > { %v848_v42 = vsel %vm410_vm3, %v808_v3, %v810_v48 }
  0xf8   : > { %v806_v41 = vpop.permute.xlu1 %805 }
  0xf9   : > { %v812_v40 = vpop.permute.xlu0 %811  ;;  %v843_v44 = vsel %vm403_vm2, %v2704_v62, %v806_v41 }
  0xfa   : > { %v850_v49 = vsel %vm413_vm4, %v848_v42, %v812_v40  ;;  %v845_v58 = vsel %vm406_vm6, %v843_v44, %v808_v3 }
  0xfc   : > { %v821_v30 = vpop.permute.xlu1 %820 }
  0xfd   : > { %v814_v51 = vpop.permute.xlu0 %813 }
  0xfe   : > { %v852_v55 = vsel %vm416_vm5, %v850_v49, %v814_v51  ;;  %v855_v57 = vsel %vm420_vm7, %v814_v51, %v821_v30 }
  0xff   : > { %1543 = vmatprep.mubr.bf16.mxu0 %v852_v55 }
 0x100   : > { %1544 = vmatmul.mubr.bf16.gmra.mxu0 %v845_v58  ;;  %v862_v59 = vpop.permute.xlu1 %861 }
 0x101   : > { %v838_v9 = vpop.permute.xlu0 %837 }
 0x102   : > { %v857_v25 = vsel %vm423_vm8, %v855_v57, %v838_v9 }
 0x103   : > { %1705 = vmatmul.mubr.bf16.gmra.mxu1 %v857_v25 }
 0x104   : > { %2162 = vmatprep.mubr.msk.bf16.mxu1 %vm403_vm2, %v2841_v43  ;;  %v866_v61 = vpop.permute.xlu1 %865 }
 0x105   : > { %v864_v62 = vpop.permute.xlu0 %863 }
 0x106   : > { %v902_v47 = vsel %vm410_vm3, %v862_v59, %v864_v62 }
 0x107   : > { %v904_v6 = vsel %vm413_vm4, %v902_v47, %v866_v61 }
 0x108   : > { %v868_v52 = vpop.permute.xlu1 %867 }
 0x109   : > { %v860_v63 = vpop.permute.xlu0 %859  ;;  %v906_v4 = vsel %vm416_vm5, %v904_v6, %v868_v52 }
 0x10a   : > { %v897_v1 = vsel %vm403_vm2, %v2723_v15, %v860_v63  ;;  %1551 = vmatprep.mubr.bf16.mxu0 %v906_v4 }
 0x10b   : > { %v899_v35 = vsel %vm406_vm6, %v897_v1, %v862_v59 }
 0x10c   : > { %1552 = vmatmul.mubr.bf16.gmra.mxu0 %v899_v35  ;;  %v892_v10 = vpop.permute.xlu1 %891 }
 0x10d   : > { %v875_v8 = vpop.permute.xlu0 %874 }
 0x10e   : > { %v909_v43 = vsel %vm420_vm7, %v868_v52, %v875_v8 }
 0x10f   : > { %v911_v11 = vsel %vm423_vm8, %v909_v43, %v892_v10 }
 0x110   : > { %1713 = vmatmul.mubr.bf16.gmra.mxu1 %v911_v11  ;;  %v918_v14 = vpop.permute.xlu1 %917 }
 0x111   : > { %v916_v13 = vpop.permute.xlu0 %915  ;;  %2163 = vmatprep.mubr.msk.bf16.mxu1 %vm403_vm2, %v2872_v18 }
 0x112   : > { %v956_v17 = vsel %vm410_vm3, %v916_v13, %v918_v14 }
 0x114   : > { %v914_v16 = vpop.permute.xlu1 %913 }
 0x115   : > { %v920_v15 = vpop.permute.xlu0 %919  ;;  %v951_v20 = vsel %vm403_vm2, %v2748_v29, %v914_v16 }
 0x116   : > { %v958_v21 = vsel %vm413_vm4, %v956_v17, %v920_v15  ;;  %v953_v32 = vsel %vm406_vm6, %v951_v20, %v916_v13  ;;  %v1217_v20 = vrot.slane %v2982_v60, 1 }
 0x118   : > { %v929_v27 = vpop.permute.xlu1 %928 }
 0x119   : > { %v922_v45 = vpop.permute.xlu0 %921 }
 0x11a   : > { %v960_v12 = vsel %vm416_vm5, %v958_v21, %v922_v45  ;;  %v963_v18 = vsel %vm420_vm7, %v922_v45, %v929_v27  ;;  %v1218_v21 = vrot.slane %v2994_v2, 1 }
 0x11b   : > { %1559 = vmatprep.mubr.bf16.mxu0 %v960_v12 }
 0x11c   : > { %1560 = vmatmul.mubr.bf16.gmra.mxu0 %v953_v32  ;;  %v970_v31 = vpop.permute.xlu1 %969 }
 0x11d   : > { %v946_v23 = vpop.permute.xlu0 %945 }
 0x11e   : > { %v965_v34 = vsel %vm423_vm8, %v963_v18, %v946_v23 }
 0x11f   : > { %1721 = vmatmul.mubr.bf16.gmra.mxu1 %v965_v34 }
 0x120   : > { %2164 = vmatprep.mubr.msk.bf16.mxu1 %vm403_vm2, %v2910_v50  ;;  %v974_v7 = vpop.permute.xlu1 %973 }
 0x121   : > { %v972_v29 = vpop.permute.xlu0 %971 }
 0x122   : > { %v1010_v0 = vsel %vm410_vm3, %v970_v31, %v972_v29 }
 0x123   : > { %v1012_v36 = vsel %vm413_vm4, %v1010_v0, %v974_v7 }
 0x124   : > { %v976_v37 = vpop.permute.xlu1 %975 }
 0x125   : > { %v968_v28 = vpop.permute.xlu0 %967  ;;  %v1014_v24 = vsel %vm416_vm5, %v1012_v36, %v976_v37 }
 0x126   : > { %v1005_v33 = vsel %vm403_vm2, %v2767_v46, %v968_v28  ;;  %1567 = vmatprep.mubr.bf16.mxu0 %v1014_v24 }
 0x127   : > { %v1007_v38 = vsel %vm406_vm6, %v1005_v33, %v970_v31 }
 0x128   : > { %1568 = vmatmul.mubr.bf16.gmra.mxu0 %v1007_v38  ;;  %v1000_v3 = vpop.permute.xlu1 %999 }
 0x129   : > { %v983_v39 = vpop.permute.xlu0 %982 }
 0x12a   : > { %v1017_v50 = vsel %vm420_vm7, %v976_v37, %v983_v39 }
 0x12b   : > { %v1019_v48 = vsel %vm423_vm8, %v1017_v50, %v1000_v3 }
 0x12c   : > { %1729 = vmatmul.mubr.bf16.gmra.mxu1 %v1019_v48  ;;  %v1026_v41 = vpop.permute.xlu1 %1025 }
 0x12d   : > { %v1024_v40 = vpop.permute.xlu0 %1023  ;;  %2165 = vmatprep.mubr.msk.bf16.mxu1 %vm403_vm2, %v2941_v22 }
 0x12e   : > { %v1064_v44 = vsel %vm410_vm3, %v1024_v40, %v1026_v41 }
 0x130   : > { %v1022_v42 = vpop.permute.xlu1 %1021 }
 0x131   : > { %v1028_v46 = vpop.permute.xlu0 %1027  ;;  %v1059_v49 = vsel %vm403_vm2, %v2809_v19, %v1022_v42 }
 0x132   : > { %v1066_v51 = vsel %vm413_vm4, %v1064_v44, %v1028_v46  ;;  %v1061_v57 = vsel %vm406_vm6, %v1059_v49, %v1024_v40 }
 0x134   : > { %v1037_v55 = vpop.permute.xlu1 %1036 }
 0x135   : > { %v1030_v30 = vpop.permute.xlu0 %1029 }
 0x136   : > { %v1068_v58 = vsel %vm416_vm5, %v1066_v51, %v1030_v30  ;;  %v1071_v22 = vsel %vm420_vm7, %v1030_v30, %v1037_v55 }
 0x137   : > { %1575 = vmatprep.mubr.bf16.mxu0 %v1068_v58 }
 0x138   : > { %1576 = vmatmul.mubr.bf16.gmra.mxu0 %v1061_v57  ;;  %v1078_v59 = vpop.permute.xlu1 %1077 }
 0x139   : > { %v1054_v9 = vpop.permute.xlu0 %1053 }
 0x13a   : > { %v1073_v25 = vsel %vm423_vm8, %v1071_v22, %v1054_v9 }
 0x13b   : > { %1737 = vmatmul.mubr.bf16.gmra.mxu1 %v1073_v25 }
 0x13c   : > { %2166 = vmatprep.mubr.msk.bf16.mxu1 %vm403_vm2, %v2979_v54  ;;  %v1082_v62 = vpop.permute.xlu1 %1081 }
 0x13d   : > { %v1080_v19 = vpop.permute.xlu0 %1079 }
 0x13e   : > { %v1118_v61 = vsel %vm410_vm3, %v1078_v59, %v1080_v19 }
 0x13f   : > { %v1120_v63 = vsel %vm413_vm4, %v1118_v61, %v1082_v62 }
 0x140   : > { %v1084_v1 = vpop.permute.xlu1 %1083 }
 0x141   : > { %v1076_v47 = vpop.permute.xlu0 %1075  ;;  %v1122_v52 = vsel %vm416_vm5, %v1120_v63, %v1084_v1 }
 0x142   : > { %v1113_v6 = vsel %vm403_vm2, %v2844_v53, %v1076_v47  ;;  %1583 = vmatprep.mubr.bf16.mxu0 %v1122_v52 }
 0x143   : > { %v1115_v4 = vsel %vm406_vm6, %v1113_v6, %v1078_v59 }
 0x144   : > { %1584 = vmatmul.mubr.bf16.gmra.mxu0 %v1115_v4  ;;  %v1108_v8 = vpop.permute.xlu1 %1107 }
 0x145   : > { %v1091_v35 = vpop.permute.xlu0 %1090 }
 0x146   : > { %v1125_v54 = vsel %vm420_vm7, %v1084_v1, %v1091_v35 }
 0x147   : > { %v1127_v43 = vsel %vm423_vm8, %v1125_v54, %v1108_v8 }
 0x148   : > { %1745 = vmatmul.mubr.bf16.gmra.mxu1 %v1127_v43  ;;  %v1134_v11 = vpop.permute.xlu1 %1133 }
 0x149   : > { %v1132_v10 = vpop.permute.xlu0 %1131  ;;  %2167 = vmatprep.mubr.msk.bf16.mxu1 %vm403_vm2, %v3013_v5 }
 0x14a   : > { %v1172_v14 = vsel %vm410_vm3, %v1132_v10, %v1134_v11 }
 0x14c   : > { %v1130_v13 = vpop.permute.xlu1 %1129 }
 0x14d   : > { %v1136_v53 = vpop.permute.xlu0 %1135  ;;  %v1167_v15 = vsel %vm403_vm2, %v2880_v26, %v1130_v13  ;;  %v1219_v26 = vsel %vm341_vm0, %v1217_v20, %v1218_v21 }
 0x14e   : > { %v1174_v16 = vsel %vm413_vm4, %v1172_v14, %v1136_v53  ;;  %v1169_v27 = vsel %vm406_vm6, %v1167_v15, %v1132_v10 }
 0x150   : > { %v1145_v45 = vpop.permute.xlu1 %1144 }
 0x151   : > { %v1138_v17 = vpop.permute.xlu0 %1137 }
 0x152   : > { %v1176_v5 = vsel %vm416_vm5, %v1174_v16, %v1138_v17  ;;  %v1179_v32 = vsel %vm420_vm7, %v1138_v17, %v1145_v45 }
 0x153   : > { %1591 = vmatprep.mubr.bf16.mxu0 %v1176_v5 }
 0x154   : > { %v2187_v12 = vpop.f32.mrf.mxu0  ;;  %1592 = vmatmul.mubr.bf16.gmra.mxu0 %v1169_v27  ;;  %v1186_v23 = vpop.permute.xlu1 %1185 }
 0x155   : > { %v1162_v18 = vpop.permute.xlu0 %1161 }
 0x156   : > { %v2188_v31 = vpop.f32.mrf.mxu0  ;;  %v1181_v60 = vsel %vm423_vm8, %v1179_v32, %v1162_v18 }
 0x157   : > { %v2189_v34 = vadd.f32 %v2188_v31, %v2187_v12  ;;  %v1642_v2 = vpop.f32.mrf.mxu1  ;;  %1753 = vmatmul.mubr.bf16.gmra.mxu1 %v1181_v60 }
 0x158   : > { %v2190_v29 = vpop.f32.mrf.mxu0  ;;  %2168 = vmatprep.mubr.msk.bf16.mxu1 %vm403_vm2, %v1219_v26  ;;  %v1190_v36 = vpop.permute.xlu1 %1189 }
 0x159   : > { %v1643_v7 = vadd.f32 %v2189_v34, %v1642_v2  ;;  %v1644_v0 = vpop.f32.mrf.mxu1  ;;  %v1188_v28 = vpop.permute.xlu0 %1187 }
 0x15a   : > { %v2191_v33 = vpop.f32.mrf.mxu0  ;;  %v1226_v37 = vsel %vm410_vm3, %v1186_v23, %v1188_v28 }
 0x15b   : > { %1770 = vst.msk [vmem:[%s3108_s6] sm:$0xff] %vm1769_vm9, %v1643_v7  ;;  %v2192_v24 = vadd.f32 %v2191_v33, %v2190_v29  ;;  %v1645_v38 = vpop.f32.mrf.mxu1  ;;  %v1871_v50 = vmul.f32 %v1643_v7, %v1643_v7  ;;  %v1802_v41 = vsel %vm1769_vm9, %v1643_v7, 0.0  ;;  %v1228_v46 = vsel %vm413_vm4, %v1226_v37, %v1190_v36 }
 0x15c   : > { %v2193_v39 = vpop.f32.mrf.mxu0  ;;  %v1192_v44 = vpop.permute.xlu1 %1191 }
 0x15d   : > { %v1646_v3 = vadd.f32 %v2192_v24, %v1645_v38  ;;  %v1647_v48 = vpop.f32.mrf.mxu1  ;;  %v1184_v40 = vpop.permute.xlu0 %1183  ;;  %v1230_v58 = vsel %vm416_vm5, %v1228_v46, %v1192_v44  ;;  %v1903_v25 = vsel %vm1769_vm9, %v1871_v50, 0.0 }
 0x15e   : > { %v1221_v42 = vsel %vm403_vm2, %v2913_v56, %v1184_v40  ;;  %v2194_v49 = vpop.f32.mrf.mxu0  ;;  %1599 = vmatprep.mubr.bf16.mxu0 %v1230_v58 }
 0x15f   : > { %1771 = vst.msk [vmem:[%s3108_s6 + $0x8] sm:$0xff] %vm1769_vm9, %v1646_v3  ;;  %v1803_v51 = vsel %vm1769_vm9, %v1646_v3, 0.0  ;;  %v1872_v30 = vmul.f32 %v1646_v3, %v1646_v3  ;;  %v2195_v55 = vadd.f32 %v2194_v49, %v2193_v39  ;;  %v1223_v9 = vsel %vm406_vm6, %v1221_v42, %v1186_v23 }
 0x160   : > { %v1804_v57 = vadd.f32 %v1803_v51, %v1802_v41  ;;  %v2196_v22 = vpop.f32.mrf.mxu0  ;;  %v1650_v59 = vpop.f32.mrf.mxu1  ;;  %1600 = vmatmul.mubr.bf16.gmra.mxu0 %v1223_v9 }
 0x161   : > { %v1904_v56 = vsel %vm1769_vm9, %v1872_v30, 0.0  ;;  %v1651_v19 = vadd.f32 %v2195_v55, %v1650_v59  ;;  %v1199_v62 = vpop.permute.xlu0 %1198  ;;  %v1216_v35 = vpop.permute.xlu1 %1215 }
 0x162   : > { %v1905_v61 = vadd.f32 %v1904_v56, %v1903_v25  ;;  %v1233_v47 = vsel %vm420_vm7, %v1192_v44, %v1199_v62  ;;  %v2197_v63 = vpop.f32.mrf.mxu0  ;;  %v1652_v6 = vpop.f32.mrf.mxu1 }
 0x163   : > { %1772 = vst.msk [vmem:[%s3108_s6 + $0x10] sm:$0xff] %vm1769_vm9, %v1651_v19  ;;  %v1805_v1 = vsel %vm1769_vm9, %v1651_v19, 0.0  ;;  %v1873_v52 = vmul.f32 %v1651_v19, %v1651_v19  ;;  %v2198_v4 = vadd.f32 %v2197_v63, %v2196_v22  ;;  %v1235_v43 = vsel %vm423_vm8, %v1233_v47, %v1216_v35 }
 0x164   : > { %v1806_v54 = vadd.f32 %v1805_v1, %v1804_v57  ;;  %v1653_v8 = vpop.f32.mrf.mxu1  ;;  %1761 = vmatmul.mubr.bf16.gmra.mxu1 %v1235_v43 }
 0x165   : > { %v1906_v10 = vsel %vm1769_vm9, %v1873_v52, 0.0  ;;  %v1654_v11 = vadd.f32 %v2198_v4, %v1653_v8 }
 0x166   : > { %v1907_v53 = vadd.f32 %v1906_v10, %v1905_v61  ;;  %v1655_v13 = vpop.f32.mrf.mxu1 }
 0x167   : > { %1773 = vst.msk [vmem:[%s3108_s6 + $0x18] sm:$0xff] %vm1769_vm9, %v1654_v11  ;;  %v1807_v14 = vsel %vm1769_vm9, %v1654_v11, 0.0  ;;  %v1874_v15 = vmul.f32 %v1654_v11, %v1654_v11 }
 0x168   : > { %v1808_v16 = vadd.f32 %v1807_v14, %v1806_v54 }
 0x169   : > { %v1908_v17 = vsel %vm1769_vm9, %v1874_v15, 0.0 }
 0x16a   : > { %v1909_v20 = vadd.f32 %v1908_v17, %v1907_v53 }
 0x16c   : > { %v2199_v21 = vpop.f32.mrf.mxu0 }
 0x16e   : > { %v2200_v45 = vpop.f32.mrf.mxu0 }
 0x16f   : > { %v2201_v5 = vadd.f32 %v2200_v45, %v2199_v21  ;;  %v1658_v27 = vpop.f32.mrf.mxu1 }
 0x170   : > { %v2202_v12 = vpop.f32.mrf.mxu0 }
 0x171   : > { %v1659_v32 = vadd.f32 %v2201_v5, %v1658_v27  ;;  %v1660_v18 = vpop.f32.mrf.mxu1 }
 0x172   : > { %v2203_v26 = vpop.f32.mrf.mxu0 }
 0x173   : > { %1774 = vst.msk [vmem:[%s3108_s6 + $0x20] sm:$0xff] %vm1769_vm9, %v1659_v32  ;;  %v1809_v23 = vsel %vm1769_vm9, %v1659_v32, 0.0  ;;  %v1875_v31 = vmul.f32 %v1659_v32, %v1659_v32  ;;  %v2204_v60 = vadd.f32 %v2203_v26, %v2202_v12  ;;  %v1661_v34 = vpop.f32.mrf.mxu1 }
 0x174   : > { %v1810_v2 = vadd.f32 %v1809_v23, %v1808_v16 }
 0x175   : > { %v1910_v29 = vsel %vm1769_vm9, %v1875_v31, 0.0  ;;  %v1662_v7 = vadd.f32 %v2204_v60, %v1661_v34  ;;  %v1663_v0 = vpop.f32.mrf.mxu1 }
 0x176   : > { %v1911_v28 = vadd.f32 %v1910_v29, %v1909_v20 }
 0x177   : > { %1775 = vst.msk [vmem:[%s3108_s6 + $0x28] sm:$0xff] %vm1769_vm9, %v1662_v7  ;;  %v1811_v36 = vsel %vm1769_vm9, %v1662_v7, 0.0  ;;  %v1876_v33 = vmul.f32 %v1662_v7, %v1662_v7 }
 0x178   : > { %v1812_v37 = vadd.f32 %v1811_v36, %v1810_v2  ;;  %v2205_v24 = vpop.f32.mrf.mxu0 }
 0x179   : > { %v1912_v38 = vsel %vm1769_vm9, %v1876_v33, 0.0 }
 0x17a   : > { %v1913_v39 = vadd.f32 %v1912_v38, %v1911_v28  ;;  %v2206_v50 = vpop.f32.mrf.mxu0 }
 0x17b   : > { %v2207_v3 = vadd.f32 %v2206_v50, %v2205_v24 }
 0x17c   : > { %v2208_v48 = vpop.f32.mrf.mxu0  ;;  %v1666_v40 = vpop.f32.mrf.mxu1 }
 0x17d   : > { %v1667_v41 = vadd.f32 %v2207_v3, %v1666_v40 }
 0x17e   : > { %v2209_v46 = vpop.f32.mrf.mxu0  ;;  %v1668_v42 = vpop.f32.mrf.mxu1 }
 0x17f   : > { %1776 = vst.msk [vmem:[%s3108_s6 + $0x30] sm:$0xff] %vm1769_vm9, %v1667_v41  ;;  %v1813_v44 = vsel %vm1769_vm9, %v1667_v41, 0.0  ;;  %v1877_v49 = vmul.f32 %v1667_v41, %v1667_v41  ;;  %v2210_v51 = vadd.f32 %v2209_v46, %v2208_v48 }
 0x180   : > { %v1814_v30 = vadd.f32 %v1813_v44, %v1812_v37  ;;  %v1669_v55 = vpop.f32.mrf.mxu1 }
 0x181   : > { %v1914_v58 = vsel %vm1769_vm9, %v1877_v49, 0.0  ;;  %v1670_v57 = vadd.f32 %v2210_v51, %v1669_v55 }
 0x182   : > { %v1915_v22 = vadd.f32 %v1914_v58, %v1913_v39  ;;  %v1671_v9 = vpop.f32.mrf.mxu1 }
 0x183   : > { %1777 = vst.msk [vmem:[%s3108_s6 + $0x38] sm:$0xff] %vm1769_vm9, %v1670_v57  ;;  %v1815_v59 = vsel %vm1769_vm9, %v1670_v57, 0.0  ;;  %v1878_v25 = vmul.f32 %v1670_v57, %v1670_v57 }
 0x184   : > { %v1816_v56 = vadd.f32 %v1815_v59, %v1814_v30 }
 0x185   : > { %v1916_v19 = vsel %vm1769_vm9, %v1878_v25, 0.0 }
 0x186   : > { %v1917_v62 = vadd.f32 %v1916_v19, %v1915_v22 }
 0x188   : > { %v2211_v61 = vpop.f32.mrf.mxu0 }
 0x18a   : > { %v2212_v47 = vpop.f32.mrf.mxu0 }
 0x18b   : > { %v2213_v63 = vadd.f32 %v2212_v47, %v2211_v61  ;;  %v1674_v6 = vpop.f32.mrf.mxu1 }
 0x18c   : > { %v2214_v1 = vpop.f32.mrf.mxu0 }
 0x18d   : > { %v1675_v52 = vadd.f32 %v2213_v63, %v1674_v6  ;;  %v1676_v4 = vpop.f32.mrf.mxu1 }
 0x18e   : > { %v2215_v35 = vpop.f32.mrf.mxu0 }
 0x18f   : > { %1778 = vst.msk [vmem:[%s3108_s6 + $0x40] sm:$0xff] %vm1769_vm9, %v1675_v52  ;;  %v1817_v54 = vsel %vm1769_vm9, %v1675_v52, 0.0  ;;  %v1879_v8 = vmul.f32 %v1675_v52, %v1675_v52  ;;  %v2216_v43 = vadd.f32 %v2215_v35, %v2214_v1  ;;  %v1677_v10 = vpop.f32.mrf.mxu1 }
 0x190   : > { %v1818_v11 = vadd.f32 %v1817_v54, %v1816_v56 }
 0x191   : > { %v1918_v53 = vsel %vm1769_vm9, %v1879_v8, 0.0  ;;  %v1678_v13 = vadd.f32 %v2216_v43, %v1677_v10  ;;  %v1679_v14 = vpop.f32.mrf.mxu1 }
 0x192   : > { %v1919_v15 = vadd.f32 %v1918_v53, %v1917_v62 }
 0x193   : > { %1779 = vst.msk [vmem:[%s3108_s6 + $0x48] sm:$0xff] %vm1769_vm9, %v1678_v13  ;;  %v1819_v16 = vsel %vm1769_vm9, %v1678_v13, 0.0  ;;  %v1880_v17 = vmul.f32 %v1678_v13, %v1678_v13 }
 0x194   : > { %v1820_v20 = vadd.f32 %v1819_v16, %v1818_v11  ;;  %v2217_v21 = vpop.f32.mrf.mxu0 }
 0x195   : > { %v1920_v45 = vsel %vm1769_vm9, %v1880_v17, 0.0 }
 0x196   : > { %v1921_v5 = vadd.f32 %v1920_v45, %v1919_v15  ;;  %v2218_v27 = vpop.f32.mrf.mxu0 }
 0x197   : > { %v2219_v12 = vadd.f32 %v2218_v27, %v2217_v21 }
 0x198   : > { %v2220_v32 = vpop.f32.mrf.mxu0  ;;  %v1682_v18 = vpop.f32.mrf.mxu1 }
 0x199   : > { %v1683_v26 = vadd.f32 %v2219_v12, %v1682_v18 }
 0x19a   : > { %v2221_v23 = vpop.f32.mrf.mxu0  ;;  %v1684_v31 = vpop.f32.mrf.mxu1 }
 0x19b   : > { %1780 = vst.msk [vmem:[%s3108_s6 + $0x50] sm:$0xff] %vm1769_vm9, %v1683_v26  ;;  %v1821_v60 = vsel %vm1769_vm9, %v1683_v26, 0.0  ;;  %v1881_v34 = vmul.f32 %v1683_v26, %v1683_v26  ;;  %v2222_v2 = vadd.f32 %v2221_v23, %v2220_v32 }
 0x19c   : > { %v1822_v29 = vadd.f32 %v1821_v60, %v1820_v20  ;;  %v1685_v7 = vpop.f32.mrf.mxu1 }
 0x19d   : > { %v1922_v0 = vsel %vm1769_vm9, %v1881_v34, 0.0  ;;  %v1686_v28 = vadd.f32 %v2222_v2, %v1685_v7 }
 0x19e   : > { %v1923_v36 = vadd.f32 %v1922_v0, %v1921_v5  ;;  %v1687_v33 = vpop.f32.mrf.mxu1 }
 0x19f   : > { %1781 = vst.msk [vmem:[%s3108_s6 + $0x58] sm:$0xff] %vm1769_vm9, %v1686_v28  ;;  %v1823_v37 = vsel %vm1769_vm9, %v1686_v28, 0.0  ;;  %v1882_v24 = vmul.f32 %v1686_v28, %v1686_v28 }
 0x1a0   : > { %v1824_v38 = vadd.f32 %v1823_v37, %v1822_v29 }
 0x1a1   : > { %v1924_v39 = vsel %vm1769_vm9, %v1882_v24, 0.0 }
 0x1a2   : > { %v1925_v50 = vadd.f32 %v1924_v39, %v1923_v36 }
 0x1a4   : > { %v2223_v3 = vpop.f32.mrf.mxu0 }
 0x1a6   : > { %v2224_v48 = vpop.f32.mrf.mxu0 }
 0x1a7   : > { %v2225_v40 = vadd.f32 %v2224_v48, %v2223_v3  ;;  %v1690_v41 = vpop.f32.mrf.mxu1 }
 0x1a8   : > { %v2226_v46 = vpop.f32.mrf.mxu0 }
 0x1a9   : > { %v1691_v42 = vadd.f32 %v2225_v40, %v1690_v41  ;;  %v1692_v44 = vpop.f32.mrf.mxu1 }
 0x1aa   : > { %v2227_v49 = vpop.f32.mrf.mxu0 }
 0x1ab   : > { %1782 = vst.msk [vmem:[%s3108_s6 + $0x60] sm:$0xff] %vm1769_vm9, %v1691_v42  ;;  %v1825_v51 = vsel %vm1769_vm9, %v1691_v42, 0.0  ;;  %v1883_v30 = vmul.f32 %v1691_v42, %v1691_v42  ;;  %v2228_v55 = vadd.f32 %v2227_v49, %v2226_v46  ;;  %v1693_v58 = vpop.f32.mrf.mxu1 }
 0x1ac   : > { %v1826_v57 = vadd.f32 %v1825_v51, %v1824_v38 }
 0x1ad   : > { %v1926_v22 = vsel %vm1769_vm9, %v1883_v30, 0.0  ;;  %v1694_v9 = vadd.f32 %v2228_v55, %v1693_v58  ;;  %v1695_v59 = vpop.f32.mrf.mxu1 }
 0x1ae   : > { %v1927_v25 = vadd.f32 %v1926_v22, %v1925_v50 }
 0x1af   : > { %1783 = vst.msk [vmem:[%s3108_s6 + $0x68] sm:$0xff] %vm1769_vm9, %v1694_v9  ;;  %v1827_v56 = vsel %vm1769_vm9, %v1694_v9, 0.0  ;;  %v1884_v19 = vmul.f32 %v1694_v9, %v1694_v9 }
 0x1b0   : > { %v1828_v62 = vadd.f32 %v1827_v56, %v1826_v57  ;;  %v2229_v61 = vpop.f32.mrf.mxu0 }
 0x1b1   : > { %v1928_v47 = vsel %vm1769_vm9, %v1884_v19, 0.0 }
 0x1b2   : > { %v1929_v63 = vadd.f32 %v1928_v47, %v1927_v25  ;;  %v2230_v6 = vpop.f32.mrf.mxu0 }
 0x1b3   : > { %v2231_v1 = vadd.f32 %v2230_v6, %v2229_v61 }
 0x1b4   : > { %v2232_v52 = vpop.f32.mrf.mxu0  ;;  %v1698_v4 = vpop.f32.mrf.mxu1 }
 0x1b5   : > { %v1699_v35 = vadd.f32 %v2231_v1, %v1698_v4 }
 0x1b6   : > { %v2233_v54 = vpop.f32.mrf.mxu0  ;;  %v1700_v8 = vpop.f32.mrf.mxu1 }
 0x1b7   : > { %1784 = vst.msk [vmem:[%s3108_s6 + $0x70] sm:$0xff] %vm1769_vm9, %v1699_v35  ;;  %v1829_v43 = vsel %vm1769_vm9, %v1699_v35, 0.0  ;;  %v1885_v10 = vmul.f32 %v1699_v35, %v1699_v35  ;;  %v2234_v11 = vadd.f32 %v2233_v54, %v2232_v52 }
 0x1b8   : > { %v1830_v53 = vadd.f32 %v1829_v43, %v1828_v62  ;;  %v1701_v13 = vpop.f32.mrf.mxu1 }
 0x1b9   : > { %v1930_v14 = vsel %vm1769_vm9, %v1885_v10, 0.0  ;;  %v1702_v15 = vadd.f32 %v2234_v11, %v1701_v13 }
 0x1ba   : > { %v1931_v16 = vadd.f32 %v1930_v14, %v1929_v63  ;;  %v1703_v17 = vpop.f32.mrf.mxu1 }
 0x1bb   : > { %1785 = vst.msk [vmem:[%s3108_s6 + $0x78] sm:$0xff] %vm1769_vm9, %v1702_v15  ;;  %v1831_v20 = vsel %vm1769_vm9, %v1702_v15, 0.0  ;;  %v1886_v21 = vmul.f32 %v1702_v15, %v1702_v15 }
 0x1bc   : > { %v1832_v45 = vadd.f32 %v1831_v20, %v1830_v53 }
 0x1bd   : > { %v1932_v5 = vsel %vm1769_vm9, %v1886_v21, 0.0 }
 0x1be   : > { %v1933_v27 = vadd.f32 %v1932_v5, %v1931_v16 }
 0x1c0   : > { %v2235_v12 = vpop.f32.mrf.mxu0 }
 0x1c2   : > { %v2236_v32 = vpop.f32.mrf.mxu0 }
 0x1c3   : > { %v2237_v18 = vadd.f32 %v2236_v32, %v2235_v12  ;;  %v1706_v26 = vpop.f32.mrf.mxu1 }
 0x1c4   : > { %v2238_v23 = vpop.f32.mrf.mxu0 }
 0x1c5   : > { %v1707_v31 = vadd.f32 %v2237_v18, %v1706_v26  ;;  %v1708_v60 = vpop.f32.mrf.mxu1 }
 0x1c6   : > { %v2239_v34 = vpop.f32.mrf.mxu0 }
 0x1c7   : > { %1786 = vst.msk [vmem:[%s3108_s6 + $0x80] sm:$0xff] %vm1769_vm9, %v1707_v31  ;;  %v1833_v2 = vsel %vm1769_vm9, %v1707_v31, 0.0  ;;  %v1887_v29 = vmul.f32 %v1707_v31, %v1707_v31  ;;  %v2240_v7 = vadd.f32 %v2239_v34, %v2238_v23  ;;  %v1709_v0 = vpop.f32.mrf.mxu1 }
 0x1c8   : > { %v1834_v28 = vadd.f32 %v1833_v2, %v1832_v45 }
 0x1c9   : > { %v1934_v36 = vsel %vm1769_vm9, %v1887_v29, 0.0  ;;  %v1710_v33 = vadd.f32 %v2240_v7, %v1709_v0  ;;  %v1711_v37 = vpop.f32.mrf.mxu1 }
 0x1ca   : > { %v1935_v24 = vadd.f32 %v1934_v36, %v1933_v27 }
 0x1cb   : > { %1787 = vst.msk [vmem:[%s3108_s6 + $0x88] sm:$0xff] %vm1769_vm9, %v1710_v33  ;;  %v1835_v38 = vsel %vm1769_vm9, %v1710_v33, 0.0  ;;  %v1888_v39 = vmul.f32 %v1710_v33, %v1710_v33 }
 0x1cc   : > { %v1836_v50 = vadd.f32 %v1835_v38, %v1834_v28  ;;  %v2241_v48 = vpop.f32.mrf.mxu0 }
 0x1cd   : > { %v1936_v3 = vsel %vm1769_vm9, %v1888_v39, 0.0 }
 0x1ce   : > { %v3191_v40 = vadd.f32 %v1936_v3, %v1935_v24  ;;  %v2242_v41 = vpop.f32.mrf.mxu0 }
 0x1cf   : > { %v2243_v46 = vadd.f32 %v2242_v41, %v2241_v48 }
 0x1d0   : > { %v1714_v42 = vpop.f32.mrf.mxu1  ;;  %v2244_v44 = vpop.f32.mrf.mxu0 }
 0x1d1   : > { %v3193_v49 = vadd.f32 %v2243_v46, %v1714_v42 }
 0x1d2   : > { %v1716_v51 = vpop.f32.mrf.mxu1  ;;  %v2245_v30 = vpop.f32.mrf.mxu0 }
 0x1d3   : > { %1788 = vst.msk [vmem:[%s3108_s6 + $0x90] sm:$0xff] %vm1769_vm9, %v3193_v49  ;;  %v1837_v55 = vsel %vm1769_vm9, %v3193_v49, 0.0  ;;  %v2246_v58 = vadd.f32 %v2245_v30, %v2244_v44  ;;  %v1889_v39 = vmul.f32 %v3193_v49, %v3193_v49 }
 0x1d4   : > { %v1717_v57 = vpop.f32.mrf.mxu1  ;;  %v3200_v22 = vadd.f32 %v1837_v55, %v1836_v50 }
 0x1d5   : > { %v1718_v9 = vadd.f32 %v2246_v58, %v1717_v57  ;;  %v1938_v41 = vsel %vm1769_vm9, %v1889_v39, 0.0 }
 0x1d6   : > { %v1719_v59 = vpop.f32.mrf.mxu1  ;;  %v1939_v58 = vadd.f32 %v1938_v41, %v3191_v40 }
 0x1d7   : > { %1789 = vst.msk [vmem:[%s3108_s6 + $0x98] sm:$0xff] %vm1769_vm9, %v1718_v9  ;;  %v1890_v48 = vmul.f32 %v1718_v9, %v1718_v9  ;;  %v1839_v46 = vsel %vm1769_vm9, %v1718_v9, 0.0 }
 0x1d8   : > { %v1840_v49 = vadd.f32 %v1839_v46, %v3200_v22 }
 0x1d9   : > { %v1940_v44 = vsel %vm1769_vm9, %v1890_v48, 0.0 }
 0x1dc   : > { %v2247_v25 = vpop.f32.mrf.mxu0 }
 0x1de   : > { %v2248_v56 = vpop.f32.mrf.mxu0 }
 0x1df   : > { %v2249_v19 = vadd.f32 %v2248_v56, %v2247_v25  ;;  %v1722_v62 = vpop.f32.mrf.mxu1 }
 0x1e0   : > { %v2250_v61 = vpop.f32.mrf.mxu0 }
 0x1e1   : > { %v1723_v47 = vadd.f32 %v2249_v19, %v1722_v62  ;;  %v1724_v63 = vpop.f32.mrf.mxu1  ;;  %v1941_v19 = vadd.f32 %v1940_v44, %v1939_v58 }
 0x1e2   : > { %v2251_v6 = vpop.f32.mrf.mxu0 }
 0x1e3   : > { %1790 = vst.msk [vmem:[%s3108_s6 + $0xa0] sm:$0xff] %vm1769_vm9, %v1723_v47  ;;  %v2252_v1 = vadd.f32 %v2251_v6, %v2250_v61  ;;  %v1725_v52 = vpop.f32.mrf.mxu1  ;;  %v1891_v42 = vmul.f32 %v1723_v47, %v1723_v47  ;;  %v1841_v51 = vsel %vm1769_vm9, %v1723_v47, 0.0 }
 0x1e4   : > { %v1842_v62 = vadd.f32 %v1841_v51, %v1840_v49 }
 0x1e5   : > { %v1726_v4 = vadd.f32 %v2252_v1, %v1725_v52  ;;  %v1727_v35 = vpop.f32.mrf.mxu1  ;;  %v1942_v57 = vsel %vm1769_vm9, %v1891_v42, 0.0 }
 0x1e6   : > { %v1943_v40 = vadd.f32 %v1942_v57, %v1941_v19 }
 0x1e7   : > { %1791 = vst.msk [vmem:[%s3108_s6 + $0xa8] sm:$0xff] %vm1769_vm9, %v1726_v4  ;;  %v1892_v30 = vmul.f32 %v1726_v4, %v1726_v4  ;;  %v1843_v59 = vsel %vm1769_vm9, %v1726_v4, 0.0 }
 0x1e8   : > { %v2253_v54 = vpop.f32.mrf.mxu0  ;;  %v1844_v52 = vadd.f32 %v1843_v59, %v1842_v62 }
 0x1e9   : > { %v1944_v63 = vsel %vm1769_vm9, %v1892_v30, 0.0 }
 0x1ea   : > { %v2254_v8 = vpop.f32.mrf.mxu0 }
 0x1eb   : > { %v2255_v43 = vadd.f32 %v2254_v8, %v2253_v54 }
 0x1ec   : > { %v1730_v10 = vpop.f32.mrf.mxu1  ;;  %v2256_v11 = vpop.f32.mrf.mxu0 }
 0x1ed   : > { %v1731_v53 = vadd.f32 %v2255_v43, %v1730_v10  ;;  %v1945_v10 = vadd.f32 %v1944_v63, %v1943_v40 }
 0x1ee   : > { %v1732_v13 = vpop.f32.mrf.mxu1  ;;  %v2257_v14 = vpop.f32.mrf.mxu0 }
 0x1ef   : > { %1792 = vst.msk [vmem:[%s3108_s6 + $0xb0] sm:$0xff] %vm1769_vm9, %v1731_v53  ;;  %v2258_v15 = vadd.f32 %v2257_v14, %v2256_v11  ;;  %v1893_v25 = vmul.f32 %v1731_v53, %v1731_v53  ;;  %v1845_v47 = vsel %vm1769_vm9, %v1731_v53, 0.0 }
 0x1f0   : > { %v1733_v16 = vpop.f32.mrf.mxu1  ;;  %v1846_v11 = vadd.f32 %v1845_v47, %v1844_v52 }
 0x1f1   : > { %v1734_v17 = vadd.f32 %v2258_v15, %v1733_v16  ;;  %v1946_v54 = vsel %vm1769_vm9, %v1893_v25, 0.0 }
 0x1f2   : > { %v1735_v20 = vpop.f32.mrf.mxu1 }
 0x1f3   : > { %1793 = vst.msk [vmem:[%s3108_s6 + $0xb8] sm:$0xff] %vm1769_vm9, %v1734_v17  ;;  %v1894_v6 = vmul.f32 %v1734_v17, %v1734_v17  ;;  %v1847_v4 = vsel %vm1769_vm9, %v1734_v17, 0.0  ;;  %v1947_v20 = vadd.f32 %v1946_v54, %v1945_v10 }
 0x1f5   : > { %v1948_v53 = vsel %vm1769_vm9, %v1894_v6, 0.0 }
 0x1f8   : > { %v2259_v21 = vpop.f32.mrf.mxu0 }
 0x1fa   : > { %v2260_v45 = vpop.f32.mrf.mxu0 }
 0x1fb   : > { %v2261_v5 = vadd.f32 %v2260_v45, %v2259_v21  ;;  %v1738_v27 = vpop.f32.mrf.mxu1  ;;  %v1848_v21 = vadd.f32 %v1847_v4, %v1846_v11 }
 0x1fc   : > { %v2262_v12 = vpop.f32.mrf.mxu0 }
 0x1fd   : > { %v1739_v32 = vadd.f32 %v2261_v5, %v1738_v27  ;;  %v1740_v18 = vpop.f32.mrf.mxu1 }
 0x1fe   : > { %v2263_v26 = vpop.f32.mrf.mxu0  ;;  %v1949_v18 = vadd.f32 %v1948_v53, %v1947_v20 }
 0x1ff   : > { %1794 = vst.msk [vmem:[%s3108_s6 + $0xc0] sm:$0xff] %vm1769_vm9, %v1739_v32  ;;  %v2264_v23 = vadd.f32 %v2263_v26, %v2262_v12  ;;  %v1741_v31 = vpop.f32.mrf.mxu1  ;;  %v1895_v8 = vmul.f32 %v1739_v32, %v1739_v32  ;;  %v1849_v15 = vsel %vm1769_vm9, %v1739_v32, 0.0 }
 0x200   : > { %v1850_v26 = vadd.f32 %v1849_v15, %v1848_v21 }
 0x201   : > { %v1742_v60 = vadd.f32 %v2264_v23, %v1741_v31  ;;  %v1743_v34 = vpop.f32.mrf.mxu1  ;;  %v1950_v17 = vsel %vm1769_vm9, %v1895_v8, 0.0 }
 0x202   : > { %v1951_v32 = vadd.f32 %v1950_v17, %v1949_v18 }
 0x203   : > { %1795 = vst.msk [vmem:[%s3108_s6 + $0xc8] sm:$0xff] %vm1769_vm9, %v1742_v60  ;;  %v1896_v16 = vmul.f32 %v1742_v60, %v1742_v60  ;;  %v1851_v27 = vsel %vm1769_vm9, %v1742_v60, 0.0 }
 0x204   : > { %v2265_v2 = vpop.f32.mrf.mxu0 }
 0x205   : > { %v1952_v23 = vsel %vm1769_vm9, %v1896_v16, 0.0 }
 0x206   : > { %v2266_v29 = vpop.f32.mrf.mxu0 }
 0x207   : > { %v2267_v7 = vadd.f32 %v2266_v29, %v2265_v2  ;;  %v1852_v2 = vadd.f32 %v1851_v27, %v1850_v26 }
 0x208   : > { %v1746_v0 = vpop.f32.mrf.mxu1  ;;  %v2268_v28 = vpop.f32.mrf.mxu0 }
 0x209   : > { %v1747_v36 = vadd.f32 %v2267_v7, %v1746_v0 }
 0x20a   : > { %v1748_v33 = vpop.f32.mrf.mxu1  ;;  %v2269_v37 = vpop.f32.mrf.mxu0 }
 0x20b   : > { %1796 = vst.msk [vmem:[%s3108_s6 + $0xd0] sm:$0xff] %vm1769_vm9, %v1747_v36  ;;  %v2270_v24 = vadd.f32 %v2269_v37, %v2268_v28  ;;  %v1897_v12 = vmul.f32 %v1747_v36, %v1747_v36  ;;  %v1853_v31 = vsel %vm1769_vm9, %v1747_v36, 0.0  ;;  %v1953_v33 = vadd.f32 %v1952_v23, %v1951_v32 }
 0x20c   : > { %v1749_v38 = vpop.f32.mrf.mxu1  ;;  %v1854_v60 = vadd.f32 %v1853_v31, %v1852_v2 }
 0x20d   : > { %v1750_v50 = vadd.f32 %v2270_v24, %v1749_v38  ;;  %v1954_v7 = vsel %vm1769_vm9, %v1897_v12, 0.0 }
 0x20e   : > { %v1751_v3 = vpop.f32.mrf.mxu1  ;;  %v1955_v36 = vadd.f32 %v1954_v7, %v1953_v33 }
 0x20f   : > { %1797 = vst.msk [vmem:[%s3108_s6 + $0xd8] sm:$0xff] %vm1769_vm9, %v1750_v50  ;;  %v1898_v34 = vmul.f32 %v1750_v50, %v1750_v50  ;;  %v1855_v0 = vsel %vm1769_vm9, %v1750_v50, 0.0 }
 0x210   : > { %v1856_v48 = vadd.f32 %v1855_v0, %v1854_v60 }
 0x211   : > { %v1956_v24 = vsel %vm1769_vm9, %v1898_v34, 0.0 }
 0x212   : > { %v1957_v51 = vadd.f32 %v1956_v24, %v1955_v36 }
 0x214   : > { %v2271_v55 = vpop.f32.mrf.mxu0 }
 0x216   : > { %v2272_v56 = vpop.f32.mrf.mxu0 }
 0x217   : > { %v2273_v9 = vadd.f32 %v2272_v56, %v2271_v55  ;;  %v1754_v61 = vpop.f32.mrf.mxu1 }
 0x218   : > { %v2274_v1 = vpop.f32.mrf.mxu0 }
 0x219   : > { %v1755_v22 = vadd.f32 %v2273_v9, %v1754_v61  ;;  %v1756_v35 = vpop.f32.mrf.mxu1 }
 0x21a   : > { %v2275_v43 = vpop.f32.mrf.mxu0 }
 0x21b   : > { %1798 = vst.msk [vmem:[%s3108_s6 + $0xe0] sm:$0xff] %vm1769_vm9, %v1755_v22  ;;  %v2276_v13 = vadd.f32 %v2275_v43, %v2274_v1  ;;  %v1757_v14 = vpop.f32.mrf.mxu1  ;;  %v1899_v28 = vmul.f32 %v1755_v22, %v1755_v22  ;;  %v1857_v38 = vsel %vm1769_vm9, %v1755_v22, 0.0 }
 0x21c   : > { %v1858_v30 = vadd.f32 %v1857_v38, %v1856_v48 }
 0x21d   : > { %v1758_v45 = vadd.f32 %v2276_v13, %v1757_v14  ;;  %v1759_v5 = vpop.f32.mrf.mxu1  ;;  %v1958_v42 = vsel %vm1769_vm9, %v1899_v28, 0.0 }
 0x21e   : > { %v1959_v56 = vadd.f32 %v1958_v42, %v1957_v51 }
 0x21f   : > { %1799 = vst.msk [vmem:[%s3108_s6 + $0xe8] sm:$0xff] %vm1769_vm9, %v1758_v45  ;;  %v1900_v39 = vmul.f32 %v1758_v45, %v1758_v45  ;;  %v1859_v44 = vsel %vm1769_vm9, %v1758_v45, 0.0 }
 0x220   : > { %v2277_v29 = vpop.f32.mrf.mxu0  ;;  %v1860_v19 = vadd.f32 %v1859_v44, %v1858_v30 }
 0x221   : > { %v1960_v49 = vsel %vm1769_vm9, %v1900_v39, 0.0 }
 0x222   : > { %v2278_v37 = vpop.f32.mrf.mxu0  ;;  %v1961_v63 = vadd.f32 %v1960_v49, %v1959_v56 }
 0x223   : > { %v2279_v3 = vadd.f32 %v2278_v37, %v2277_v29 }
 0x224   : > { %v2280_v41 = vpop.f32.mrf.mxu0  ;;  %v1762_v46 = vpop.f32.mrf.mxu1 }
 0x225   : > { %v1763_v50 = vadd.f32 %v2279_v3, %v1762_v46 }
 0x226   : > { %v2281_v55 = vpop.f32.mrf.mxu0  ;;  %v1764_v58 = vpop.f32.mrf.mxu1 }
 0x227   : > { %1800 = vst.msk [vmem:[%s3108_s6 + $0xf0] sm:$0xff] %vm1769_vm9, %v1763_v50  ;;  %v1861_v57 = vsel %vm1769_vm9, %v1763_v50, 0.0  ;;  %v1901_v59 = vmul.f32 %v1763_v50, %v1763_v50  ;;  %v2282_v25 = vadd.f32 %v2281_v55, %v2280_v41 }
 0x228   : > { %v1765_v62 = vpop.f32.mrf.mxu1  ;;  %v1862_v47 = vadd.f32 %v1861_v57, %v1860_v19 }
 0x229   : > { %v1962_v9 = vsel %vm1769_vm9, %v1901_v59, 0.0  ;;  %v1766_v61 = vadd.f32 %v2282_v25, %v1765_v62 }
 0x22a   : > { %v1767_v6 = vpop.f32.mrf.mxu1  ;;  %v1963_v52 = vadd.f32 %v1962_v9, %v1961_v63 }
 0x22b   : > { %1801 = vst.msk [vmem:[%s3108_s6 + $0xf8] sm:$0xff] %vm1769_vm9, %v1766_v61  ;;  %v1863_v1 = vsel %vm1769_vm9, %v1766_v61, 0.0  ;;  %v1902_v40 = vmul.f32 %v1766_v61, %v1766_v61 }
 0x22c   : > { %v1864_v22 = vadd.f32 %v1863_v1, %v1862_v47 }
 0x22d   : > { %v1964_v35 = vsel %vm1769_vm9, %v1902_v40, 0.0 }
 0x22e   : > { %v1865_v54 = vrot.slane %v1864_v22, 4  ;;  %v1965_v4 = vadd.f32 %v1964_v35, %v1963_v52 }
 0x230   : > { %v1866_v8 = vadd.f32 %v1865_v54, %v1864_v22  ;;  %v1966_v43 = vrot.slane %v1965_v4, 4 }
 0x232   : > { %v1867_v10 = vrot.slane %v1866_v8, 2  ;;  %v1967_v11 = vadd.f32 %v1966_v43, %v1965_v4 }
 0x234   : > { %v1868_v13 = vadd.f32 %v1867_v10, %v1866_v8  ;;  %v1968_v14 = vrot.slane %v1967_v11, 2 }
 0x236   : > { %v1869_v53 = vrot.slane %v1868_v13, 1  ;;  %v1969_v15 = vadd.f32 %v1968_v14, %v1967_v11 }
 0x238   : > { %v1970_v16 = vrot.slane %v1969_v15, 1  ;;  %v1870_v20 = vadd.f32 %v1869_v53, %v1868_v13 }
 0x23a   : > { %v1971_v21 = vadd.f32 %v1970_v16, %v1969_v15 }
 0x23c   : > { %v1973_v45 = vsel %vm1972_vm10, %v1870_v20, %v1971_v21 }
 0x23d   : > { %v1975_v5 = vsel %vm1974_vm11, %v1973_v45, 0.0 }
 0x23e   : > { %1976 = vst.msk [vmem:[%s203_s10] sm:$0xff] %vm1769_vm9, %v1975_v5 }
 0x23f PF: > { %s14_s14 = sadd.s32 1, %s2401_s14   ;;  %s3277_s12 = smov %s2397_s13 }
 0x240   : > { %p11_p6 = scmp.ge.s32.totalorder %s14_s14, 4   ;;  %s3278_s13 = smov %s3280_s15 }
 0x242   :  { %13 = sbr.rel (!%p11_p6) target bundleno = 2 (0x2), region = 71 }

</bundles_post_ra>
